<compile_context>
chip_gen: v7x
topology: tpu7x:2x2x1
jax: 0.10.0
libtpu: 0.0.40
codegen_flags: <defaults>
</compile_context>

<pallas_src>
import functools

import jax
import jax.numpy as jnp
from jax import lax
from jax.experimental import pallas as pl
from jax.experimental.pallas import tpu as pltpu


# ---------------------------------------------------------------------------
# Kernel 1: full MLP, final Linear(1024, 8192) tiled over its output dim.
# ---------------------------------------------------------------------------
def _mlp_kernel(x_ref,
                w1_ref, b1_ref,
                w2_ref, b2_ref, g2_ref, be2_ref,
                w3_ref, b3_ref, g3_ref, be3_ref,
                w4_ref, b4_ref, g4_ref, be4_ref,
                w5_ref, b5_ref,
                feat_ref,            # output block (B, TN) f32
                h4_ref,              # scratch (B, 1024) bf16, persists across grid
                *, eps):

    def linear_lrelu(h, w_ref, b_ref):
        # bf16 operands on the MXU, f32 accumulate; elementwise in f32.
        y = jnp.dot(h.astype(jnp.bfloat16), w_ref[...],
                    preferred_element_type=jnp.float32) + b_ref[...]
        return jnp.maximum(y, 0.2 * y)                      # LeakyReLU(0.2)

    def batchnorm(h, g_ref, be_ref):
        # Training-mode BatchNorm1d: batch statistics, biased variance, eps=0.8.
        mu = jnp.mean(h, axis=0, keepdims=True)
        var = jnp.mean(jnp.square(h - mu), axis=0, keepdims=True)
        return (h - mu) * lax.rsqrt(var + eps) * g_ref[...] + be_ref[...]

    @pl.when(pl.program_id(0) == 0)
    def _():
        h = linear_lrelu(x_ref[...], w1_ref, b1_ref)                    # (B, 128)
        h = batchnorm(linear_lrelu(h, w2_ref, b2_ref), g2_ref, be2_ref) # (B, 256)
        h = batchnorm(linear_lrelu(h, w3_ref, b3_ref), g3_ref, be3_ref) # (B, 512)
        h = batchnorm(linear_lrelu(h, w4_ref, b4_ref), g4_ref, be4_ref) # (B, 1024)
        h4_ref[...] = h.astype(jnp.bfloat16)

    # Final layer tile:  (B, 1024) @ (1024, TN)  -> tanh -> (B, TN)
    f = jnp.dot(h4_ref[...], w5_ref[...], preferred_element_type=jnp.float32)
    feat_ref[...] = jnp.tanh(f + b5_ref[...])


# ---------------------------------------------------------------------------
# Kernel 2: per-row standardization over the 8192 features (unbiased std).
# ---------------------------------------------------------------------------
def _standardize_kernel(f_ref, o_ref):
    f = f_ref[...]                                          # (TB, 8192) f32
    n = f.shape[-1]
    mean = jnp.mean(f, axis=-1, keepdims=True)
    d = f - mean
    var = jnp.sum(d * d, axis=-1, keepdims=True) * (1.0 / (n - 1))   # torch.std default
    o_ref[...] = d * lax.rsqrt(var)


# ---------------------------------------------------------------------------
# Wrapper mirroring Generator.forward(semantic, noise)
# ---------------------------------------------------------------------------
def generator_forward(semantic, noise, params, *, n_tile=2048):
    (w1, b1,
     w2, b2, g2, be2,
     w3, b3, g3, be3,
     w4, b4, g4, be4,
     w5, b5) = params

    # Wrapper-side layout plumbing (free): concat + bf16 weight cast.
    x = jnp.concatenate([semantic, noise], axis=-1).astype(jnp.float32)   # (B, S+N)
    B = x.shape[0]
    out_dim = w5.shape[1]                                   # 8192
    assert out_dim % n_tile == 0
    nj = out_dim // n_tile
    w1b, w2b, w3b, w4b, w5b = (w.astype(jnp.bfloat16) for w in (w1, w2, w3, w4, w5))

    def const(shape):
        return pl.BlockSpec(shape, lambda j: (0,) * len(shape))

    feature = pl.pallas_call(
        functools.partial(_mlp_kernel, eps=0.8),
        out_shape=jax.ShapeDtypeStruct((B, out_dim), jnp.float32),
        grid=(nj,),
        in_specs=[const(x.shape),
                  const(w1.shape), const(b1.shape),
                  const(w2.shape), const(b2.shape), const(g2.shape), const(be2.shape),
                  const(w3.shape), const(b3.shape), const(g3.shape), const(be3.shape),
                  const(w4.shape), const(b4.shape), const(g4.shape), const(be4.shape),
                  pl.BlockSpec((w5.shape[0], n_tile), lambda j: (0, j)),
                  pl.BlockSpec((1, n_tile), lambda j: (0, j))],
        out_specs=pl.BlockSpec((B, n_tile), lambda j: (0, j)),
        scratch_shapes=[pltpu.VMEM((B, w5.shape[0]), jnp.bfloat16)],
        compiler_params=pltpu.CompilerParams(
            # h4 scratch (computed at step 0) is reused across steps -> sequential axis.
            dimension_semantics=("arbitrary",),
            vmem_limit_bytes=48 * 1024 * 1024),
    )(x, w1b, b1, w2b, b2, g2, be2, w3b, b3, g3, be3, w4b, b4, g4, be4, w5b, b5)

    # Row standardization: (feature - mean) / std  with unbiased std (PyTorch default).
    tb = B if B < 8 else 8
    # TODO(synk): assumes B % tb == 0; pad the batch for ragged sizes.
    out = pl.pallas_call(
        _standardize_kernel,
        out_shape=jax.ShapeDtypeStruct((B, out_dim), jnp.float32),
        grid=(B // tb,),
        in_specs=[pl.BlockSpec((tb, out_dim), lambda i: (i, 0))],
        out_specs=pl.BlockSpec((tb, out_dim), lambda i: (i, 0)),
        compiler_params=pltpu.CompilerParams(dimension_semantics=("parallel",)),
    )(feature)
    return out


# ---------------------------------------------------------------------------
# Parameter init (matches nn.Linear default uniform(+-1/sqrt(fan_in)); BN gamma=1, beta=0).
# Linear weights are stored transposed as (in_features, out_features); biases as (1, out).
# ---------------------------------------------------------------------------
def init_params(key, semantic_dim, noise_dim):
    dims = [semantic_dim + noise_dim, 128, 256, 512, 1024, 8192]
    ks = jax.random.split(key, 2 * (len(dims) - 1))
    lin = []
    for i in range(len(dims) - 1):
        fan_in, fan_out = dims[i], dims[i + 1]
        bound = fan_in ** -0.5
        w = jax.random.uniform(ks[2 * i], (fan_in, fan_out), jnp.float32, -bound, bound)
        b = jax.random.uniform(ks[2 * i + 1], (1, fan_out), jnp.float32, -bound, bound)
        lin.append((w, b))
    (w1, b1), (w2, b2), (w3, b3), (w4, b4), (w5, b5) = lin
    g2, be2 = jnp.ones((1, 256), jnp.float32), jnp.zeros((1, 256), jnp.float32)
    g3, be3 = jnp.ones((1, 512), jnp.float32), jnp.zeros((1, 512), jnp.float32)
    g4, be4 = jnp.ones((1, 1024), jnp.float32), jnp.zeros((1, 1024), jnp.float32)
    return (w1, b1, w2, b2, g2, be2, w3, b3, g3, be3, w4, b4, g4, be4, w5, b5)


if __name__ == "__main__":
    key = jax.random.PRNGKey(0)
    B = 2
    semantic_dim, noise_dim = 16, 16

    k_sem, k_noise, k_par = jax.random.split(key, 3)
    semantic = jax.random.normal(k_sem, (B, semantic_dim), jnp.float32)
    noise = jax.random.normal(k_noise, (B, noise_dim), jnp.float32)
    params = init_params(k_par, semantic_dim, noise_dim)

    feature = generator_forward(semantic, noise, params)
    jax.block_until_ready(feature)

    assert feature.shape == (B, 8192)
    assert bool(jnp.all(jnp.isfinite(feature)))
    print("KERNEL_OK")
</pallas_src>

<mosaic_0001>
module attributes {stable_mosaic.version = 11 : i64} {
  func.func @_mlp_kernel(%arg0: i32, %arg1: memref<2x32xf32, #tpu.memory_space<vmem>>, %arg2: memref<32x128xbf16, #tpu.memory_space<vmem>>, %arg3: memref<1x128xf32, #tpu.memory_space<vmem>>, %arg4: memref<128x256xbf16, #tpu.memory_space<vmem>>, %arg5: memref<1x256xf32, #tpu.memory_space<vmem>>, %arg6: memref<1x256xf32, #tpu.memory_space<vmem>>, %arg7: memref<1x256xf32, #tpu.memory_space<vmem>>, %arg8: memref<256x512xbf16, #tpu.memory_space<vmem>>, %arg9: memref<1x512xf32, #tpu.memory_space<vmem>>, %arg10: memref<1x512xf32, #tpu.memory_space<vmem>>, %arg11: memref<1x512xf32, #tpu.memory_space<vmem>>, %arg12: memref<512x1024xbf16, #tpu.memory_space<vmem>>, %arg13: memref<1x1024xf32, #tpu.memory_space<vmem>>, %arg14: memref<1x1024xf32, #tpu.memory_space<vmem>>, %arg15: memref<1x1024xf32, #tpu.memory_space<vmem>>, %arg16: memref<1024x2048xbf16, #tpu.memory_space<vmem>>, %arg17: memref<1x2048xf32, #tpu.memory_space<vmem>>, %arg18: memref<2x2048xf32, #tpu.memory_space<vmem>>, %arg19: memref<2x1024xbf16, #tpu.memory_space<vmem>>) attributes {dimension_semantics = [#tpu.dimension_semantics<arbitrary>], iteration_bounds = array<i64: 4>, scalar_prefetch = 0 : i64, scratch_operands = 1 : i64, tpu.core_type = #tpu.core_type<tc>, window_params = [{pipeline_mode = #tpu.pipeline_mode<synchronous>, transform_indices = @transform_0, window_bounds = array<i64: 2, 32>}, {pipeline_mode = #tpu.pipeline_mode<synchronous>, transform_indices = @transform_1, window_bounds = array<i64: 32, 128>}, {pipeline_mode = #tpu.pipeline_mode<synchronous>, transform_indices = @transform_2, window_bounds = array<i64: 1, 128>}, {pipeline_mode = #tpu.pipeline_mode<synchronous>, transform_indices = @transform_3, window_bounds = array<i64: 128, 256>}, {pipeline_mode = #tpu.pipeline_mode<synchronous>, transform_indices = @transform_4, window_bounds = array<i64: 1, 256>}, {pipeline_mode = #tpu.pipeline_mode<synchronous>, transform_indices = @transform_5, window_bounds = array<i64: 1, 256>}, {pipeline_mode = #tpu.pipeline_mode<synchronous>, transform_indices = @transform_6, window_bounds = array<i64: 1, 256>}, {pipeline_mode = #tpu.pipeline_mode<synchronous>, transform_indices = @transform_7, window_bounds = array<i64: 256, 512>}, {pipeline_mode = #tpu.pipeline_mode<synchronous>, transform_indices = @transform_8, window_bounds = array<i64: 1, 512>}, {pipeline_mode = #tpu.pipeline_mode<synchronous>, transform_indices = @transform_9, window_bounds = array<i64: 1, 512>}, {pipeline_mode = #tpu.pipeline_mode<synchronous>, transform_indices = @transform_10, window_bounds = array<i64: 1, 512>}, {pipeline_mode = #tpu.pipeline_mode<synchronous>, transform_indices = @transform_11, window_bounds = array<i64: 512, 1024>}, {pipeline_mode = #tpu.pipeline_mode<synchronous>, transform_indices = @transform_12, window_bounds = array<i64: 1, 1024>}, {pipeline_mode = #tpu.pipeline_mode<synchronous>, transform_indices = @transform_13, window_bounds = array<i64: 1, 1024>}, {pipeline_mode = #tpu.pipeline_mode<synchronous>, transform_indices = @transform_14, window_bounds = array<i64: 1, 1024>}, {transform_indices = @transform_15, window_bounds = array<i64: 1024, 2048>}, {transform_indices = @transform_16, window_bounds = array<i64: 1, 2048>}, {transform_indices = @transform_17, window_bounds = array<i64: 2, 2048>}]} {
    %c0_i32 = arith.constant 0 : i32
    %0 = arith.cmpi eq, %arg0, %c0_i32 : i32
    %1 = arith.extui %0 : i1 to i32
    %c0_i32_0 = arith.constant 0 : i32
    %2 = arith.cmpi ne, %1, %c0_i32_0 : i32
    scf.if %2 {
      %c0_8 = arith.constant 0 : index
      %c0_9 = arith.constant 0 : index
      %11 = vector.load %arg1[%c0_8, %c0_9] : memref<2x32xf32, #tpu.memory_space<vmem>>, vector<2x32xf32>
      %12 = arith.truncf %11 : vector<2x32xf32> to vector<2x32xbf16>
      %c0_10 = arith.constant 0 : index
      %c0_11 = arith.constant 0 : index
      %13 = vector.load %arg2[%c0_10, %c0_11] : memref<32x128xbf16, #tpu.memory_space<vmem>>, vector<32x128xbf16>
      %cst_12 = arith.constant dense<0.000000e+00> : vector<2x128xf32>
      %14 = tpu.matmul %12, %13, %cst_12 {dimension_numbers = #tpu.dot_dimension_numbers<[1], [0], [0], [1], [0, 0, 1, 1], [], []>} : vector<2x32xbf16>, vector<32x128xbf16>, vector<2x128xf32> -> vector<2x128xf32>
      %c0_13 = arith.constant 0 : index
      %c0_14 = arith.constant 0 : index
      %15 = vector.load %arg3[%c0_13, %c0_14] : memref<1x128xf32, #tpu.memory_space<vmem>>, vector<1x128xf32>
      %16 = vector.broadcast %15 : vector<1x128xf32> to vector<2x128xf32>
      %17 = arith.addf %14, %16 : vector<2x128xf32>
      %cst_15 = arith.constant 2.000000e-01 : f32
      %18 = vector.broadcast %cst_15 : f32 to vector<2x128xf32>
      %19 = arith.mulf %18, %17 : vector<2x128xf32>
      %20 = arith.maximumf %17, %19 : vector<2x128xf32>
      %21 = arith.truncf %20 : vector<2x128xf32> to vector<2x128xbf16>
      %c0_16 = arith.constant 0 : index
      %c0_17 = arith.constant 0 : index
      %22 = vector.load %arg4[%c0_16, %c0_17] : memref<128x256xbf16, #tpu.memory_space<vmem>>, vector<128x256xbf16>
      %cst_18 = arith.constant dense<0.000000e+00> : vector<2x256xf32>
      %23 = tpu.matmul %21, %22, %cst_18 {dimension_numbers = #tpu.dot_dimension_numbers<[1], [0], [0], [1], [0, 0, 1, 1], [], []>} : vector<2x128xbf16>, vector<128x256xbf16>, vector<2x256xf32> -> vector<2x256xf32>
      %c0_19 = arith.constant 0 : index
      %c0_20 = arith.constant 0 : index
      %24 = vector.load %arg5[%c0_19, %c0_20] : memref<1x256xf32, #tpu.memory_space<vmem>>, vector<1x256xf32>
      %25 = vector.broadcast %24 : vector<1x256xf32> to vector<2x256xf32>
      %26 = arith.addf %23, %25 : vector<2x256xf32>
      %cst_21 = arith.constant 2.000000e-01 : f32
      %27 = vector.broadcast %cst_21 : f32 to vector<2x256xf32>
      %28 = arith.mulf %27, %26 : vector<2x256xf32>
      %29 = arith.maximumf %26, %28 : vector<2x256xf32>
      %cst_22 = arith.constant dense<0.000000e+00> : vector<256xf32>
      %30 = vector.multi_reduction <add>, %29, %cst_22 [0] : vector<2x256xf32> to vector<256xf32>
      %31 = vector.shape_cast %30 : vector<256xf32> to vector<1x256xf32>
      %cst_23 = arith.constant 2.000000e+00 : f32
      %32 = vector.broadcast %cst_23 : f32 to vector<1x256xf32>
      %33 = arith.divf %31, %32 : vector<1x256xf32>
      %34 = vector.broadcast %33 : vector<1x256xf32> to vector<2x256xf32>
      %35 = arith.subf %29, %34 : vector<2x256xf32>
      %36 = arith.mulf %35, %35 : vector<2x256xf32>
      %cst_24 = arith.constant dense<0.000000e+00> : vector<256xf32>
      %37 = vector.multi_reduction <add>, %36, %cst_24 [0] : vector<2x256xf32> to vector<256xf32>
      %38 = vector.shape_cast %37 : vector<256xf32> to vector<1x256xf32>
      %cst_25 = arith.constant 2.000000e+00 : f32
      %39 = vector.broadcast %cst_25 : f32 to vector<1x256xf32>
      %40 = arith.divf %38, %39 : vector<1x256xf32>
      %41 = vector.broadcast %33 : vector<1x256xf32> to vector<2x256xf32>
      %42 = arith.subf %29, %41 : vector<2x256xf32>
      %cst_26 = arith.constant 8.000000e-01 : f32
      %43 = vector.broadcast %cst_26 : f32 to vector<1x256xf32>
      %44 = arith.addf %40, %43 : vector<1x256xf32>
      %45 = math.rsqrt %44 : vector<1x256xf32>
      %46 = vector.broadcast %45 : vector<1x256xf32> to vector<2x256xf32>
      %47 = arith.mulf %42, %46 : vector<2x256xf32>
      %c0_27 = arith.constant 0 : index
      %c0_28 = arith.constant 0 : index
      %48 = vector.load %arg6[%c0_27, %c0_28] : memref<1x256xf32, #tpu.memory_space<vmem>>, vector<1x256xf32>
      %49 = vector.broadcast %48 : vector<1x256xf32> to vector<2x256xf32>
      %50 = arith.mulf %47, %49 : vector<2x256xf32>
      %c0_29 = arith.constant 0 : index
      %c0_30 = arith.constant 0 : index
      %51 = vector.load %arg7[%c0_29, %c0_30] : memref<1x256xf32, #tpu.memory_space<vmem>>, vector<1x256xf32>
      %52 = vector.broadcast %51 : vector<1x256xf32> to vector<2x256xf32>
      %53 = arith.addf %50, %52 : vector<2x256xf32>
      %54 = arith.truncf %53 : vector<2x256xf32> to vector<2x256xbf16>
      %c0_31 = arith.constant 0 : index
      %c0_32 = arith.constant 0 : index
      %55 = vector.load %arg8[%c0_31, %c0_32] : memref<256x512xbf16, #tpu.memory_space<vmem>>, vector<256x512xbf16>
      %cst_33 = arith.constant dense<0.000000e+00> : vector<2x512xf32>
      %56 = tpu.matmul %54, %55, %cst_33 {dimension_numbers = #tpu.dot_dimension_numbers<[1], [0], [0], [1], [0, 0, 1, 1], [], []>} : vector<2x256xbf16>, vector<256x512xbf16>, vector<2x512xf32> -> vector<2x512xf32>
      %c0_34 = arith.constant 0 : index
      %c0_35 = arith.constant 0 : index
      %57 = vector.load %arg9[%c0_34, %c0_35] : memref<1x512xf32, #tpu.memory_space<vmem>>, vector<1x512xf32>
      %58 = vector.broadcast %57 : vector<1x512xf32> to vector<2x512xf32>
      %59 = arith.addf %56, %58 : vector<2x512xf32>
      %cst_36 = arith.constant 2.000000e-01 : f32
      %60 = vector.broadcast %cst_36 : f32 to vector<2x512xf32>
      %61 = arith.mulf %60, %59 : vector<2x512xf32>
      %62 = arith.maximumf %59, %61 : vector<2x512xf32>
      %cst_37 = arith.constant dense<0.000000e+00> : vector<512xf32>
      %63 = vector.multi_reduction <add>, %62, %cst_37 [0] : vector<2x512xf32> to vector<512xf32>
      %64 = vector.shape_cast %63 : vector<512xf32> to vector<1x512xf32>
      %cst_38 = arith.constant 2.000000e+00 : f32
      %65 = vector.broadcast %cst_38 : f32 to vector<1x512xf32>
      %66 = arith.divf %64, %65 : vector<1x512xf32>
      %67 = vector.broadcast %66 : vector<1x512xf32> to vector<2x512xf32>
      %68 = arith.subf %62, %67 : vector<2x512xf32>
      %69 = arith.mulf %68, %68 : vector<2x512xf32>
      %cst_39 = arith.constant dense<0.000000e+00> : vector<512xf32>
      %70 = vector.multi_reduction <add>, %69, %cst_39 [0] : vector<2x512xf32> to vector<512xf32>
      %71 = vector.shape_cast %70 : vector<512xf32> to vector<1x512xf32>
      %cst_40 = arith.constant 2.000000e+00 : f32
      %72 = vector.broadcast %cst_40 : f32 to vector<1x512xf32>
      %73 = arith.divf %71, %72 : vector<1x512xf32>
      %74 = vector.broadcast %66 : vector<1x512xf32> to vector<2x512xf32>
      %75 = arith.subf %62, %74 : vector<2x512xf32>
      %cst_41 = arith.constant 8.000000e-01 : f32
      %76 = vector.broadcast %cst_41 : f32 to vector<1x512xf32>
      %77 = arith.addf %73, %76 : vector<1x512xf32>
      %78 = math.rsqrt %77 : vector<1x512xf32>
      %79 = vector.broadcast %78 : vector<1x512xf32> to vector<2x512xf32>
      %80 = arith.mulf %75, %79 : vector<2x512xf32>
      %c0_42 = arith.constant 0 : index
      %c0_43 = arith.constant 0 : index
      %81 = vector.load %arg10[%c0_42, %c0_43] : memref<1x512xf32, #tpu.memory_space<vmem>>, vector<1x512xf32>
      %82 = vector.broadcast %81 : vector<1x512xf32> to vector<2x512xf32>
      %83 = arith.mulf %80, %82 : vector<2x512xf32>
      %c0_44 = arith.constant 0 : index
      %c0_45 = arith.constant 0 : index
      %84 = vector.load %arg11[%c0_44, %c0_45] : memref<1x512xf32, #tpu.memory_space<vmem>>, vector<1x512xf32>
      %85 = vector.broadcast %84 : vector<1x512xf32> to vector<2x512xf32>
      %86 = arith.addf %83, %85 : vector<2x512xf32>
      %87 = arith.truncf %86 : vector<2x512xf32> to vector<2x512xbf16>
      %c0_46 = arith.constant 0 : index
      %c0_47 = arith.constant 0 : index
      %88 = vector.load %arg12[%c0_46, %c0_47] : memref<512x1024xbf16, #tpu.memory_space<vmem>>, vector<512x1024xbf16>
      %cst_48 = arith.constant dense<0.000000e+00> : vector<2x1024xf32>
      %89 = tpu.matmul %87, %88, %cst_48 {dimension_numbers = #tpu.dot_dimension_numbers<[1], [0], [0], [1], [0, 0, 1, 1], [], []>} : vector<2x512xbf16>, vector<512x1024xbf16>, vector<2x1024xf32> -> vector<2x1024xf32>
      %c0_49 = arith.constant 0 : index
      %c0_50 = arith.constant 0 : index
      %90 = vector.load %arg13[%c0_49, %c0_50] : memref<1x1024xf32, #tpu.memory_space<vmem>>, vector<1x1024xf32>
      %91 = vector.broadcast %90 : vector<1x1024xf32> to vector<2x1024xf32>
      %92 = arith.addf %89, %91 : vector<2x1024xf32>
      %cst_51 = arith.constant 2.000000e-01 : f32
      %93 = vector.broadcast %cst_51 : f32 to vector<2x1024xf32>
      %94 = arith.mulf %93, %92 : vector<2x1024xf32>
      %95 = arith.maximumf %92, %94 : vector<2x1024xf32>
      %cst_52 = arith.constant dense<0.000000e+00> : vector<1024xf32>
      %96 = vector.multi_reduction <add>, %95, %cst_52 [0] : vector<2x1024xf32> to vector<1024xf32>
      %97 = vector.shape_cast %96 : vector<1024xf32> to vector<1x1024xf32>
      %cst_53 = arith.constant 2.000000e+00 : f32
      %98 = vector.broadcast %cst_53 : f32 to vector<1x1024xf32>
      %99 = arith.divf %97, %98 : vector<1x1024xf32>
      %100 = vector.broadcast %99 : vector<1x1024xf32> to vector<2x1024xf32>
      %101 = arith.subf %95, %100 : vector<2x1024xf32>
      %102 = arith.mulf %101, %101 : vector<2x1024xf32>
      %cst_54 = arith.constant dense<0.000000e+00> : vector<1024xf32>
      %103 = vector.multi_reduction <add>, %102, %cst_54 [0] : vector<2x1024xf32> to vector<1024xf32>
      %104 = vector.shape_cast %103 : vector<1024xf32> to vector<1x1024xf32>
      %cst_55 = arith.constant 2.000000e+00 : f32
      %105 = vector.broadcast %cst_55 : f32 to vector<1x1024xf32>
      %106 = arith.divf %104, %105 : vector<1x1024xf32>
      %107 = vector.broadcast %99 : vector<1x1024xf32> to vector<2x1024xf32>
      %108 = arith.subf %95, %107 : vector<2x1024xf32>
      %cst_56 = arith.constant 8.000000e-01 : f32
      %109 = vector.broadcast %cst_56 : f32 to vector<1x1024xf32>
      %110 = arith.addf %106, %109 : vector<1x1024xf32>
      %111 = math.rsqrt %110 : vector<1x1024xf32>
      %112 = vector.broadcast %111 : vector<1x1024xf32> to vector<2x1024xf32>
      %113 = arith.mulf %108, %112 : vector<2x1024xf32>
      %c0_57 = arith.constant 0 : index
      %c0_58 = arith.constant 0 : index
      %114 = vector.load %arg14[%c0_57, %c0_58] : memref<1x1024xf32, #tpu.memory_space<vmem>>, vector<1x1024xf32>
      %115 = vector.broadcast %114 : vector<1x1024xf32> to vector<2x1024xf32>
      %116 = arith.mulf %113, %115 : vector<2x1024xf32>
      %c0_59 = arith.constant 0 : index
      %c0_60 = arith.constant 0 : index
      %117 = vector.load %arg15[%c0_59, %c0_60] : memref<1x1024xf32, #tpu.memory_space<vmem>>, vector<1x1024xf32>
      %118 = vector.broadcast %117 : vector<1x1024xf32> to vector<2x1024xf32>
      %119 = arith.addf %116, %118 : vector<2x1024xf32>
      %120 = arith.truncf %119 : vector<2x1024xf32> to vector<2x1024xbf16>
      %c0_61 = arith.constant 0 : index
      %c0_62 = arith.constant 0 : index
      %121 = vector.load %arg19[%c0_61, %c0_62] : memref<2x1024xbf16, #tpu.memory_space<vmem>>, vector<2x1024xbf16>
      tpu.vector_store %arg19[%c0_61, %c0_62], %120 {strides = array<i32>} : memref<2x1024xbf16, #tpu.memory_space<vmem>>, vector<2x1024xbf16>,
    } else {
    }
    %c0 = arith.constant 0 : index
    %c0_1 = arith.constant 0 : index
    %3 = vector.load %arg19[%c0, %c0_1] : memref<2x1024xbf16, #tpu.memory_space<vmem>>, vector<2x1024xbf16>
    %c0_2 = arith.constant 0 : index
    %c0_3 = arith.constant 0 : index
    %4 = vector.load %arg16[%c0_2, %c0_3] : memref<1024x2048xbf16, #tpu.memory_space<vmem>>, vector<1024x2048xbf16>
    %cst = arith.constant dense<0.000000e+00> : vector<2x2048xf32>
    %5 = tpu.matmul %3, %4, %cst {dimension_numbers = #tpu.dot_dimension_numbers<[1], [0], [0], [1], [0, 0, 1, 1], [], []>} : vector<2x1024xbf16>, vector<1024x2048xbf16>, vector<2x2048xf32> -> vector<2x2048xf32>
    %c0_4 = arith.constant 0 : index
    %c0_5 = arith.constant 0 : index
    %6 = vector.load %arg17[%c0_4, %c0_5] : memref<1x2048xf32, #tpu.memory_space<vmem>>, vector<1x2048xf32>
    %7 = vector.broadcast %6 : vector<1x2048xf32> to vector<2x2048xf32>
    %8 = arith.addf %5, %7 : vector<2x2048xf32>
    %9 = math.tanh %8 : vector<2x2048xf32>
    %c0_6 = arith.constant 0 : index
    %c0_7 = arith.constant 0 : index
    %10 = vector.load %arg18[%c0_6, %c0_7] : memref<2x2048xf32, #tpu.memory_space<vmem>>, vector<2x2048xf32>
    tpu.vector_store %arg18[%c0_6, %c0_7], %9 {strides = array<i32>} : memref<2x2048xf32, #tpu.memory_space<vmem>>, vector<2x2048xf32>,
    return
  }
  func.func @transform_0(%arg0: i32) -> (i32, i32) {
    %c0_i32 = arith.constant 0 : i32
    %c0_i32_0 = arith.constant 0 : i32
    %c0_i32_1 = arith.constant 0 : i32
    return %c0_i32, %c0_i32_0 : i32, i32
  }
  func.func @transform_1(%arg0: i32) -> (i32, i32) {
    %c0_i32 = arith.constant 0 : i32
    %c0_i32_0 = arith.constant 0 : i32
    %c0_i32_1 = arith.constant 0 : i32
    return %c0_i32, %c0_i32_0 : i32, i32
  }
  func.func @transform_2(%arg0: i32) -> (i32, i32) {
    %c0_i32 = arith.constant 0 : i32
    %c0_i32_0 = arith.constant 0 : i32
    %c0_i32_1 = arith.constant 0 : i32
    return %c0_i32, %c0_i32_0 : i32, i32
  }
  func.func @transform_3(%arg0: i32) -> (i32, i32) {
    %c0_i32 = arith.constant 0 : i32
    %c0_i32_0 = arith.constant 0 : i32
    %c0_i32_1 = arith.constant 0 : i32
    return %c0_i32, %c0_i32_0 : i32, i32
  }
  func.func @transform_4(%arg0: i32) -> (i32, i32) {
    %c0_i32 = arith.constant 0 : i32
    %c0_i32_0 = arith.constant 0 : i32
    %c0_i32_1 = arith.constant 0 : i32
    return %c0_i32, %c0_i32_0 : i32, i32
  }
  func.func @transform_5(%arg0: i32) -> (i32, i32) {
    %c0_i32 = arith.constant 0 : i32
    %c0_i32_0 = arith.constant 0 : i32
    %c0_i32_1 = arith.constant 0 : i32
    return %c0_i32, %c0_i32_0 : i32, i32
  }
  func.func @transform_6(%arg0: i32) -> (i32, i32) {
    %c0_i32 = arith.constant 0 : i32
    %c0_i32_0 = arith.constant 0 : i32
    %c0_i32_1 = arith.constant 0 : i32
    return %c0_i32, %c0_i32_0 : i32, i32
  }
  func.func @transform_7(%arg0: i32) -> (i32, i32) {
    %c0_i32 = arith.constant 0 : i32
    %c0_i32_0 = arith.constant 0 : i32
    %c0_i32_1 = arith.constant 0 : i32
    return %c0_i32, %c0_i32_0 : i32, i32
  }
  func.func @transform_8(%arg0: i32) -> (i32, i32) {
    %c0_i32 = arith.constant 0 : i32
    %c0_i32_0 = arith.constant 0 : i32
    %c0_i32_1 = arith.constant 0 : i32
    return %c0_i32, %c0_i32_0 : i32, i32
  }
  func.func @transform_9(%arg0: i32) -> (i32, i32) {
    %c0_i32 = arith.constant 0 : i32
    %c0_i32_0 = arith.constant 0 : i32
    %c0_i32_1 = arith.constant 0 : i32
    return %c0_i32, %c0_i32_0 : i32, i32
  }
  func.func @transform_10(%arg0: i32) -> (i32, i32) {
    %c0_i32 = arith.constant 0 : i32
    %c0_i32_0 = arith.constant 0 : i32
    %c0_i32_1 = arith.constant 0 : i32
    return %c0_i32, %c0_i32_0 : i32, i32
  }
  func.func @transform_11(%arg0: i32) -> (i32, i32) {
    %c0_i32 = arith.constant 0 : i32
    %c0_i32_0 = arith.constant 0 : i32
    %c0_i32_1 = arith.constant 0 : i32
    return %c0_i32, %c0_i32_0 : i32, i32
  }
  func.func @transform_12(%arg0: i32) -> (i32, i32) {
    %c0_i32 = arith.constant 0 : i32
    %c0_i32_0 = arith.constant 0 : i32
    %c0_i32_1 = arith.constant 0 : i32
    return %c0_i32, %c0_i32_0 : i32, i32
  }
  func.func @transform_13(%arg0: i32) -> (i32, i32) {
    %c0_i32 = arith.constant 0 : i32
    %c0_i32_0 = arith.constant 0 : i32
    %c0_i32_1 = arith.constant 0 : i32
    return %c0_i32, %c0_i32_0 : i32, i32
  }
  func.func @transform_14(%arg0: i32) -> (i32, i32) {
    %c0_i32 = arith.constant 0 : i32
    %c0_i32_0 = arith.constant 0 : i32
    %c0_i32_1 = arith.constant 0 : i32
    return %c0_i32, %c0_i32_0 : i32, i32
  }
  func.func @transform_15(%arg0: i32) -> (i32, i32) {
    %c0_i32 = arith.constant 0 : i32
    %c0_i32_0 = arith.constant 0 : i32
    return %c0_i32, %arg0 : i32, i32
  }
  func.func @transform_16(%arg0: i32) -> (i32, i32) {
    %c0_i32 = arith.constant 0 : i32
    %c0_i32_0 = arith.constant 0 : i32
    return %c0_i32, %arg0 : i32, i32
  }
  func.func @transform_17(%arg0: i32) -> (i32, i32) {
    %c0_i32 = arith.constant 0 : i32
    %c0_i32_0 = arith.constant 0 : i32
    return %c0_i32, %arg0 : i32, i32
  }
}

</mosaic_0001>

<bundles_post_ra>
// kernel: tpu_custom_call.1
= control target key start
LH: loop header
LB: loop body
LE: loop exit
PB: predicated region body
PF: predicated region fallthrough
CT: control target
= control target key end

     0   :  { %s16606_s0 = inlined_call_operand.hbm [shape: f32[2,32], index: 0, kind: input, shape index: {}]   ;;  %s16607_s1 = inlined_call_operand.hbm [shape: bf16[32,128], index: 1, kind: input, shape index: {}]   ;;  %s16608_s2 = inlined_call_operand.hbm [shape: f32[1,128], index: 2, kind: input, shape index: {}]   ;;  %s16609_s3 = inlined_call_operand.hbm [shape: bf16[128,256], index: 3, kind: input, shape index: {}]   ;;  %s16610_s4 = inlined_call_operand.hbm [shape: f32[1,256], index: 4, kind: input, shape index: {}]   ;;  %s16611_s5 = inlined_call_operand.hbm [shape: f32[1,256], index: 5, kind: input, shape index: {}]   ;;  %s16612_s6 = inlined_call_operand.hbm [shape: f32[1,256], index: 6, kind: input, shape index: {}]   ;;  %s16613_s7 = inlined_call_operand.hbm [shape: bf16[256,512], index: 7, kind: input, shape index: {}]   ;;  %s16614_s8 = inlined_call_operand.hbm [shape: f32[1,512], index: 8, kind: input, shape index: {}]   ;;  %s16615_s9 = inlined_call_operand.hbm [shape: f32[1,512], index: 9, kind: input, shape index: {}]   ;;  %s16616_s10 = inlined_call_operand.hbm [shape: f32[1,512], index: 10, kind: input, shape index: {}]   ;;  %s16617_s11 = inlined_call_operand.hbm [shape: bf16[512,1024], index: 11, kind: input, shape index: {}]   ;;  %s16618_s12 = inlined_call_operand.hbm [shape: f32[1,1024], index: 12, kind: input, shape index: {}]   ;;  %s16619_s13 = inlined_call_operand.hbm [shape: f32[1,1024], index: 13, kind: input, shape index: {}]   ;;  %s16620_s14 = inlined_call_operand.hbm [shape: f32[1,1024], index: 14, kind: input, shape index: {}]   ;;  %s16621_s15 = inlined_call_operand.hbm [shape: bf16[1024,8192], index: 15, kind: input, shape index: {}]   ;;  %s16622_s16 = inlined_call_operand.hbm [shape: f32[1,8192], index: 16, kind: input, shape index: {}]   ;;  %s16623_s17 = inlined_call_operand.hbm [shape: f32[2,8192], index: 17, kind: output, shape index: {}]  }
   0x1   :  { %16648 = sst [smem:[#allocation44_spill]] %s16606_s0 }
   0x2   :  { %16649 = sst [smem:[#allocation45_spill]] %s16607_s1 }
   0x3   :  { %16650 = sst [smem:[#allocation46_spill]] %s16608_s2 }
   0x4   :  { %16651 = sst [smem:[#allocation47_spill]] %s16609_s3 }
   0x5   :  { %16652 = sst [smem:[#allocation48_spill]] %s16610_s4 }
   0x6   :  { %16653 = sst [smem:[#allocation49_spill]] %s16611_s5 }
   0x7   :  { %16654 = sst [smem:[#allocation50_spill]] %s16612_s6 }
   0x8   :  { %16655 = sst [smem:[#allocation51_spill]] %s16613_s7 }
   0x9   :  { %16656 = sst [smem:[#allocation52_spill]] %s16614_s8 }
   0xa   :  { %16657 = sst [smem:[#allocation53_spill]] %s16615_s9 }
   0xb   :  { %16658 = sst [smem:[#allocation54_spill]] %s16616_s10 }
   0xc   :  { %16659 = sst [smem:[#allocation55_spill]] %s16617_s11 }
   0xd   :  { %16660 = sst [smem:[#allocation56_spill]] %s16618_s12 }
   0xe   :  { %16661 = sst [smem:[#allocation57_spill]] %s16619_s13 }
   0xf   :  { %16662 = sst [smem:[#allocation58_spill]] %s16620_s14 }
  0x10   :  { %16663 = sst [smem:[#allocation59_spill]] %s16621_s15 }
  0x11   :  { %16664 = sst [smem:[#allocation60_spill]] %s16622_s16 }
  0x12   :  { %16665 = sst [smem:[#allocation61_spill]] %s16623_s17 }
  0x13   :  { %22 = vsyncpa [#allocation4], 0 }
  0x14   :  { %23 = vsyncpa [#allocation7], 0 }
  0x15   :  { %24 = vsyncpa [#allocation10], 0 }
  0x16   :  { %25 = vsyncpa [#allocation13], 0 }
  0x17   :  { %26 = vsyncpa [#allocation16], 0 }
  0x18   :  { %27 = vsyncpa [#allocation19], 0 }
  0x19   :  { %28 = vsyncpa [#allocation22], 0 }
  0x1a   :  { %29 = vsyncpa [#allocation25], 0 }
  0x1b   :  { %30 = vsyncpa [#allocation28], 0 }
  0x1c   :  { %32 = vsyncpa [#allocation28 + $0x1], 0 }
  0x1d   :  { %33 = vsyncpa [#allocation5], 0 }
  0x1e   :  { %35 = vsyncpa [#allocation5 + $0x1], 0  ;;  %s14628_s24 = smov 0   ;;  %s14630_s25 = smov 0  }
  0x1f   :  { %s14632_s26 = smov 0   ;;  %s14634_s27 = smov 0  }
  0x20 LB: > { %s14504_s28 = smov [#allocation6]   ;;  %s14649_s0 = sadd.s32 4294967295, %s14502_s27   ;;  %s14502_s27 = sphi %s14634_s27, %s16723_s27   ;;  %s14498_s26 = sphi %s14632_s26, %s16727_s26   ;;  %s14494_s25 = sphi %s14630_s25, %s16726_s25   ;;  %s14490_s24 = sphi %s14628_s24, %s16725_s24  }
  0x21   : > { %s462_s29 = sshll.u32 %s14504_s28, 4  ;;  %p11956_p0 = scmp.ge.s32.totalorder %s14502_s27, 1  ;;  %s14655_s29 = int_to_ptr.vmem [resolvable:$true] %s462_s29 }
  0x22   : > { %p16634_p1 = scmp.eq.s32.totalorder %s14649_s0, 0  ;;  %p439_p2 = scmp.lt.s32.totalorder %s14502_s27, 5 }
  0x23   : > { %s14505_s18 = smov [#allocation9]   ;;  %s14506_s20 = smov [#allocation12]  }
  0x24   : > { %p14657_p4 = pnand %p11956_p0, %p439_p2  ;;  %s486_s19 = sshll.u32 %s14505_s18, 4  ;;  %s14669_s19 = int_to_ptr.vmem [resolvable:$true] %s486_s19 }
  0x25   : > { %s14671_s21 = sshll.u32 %s14506_s20, 4  ;;  %s16669_s28 = sld [smem:[#allocation45_spill]]  ;;  %s512_s21 = int_to_ptr.vmem [resolvable:$true] %s14671_s21 }
  0x26   : > { %s16666_s30 = scalar_select %p14657_p4, 1, 0 }
  0x27   : > { %p13588_p5 = pneg %p14657_p4 }
  0x28   : > { %16667 = sst [smem:[#allocation41_spill]] %s16666_s30 }
  0x29   : > { %p14665_p6 = pnand %p13588_p5, %p16634_p1 }
  0x2b   : > { %s16668_s1 = scalar_select %p14665_p6, 1, 0 }
  0x2c   : > { %s13924_s17 = scalar_lea.hbm %s16669_s28, 256  ;;  %p14681_p8 = pneg %p14665_p6 }
  0x2d   : > { %p13925_p7 = scmp.ne.s32.totalorder %s16669_s28, %s13924_s17  ;;  %p13931_p11 = scmp.lt.u32.totalorder %s13924_s17, %s16669_s28 }
  0x2f   : > { %p13927_p9 = pnand %p14681_p8, %p13925_p7 }
  0x31   : > { %p13928_p10 = pneg %p13927_p9 }
  0x33   : > { %p13933_p12 = pnand %p13931_p11, %p13928_p10 }
  0x35   : > { %13936 = shalt.err (!%p13933_p12)
}
  0x36   : > { %s13937_s16 = scalar_lea.vmem %s14655_s29, 256  ;;  %p13945_p5 = scmp.lt.s32.totalorder %s14655_s29, %s14655_s29 }
  0x37   : > { %p13938_p13 = scmp.ne.s32.totalorder %s14655_s29, %s13937_s16  ;;  %p13946_p3 = scmp.lt.s32.totalorder %s13937_s16, %s13937_s16 }
  0x39   : > { %p13940_p0 = pnand %p13938_p13, %p14681_p8  ;;  %p13947_p7 = por %p13946_p3, %p13945_p5 }
  0x3b   : > { %p13941_p2 = pneg %p13940_p0 }
  0x3d   : > { %p13948_p9 = pnand %p13947_p7, %p13941_p2 }
  0x3f   : > { %13951 = shalt.err (!%p13948_p9)
}
  0x40   : > { %s16636_s30 = smov 64   ;;  %s14508_s14 = smov 4  }
  0x41   : > { %13594 = dma.hbm_to_vmem [thread:$0]  (!%p14665_p6), %s16669_s28, 256, %s14655_s29, [#allocation7], %s16636_s30, %s16636_s30, %s14508_s14  }
  0x42   : > { %s16671_s3 = sld [smem:[#allocation47_spill]] }
  0x48   : > { %s13952_s12 = scalar_lea.hbm %s16671_s3, 2048 }
  0x49   : > { %p13953_p3 = scmp.ne.s32.totalorder %s16671_s3, %s13952_s12  ;;  %p13959_p12 = scmp.lt.u32.totalorder %s13952_s12, %s16671_s3 }
  0x4b   : > { %p13955_p10 = pnand %p13953_p3, %p14681_p8 }
  0x4d   : > { %p13956_p11 = pneg %p13955_p10 }
  0x4f   : > { %p13961_p13 = pnand %p13959_p12, %p13956_p11 }
  0x51   : > { %13964 = shalt.err (!%p13961_p13)
}
  0x52   : > { %s13965_s29 = scalar_lea.vmem %s14669_s19, 2048  ;;  %p13973_p7 = scmp.lt.s32.totalorder %s14669_s19, %s14669_s19 }
  0x53   : > { %p13966_p0 = scmp.ne.s32.totalorder %s14669_s19, %s13965_s29  ;;  %p13974_p9 = scmp.lt.s32.totalorder %s13965_s29, %s13965_s29 }
  0x55   : > { %p13968_p2 = pnand %p13966_p0, %p14681_p8  ;;  %p13975_p3 = por %p13974_p9, %p13973_p7 }
  0x57   : > { %p13969_p5 = pneg %p13968_p2 }
  0x59   : > { %p13976_p10 = pnand %p13975_p3, %p13969_p5 }
  0x5b   : > { %13979 = shalt.err (!%p13976_p10)
}
  0x5c   : > { %s14509_s10 = smov 128   ;;  %s14510_s6 = smov 8  }
  0x5d   : > { %13600 = dma.hbm_to_vmem [thread:$0]  (!%p14665_p6), %s16671_s3, 2048, %s14669_s19, [#allocation10], %s14509_s10, %s14509_s10, %s14510_s6  }
  0x5e   : > { %s16672_s5 = sld [smem:[#allocation49_spill]] }
  0x64   : > { %s13980_s22 = scalar_lea.hbm %s16672_s5, 32 }
  0x65   : > { %p13981_p11 = scmp.ne.s32.totalorder %s16672_s5, %s13980_s22  ;;  %p13987_p0 = scmp.lt.u32.totalorder %s13980_s22, %s16672_s5 }
  0x67   : > { %p13983_p12 = pnand %p13981_p11, %p14681_p8 }
  0x69   : > { %p13984_p13 = pneg %p13983_p12 }
  0x6b   : > { %p13989_p2 = pnand %p13987_p0, %p13984_p13 }
  0x6d   : > { %13992 = shalt.err (!%p13989_p2)
}
  0x6e   : > { %s13993_s8 = scalar_lea.vmem %s512_s21, 32  ;;  %p14001_p3 = scmp.lt.s32.totalorder %s512_s21, %s512_s21 }
  0x6f   : > { %p13994_p5 = scmp.ne.s32.totalorder %s512_s21, %s13993_s8  ;;  %p14002_p10 = scmp.lt.s32.totalorder %s13993_s8, %s13993_s8 }
  0x71   : > { %p13996_p7 = pnand %p13994_p5, %p14681_p8  ;;  %p14003_p1 = por %p14002_p10, %p14001_p3 }
  0x73   : > { %p13997_p9 = pneg %p13996_p7 }
  0x75   : > { %p14004_p4 = pnand %p14003_p1, %p13997_p9 }
  0x77   : > { %14007 = shalt.err (!%p14004_p4)
}
  0x78   : > { %13606 = dma.hbm_to_vmem [thread:$0]  (!%p14665_p6), %s16672_s5, 32, %s512_s21, [#allocation13]  }
  0x79   : > { %s14511_s6 = smov [#allocation15]   ;;  %s16673_s7 = sld [smem:[#allocation51_spill]] }
  0x7a   : > { %s532_s12 = sshll.u32 %s14511_s6, 4  ;;  %s533_s12 = int_to_ptr.vmem [resolvable:$true] %s532_s12 }
  0x7f   : > { %s14008_s22 = scalar_lea.hbm %s16673_s7, 8192 }
  0x80   : > { %p14009_p11 = scmp.ne.s32.totalorder %s16673_s7, %s14008_s22  ;;  %p14015_p12 = scmp.lt.u32.totalorder %s14008_s22, %s16673_s7 }
  0x82   : > { %p14011_p1 = pnand %p14009_p11, %p14681_p8 }
  0x84   : > { %p14012_p4 = pneg %p14011_p1 }
  0x86   : > { %p14017_p13 = pnand %p14015_p12, %p14012_p4 }
  0x88   : > { %14020 = shalt.err (!%p14017_p13)
}
  0x89   : > { %s14021_s21 = scalar_lea.vmem %s533_s12, 8192  ;;  %p14029_p7 = scmp.lt.s32.totalorder %s533_s12, %s533_s12 }
  0x8a   : > { %p14022_p0 = scmp.ne.s32.totalorder %s533_s12, %s14021_s21  ;;  %p14030_p9 = scmp.lt.s32.totalorder %s14021_s21, %s14021_s21 }
  0x8c   : > { %p14024_p2 = pnand %p14022_p0, %p14681_p8  ;;  %p14031_p3 = por %p14030_p9, %p14029_p7 }
  0x8e   : > { %p14025_p5 = pneg %p14024_p2 }
  0x90   : > { %p14032_p10 = pnand %p14031_p3, %p14025_p5 }
  0x92   : > { %14035 = shalt.err (!%p14032_p10)
}
  0x93   : > { %s14512_s8 = smov 256   ;;  %s14513_s19 = smov 16  }
  0x94   : > { %13612 = dma.hbm_to_vmem [thread:$0]  (!%p14665_p6), %s16673_s7, 8192, %s533_s12, [#allocation16], %s14512_s8, %s14512_s8, %s14513_s19  }
  0x95   : > { %s14514_s14 = smov [#allocation18]   ;;  %s14515_s22 = smov [#allocation21]  }
  0x96   : > { %s557_s17 = sshll.u32 %s14514_s14, 4  ;;  %s578_s23 = sshll.u32 %s14515_s22, 4  ;;  %s558_s17 = int_to_ptr.vmem [resolvable:$true] %s557_s17  ;;  %s14764_s23 = int_to_ptr.vmem [resolvable:$true] %s578_s23 }
  0x97   : > { %s16674_s9 = sld [smem:[#allocation53_spill]] }
  0x9d   : > { %s14036_s29 = scalar_lea.hbm %s16674_s9, 64 }
  0x9e   : > { %p14037_p11 = scmp.ne.s32.totalorder %s16674_s9, %s14036_s29  ;;  %p14043_p12 = scmp.lt.u32.totalorder %s14036_s29, %s16674_s9 }
  0xa0   : > { %p14039_p1 = pnand %p14037_p11, %p14681_p8 }
  0xa2   : > { %p14040_p4 = pneg %p14039_p1 }
  0xa4   : > { %p14045_p13 = pnand %p14043_p12, %p14040_p4 }
  0xa6   : > { %14048 = shalt.err (!%p14045_p13)
}
  0xa7   : > { %s14049_s8 = scalar_lea.vmem %s558_s17, 64  ;;  %p14057_p7 = scmp.lt.s32.totalorder %s558_s17, %s558_s17 }
  0xa8   : > { %p14050_p0 = scmp.ne.s32.totalorder %s558_s17, %s14049_s8  ;;  %p14058_p9 = scmp.lt.s32.totalorder %s14049_s8, %s14049_s8 }
  0xaa   : > { %p14052_p2 = pnand %p14050_p0, %p14681_p8  ;;  %p14059_p3 = por %p14058_p9, %p14057_p7 }
  0xac   : > { %p14053_p5 = pneg %p14052_p2 }
  0xae   : > { %p14060_p10 = pnand %p14059_p3, %p14053_p5 }
  0xb0   : > { %14063 = shalt.err (!%p14060_p10)
}
  0xb1   : > { %13618 = dma.hbm_to_vmem [thread:$0]  (!%p14665_p6), %s16674_s9, 64, %s558_s17, [#allocation19]  }
  0xb2   : > { %s16675_s11 = sld [smem:[#allocation55_spill]] }
  0xb8   : > { %s14064_s22 = scalar_lea.hbm %s16675_s11, 32768 }
  0xb9   : > { %p14065_p11 = scmp.ne.s32.totalorder %s16675_s11, %s14064_s22  ;;  %p14071_p12 = scmp.lt.u32.totalorder %s14064_s22, %s16675_s11 }
  0xbb   : > { %p14067_p1 = pnand %p14065_p11, %p14681_p8 }
  0xbd   : > { %p14068_p4 = pneg %p14067_p1 }
  0xbf   : > { %p14073_p13 = pnand %p14071_p12, %p14068_p4 }
  0xc1   : > { %14076 = shalt.err (!%p14073_p13)
}
  0xc2   : > { %s14077_s17 = scalar_lea.vmem %s14764_s23, 32768  ;;  %p14085_p7 = scmp.lt.s32.totalorder %s14764_s23, %s14764_s23 }
  0xc3   : > { %p14078_p0 = scmp.ne.s32.totalorder %s14764_s23, %s14077_s17  ;;  %p14086_p9 = scmp.lt.s32.totalorder %s14077_s17, %s14077_s17 }
  0xc5   : > { %p14080_p2 = pnand %p14078_p0, %p14681_p8  ;;  %p14087_p3 = por %p14086_p9, %p14085_p7 }
  0xc7   : > { %p14081_p5 = pneg %p14080_p2 }
  0xc9   : > { %p14088_p10 = pnand %p14087_p3, %p14081_p5 }
  0xcb   : > { %14091 = shalt.err (!%p14088_p10)
}
  0xcc   : > { %s14516_s10 = smov 512   ;;  %s14517_s12 = smov 32  }
  0xcd   : > { %13624 = dma.hbm_to_vmem [thread:$0]  (!%p14665_p6), %s16675_s11, 32768, %s14764_s23, [#allocation22], %s14516_s10, %s14516_s10, %s14517_s12  }
  0xce   : > { %s14518_s19 = smov [#allocation24]   ;;  %s16676_s13 = sld [smem:[#allocation57_spill]] }
  0xcf   : > { %s603_s6 = sshll.u32 %s14518_s19, 4  ;;  %s604_s6 = int_to_ptr.vmem [resolvable:$true] %s603_s6 }
  0xd4   : > { %s14092_s20 = scalar_lea.hbm %s16676_s13, 128 }
  0xd5   : > { %p14093_p11 = scmp.ne.s32.totalorder %s16676_s13, %s14092_s20  ;;  %p14099_p12 = scmp.lt.u32.totalorder %s14092_s20, %s16676_s13 }
  0xd7   : > { %p14095_p1 = pnand %p14093_p11, %p14681_p8 }
  0xd9   : > { %p14096_p4 = pneg %p14095_p1 }
  0xdb   : > { %p14101_p13 = pnand %p14099_p12, %p14096_p4 }
  0xdd   : > { %14104 = shalt.err (!%p14101_p13)
}
  0xde   : > { %s14105_s23 = scalar_lea.vmem %s604_s6, 128  ;;  %p14113_p7 = scmp.lt.s32.totalorder %s604_s6, %s604_s6 }
  0xdf   : > { %p14106_p0 = scmp.ne.s32.totalorder %s604_s6, %s14105_s23  ;;  %p14114_p9 = scmp.lt.s32.totalorder %s14105_s23, %s14105_s23 }
  0xe1   : > { %p14108_p2 = pnand %p14106_p0, %p14681_p8  ;;  %p14115_p3 = por %p14114_p9, %p14113_p7 }
  0xe3   : > { %p14109_p5 = pneg %p14108_p2 }
  0xe5   : > { %p14116_p10 = pnand %p14115_p3, %p14109_p5 }
  0xe7   : > { %14119 = shalt.err (!%p14116_p10)
}
  0xe8   : > { %13630 = dma.hbm_to_vmem [thread:$0]  (!%p14665_p6), %s16676_s13, 128, %s604_s6, [#allocation25]  }
  0xe9   : > { %s11955_s8 = sadd.s32 4294967294, %s14502_s27   ;;  %s14827_s30 = sadd.s32 1, %s14502_s27  }
  0xea   : > { %16677 = sst [smem:[#allocation42_spill]] %s14827_s30  ;;  %s363_s19 = sadd.s32 1, %s14498_s26 }
  0xeb   : > { %s360_s14 = ssub.s32 %s14502_s27, %s14827_s30  ;;  %p370_p11 = scmp.ne.s32.totalorder %s14498_s26, %s14494_s25 }
  0xec   : > { %p361_p1 = scmp.eq.s32.totalorder %s360_s14, 0  ;;  %p371_p4 = scmp.eq.s32.totalorder %s14502_s27, 0 }
  0xed   : > { %p376_p12 = scmp.ne.s32.totalorder %s14494_s25, %s14490_s24  ;;  %p426_p13 = scmp.eq.s32.totalorder %s14649_s0, 3 }
  0xee   : > { %s14839_s22 = scalar_select %p361_p1, %s14498_s26, %s363_s19  }
  0xef   : > { %p372_p0 = por %p371_p4, %p370_p11  ;;  %p16679_p2 = scmp.eq.s32.totalorder %s14649_s0, 0 }
  0xf0   : > { %16678 = sst [smem:[#allocation43_spill]] %s14839_s22  ;;  %p14847_p7 = por %p426_p13, %p370_p11 }
  0xf1   : > { %p14843_p5 = por %p16679_p2, %p376_p12  ;;  %p432_p9 = scmp.eq.s32.totalorder %s11955_s8, 3 }
  0xf2   : > { %s16681_s20 = scalar_select %p14847_p7, 1, 0 }
  0xf3   : > { %s16680_s6 = scalar_select %p14843_p5, 1, 0 }
  0xf4   : > { %p13660_p3 = scmp.lt.s32.totalorder %s14502_s27, 4  ;;  %s625_s16 = sand.u32 1, %s14502_s27  }
  0xf5   : > { %p14853_p10 = por %p432_p9, %p376_p12  ;;  %s16637_s21 = sand.u32 1, %s14498_s26  }
  0xf6   : > { %s13372_s17 = sshll.u32 %s14502_s27, 10  ;;  %s11973_s23 = sshll.u32 %s16637_s21, 13 }
  0xf7   : > { %s16682_s29 = scalar_select %p14853_p10, 1, 0 }
  0xf8   : > { %s16683_s15 = sld [smem:[#allocation59_spill]]  ;;  %p14866_p11 = pnand %p13660_p3, %p372_p0 }
  0xf9   : > { %s629_s14 = scalar_lea.vmem [#allocation27], %s11973_s23  ;;  %s14872_s21 = scalar_lea.sflag [#allocation28], %s625_s16 }
  0xfa   : > { %s16684_s8 = scalar_select %p14866_p11, 1, 0 }
  0xfb   : > { %s636_s3 = sshll.u32 %s629_s14, 4  ;;  %p16645_p4 = pneg %p14866_p11  ;;  %s14870_s3 = int_to_ptr.vmem [resolvable:$true] %s636_s3 }
  0xfe   : > { %s14864_s19 = scalar_lea.hbm %s16683_s15, %s13372_s17  ;;  %s14125_s12 = scalar_lea.hbm %s16683_s15, 524288 }
  0xff   : > { %s14120_s5 = scalar_lea.hbm %s14864_s19, 131072  ;;  %p14126_p0 = scmp.lt.u32.totalorder %s14864_s19, %s16683_s15 }
 0x100   : > { %p14121_p1 = scmp.ne.s32.totalorder %s14864_s19, %s14120_s5  ;;  %p14127_p2 = scmp.lt.u32.totalorder %s14125_s12, %s14120_s5 }
 0x101   : > { %p14129_p3 = scmp.lt.u32.totalorder %s14120_s5, %s14864_s19 }
 0x102   : > { %p14123_p12 = pnand %p16645_p4, %p14121_p1  ;;  %p14128_p9 = por %p14127_p2, %p14126_p0 }
 0x104   : > { %p14124_p13 = pneg %p14123_p12  ;;  %p14130_p10 = por %p14129_p3, %p14128_p9 }
 0x106   : > { %p14131_p7 = pnand %p14130_p10, %p14124_p13 }
 0x108   : > { %14134 = shalt.err (!%p14131_p7)
}
 0x109   : > { %s14135_s16 = scalar_lea.vmem %s14870_s3, 131072  ;;  %s14519_s23 = smov [#allocation27]  }
 0x10a   : > { %p14136_p1 = scmp.ne.s32.totalorder %s14870_s3, %s14135_s16  ;;  %s14140_s14 = sshll.u32 %s14519_s23, 4  ;;  %s14141_s14 = int_to_ptr.vmem [resolvable:$false] %s14140_s14 }
 0x10b   : > { %s14142_s7 = scalar_lea.vmem %s14141_s14, 262144  ;;  %p14143_p6 = scmp.lt.s32.totalorder %s14870_s3, %s14141_s14 }
 0x10c   : > { %p14138_p12 = pnand %p14136_p1, %p16645_p4  ;;  %p14144_p0 = scmp.lt.s32.totalorder %s14142_s7, %s14135_s16 }
 0x10e   : > { %p14139_p5 = pneg %p14138_p12  ;;  %p14145_p2 = por %p14144_p0, %p14143_p6 }
 0x110   : > { %p14146_p9 = pnand %p14145_p2, %p14139_p5 }
 0x112   : > { %14149 = shalt.err (!%p14146_p9)
}
 0x113   : > { %s14520_s5 = smov 4096   ;;  %s14521_s9 = smov 1024  }
 0x114   : > { %s16685_s17 = smov 64   ;;  %s14522_s10 = smov [#allocation3]  }
 0x115   : > { %13637 = dma.hbm_to_vmem [thread:$0]  (!%p14866_p11), %s14864_s19, 131072, %s14870_s3, %s14872_s21, %s14520_s5, %s14521_s9, %s16685_s17  }
 0x116   : > { %s452_s12 = sshll.u32 %s14522_s10, 4  ;;  %s14523_s23 = smov [#allocation8]   ;;  %s453_s12 = int_to_ptr.vmem [resolvable:$true] %s452_s12 }
 0x117   : > { %s476_s11 = sshll.u32 %s14523_s23, 4  ;;  %s16686_s7 = sld [smem:[#allocation44_spill]]  ;;  %s477_s11 = int_to_ptr.vmem [resolvable:$true] %s476_s11 }
 0x11d   : > { %s14150_s13 = scalar_lea.hbm %s16686_s7, 32 }
 0x11e   : > { %p14151_p6 = scmp.ne.s32.totalorder %s16686_s7, %s14150_s13  ;;  %p14157_p10 = scmp.lt.u32.totalorder %s14150_s13, %s16686_s7 }
 0x120   : > { %p14153_p5 = pnand %p14151_p6, %p14681_p8 }
 0x122   : > { %p14154_p7 = pneg %p14153_p5 }
 0x124   : > { %p14159_p13 = pnand %p14157_p10, %p14154_p7 }
 0x126   : > { %14162 = shalt.err (!%p14159_p13)
}
 0x127   : > { %s14163_s3 = scalar_lea.vmem %s453_s12, 32  ;;  %p14171_p0 = scmp.lt.s32.totalorder %s453_s12, %s453_s12 }
 0x128   : > { %p14164_p3 = scmp.ne.s32.totalorder %s453_s12, %s14163_s3  ;;  %p14172_p2 = scmp.lt.s32.totalorder %s14163_s3, %s14163_s3 }
 0x12a   : > { %p14166_p1 = pnand %p14164_p3, %p14681_p8  ;;  %p14173_p9 = por %p14172_p2, %p14171_p0 }
 0x12c   : > { %p14167_p12 = pneg %p14166_p1 }
 0x12e   : > { %p14174_p4 = pnand %p14173_p9, %p14167_p12 }
 0x130   : > { %14177 = shalt.err (!%p14174_p4)
}
 0x131   : > { %p16687_p6 = scmp.ne.s32.totalorder %s16668_s1, 0  ;;  %s16688_s2 = sld [smem:[#allocation46_spill]] }
 0x133   : > { %13591 = dma.hbm_to_vmem [thread:$0]  (!%p16687_p6), %s16686_s7, 32, %s453_s12, [#allocation4]  }
 0x137   : > { %s14178_s22 = scalar_lea.hbm %s16688_s2, 16 }
 0x138   : > { %p14179_p5 = scmp.ne.s32.totalorder %s16688_s2, %s14178_s22  ;;  %p14185_p4 = scmp.lt.u32.totalorder %s14178_s22, %s16688_s2 }
 0x13a   : > { %p14181_p7 = pnand %p14179_p5, %p14681_p8 }
 0x13c   : > { %p14182_p10 = pneg %p14181_p7 }
 0x13e   : > { %p14187_p13 = pnand %p14185_p4, %p14182_p10 }
 0x140   : > { %14190 = shalt.err (!%p14187_p13)
}
 0x141   : > { %s14191_s10 = scalar_lea.vmem %s477_s11, 16  ;;  %s14198_s12 = scalar_lea.vmem %s477_s11, 32 }
 0x142   : > { %p14192_p3 = scmp.ne.s32.totalorder %s477_s11, %s14191_s10  ;;  %p14199_p0 = scmp.lt.s32.totalorder %s477_s11, %s477_s11 }
 0x143   : > { %p14200_p2 = scmp.lt.s32.totalorder %s14198_s12, %s14191_s10 }
 0x144   : > { %p14194_p1 = pnand %p14192_p3, %p14681_p8 }
 0x145   : > { %p14201_p9 = por %p14200_p2, %p14199_p0 }
 0x146   : > { %p14195_p12 = pneg %p14194_p1 }
 0x148   : > { %p14202_p11 = pnand %p14201_p9, %p14195_p12 }
 0x14a   : > { %14205 = shalt.err (!%p14202_p11)
}
 0x14b   : > { %13597 = dma.hbm_to_vmem [thread:$0]  (!%p16687_p6), %s16688_s2, 16, %s477_s11, [#allocation7]  }
 0x14c   : > { %s14524_s16 = smov [#allocation11]   ;;  %s14525_s15 = smov [#allocation14]  }
 0x14d   : > { %s500_s3 = sshll.u32 %s14524_s16, 4  ;;  %s522_s28 = sshll.u32 %s14525_s15, 4  ;;  %s501_s3 = int_to_ptr.vmem [resolvable:$true] %s500_s3  ;;  %s523_s28 = int_to_ptr.vmem [resolvable:$true] %s522_s28 }
 0x14e   : > { %s16689_s4 = sld [smem:[#allocation48_spill]] }
 0x154   : > { %s14206_s22 = scalar_lea.hbm %s16689_s4, 32 }
 0x155   : > { %p14207_p11 = scmp.ne.s32.totalorder %s16689_s4, %s14206_s22  ;;  %p14213_p10 = scmp.lt.u32.totalorder %s14206_s22, %s16689_s4 }
 0x157   : > { %p14209_p5 = pnand %p14207_p11, %p14681_p8 }
 0x159   : > { %p14210_p7 = pneg %p14209_p5 }
 0x15b   : > { %p14215_p4 = pnand %p14213_p10, %p14210_p7 }
 0x15d   : > { %14218 = shalt.err (!%p14215_p4)
}
 0x15e   : > { %s14219_s11 = scalar_lea.vmem %s501_s3, 32  ;;  %p14227_p12 = scmp.lt.s32.totalorder %s501_s3, %s501_s3 }
 0x15f   : > { %p14220_p13 = scmp.ne.s32.totalorder %s501_s3, %s14219_s11  ;;  %p14228_p0 = scmp.lt.s32.totalorder %s14219_s11, %s14219_s11 }
 0x161   : > { %p14222_p3 = pnand %p14220_p13, %p14681_p8  ;;  %p14229_p2 = por %p14228_p0, %p14227_p12 }
 0x163   : > { %p14223_p1 = pneg %p14222_p3 }
 0x165   : > { %p14230_p9 = pnand %p14229_p2, %p14223_p1 }
 0x167   : > { %14233 = shalt.err (!%p14230_p9)
}
 0x168   : > { %13603 = dma.hbm_to_vmem [thread:$0]  (!%p16687_p6), %s16689_s4, 32, %s501_s3, [#allocation10]  }
 0x169   : > { %s16690_s16 = sld [smem:[#allocation50_spill]] }
 0x16f   : > { %s14234_s15 = scalar_lea.hbm %s16690_s16, 32 }
 0x170   : > { %p14235_p11 = scmp.ne.s32.totalorder %s16690_s16, %s14234_s15  ;;  %p14241_p10 = scmp.lt.u32.totalorder %s14234_s15, %s16690_s16 }
 0x172   : > { %p14237_p5 = pnand %p14235_p11, %p14681_p8 }
 0x174   : > { %p14238_p7 = pneg %p14237_p5 }
 0x176   : > { %p14243_p4 = pnand %p14241_p10, %p14238_p7 }
 0x178   : > { %14246 = shalt.err (!%p14243_p4)
}
 0x179   : > { %s14247_s5 = scalar_lea.vmem %s523_s28, 32  ;;  %p14255_p12 = scmp.lt.s32.totalorder %s523_s28, %s523_s28 }
 0x17a   : > { %p14248_p13 = scmp.ne.s32.totalorder %s523_s28, %s14247_s5  ;;  %p14256_p0 = scmp.lt.s32.totalorder %s14247_s5, %s14247_s5 }
 0x17c   : > { %p14250_p3 = pnand %p14248_p13, %p14681_p8  ;;  %p14257_p2 = por %p14256_p0, %p14255_p12 }
 0x17e   : > { %p14251_p1 = pneg %p14250_p3 }
 0x180   : > { %p14258_p9 = pnand %p14257_p2, %p14251_p1 }
 0x182   : > { %14261 = shalt.err (!%p14258_p9)
}
 0x183   : > { %13609 = dma.hbm_to_vmem [thread:$0]  (!%p16687_p6), %s16690_s16, 32, %s523_s28, [#allocation13]  }
 0x184   : > { %s14526_s17 = smov [#allocation17]   ;;  %s14527_s10 = smov [#allocation20]  }
 0x185   : > { %s546_s11 = sshll.u32 %s14526_s17, 4  ;;  %s568_s12 = sshll.u32 %s14527_s10, 4  ;;  %s547_s11 = int_to_ptr.vmem [resolvable:$true] %s546_s11  ;;  %s569_s12 = int_to_ptr.vmem [resolvable:$true] %s568_s12 }
 0x186   : > { %s16691_s15 = sld [smem:[#allocation52_spill]] }
 0x18c   : > { %s14262_s13 = scalar_lea.hbm %s16691_s15, 64 }
 0x18d   : > { %p14263_p11 = scmp.ne.s32.totalorder %s16691_s15, %s14262_s13  ;;  %p14269_p10 = scmp.lt.u32.totalorder %s14262_s13, %s16691_s15 }
 0x18f   : > { %p14265_p5 = pnand %p14263_p11, %p14681_p8 }
 0x191   : > { %p14266_p7 = pneg %p14265_p5 }
 0x193   : > { %p14271_p4 = pnand %p14269_p10, %p14266_p7 }
 0x195   : > { %14274 = shalt.err (!%p14271_p4)
}
 0x196   : > { %s14275_s28 = scalar_lea.vmem %s547_s11, 64  ;;  %p14283_p12 = scmp.lt.s32.totalorder %s547_s11, %s547_s11 }
 0x197   : > { %p14276_p13 = scmp.ne.s32.totalorder %s547_s11, %s14275_s28  ;;  %p14284_p0 = scmp.lt.s32.totalorder %s14275_s28, %s14275_s28 }
 0x199   : > { %p14278_p3 = pnand %p14276_p13, %p14681_p8  ;;  %p14285_p2 = por %p14284_p0, %p14283_p12 }
 0x19b   : > { %p14279_p1 = pneg %p14278_p3 }
 0x19d   : > { %p14286_p9 = pnand %p14285_p2, %p14279_p1 }
 0x19f   : > { %14289 = shalt.err (!%p14286_p9)
}
 0x1a0   : > { %13615 = dma.hbm_to_vmem [thread:$0]  (!%p16687_p6), %s16691_s15, 64, %s547_s11, [#allocation16]  }
 0x1a1   : > { %s16692_s23 = sld [smem:[#allocation54_spill]] }
 0x1a7   : > { %s14290_s14 = scalar_lea.hbm %s16692_s23, 64 }
 0x1a8   : > { %p14291_p11 = scmp.ne.s32.totalorder %s16692_s23, %s14290_s14  ;;  %p14297_p10 = scmp.lt.u32.totalorder %s14290_s14, %s16692_s23 }
 0x1aa   : > { %p14293_p5 = pnand %p14291_p11, %p14681_p8 }
 0x1ac   : > { %p14294_p7 = pneg %p14293_p5 }
 0x1ae   : > { %p14299_p4 = pnand %p14297_p10, %p14294_p7 }
 0x1b0   : > { %14302 = shalt.err (!%p14299_p4)
}
 0x1b1   : > { %s14303_s5 = scalar_lea.vmem %s569_s12, 64  ;;  %p14311_p12 = scmp.lt.s32.totalorder %s569_s12, %s569_s12 }
 0x1b2   : > { %p14304_p13 = scmp.ne.s32.totalorder %s569_s12, %s14303_s5  ;;  %p14312_p0 = scmp.lt.s32.totalorder %s14303_s5, %s14303_s5 }
 0x1b4   : > { %p14306_p3 = pnand %p14304_p13, %p14681_p8  ;;  %p14313_p2 = por %p14312_p0, %p14311_p12 }
 0x1b6   : > { %p14307_p1 = pneg %p14306_p3 }
 0x1b8   : > { %p14314_p9 = pnand %p14313_p2, %p14307_p1 }
 0x1ba   : > { %14317 = shalt.err (!%p14314_p9)
}
 0x1bb   : > { %13621 = dma.hbm_to_vmem [thread:$0]  (!%p16687_p6), %s16692_s23, 64, %s569_s12, [#allocation19]  }
 0x1bc   : > { %s14528_s3 = smov [#allocation23]   ;;  %s14529_s17 = smov [#allocation26]  }
 0x1bd   : > { %s592_s9 = sshll.u32 %s14528_s3, 4  ;;  %s614_s10 = sshll.u32 %s14529_s17, 4  ;;  %s593_s9 = int_to_ptr.vmem [resolvable:$true] %s592_s9  ;;  %s615_s10 = int_to_ptr.vmem [resolvable:$true] %s614_s10 }
 0x1be   : > { %s16693_s30 = sld [smem:[#allocation56_spill]] }
 0x1c4   : > { %s14318_s22 = scalar_lea.hbm %s16693_s30, 128 }
 0x1c5   : > { %p14319_p11 = scmp.ne.s32.totalorder %s16693_s30, %s14318_s22  ;;  %p14325_p10 = scmp.lt.u32.totalorder %s14318_s22, %s16693_s30 }
 0x1c7   : > { %p14321_p5 = pnand %p14319_p11, %p14681_p8 }
 0x1c9   : > { %p14322_p7 = pneg %p14321_p5 }
 0x1cb   : > { %p14327_p4 = pnand %p14325_p10, %p14322_p7 }
 0x1cd   : > { %14330 = shalt.err (!%p14327_p4)
}
 0x1ce   : > { %s14331_s12 = scalar_lea.vmem %s593_s9, 128  ;;  %p14339_p12 = scmp.lt.s32.totalorder %s593_s9, %s593_s9 }
 0x1cf   : > { %p14332_p13 = scmp.ne.s32.totalorder %s593_s9, %s14331_s12  ;;  %p14340_p0 = scmp.lt.s32.totalorder %s14331_s12, %s14331_s12 }
 0x1d1   : > { %p14334_p3 = pnand %p14332_p13, %p14681_p8  ;;  %p14341_p2 = por %p14340_p0, %p14339_p12 }
 0x1d3   : > { %p14335_p1 = pneg %p14334_p3 }
 0x1d5   : > { %p14342_p9 = pnand %p14341_p2, %p14335_p1 }
 0x1d7   : > { %14345 = shalt.err (!%p14342_p9)
}
 0x1d8   : > { %13627 = dma.hbm_to_vmem [thread:$0]  (!%p16687_p6), %s16693_s30, 128, %s593_s9, [#allocation22]  }
 0x1d9   : > { %s16694_s2 = sand.u32 1, %s14498_s26   ;;  %s16695_s22 = sld [smem:[#allocation58_spill]] }
 0x1da   : > { %s11976_s17 = sshll.u32 %s16694_s2, 4 }
 0x1df   : > { %s14346_s19 = scalar_lea.hbm %s16695_s22, 128 }
 0x1e0   : > { %p14347_p11 = scmp.ne.s32.totalorder %s16695_s22, %s14346_s19  ;;  %p14353_p10 = scmp.lt.u32.totalorder %s14346_s19, %s16695_s22 }
 0x1e2   : > { %p14349_p5 = pnand %p14347_p11, %p14681_p8 }
 0x1e4   : > { %p14350_p7 = pneg %p14349_p5 }
 0x1e6   : > { %p14355_p4 = pnand %p14353_p10, %p14350_p7 }
 0x1e8   : > { %14358 = shalt.err (!%p14355_p4)
}
 0x1e9   : > { %s14359_s9 = scalar_lea.vmem %s615_s10, 128  ;;  %p14367_p12 = scmp.lt.s32.totalorder %s615_s10, %s615_s10 }
 0x1ea   : > { %p14360_p13 = scmp.ne.s32.totalorder %s615_s10, %s14359_s9  ;;  %p14368_p0 = scmp.lt.s32.totalorder %s14359_s9, %s14359_s9 }
 0x1ec   : > { %p14362_p3 = pnand %p14360_p13, %p14681_p8  ;;  %p14369_p2 = por %p14368_p0, %p14367_p12 }
 0x1ee   : > { %p14363_p1 = pneg %p14362_p3 }
 0x1f0   : > { %p14370_p9 = pnand %p14369_p2, %p14363_p1 }
 0x1f2   : > { %14373 = shalt.err (!%p14370_p9)
}
 0x1f3   : > { %13633 = dma.hbm_to_vmem [thread:$0]  (!%p16687_p6), %s16695_s22, 128, %s615_s10, [#allocation25]  }
 0x1f4   : > { %s13373_s4 = sshll.u32 %s14502_s27, 8  ;;  %s16696_s13 = sld [smem:[#allocation60_spill]] }
 0x1f5   : > { %s650_s19 = scalar_lea.vmem [#allocation29], %s11976_s17  ;;  %p16697_p11 = scmp.ne.s32.totalorder %s16684_s8, 0 }
 0x1f6   : > { %s658_s5 = sshll.u32 %s650_s19, 4  ;;  %s659_s5 = int_to_ptr.vmem [resolvable:$true] %s658_s5 }
 0x1f7   : > { %p16698_p5 = pneg %p16697_p11 }
 0x1fa   : > { %s15051_s18 = scalar_lea.hbm %s16696_s13, %s13373_s4  ;;  %s14379_s12 = scalar_lea.hbm %s16696_s13, 1024 }
 0x1fb   : > { %s14374_s1 = scalar_lea.hbm %s15051_s18, 256  ;;  %p14380_p6 = scmp.lt.u32.totalorder %s15051_s18, %s16696_s13 }
 0x1fc   : > { %p14375_p8 = scmp.ne.s32.totalorder %s15051_s18, %s14374_s1  ;;  %p14381_p4 = scmp.lt.u32.totalorder %s14379_s12, %s14374_s1 }
 0x1fd   : > { %p14383_p3 = scmp.lt.u32.totalorder %s14374_s1, %s15051_s18 }
 0x1fe   : > { %p14377_p7 = pnand %p14375_p8, %p16698_p5  ;;  %p14382_p13 = por %p14381_p4, %p14380_p6 }
 0x200   : > { %p14378_p10 = pneg %p14377_p7  ;;  %p14384_p1 = por %p14383_p3, %p14382_p13 }
 0x202   : > { %p14385_p12 = pnand %p14384_p1, %p14378_p10 }
 0x204   : > { %14388 = shalt.err (!%p14385_p12)
}
 0x205   : > { %s14389_s17 = scalar_lea.vmem %s659_s5, 256  ;;  %p16699_p2 = pmov %p16698_p5 }
 0x206   : > { %p14390_p0 = scmp.ne.s32.totalorder %s659_s5, %s14389_s17  ;;  %s14530_s3 = smov [#allocation29]  }
 0x207   : > { %s14394_s4 = sshll.u32 %s14530_s3, 4  ;;  %s14395_s4 = int_to_ptr.vmem [resolvable:$false] %s14394_s4 }
 0x208   : > { %p14392_p9 = pnand %p14390_p0, %p16699_p2  ;;  %s14396_s2 = scalar_lea.vmem %s14395_s4, 512 }
 0x209   : > { %p14397_p5 = scmp.lt.s32.totalorder %s659_s5, %s14395_s4  ;;  %p14398_p7 = scmp.lt.s32.totalorder %s14396_s2, %s14389_s17 }
 0x20a   : > { %p14393_p8 = pneg %p14392_p9 }
 0x20b   : > { %p14399_p4 = por %p14398_p7, %p14397_p5 }
 0x20d   : > { %p14400_p6 = pnand %p14399_p4, %p14393_p8 }
 0x20f   : > { %14403 = shalt.err (!%p14400_p6)
}
 0x210   : > { %13640 = dma.hbm_to_vmem [thread:$0]  (!%p16697_p11), %s15051_s18, 256, %s659_s5, %s14872_s21  }
 0x211   : > { %s16700_s14 = sld [smem:[#allocation41_spill]] }
 0x217   : > { %p16701_p10 = scmp.ne.s32.totalorder %s16700_s14, 0 }
 0x218   : > { %p16702_p13 = scmp.eq.s32.totalorder (!%p16701_p10), %s14649_s0, 0 }
 0x219   : > { %667 = sbr.rel (%p16701_p10) target bundleno = 3108 (0xc24), region = 88 }
 0x220   : > { %14449 = dma.done.wait (%p16702_p13), [#allocation4], 32   ;;  %p16703_p3 = pmov %p16702_p13 }
 0x222   : > { %14451 = vsyncadd (%p16703_p3), [#allocation4], 4294967264  ;;  %p16704_p1 = pmov %p16703_p3 }
 0x224   : > { %14453 = dma.done.wait (%p16704_p1), [#allocation7], 272   ;;  %p16705_p12 = pmov %p16704_p1 }
 0x225   : > { %p16706_p0 = pmov %p16704_p1 }
 0x226   : > { %14455 = vsyncadd (%p16705_p12), [#allocation7], 4294967024 }
 0x227   : > { %14457 = dma.done.wait (%p16706_p0), [#allocation10], 2080   ;;  %p16707_p11 = pmov %p16706_p0 }
 0x228   : > { %p16708_p2 = pmov %p16706_p0 }
 0x229   : > { %14459 = vsyncadd (%p16707_p11), [#allocation10], 4294965216 }
 0x22a   : > { %14461 = dma.done.wait (%p16708_p2), [#allocation13], 64   ;;  %p16709_p9 = pmov %p16706_p0 }
 0x22b   : > { %p16710_p8 = pmov %p16706_p0 }
 0x22c   : > { %14463 = vsyncadd (%p16709_p9), [#allocation13], 4294967232 }
 0x22d   : > { %14465 = dma.done.wait (%p16710_p8), [#allocation16], 8256   ;;  %p16711_p5 = pmov %p16706_p0 }
 0x22e   : > { %p16712_p7 = pmov %p16706_p0 }
 0x22f   : > { %14467 = vsyncadd (%p16711_p5), [#allocation16], 4294959040 }
 0x230   : > { %14469 = dma.done.wait (%p16712_p7), [#allocation19], 128   ;;  %p16713_p4 = pmov %p16706_p0 }
 0x231   : > { %p16714_p6 = pmov %p16706_p0 }
 0x232   : > { %14471 = vsyncadd (%p16713_p4), [#allocation19], 4294967168 }
 0x233   : > { %14473 = dma.done.wait (%p16714_p6), [#allocation22], 32896   ;;  %p16715_p10 = pmov %p16706_p0 }
 0x234   : > { %p16716_p13 = pmov %p16706_p0 }
 0x235   : > { %14475 = vsyncadd (%p16715_p10), [#allocation22], 4294934400 }
 0x236   : > { %14477 = dma.done.wait (%p16716_p13), [#allocation25], 256   ;;  %p16717_p3 = pmov %p16706_p0 }
 0x237   : > { %s729_s21 = sand.u32 1, %s14649_s0   ;;  %s15109_s8 = sand.u32 1, %s14494_s25  }
 0x238   : > { %14479 = vsyncadd (%p16717_p3), [#allocation25], 4294967040  ;;  %s11995_s18 = sshll.u32 %s15109_s8, 13  ;;  %s730_s19 = scalar_lea.sflag [#allocation28], %s729_s21 }
 0x239   : > { %s15112_s5 = scalar_lea.vmem [#allocation27], %s11995_s18  ;;  %p16718_p1 = scmp.ne.s32.totalorder %s16680_s6, 0 }
 0x23b   : > { %14481 = dma.done.wait (%p16718_p1), %s730_s19, 131328  }
 0x23c   : > { %14483 = vsyncadd (%p16718_p1), %s730_s19, 4294835968  ;;  %s11996_s1 = sshll.u32 %s15109_s8, 4  ;;  %s11997_s10 = sshll.u32 %s15109_s8, 5 }
 0x23d   : > { %s15120_s11 = scalar_lea.vmem [#allocation29], %s11996_s1  ;;  %s15122_s12 = scalar_lea.vmem [#allocation30], %s11997_s10 }
 0x23e   : > { %p16719_p12 = scmp.ne.s32.totalorder %s14649_s0, 0 }
 0x23f   : > { %v13740_v0 = vld [vmem:[#allocation6] sm:$0xff] (!%p16719_p12)   ;;  %v14531_v1 = vmov (!%p16719_p12), 0.0   ;;  %v13741_v2 = vld [vmem:[#allocation6 + $0x8] sm:$0xff] (!%p16719_p12)   ;;  %vm14532_vm0 = vmmov (!%p16719_p12), 0   ;;  %v806_v3 = vld [vmem:[#allocation3] sm:$0x3] (!%p16719_p12) }
 0x240   : > { %805 = sbr.rel (%p16719_p12) target bundleno = 1832 (0x728), region = 160  ;;  %13378 = vmatprep.subr.bf16.mxu0 (!%p16719_p12), %v14531_v1  ;;  %13382 = vmatprep.mubr.msk.bf16.mxu0 (!%p16719_p12), %vm14532_vm0, %v14531_v1  ;;  %v13742_v4 = vld [vmem:[#allocation9 + $0x4] ss:$8 sps:$4 sm:$0xff] (!%p16719_p12)   ;;  %v13744_v5 = vld [vmem:[#allocation9] ss:$8 sps:$4 sm:$0xff] (!%p16719_p12)   ;;  %v807_v7 = vpack.c.bf16 (!%p16719_p12), %v806_v3, %v806_v3  ;;  %vm831_vm1 = vcmask (!%p16719_p12), 261120  }
 0x241   : > { %13379 = vmatpush3.bf16.msra.mxu0 (!%p16719_p12), %v13740_v0  ;;  %v13745_v6 = vld [vmem:[#allocation9 + $0x14] ss:$8 sps:$4 sm:$0xff] (!%p16719_p12)   ;;  %986 = vmatprep.subr.bf16.mxu1 (!%p16719_p12), %v13742_v4  ;;  %v13747_v8 = vld [vmem:[#allocation9 + $0x10] ss:$8 sps:$4 sm:$0xff] (!%p16719_p12)   ;;  %v13748_v9 = vld [vmem:[#allocation9 + $0x24] ss:$8 sps:$4 sm:$0xff] (!%p16719_p12)  }
 0x242   : > { %13380 = vmatprep.subr.bf16.mxu0 (!%p16719_p12), %v14531_v1  ;;  %987 = vmatpush1.bf16.msra.mxu1 (!%p16719_p12), %v13744_v5  ;;  %v13750_v10 = vld [vmem:[#allocation9 + $0x20] ss:$8 sps:$4 sm:$0xff] (!%p16719_p12)   ;;  %v13751_v11 = vld [vmem:[#allocation9 + $0x34] ss:$8 sps:$4 sm:$0xff] (!%p16719_p12)   ;;  %v13753_v12 = vld [vmem:[#allocation9 + $0x30] ss:$8 sps:$4 sm:$0xff] (!%p16719_p12)  }
 0x243   : > { %988 = vmatprep.subr.bf16.mxu1 (!%p16719_p12), %v13745_v6  ;;  %v13754_v13 = vld [vmem:[#allocation9 + $0x44] ss:$8 sps:$4 sm:$0xff] (!%p16719_p12)   ;;  %v13756_v14 = vld [vmem:[#allocation9 + $0x40] ss:$8 sps:$4 sm:$0xff] (!%p16719_p12)   ;;  %v13757_v15 = vld [vmem:[#allocation9 + $0x54] ss:$8 sps:$4 sm:$0xff] (!%p16719_p12)  }
 0x244   : > { %v13759_v16 = vld [vmem:[#allocation9 + $0x50] ss:$8 sps:$4 sm:$0xff] (!%p16719_p12)   ;;  %v13760_v17 = vld [vmem:[#allocation9 + $0x64] ss:$8 sps:$4 sm:$0xff] (!%p16719_p12)   ;;  %v13762_v18 = vld [vmem:[#allocation9 + $0x60] ss:$8 sps:$4 sm:$0xff] (!%p16719_p12)  }
 0x245   : > { %13381 = vmatpush3.bf16.msra.mxu0 (!%p16719_p12), %v13741_v2  ;;  %v13763_v19 = vld [vmem:[#allocation9 + $0x74] ss:$8 sps:$4 sm:$0xff] (!%p16719_p12)   ;;  %v13765_v20 = vld [vmem:[#allocation9 + $0x70] ss:$8 sps:$4 sm:$0xff] (!%p16719_p12)   ;;  %v14533_v21 = vmov (!%p16719_p12), 0   ;;  %vm1031_vm2 = vcmask (!%p16719_p12), 1041408  }
 0x246   : > { %989 = vmatpush1.bf16.msra.mxu1 (!%p16719_p12), %v13747_v8  ;;  %1018 = vmatprep.mubr.bf16.mxu1 (!%p16719_p12), %v14533_v21  ;;  %v11999_v22 = vld [vmem:[#allocation8] ss:$0 sm:$0xff] (!%p16719_p12)  ;;  %v13768_v31 = vld [vmem:[#allocation15 + $0x4] ss:$16 sps:$4 sm:$0xff] (!%p16719_p12)   ;;  %v13771_v32 = vld [vmem:[#allocation15 + $0xc] ss:$16 sps:$4 sm:$0xff] (!%p16719_p12)  }
 0x247   : > { %990 = vmatprep.subr.bf16.mxu1 %v13748_v9  ;;  %v13766_v33 = vld [vmem:[#allocation15] ss:$16 sps:$4 sm:$0xff]   ;;  %v13769_v34 = vld [vmem:[#allocation15 + $0x8] ss:$16 sps:$4 sm:$0xff]   ;;  %1511 = vmatprep.subr.bf16.mxu0 %v13768_v31  ;;  %v13774_v35 = vld [vmem:[#allocation15 + $0x24] ss:$16 sps:$4 sm:$0xff]  }
 0x248   : > { %13383 = vmatmul.mubr.msk.bf16.vlgmr.msra.gmra.mrb[0].mxu0 %vm831_vm1, %v807_v7  ;;  %v13777_v36 = vld [vmem:[#allocation15 + $0x2c] ss:$16 sps:$4 sm:$0xff]   ;;  %v13772_v37 = vld [vmem:[#allocation15 + $0x20] ss:$16 sps:$4 sm:$0xff]   ;;  %v13775_v38 = vld [vmem:[#allocation15 + $0x28] ss:$16 sps:$4 sm:$0xff]  }
 0x249   : > { %1512 = vmatpush1.bf16.msra.mxu0 %v13766_v33  ;;  %v13780_v39 = vld [vmem:[#allocation15 + $0x44] ss:$16 sps:$4 sm:$0xff]   ;;  %v13783_v40 = vld [vmem:[#allocation15 + $0x4c] ss:$16 sps:$4 sm:$0xff]   ;;  %v13778_v41 = vld [vmem:[#allocation15 + $0x40] ss:$16 sps:$4 sm:$0xff]  }
 0x24a   : > { %991 = vmatpush1.bf16.msra.mxu1 %v13750_v10  ;;  %1513 = vmatprep.subr.bf16.mxu0 %v13774_v35  ;;  %v13781_v42 = vld [vmem:[#allocation15 + $0x48] ss:$16 sps:$4 sm:$0xff]   ;;  %v13786_v43 = vld [vmem:[#allocation15 + $0x64] ss:$16 sps:$4 sm:$0xff]   ;;  %v13789_v44 = vld [vmem:[#allocation15 + $0x6c] ss:$16 sps:$4 sm:$0xff]  }
 0x24b   : > { %992 = vmatprep.subr.bf16.mxu1 %v13751_v11  ;;  %v13784_v45 = vld [vmem:[#allocation15 + $0x60] ss:$16 sps:$4 sm:$0xff]   ;;  %v13787_v46 = vld [vmem:[#allocation15 + $0x68] ss:$16 sps:$4 sm:$0xff]   ;;  %v13792_v47 = vld [vmem:[#allocation15 + $0x84] ss:$16 sps:$4 sm:$0xff]  }
 0x24c   : > { %v13795_v48 = vld [vmem:[#allocation15 + $0x8c] ss:$16 sps:$4 sm:$0xff]   ;;  %v13790_v49 = vld [vmem:[#allocation15 + $0x80] ss:$16 sps:$4 sm:$0xff]   ;;  %v13793_v50 = vld [vmem:[#allocation15 + $0x88] ss:$16 sps:$4 sm:$0xff]  }
 0x24d   : > { %1514 = vmatpush1.bf16.msra.mxu0 %v13772_v37  ;;  %v13798_v51 = vld [vmem:[#allocation15 + $0xa4] ss:$16 sps:$4 sm:$0xff]   ;;  %v13801_v52 = vld [vmem:[#allocation15 + $0xac] ss:$16 sps:$4 sm:$0xff]   ;;  %v13796_v53 = vld [vmem:[#allocation15 + $0xa0] ss:$16 sps:$4 sm:$0xff]  }
 0x24e   : > { %993 = vmatpush1.bf16.msra.mxu1 %v13753_v12  ;;  %1515 = vmatprep.subr.bf16.mxu0 %v13780_v39  ;;  %v13799_v54 = vld [vmem:[#allocation15 + $0xa8] ss:$16 sps:$4 sm:$0xff]   ;;  %v13804_v55 = vld [vmem:[#allocation15 + $0xc4] ss:$16 sps:$4 sm:$0xff]   ;;  %v13807_v56 = vld [vmem:[#allocation15 + $0xcc] ss:$16 sps:$4 sm:$0xff]   ;;  %v896_v39 = vlaneseq }
 0x24f   : > { %994 = vmatprep.subr.bf16.mxu1 %v13754_v13  ;;  %v13802_v57 = vld [vmem:[#allocation15 + $0xc0] ss:$16 sps:$4 sm:$0xff]   ;;  %v13805_v58 = vld [vmem:[#allocation15 + $0xc8] ss:$16 sps:$4 sm:$0xff]   ;;  %v13810_v59 = vld [vmem:[#allocation15 + $0xe4] ss:$16 sps:$4 sm:$0xff]  }
 0x250   : > { %v13813_v60 = vld [vmem:[#allocation15 + $0xec] ss:$16 sps:$4 sm:$0xff]   ;;  %v13808_v61 = vld [vmem:[#allocation15 + $0xe0] ss:$16 sps:$4 sm:$0xff]   ;;  %v13811_v62 = vld [vmem:[#allocation15 + $0xe8] ss:$16 sps:$4 sm:$0xff]  }
 0x251   : > { %1516 = vmatpush1.bf16.msra.mxu0 %v13778_v41  ;;  %v13816_v63 = vld [vmem:[#allocation15 + $0x104] ss:$16 sps:$4 sm:$0xff]   ;;  %v13819_v0 = vld [vmem:[#allocation15 + $0x10c] ss:$16 sps:$4 sm:$0xff]   ;;  %v13814_v1 = vld [vmem:[#allocation15 + $0x100] ss:$16 sps:$4 sm:$0xff]  }
 0x252   : > { %995 = vmatpush1.bf16.msra.mxu1 %v13756_v14  ;;  %1517 = vmatprep.subr.bf16.mxu0 %v13786_v43  ;;  %v13817_v2 = vld [vmem:[#allocation15 + $0x108] ss:$16 sps:$4 sm:$0xff]   ;;  %v13822_v3 = vld [vmem:[#allocation15 + $0x124] ss:$16 sps:$4 sm:$0xff]   ;;  %v13825_v4 = vld [vmem:[#allocation15 + $0x12c] ss:$16 sps:$4 sm:$0xff]  }
 0x253   : > { %996 = vmatprep.subr.bf16.mxu1 %v13757_v15  ;;  %v13820_v5 = vld [vmem:[#allocation15 + $0x120] ss:$16 sps:$4 sm:$0xff]   ;;  %v13823_v6 = vld [vmem:[#allocation15 + $0x128] ss:$16 sps:$4 sm:$0xff]   ;;  %v13828_v7 = vld [vmem:[#allocation15 + $0x144] ss:$16 sps:$4 sm:$0xff]  }
 0x254   : > { %v13831_v8 = vld [vmem:[#allocation15 + $0x14c] ss:$16 sps:$4 sm:$0xff]   ;;  %v13826_v9 = vld [vmem:[#allocation15 + $0x140] ss:$16 sps:$4 sm:$0xff]   ;;  %v13829_v10 = vld [vmem:[#allocation15 + $0x148] ss:$16 sps:$4 sm:$0xff]  }
 0x255   : > { %1518 = vmatpush1.bf16.msra.mxu0 %v13784_v45  ;;  %v13834_v11 = vld [vmem:[#allocation15 + $0x164] ss:$16 sps:$4 sm:$0xff]   ;;  %v13837_v12 = vld [vmem:[#allocation15 + $0x16c] ss:$16 sps:$4 sm:$0xff]   ;;  %v13832_v13 = vld [vmem:[#allocation15 + $0x160] ss:$16 sps:$4 sm:$0xff]  }
 0x256   : > { %997 = vmatpush1.bf16.msra.mxu1 %v13759_v16  ;;  %1519 = vmatprep.subr.bf16.mxu0 %v13792_v47  ;;  %v13835_v14 = vld [vmem:[#allocation15 + $0x168] ss:$16 sps:$4 sm:$0xff]   ;;  %v13840_v15 = vld [vmem:[#allocation15 + $0x184] ss:$16 sps:$4 sm:$0xff]   ;;  %v13843_v16 = vld [vmem:[#allocation15 + $0x18c] ss:$16 sps:$4 sm:$0xff]  }
 0x257   : > { %998 = vmatprep.subr.bf16.mxu1 %v13760_v17  ;;  %v13838_v17 = vld [vmem:[#allocation15 + $0x180] ss:$16 sps:$4 sm:$0xff]   ;;  %v15130_v33 = vld [vmem:[#allocation21 + $0x8] sm:$0xff] }
 0x258   : > { %v13844_v21 = vld [vmem:[#allocation15 + $0x1a0] ss:$16 sps:$4 sm:$0xff]  }
 0x259   : > { %1520 = vmatpush1.bf16.msra.mxu0 %v13790_v49  ;;  %v15126_v31 = vld [vmem:[#allocation21] sm:$0xff] }
 0x25a   : > { %999 = vmatpush1.bf16.msra.mxu1 %v13762_v18  ;;  %1521 = vmatprep.subr.bf16.mxu0 %v13798_v51  ;;  %v13841_v18 = vld [vmem:[#allocation15 + $0x188] ss:$16 sps:$4 sm:$0xff]  }
 0x25b   : > { %1000 = vmatprep.subr.bf16.mxu1 %v13763_v19  ;;  %v13846_v19 = vld [vmem:[#allocation15 + $0x1a4] ss:$16 sps:$4 sm:$0xff]  }
 0x25d   : > { %1522 = vmatpush1.bf16.msra.mxu0 %v13796_v53 }
 0x25e   : > { %1001 = vmatpush1.bf16.msra.mxu1 %v13765_v20  ;;  %1523 = vmatprep.subr.bf16.mxu0 %v13804_v55  ;;  %v13849_v20 = vld [vmem:[#allocation15 + $0x1ac] ss:$16 sps:$4 sm:$0xff]  }
 0x25f   : > { %1552 = vmatprep.subr.bf16.mxu1 %v13771_v32  ;;  %v15128_v32 = vld [vmem:[#allocation21 + $0x20] sm:$0xff] }
 0x260   : > { %v12084_v35 = vcombine.high %v15126_v31, %v15128_v32 }
 0x261   : > { %1524 = vmatpush1.bf16.msra.mxu0 %v13802_v57 }
 0x262   : > { %1525 = vmatprep.subr.bf16.mxu0 %v13810_v59 }
 0x265   : > { %1526 = vmatpush1.bf16.msra.mxu0 %v13808_v61 }
 0x266   : > { %1527 = vmatprep.subr.bf16.mxu0 %v13816_v63 }
 0x269   : > { %1528 = vmatpush1.bf16.msra.mxu0 %v13814_v1 }
 0x26a   : > { %1529 = vmatprep.subr.bf16.mxu0 %v13822_v3 }
 0x26d   : > { %1530 = vmatpush1.bf16.msra.mxu0 %v13820_v5 }
 0x26e   : > { %1531 = vmatprep.subr.bf16.mxu0 %v13828_v7 }
 0x271   : > { %1532 = vmatpush1.bf16.msra.mxu0 %v13826_v9 }
 0x272   : > { %1533 = vmatprep.subr.bf16.mxu0 %v13834_v11 }
 0x275   : > { %1534 = vmatpush1.bf16.msra.mxu0 %v13832_v13 }
 0x276   : > { %1535 = vmatprep.subr.bf16.mxu0 %v13840_v15 }
 0x279   : > { %1536 = vmatpush1.bf16.msra.mxu0 %v13838_v17 }
 0x27a   : > { %1537 = vmatprep.subr.bf16.mxu0 %v13846_v19 }
 0x27d   : > { %1538 = vmatpush1.bf16.msra.mxu0 %v13844_v21 }
 0x31b   : > { %v869_v23 = vpop.f32.mrb[0].mxu0 }
 0x31c   : > { %v870_v24 = vadd.f32 %v11999_v22, %v869_v23  ;;  %v13384_v25 = vpop.f32.mrb[1].mxu0  ;;  %v13847_v22 = vld [vmem:[#allocation15 + $0x1a8] ss:$16 sps:$4 sm:$0xff]   ;;  %v13852_v23 = vld [vmem:[#allocation15 + $0x1c4] ss:$16 sps:$4 sm:$0xff]  }
 0x31d   : > { %v872_v26 = vpop.f32.mrb[2].mxu0  ;;  %v13850_v25 = vld [vmem:[#allocation15 + $0x1c0] ss:$16 sps:$4 sm:$0xff]   ;;  %1539 = vmatprep.subr.bf16.mxu0 %v13852_v23 }
 0x31e   : > { %v875_v27 = vmul.f32 0.2, %v870_v24  ;;  %v13385_v28 = vpop.f32.mrb[3].mxu0  ;;  %v13853_v26 = vld [vmem:[#allocation15 + $0x1c8] ss:$16 sps:$4 sm:$0xff]   ;;  %1540 = vmatpush1.bf16.msra.mxu0 %v13850_v25 }
 0x31f   : > { %v13856_v28 = vld [vmem:[#allocation15 + $0x1e0] ss:$16 sps:$4 sm:$0xff]  }
 0x320   : > { %v876_v29 = vmax.f32 %v870_v24, %v875_v27  ;;  %v13855_v24 = vld [vmem:[#allocation15 + $0x1cc] ss:$16 sps:$4 sm:$0xff]   ;;  %v13858_v27 = vld [vmem:[#allocation15 + $0x1e4] ss:$16 sps:$4 sm:$0xff]  }
 0x321   : > { %1541 = vmatprep.subr.bf16.mxu0 %v13858_v27 }
 0x322   : > { %v877_v30 = vpack.c.bf16 %v876_v29, %v876_v29  ;;  %v13859_v29 = vld [vmem:[#allocation15 + $0x1e8] ss:$16 sps:$4 sm:$0xff]   ;;  %1542 = vmatpush1.bf16.msra.mxu0 %v13856_v28 }
 0x323   : > { %3319 = vmatprep.subr.bf16.mxu0 %v12084_v35  ;;  %v1089_v35 = vld [vmem:[#allocation14] sm:$0x3] }
 0x324   : > { %1019 = vmatmul.mubr.bf16.vlgmr.msra.gmra.mrb[0].mxu1 %v877_v30  ;;  %v13861_v30 = vld [vmem:[#allocation15 + $0x1ec] ss:$16 sps:$4 sm:$0xff]  }
 0x325   : > { %1553 = vmatpush1.bf16.msra.mxu1 %v13769_v34  ;;  %v12083_v34 = vcombine.low %v15126_v31, %v15128_v32  ;;  %v1762_v32 = vld [vmem:[#allocation21 + $0xa8] sm:$0xff] }
 0x326   : > { %1554 = vmatprep.subr.bf16.mxu1 %v13777_v36  ;;  %v15136_v36 = vld [vmem:[#allocation21 + $0x28] sm:$0xff] }
 0x327   : > { %v12085_v37 = vcombine.low %v15130_v33, %v15136_v36 }
 0x329   : > { %1555 = vmatpush1.bf16.msra.mxu1 %v13775_v38  ;;  %v12086_v38 = vcombine.high %v15130_v33, %v15136_v36 }
 0x32a   : > { %1556 = vmatprep.subr.bf16.mxu1 %v13783_v40  ;;  %v15142_v40 = vshrl.u32 %v896_v39, 7 }
 0x32c   : > { %v15145_v41 = vsub.s32 0, %v15142_v40  ;;  %v15148_v43 = vsub.s32 1, %v15142_v40 }
 0x32d   : > { %1557 = vmatpush1.bf16.msra.mxu1 %v13781_v42  ;;  %v894_v42 = vld [vmem:[#allocation11] sm:$0x3] }
 0x32e   : > { %1558 = vmatprep.subr.bf16.mxu1 %v13789_v44  ;;  %v899_v44 = vrot.slane %v894_v42, %v15145_v41  ;;  %v903_v45 = vrot.slane %v894_v42, %v15148_v43 }
 0x331   : > { %1559 = vmatpush1.bf16.msra.mxu1 %v13787_v46 }
 0x332   : > { %1560 = vmatprep.subr.bf16.mxu1 %v13795_v48 }
 0x335   : > { %1561 = vmatpush1.bf16.msra.mxu1 %v13793_v50 }
 0x336   : > { %1562 = vmatprep.subr.bf16.mxu1 %v13801_v52 }
 0x339   : > { %1563 = vmatpush1.bf16.msra.mxu1 %v13799_v54 }
 0x33a   : > { %1564 = vmatprep.subr.bf16.mxu1 %v13807_v56 }
 0x33d   : > { %1565 = vmatpush1.bf16.msra.mxu1 %v13805_v58 }
 0x33e   : > { %1566 = vmatprep.subr.bf16.mxu1 %v13813_v60 }
 0x341   : > { %1567 = vmatpush1.bf16.msra.mxu1 %v13811_v62 }
 0x342   : > { %1568 = vmatprep.subr.bf16.mxu1 %v13819_v0 }
 0x345   : > { %1569 = vmatpush1.bf16.msra.mxu1 %v13817_v2 }
 0x346   : > { %1570 = vmatprep.subr.bf16.mxu1 %v13825_v4 }
 0x349   : > { %1571 = vmatpush1.bf16.msra.mxu1 %v13823_v6 }
 0x34a   : > { %1572 = vmatprep.subr.bf16.mxu1 %v13831_v8 }
 0x34d   : > { %1573 = vmatpush1.bf16.msra.mxu1 %v13829_v10 }
 0x34e   : > { %1574 = vmatprep.subr.bf16.mxu1 %v13837_v12 }
 0x351   : > { %1575 = vmatpush1.bf16.msra.mxu1 %v13835_v14 }
 0x352   : > { %1576 = vmatprep.subr.bf16.mxu1 %v13843_v16 }
 0x355   : > { %1577 = vmatpush1.bf16.msra.mxu1 %v13841_v18 }
 0x356   : > { %1578 = vmatprep.subr.bf16.mxu1 %v13849_v20 }
 0x359   : > { %1579 = vmatpush1.bf16.msra.mxu1 %v13847_v22 }
 0x35a   : > { %1580 = vmatprep.subr.bf16.mxu1 %v13855_v24 }
 0x35d   : > { %1581 = vmatpush1.bf16.msra.mxu1 %v13853_v26 }
 0x35e   : > { %1582 = vmatprep.subr.bf16.mxu1 %v13861_v30  ;;  %v1075_v30 = vld [vmem:[#allocation12] sm:$0x3] }
 0x35f   : > { %v1084_v42 = vrot.slane %v1075_v30, %v15148_v43 }
 0x361   : > { %1583 = vmatpush1.bf16.msra.mxu1 %v13859_v29 }
 0x362   : > { %3401 = vmatprep.subr.bf16.mxu1 %v12086_v38  ;;  %v1080_v38 = vrot.slane %v1075_v30, %v15145_v41 }
 0x3f7   : > { %v1020_v46 = vpop.f32.mrb[0].mxu1 }
 0x3f8   : > { %v1021_v47 = vadd.f32 %v1020_v46, %v899_v44  ;;  %v1022_v48 = vpop.f32.mrb[1].mxu1  ;;  %v1094_v46 = vrot.slane %v1089_v35, %v15145_v41 }
 0x3f9   : > { %v1023_v49 = vadd.f32 %v1022_v48, %v903_v45  ;;  %v1024_v50 = vpop.f32.mrb[2].mxu1  ;;  %v1098_v48 = vrot.slane %v1089_v35, %v15148_v43 }
 0x3fa   : > { %v1027_v51 = vmul.f32 0.2, %v1021_v47  ;;  %v1025_v52 = vpop.f32.mrb[3].mxu1 }
 0x3fb   : > { %v1028_v53 = vmul.f32 0.2, %v1023_v49 }
 0x3fc   : > { %v1029_v54 = vmax.f32 %v1021_v47, %v1027_v51 }
 0x3fd   : > { %v1030_v55 = vmax.f32 %v1023_v49, %v1028_v53 }
 0x3fe   : > { %v1032_v56 = vsel %vm1031_vm2, %v1029_v54, 0.0 }
 0x3ff   : > { %v1033_v57 = vrot.slane %v1032_v56, 4  ;;  %v1039_v58 = vsel %vm1031_vm2, %v1030_v55, 0.0 }
 0x400   : > { %v1040_v59 = vrot.slane %v1039_v58, 4 }
 0x401   : > { %v1034_v60 = vadd.f32 %v1033_v57, %v1032_v56  ;;  %v1753_v56 = vld [vmem:[#allocation21 + $0x60] sm:$0xff]  ;;  %v1750_v57 = vld [vmem:[#allocation21 + $0x48] sm:$0xff] }
 0x402   : > { %v1041_v61 = vadd.f32 %v1040_v59, %v1039_v58  ;;  %v1754_v59 = vld [vmem:[#allocation21 + $0x68] sm:$0xff] }
 0x403   : > { %v1035_v62 = vrot.slane %v1034_v60, 2 }
 0x404   : > { %v1042_v63 = vrot.slane %v1041_v61, 2 }
 0x405   : > { %v1036_v0 = vadd.f32 %v1035_v62, %v1034_v60  ;;  %v12094_v62 = vcombine.high %v1750_v57, %v1754_v59 }
 0x406   : > { %v1043_v1 = vadd.f32 %v1042_v63, %v1041_v61  ;;  %v12093_v61 = vcombine.low %v1750_v57, %v1754_v59  ;;  %v1757_v63 = vld [vmem:[#allocation21 + $0x80] sm:$0xff] }
 0x407   : > { %v1037_v2 = vrot.slane %v1036_v0, 1  ;;  %v1817_v59 = vld [vmem:[#allocation21 + $0x260] sm:$0xff] }
 0x408   : > { %v1044_v3 = vrot.slane %v1043_v1, 1 }
 0x409   : > { %v1038_v4 = vadd.f32 %v1037_v2, %v1036_v0  ;;  %v1761_v0 = vld [vmem:[#allocation21 + $0xa0] sm:$0xff] }
 0x40a   : > { %v1045_v5 = vadd.f32 %v1044_v3, %v1043_v1  ;;  %v1758_v1 = vld [vmem:[#allocation21 + $0x88] sm:$0xff]  ;;  %v12100_v31 = vcombine.high %v1757_v63, %v1761_v0  ;;  %v1769_v2 = vld [vmem:[#allocation21 + $0xe0] sm:$0xff] }
 0x40b   : > { %v1047_v6 = vmul.f32 0.5, %v1038_v4  ;;  %v12101_v33 = vcombine.low %v1758_v1, %v1762_v32  ;;  %v12102_v36 = vcombine.high %v1758_v1, %v1762_v32  ;;  %v1766_v3 = vld [vmem:[#allocation21 + $0xc8] sm:$0xff]  ;;  %v1825_v32 = vld [vmem:[#allocation21 + $0x2a0] sm:$0xff] }
 0x40c   : > { %v1048_v7 = vmul.f32 0.5, %v1045_v5  ;;  %v1770_v5 = vld [vmem:[#allocation21 + $0xe8] sm:$0xff] }
 0x40d   : > { %v1049_v8 = vsub.f32 %v1029_v54, %v1047_v6 }
 0x40e   : > { %v1050_v9 = vsub.f32 %v1030_v55, %v1048_v7  ;;  %v1749_v55 = vld [vmem:[#allocation21 + $0x40] sm:$0xff]  ;;  %v12109_v7 = vcombine.low %v1766_v3, %v1770_v5 }
 0x40f   : > { %v1051_v10 = vmul.f32 %v1049_v8, %v1049_v8  ;;  %v12092_v58 = vcombine.high %v1749_v55, %v1753_v56  ;;  %v12091_v60 = vcombine.low %v1749_v55, %v1753_v56 }
 0x410   : > { %v1052_v11 = vmul.f32 %v1050_v9, %v1050_v9 }
 0x411   : > { %v1053_v12 = vsel %vm1031_vm2, %v1051_v10, 0.0  ;;  %v1777_v10 = vld [vmem:[#allocation21 + $0x120] sm:$0xff] }
 0x412   : > { %v1054_v13 = vrot.slane %v1053_v12, 4  ;;  %v1060_v14 = vsel %vm1031_vm2, %v1052_v11, 0.0  ;;  %v1774_v11 = vld [vmem:[#allocation21 + $0x108] sm:$0xff] }
 0x413   : > { %v1061_v15 = vrot.slane %v1060_v14, 4 }
 0x414   : > { %v1055_v16 = vadd.f32 %v1054_v13, %v1053_v12  ;;  %v1778_v13 = vld [vmem:[#allocation21 + $0x128] sm:$0xff] }
 0x415   : > { %v1062_v17 = vadd.f32 %v1061_v15, %v1060_v14  ;;  %v12117_v15 = vcombine.low %v1774_v11, %v1778_v13 }
 0x416   : > { %v1056_v18 = vrot.slane %v1055_v16, 2 }
 0x417   : > { %v1063_v19 = vrot.slane %v1062_v17, 2 }
 0x418   : > { %v1057_v20 = vadd.f32 %v1056_v18, %v1055_v16  ;;  %v12118_v16 = vcombine.high %v1774_v11, %v1778_v13  ;;  %v1785_v18 = vld [vmem:[#allocation21 + $0x160] sm:$0xff] }
 0x419   : > { %v1064_v21 = vadd.f32 %v1063_v19, %v1062_v17  ;;  %v1781_v17 = vld [vmem:[#allocation21 + $0x140] sm:$0xff]  ;;  %v1782_v19 = vld [vmem:[#allocation21 + $0x148] sm:$0xff] }
 0x41a   : > { %v1058_v22 = vrot.slane %v1057_v20, 1  ;;  %v1841_v13 = vld [vmem:[#allocation21 + $0x320] sm:$0xff] }
 0x41b   : > { %v1065_v23 = vrot.slane %v1064_v21, 1 }
 0x41c   : > { %v1059_v24 = vadd.f32 %v1058_v22, %v1057_v20  ;;  %v12124_v20 = vcombine.high %v1781_v17, %v1785_v18  ;;  %v12123_v22 = vcombine.low %v1781_v17, %v1785_v18 }
 0x41d   : > { %v1066_v25 = vadd.f32 %v1065_v23, %v1064_v21  ;;  %v1786_v21 = vld [vmem:[#allocation21 + $0x168] sm:$0xff] }
 0x41e   : > { %v1067_v26 = vmul.f32 0.5, %v1059_v24  ;;  %v12125_v23 = vcombine.low %v1782_v19, %v1786_v21  ;;  %v12126_v24 = vcombine.high %v1782_v19, %v1786_v21  ;;  %v1849_v21 = vld [vmem:[#allocation21 + $0x360] sm:$0xff] }
 0x41f   : > { %v1068_v27 = vmul.f32 0.5, %v1066_v25  ;;  %v1789_v25 = vld [vmem:[#allocation21 + $0x180] sm:$0xff] }
 0x420   : > { %v1069_v28 = vadd.f32 0.8, %v1067_v26  ;;  %v1793_v26 = vld [vmem:[#allocation21 + $0x1a0] sm:$0xff] }
 0x421   : > { %v1070_v29 = vadd.f32 0.8, %v1068_v27  ;;  %v1790_v27 = vld [vmem:[#allocation21 + $0x188] sm:$0xff]  ;;  %v12131_v30 = vcombine.low %v1789_v25, %v1793_v26 }
 0x422   : > { %13862 = vrsqrt.f32 %v1069_v28  ;;  %v12132_v28 = vcombine.high %v1789_v25, %v1793_v26 }
 0x423   : > { %13864 = vrsqrt.f32 %v1070_v29  ;;  %v1794_v29 = vld [vmem:[#allocation21 + $0x1a8] sm:$0xff] }
 0x424   : > { %v12133_v35 = vcombine.low %v1790_v27, %v1794_v29 }
 0x42c   : > { %v13863_v39 = vpop.eup %13862 }
 0x42d   : > { %v13865_v44 = vpop.eup %13864  ;;  %v1073_v45 = vmul.f32 %v13863_v39, %v1049_v8  ;;  %v12110_v8 = vcombine.high %v1766_v3, %v1770_v5  ;;  %v1797_v39 = vld [vmem:[#allocation21 + $0x1c0] sm:$0xff] }
 0x42e   : > { %v1074_v47 = vmul.f32 %v13865_v44, %v1050_v9  ;;  %v1773_v9 = vld [vmem:[#allocation21 + $0x100] sm:$0xff]  ;;  %v1798_v44 = vld [vmem:[#allocation21 + $0x1c8] sm:$0xff] }
 0x42f   : > { %v1087_v49 = vmul.f32 %v1080_v38, %v1073_v45  ;;  %v12116_v12 = vcombine.high %v1773_v9, %v1777_v10  ;;  %v12115_v14 = vcombine.low %v1773_v9, %v1777_v10  ;;  %v12134_v38 = vcombine.high %v1790_v27, %v1794_v29  ;;  %v1833_v5 = vld [vmem:[#allocation21 + $0x2e0] sm:$0xff] }
 0x430   : > { %v1088_v50 = vmul.f32 %v1084_v42, %v1074_v47  ;;  %v1801_v42 = vld [vmem:[#allocation21 + $0x1e0] sm:$0xff] }
 0x431   : > { %v1101_v51 = vadd.f32 %v1094_v46, %v1087_v49  ;;  %v12140_v45 = vcombine.high %v1797_v39, %v1801_v42  ;;  %v1802_v46 = vld [vmem:[#allocation21 + $0x1e8] sm:$0xff]  ;;  %v12139_v47 = vcombine.low %v1797_v39, %v1801_v42  ;;  %v1857_v29 = vld [vmem:[#allocation21 + $0x3a0] sm:$0xff] }
 0x432   : > { %v1102_v52 = vadd.f32 %v1098_v48, %v1088_v50  ;;  %v12141_v48 = vcombine.low %v1798_v44, %v1802_v46  ;;  %v12142_v49 = vcombine.high %v1798_v44, %v1802_v46  ;;  %v1805_v50 = vld [vmem:[#allocation21 + $0x200] sm:$0xff] }
 0x433   : > { %v1103_v54 = vpack.c.bf16 %v1101_v51, %v1101_v51  ;;  %v1809_v51 = vld [vmem:[#allocation21 + $0x220] sm:$0xff] }
 0x434   : > { %v1104_v53 = vpack.c.bf16 %v1102_v52, %v1102_v52  ;;  %v1806_v52 = vld [vmem:[#allocation21 + $0x208] sm:$0xff]  ;;  %v12147_v55 = vcombine.low %v1805_v50, %v1809_v51  ;;  %v1865_v46 = vld [vmem:[#allocation21 + $0x3e0] sm:$0xff] }
 0x436   : > { %1543 = vmatprep.mubr.bf16.mxu0 %v1104_v53  ;;  %1584 = vmatprep.mubr.bf16.mxu1 %v1104_v53  ;;  %v12148_v53 = vcombine.high %v1805_v50, %v1809_v51  ;;  %v1866_v50 = vld [vmem:[#allocation21 + $0x3e8] sm:$0xff] }
 0x437   : > { %1544 = vmatmul.mubr.bf16.vlgmr.msra.gmra.mrb[4].mxu0 %v1103_v54  ;;  %1585 = vmatmul.mubr.bf16.vlgmr.msra.gmra.mrb[4].mxu1 %v1103_v54  ;;  %v1810_v54 = vld [vmem:[#allocation21 + $0x228] sm:$0xff] }
 0x438   : > { %3320 = vmatpush1.bf16.msra.mxu0 %v12083_v34  ;;  %3402 = vmatpush1.bf16.msra.mxu1 %v12085_v37  ;;  %v12099_v34 = vcombine.low %v1757_v63, %v1761_v0  ;;  %v1765_v37 = vld [vmem:[#allocation21 + $0xc0] sm:$0xff]  ;;  %v12149_v56 = vcombine.low %v1806_v52, %v1810_v54  ;;  %v12150_v57 = vcombine.high %v1806_v52, %v1810_v54 }
 0x439   : > { %3321 = vmatprep.subr.bf16.mxu0 %v12092_v58  ;;  %3403 = vmatprep.subr.bf16.mxu1 %v12094_v62  ;;  %v12108_v4 = vcombine.high %v1765_v37, %v1769_v2  ;;  %v12107_v6 = vcombine.low %v1765_v37, %v1769_v2  ;;  %v1813_v58 = vld [vmem:[#allocation21 + $0x240] sm:$0xff]  ;;  %v1818_v62 = vld [vmem:[#allocation21 + $0x268] sm:$0xff] }
 0x43a   : > { %v12155_v63 = vcombine.low %v1813_v58, %v1817_v59  ;;  %v15168_v54 = vld [vmem:[#allocation21 + $0x420] sm:$0xff] }
 0x43c   : > { %3322 = vmatpush1.bf16.msra.mxu0 %v12091_v60  ;;  %3404 = vmatpush1.bf16.msra.mxu1 %v12093_v61  ;;  %v1814_v60 = vld [vmem:[#allocation21 + $0x248] sm:$0xff]  ;;  %v12156_v61 = vcombine.high %v1813_v58, %v1817_v59 }
 0x43d   : > { %3323 = vmatprep.subr.bf16.mxu0 %v12100_v31  ;;  %3405 = vmatprep.subr.bf16.mxu1 %v12102_v36  ;;  %v12157_v0 = vcombine.low %v1814_v60, %v1818_v62  ;;  %v12158_v1 = vcombine.high %v1814_v60, %v1818_v62  ;;  %v1821_v31 = vld [vmem:[#allocation21 + $0x280] sm:$0xff]  ;;  %v1826_v36 = vld [vmem:[#allocation21 + $0x2a8] sm:$0xff]  ;;  %v1169_v62 = vld [vmem:[#allocation17] sm:$0xf] }
 0x43e   : > { %v12163_v37 = vcombine.low %v1821_v31, %v1825_v32 }
 0x440   : > { %3324 = vmatpush1.bf16.msra.mxu0 %v12099_v34  ;;  %3406 = vmatpush1.bf16.msra.mxu1 %v12101_v33  ;;  %v1822_v34 = vld [vmem:[#allocation21 + $0x288] sm:$0xff]  ;;  %v12164_v33 = vcombine.high %v1821_v31, %v1825_v32  ;;  %v1178_v31 = vrot.slane %v1169_v62, %v15148_v43 }
 0x441   : > { %3325 = vmatprep.subr.bf16.mxu0 %v12108_v4  ;;  %3407 = vmatprep.subr.bf16.mxu1 %v12110_v8  ;;  %v12165_v2 = vcombine.low %v1822_v34, %v1826_v36  ;;  %v12166_v3 = vcombine.high %v1822_v34, %v1826_v36  ;;  %v1829_v4 = vld [vmem:[#allocation21 + $0x2c0] sm:$0xff]  ;;  %v1834_v8 = vld [vmem:[#allocation21 + $0x2e8] sm:$0xff] }
 0x442   : > { %v12171_v9 = vcombine.low %v1829_v4, %v1833_v5 }
 0x444   : > { %3326 = vmatpush1.bf16.msra.mxu0 %v12107_v6  ;;  %3408 = vmatpush1.bf16.msra.mxu1 %v12109_v7  ;;  %v1830_v6 = vld [vmem:[#allocation21 + $0x2c8] sm:$0xff]  ;;  %v12172_v7 = vcombine.high %v1829_v4, %v1833_v5 }
 0x445   : > { %3327 = vmatprep.subr.bf16.mxu0 %v12116_v12  ;;  %3409 = vmatprep.subr.bf16.mxu1 %v12118_v16  ;;  %v12173_v10 = vcombine.low %v1830_v6, %v1834_v8  ;;  %v12174_v11 = vcombine.high %v1830_v6, %v1834_v8  ;;  %v1837_v12 = vld [vmem:[#allocation21 + $0x300] sm:$0xff]  ;;  %v1842_v16 = vld [vmem:[#allocation21 + $0x328] sm:$0xff] }
 0x446   : > { %v12179_v17 = vcombine.low %v1837_v12, %v1841_v13 }
 0x448   : > { %3328 = vmatpush1.bf16.msra.mxu0 %v12115_v14  ;;  %3410 = vmatpush1.bf16.msra.mxu1 %v12117_v15  ;;  %v1838_v14 = vld [vmem:[#allocation21 + $0x308] sm:$0xff]  ;;  %v12180_v15 = vcombine.high %v1837_v12, %v1841_v13 }
 0x449   : > { %3329 = vmatprep.subr.bf16.mxu0 %v12124_v20  ;;  %3411 = vmatprep.subr.bf16.mxu1 %v12126_v24  ;;  %v12181_v18 = vcombine.low %v1838_v14, %v1842_v16  ;;  %v12182_v19 = vcombine.high %v1838_v14, %v1842_v16  ;;  %v1845_v20 = vld [vmem:[#allocation21 + $0x340] sm:$0xff]  ;;  %v1850_v24 = vld [vmem:[#allocation21 + $0x368] sm:$0xff] }
 0x44a   : > { %v12187_v25 = vcombine.low %v1845_v20, %v1849_v21 }
 0x44c   : > { %3330 = vmatpush1.bf16.msra.mxu0 %v12123_v22  ;;  %3412 = vmatpush1.bf16.msra.mxu1 %v12125_v23  ;;  %v1846_v22 = vld [vmem:[#allocation21 + $0x348] sm:$0xff]  ;;  %v12188_v23 = vcombine.high %v1845_v20, %v1849_v21 }
 0x44d   : > { %3331 = vmatprep.subr.bf16.mxu0 %v12132_v28  ;;  %3413 = vmatprep.subr.bf16.mxu1 %v12134_v38  ;;  %v12189_v26 = vcombine.low %v1846_v22, %v1850_v24  ;;  %v12190_v27 = vcombine.high %v1846_v22, %v1850_v24  ;;  %v1853_v28 = vld [vmem:[#allocation21 + $0x380] sm:$0xff]  ;;  %v1858_v38 = vld [vmem:[#allocation21 + $0x3a8] sm:$0xff] }
 0x44e   : > { %v12195_v39 = vcombine.low %v1853_v28, %v1857_v29 }
 0x450   : > { %3332 = vmatpush1.bf16.msra.mxu0 %v12131_v30  ;;  %3414 = vmatpush1.bf16.msra.mxu1 %v12133_v35  ;;  %v1854_v30 = vld [vmem:[#allocation21 + $0x388] sm:$0xff]  ;;  %v12196_v35 = vcombine.high %v1853_v28, %v1857_v29 }
 0x451   : > { %3333 = vmatprep.subr.bf16.mxu0 %v12140_v45  ;;  %3415 = vmatprep.subr.bf16.mxu1 %v12142_v49  ;;  %v12197_v42 = vcombine.low %v1854_v30, %v1858_v38  ;;  %v12198_v44 = vcombine.high %v1854_v30, %v1858_v38  ;;  %v1861_v45 = vld [vmem:[#allocation21 + $0x3c0] sm:$0xff] }
 0x452   : > { %v12204_v49 = vcombine.high %v1861_v45, %v1865_v46 }
 0x454   : > { %3334 = vmatpush1.bf16.msra.mxu0 %v12139_v47  ;;  %3416 = vmatpush1.bf16.msra.mxu1 %v12141_v48  ;;  %v1862_v47 = vld [vmem:[#allocation21 + $0x3c8] sm:$0xff]  ;;  %v12203_v48 = vcombine.low %v1861_v45, %v1865_v46 }
 0x455   : > { %3335 = vmatprep.subr.bf16.mxu0 %v12148_v53  ;;  %3417 = vmatprep.subr.bf16.mxu1 %v12150_v57  ;;  %v12205_v51 = vcombine.low %v1862_v47, %v1866_v50  ;;  %v12206_v52 = vcombine.high %v1862_v47, %v1866_v50  ;;  %v15166_v53 = vld [vmem:[#allocation21 + $0x400] sm:$0xff]  ;;  %v15174_v57 = vld [vmem:[#allocation21 + $0x428] sm:$0xff] }
 0x456   : > { %v12211_v58 = vcombine.low %v15166_v53, %v15168_v54 }
 0x458   : > { %3336 = vmatpush1.bf16.msra.mxu0 %v12147_v55  ;;  %3418 = vmatpush1.bf16.msra.mxu1 %v12149_v56  ;;  %v15170_v55 = vld [vmem:[#allocation21 + $0x408] sm:$0xff]  ;;  %v12212_v56 = vcombine.high %v15166_v53, %v15168_v54 }
 0x459   : > { %3337 = vmatprep.subr.bf16.mxu0 %v12156_v61  ;;  %3419 = vmatprep.subr.bf16.mxu1 %v12158_v1  ;;  %v12213_v59 = vcombine.low %v15170_v55, %v15174_v57  ;;  %v12214_v60 = vcombine.high %v15170_v55, %v15174_v57  ;;  %v15183_v61 = vsub.s32 2, %v15142_v40 }
 0x45b   : > { %v1182_v1 = vrot.slane %v1169_v62, %v15183_v61 }
 0x45c   : > { %3338 = vmatpush1.bf16.msra.mxu0 %v12155_v63  ;;  %3420 = vmatpush1.bf16.msra.mxu1 %v12157_v0  ;;  %v15186_v63 = vsub.s32 3, %v15142_v40  ;;  %v1174_v0 = vrot.slane %v1169_v62, %v15145_v41 }
 0x45d   : > { %3339 = vmatprep.subr.bf16.mxu0 %v12164_v33  ;;  %3421 = vmatprep.subr.bf16.mxu1 %v12166_v3 }
 0x45e   : > { %v1186_v32 = vrot.slane %v1169_v62, %v15186_v63 }
 0x460   : > { %3340 = vmatpush1.bf16.msra.mxu0 %v12163_v37  ;;  %3422 = vmatpush1.bf16.msra.mxu1 %v12165_v2 }
 0x461   : > { %3341 = vmatprep.subr.bf16.mxu0 %v12172_v7  ;;  %3423 = vmatprep.subr.bf16.mxu1 %v12174_v11 }
 0x464   : > { %3342 = vmatpush1.bf16.msra.mxu0 %v12171_v9  ;;  %3424 = vmatpush1.bf16.msra.mxu1 %v12173_v10 }
 0x465   : > { %3343 = vmatprep.subr.bf16.mxu0 %v12180_v15  ;;  %3425 = vmatprep.subr.bf16.mxu1 %v12182_v19 }
 0x468   : > { %3344 = vmatpush1.bf16.msra.mxu0 %v12179_v17  ;;  %3426 = vmatpush1.bf16.msra.mxu1 %v12181_v18 }
 0x469   : > { %3345 = vmatprep.subr.bf16.mxu0 %v12188_v23  ;;  %3427 = vmatprep.subr.bf16.mxu1 %v12190_v27 }
 0x46c   : > { %3346 = vmatpush1.bf16.msra.mxu0 %v12187_v25  ;;  %3428 = vmatpush1.bf16.msra.mxu1 %v12189_v26 }
 0x46d   : > { %3347 = vmatprep.subr.bf16.mxu0 %v12196_v35  ;;  %3429 = vmatprep.subr.bf16.mxu1 %v12198_v44 }
 0x470   : > { %3348 = vmatpush1.bf16.msra.mxu0 %v12195_v39  ;;  %3430 = vmatpush1.bf16.msra.mxu1 %v12197_v42 }
 0x471   : > { %3349 = vmatprep.subr.bf16.mxu0 %v12204_v49  ;;  %3431 = vmatprep.subr.bf16.mxu1 %v12206_v52 }
 0x474   : > { %3350 = vmatpush1.bf16.msra.mxu0 %v12203_v48  ;;  %3432 = vmatpush1.bf16.msra.mxu1 %v12205_v51 }
 0x475   : > { %3360 = vmatprep.subr.bf16.mxu0 %v12212_v56  ;;  %3442 = vmatprep.subr.bf16.mxu1 %v12214_v60 }
 0x50a   : > { %v1545_v34 = vpop.f32.mrb[4].mxu0  ;;  %v1586_v33 = vpop.f32.mrb[4].mxu1 }
 0x50b   : > { %v1546_v36 = vadd.f32 %v1545_v34, %v1174_v0  ;;  %v1587_v37 = vadd.f32 %v1586_v33, %v1182_v1  ;;  %v1547_v2 = vpop.f32.mrb[5].mxu0  ;;  %v1588_v3 = vpop.f32.mrb[5].mxu1 }
 0x50c   : > { %v1548_v4 = vadd.f32 %v1547_v2, %v1178_v31  ;;  %v1589_v5 = vadd.f32 %v1588_v3, %v1186_v32  ;;  %v1549_v6 = vpop.f32.mrb[6].mxu0  ;;  %v1590_v7 = vpop.f32.mrb[6].mxu1 }
 0x50d   : > { %v1593_v8 = vmul.f32 0.2, %v1546_v36  ;;  %v1595_v9 = vmul.f32 0.2, %v1587_v37  ;;  %v1550_v10 = vpop.f32.mrb[7].mxu0  ;;  %v1591_v11 = vpop.f32.mrb[7].mxu1 }
 0x50e   : > { %v1594_v12 = vmul.f32 0.2, %v1548_v4  ;;  %v1596_v13 = vmul.f32 0.2, %v1589_v5 }
 0x50f   : > { %v1597_v14 = vmax.f32 %v1546_v36, %v1593_v8  ;;  %v1599_v15 = vmax.f32 %v1587_v37, %v1595_v9 }
 0x510   : > { %v1598_v16 = vmax.f32 %v1548_v4, %v1594_v12  ;;  %v1600_v17 = vmax.f32 %v1589_v5, %v1596_v13 }
 0x511   : > { %v1601_v18 = vsel %vm1031_vm2, %v1597_v14, 0.0  ;;  %v1615_v19 = vsel %vm1031_vm2, %v1599_v15, 0.0 }
 0x512   : > { %v1602_v20 = vrot.slane %v1601_v18, 4  ;;  %v1616_v21 = vrot.slane %v1615_v19, 4  ;;  %v1608_v22 = vsel %vm1031_vm2, %v1598_v16, 0.0  ;;  %v1622_v23 = vsel %vm1031_vm2, %v1600_v17, 0.0 }
 0x513   : > { %v1609_v24 = vrot.slane %v1608_v22, 4  ;;  %v1623_v25 = vrot.slane %v1622_v23, 4 }
 0x514   : > { %v1603_v26 = vadd.f32 %v1602_v20, %v1601_v18  ;;  %v1617_v27 = vadd.f32 %v1616_v21, %v1615_v19 }
 0x515   : > { %v1610_v28 = vadd.f32 %v1609_v24, %v1608_v22  ;;  %v1624_v29 = vadd.f32 %v1623_v25, %v1622_v23 }
 0x516   : > { %v1604_v30 = vrot.slane %v1603_v26, 2  ;;  %v1618_v35 = vrot.slane %v1617_v27, 2 }
 0x517   : > { %v1611_v38 = vrot.slane %v1610_v28, 2  ;;  %v1625_v39 = vrot.slane %v1624_v29, 2 }
 0x518   : > { %v1605_v42 = vadd.f32 %v1604_v30, %v1603_v26  ;;  %v1619_v44 = vadd.f32 %v1618_v35, %v1617_v27 }
 0x519   : > { %v1612_v45 = vadd.f32 %v1611_v38, %v1610_v28  ;;  %v1626_v46 = vadd.f32 %v1625_v39, %v1624_v29 }
 0x51a   : > { %v1606_v47 = vrot.slane %v1605_v42, 1  ;;  %v1620_v48 = vrot.slane %v1619_v44, 1 }
 0x51b   : > { %v1613_v49 = vrot.slane %v1612_v45, 1  ;;  %v1627_v50 = vrot.slane %v1626_v46, 1 }
 0x51c   : > { %v1607_v51 = vadd.f32 %v1606_v47, %v1605_v42  ;;  %v1621_v52 = vadd.f32 %v1620_v48, %v1619_v44 }
 0x51d   : > { %v1614_v56 = vadd.f32 %v1613_v49, %v1612_v45  ;;  %v1628_v60 = vadd.f32 %v1627_v50, %v1626_v46  ;;  %v1685_v50 = vld [vmem:[#allocation18] sm:$0xf] }
 0x51e   : > { %v1629_v62 = vmul.f32 0.5, %v1607_v51  ;;  %v1631_v0 = vmul.f32 0.5, %v1621_v52  ;;  %v1690_v51 = vrot.slane %v1685_v50, %v15145_v41  ;;  %v1711_v52 = vld [vmem:[#allocation20] sm:$0xf] }
 0x51f   : > { %v1630_v1 = vmul.f32 0.5, %v1614_v56  ;;  %v1632_v31 = vmul.f32 0.5, %v1628_v60  ;;  %v1698_v60 = vrot.slane %v1685_v50, %v15183_v61 }
 0x520   : > { %v1633_v32 = vsub.f32 %v1597_v14, %v1629_v62  ;;  %v1635_v34 = vsub.f32 %v1599_v15, %v1631_v0 }
 0x521   : > { %v1634_v33 = vsub.f32 %v1598_v16, %v1630_v1  ;;  %v15196_v36 = vsub.f32 %v1600_v17, %v1632_v31  ;;  %v1694_v1 = vrot.slane %v1685_v50, %v15148_v43 }
 0x522   : > { %v1637_v37 = vmul.f32 %v1633_v32, %v1633_v32  ;;  %v1639_v2 = vmul.f32 %v1635_v34, %v1635_v34 }
 0x523   : > { %v1638_v3 = vmul.f32 %v1634_v33, %v1634_v33  ;;  %v1640_v4 = vmul.f32 %v15196_v36, %v15196_v36 }
 0x524   : > { %v1641_v5 = vsel %vm1031_vm2, %v1637_v37, 0.0  ;;  %v1655_v6 = vsel %vm1031_vm2, %v1639_v2, 0.0  ;;  %v1702_v2 = vrot.slane %v1685_v50, %v15186_v63  ;;  %v1909_v50 = vld [vmem:[#allocation21 + $0x540] sm:$0xff] }
 0x525   : > { %v1642_v7 = vrot.slane %v1641_v5, 4  ;;  %v1656_v8 = vrot.slane %v1655_v6, 4  ;;  %v1648_v9 = vsel %vm1031_vm2, %v1638_v3, 0.0  ;;  %v1662_v10 = vsel %vm1031_vm2, %v1640_v4, 0.0 }
 0x526   : > { %v1649_v11 = vrot.slane %v1648_v9, 4  ;;  %v1663_v12 = vrot.slane %v1662_v10, 4  ;;  %v1716_v3 = vrot.slane %v1711_v52, %v15145_v41  ;;  %v1724_v4 = vrot.slane %v1711_v52, %v15183_v61 }
 0x527   : > { %v1643_v13 = vadd.f32 %v1642_v7, %v1641_v5  ;;  %v1657_v14 = vadd.f32 %v1656_v8, %v1655_v6  ;;  %v1720_v8 = vrot.slane %v1711_v52, %v15148_v43 }
 0x528   : > { %v1650_v15 = vadd.f32 %v1649_v11, %v1648_v9  ;;  %v1664_v16 = vadd.f32 %v1663_v12, %v1662_v10 }
 0x529   : > { %v1644_v17 = vrot.slane %v1643_v13, 2  ;;  %v1658_v18 = vrot.slane %v1657_v14, 2 }
 0x52a   : > { %v1651_v19 = vrot.slane %v1650_v15, 2  ;;  %v1665_v20 = vrot.slane %v1664_v16, 2 }
 0x52b   : > { %v1645_v21 = vadd.f32 %v1644_v17, %v1643_v13  ;;  %v1659_v22 = vadd.f32 %v1658_v18, %v1657_v14  ;;  %v1881_v17 = vld [vmem:[#allocation21 + $0x460] sm:$0xff]  ;;  %v1878_v18 = vld [vmem:[#allocation21 + $0x448] sm:$0xff] }
 0x52c   : > { %v1652_v23 = vadd.f32 %v1651_v19, %v1650_v15  ;;  %v1666_v24 = vadd.f32 %v1665_v20, %v1664_v16  ;;  %v1877_v15 = vld [vmem:[#allocation21 + $0x440] sm:$0xff]  ;;  %v1882_v19 = vld [vmem:[#allocation21 + $0x468] sm:$0xff] }
 0x52d   : > { %v1646_v25 = vrot.slane %v1645_v21, 1  ;;  %v1660_v26 = vrot.slane %v1659_v22, 1 }
 0x52e   : > { %v1653_v27 = vrot.slane %v1652_v23, 1  ;;  %v1667_v28 = vrot.slane %v1666_v24, 1 }
 0x52f   : > { %v1647_v29 = vadd.f32 %v1646_v25, %v1645_v21  ;;  %v1661_v30 = vadd.f32 %v1660_v26, %v1659_v22  ;;  %v1885_v21 = vld [vmem:[#allocation21 + $0x480] sm:$0xff]  ;;  %v12222_v22 = vcombine.high %v1878_v18, %v1882_v19  ;;  %v1890_v25 = vld [vmem:[#allocation21 + $0x4a8] sm:$0xff] }
 0x530   : > { %v1654_v35 = vadd.f32 %v1653_v27, %v1652_v23  ;;  %v1668_v38 = vadd.f32 %v1667_v28, %v1666_v24  ;;  %v1889_v23 = vld [vmem:[#allocation21 + $0x4a0] sm:$0xff]  ;;  %v1886_v24 = vld [vmem:[#allocation21 + $0x488] sm:$0xff]  ;;  %v12219_v27 = vcombine.low %v1877_v15, %v1881_v17  ;;  %v12221_v28 = vcombine.low %v1878_v18, %v1882_v19 }
 0x531   : > { %v1669_v39 = vmul.f32 0.5, %v1647_v29  ;;  %v1671_v42 = vmul.f32 0.5, %v1661_v30  ;;  %v12228_v29 = vcombine.high %v1885_v21, %v1889_v23  ;;  %v12230_v30 = vcombine.high %v1886_v24, %v1890_v25  ;;  %v1938_v18 = vld [vmem:[#allocation21 + $0x628] sm:$0xff] }
 0x532   : > { %v1670_v44 = vmul.f32 0.5, %v1654_v35  ;;  %v1672_v45 = vmul.f32 0.5, %v1668_v38  ;;  %v1893_v35 = vld [vmem:[#allocation21 + $0x4c0] sm:$0xff]  ;;  %v12227_v53 = vcombine.low %v1885_v21, %v1889_v23  ;;  %v12229_v54 = vcombine.low %v1886_v24, %v1890_v25  ;;  %v1942_v25 = vld [vmem:[#allocation21 + $0x648] sm:$0xff] }
 0x533   : > { %v1673_v46 = vadd.f32 0.8, %v1669_v39  ;;  %v1675_v47 = vadd.f32 0.8, %v1671_v42  ;;  %v1897_v38 = vld [vmem:[#allocation21 + $0x4e0] sm:$0xff]  ;;  %v1894_v39 = vld [vmem:[#allocation21 + $0x4c8] sm:$0xff] }
 0x534   : > { %v1674_v48 = vadd.f32 0.8, %v1670_v44  ;;  %v1676_v49 = vadd.f32 0.8, %v1672_v45  ;;  %v1898_v42 = vld [vmem:[#allocation21 + $0x4e8] sm:$0xff]  ;;  %v12236_v55 = vcombine.high %v1893_v35, %v1897_v38  ;;  %v1941_v23 = vld [vmem:[#allocation21 + $0x640] sm:$0xff] }
 0x535   : > { %13866 = vrsqrt.f32 %v1673_v46  ;;  %v12238_v57 = vcombine.high %v1894_v39, %v1898_v42  ;;  %v1902_v44 = vld [vmem:[#allocation21 + $0x508] sm:$0xff]  ;;  %v12235_v46 = vcombine.low %v1893_v35, %v1897_v38  ;;  %v1945_v24 = vld [vmem:[#allocation21 + $0x660] sm:$0xff] }
 0x536   : > { %13868 = vrsqrt.f32 %v1675_v47  ;;  %v1906_v45 = vld [vmem:[#allocation21 + $0x528] sm:$0xff]  ;;  %v12237_v47 = vcombine.low %v1894_v39, %v1898_v42  ;;  %v1949_v38 = vld [vmem:[#allocation21 + $0x680] sm:$0xff] }
 0x537   : > { %13870 = vrsqrt.f32 %v1674_v48  ;;  %v1953_v39 = vld [vmem:[#allocation21 + $0x6a0] sm:$0xff]  ;;  %v1950_v42 = vld [vmem:[#allocation21 + $0x688] sm:$0xff] }
 0x538   : > { %13872 = vrsqrt.f32 %v1676_v49  ;;  %v12246_v49 = vcombine.high %v1902_v44, %v1906_v45 }
 0x53f   : > { %v13867_v56 = vpop.eup %13866 }
 0x540   : > { %v13869_v62 = vpop.eup %13868  ;;  %v1681_v0 = vmul.f32 %v13867_v56, %v1633_v32  ;;  %v1728_v32 = vrot.slane %v1711_v52, %v15186_v63  ;;  %v1910_v52 = vld [vmem:[#allocation21 + $0x548] sm:$0xff] }
 0x541   : > { %v13871_v31 = vpop.eup %13870  ;;  %v1683_v37 = vmul.f32 %v13869_v62, %v1635_v34  ;;  %v1914_v56 = vld [vmem:[#allocation21 + $0x568] sm:$0xff]  ;;  %v12245_v62 = vcombine.low %v1902_v44, %v1906_v45  ;;  %v1961_v44 = vld [vmem:[#allocation21 + $0x6e0] sm:$0xff] }
 0x542   : > { %v13873_v5 = vpop.eup %13872  ;;  %v1707_v6 = vmul.f32 %v1690_v51, %v1681_v0  ;;  %v1682_v7 = vmul.f32 %v13871_v31, %v1634_v33  ;;  %v1913_v51 = vld [vmem:[#allocation21 + $0x560] sm:$0xff]  ;;  %v1958_v45 = vld [vmem:[#allocation21 + $0x6c8] sm:$0xff] }
 0x543   : > { %v1709_v9 = vmul.f32 %v1698_v60, %v1683_v37  ;;  %v1684_v10 = vmul.f32 %v13873_v5, %v15196_v36  ;;  %v12220_v36 = vcombine.high %v1877_v15, %v1881_v17  ;;  %v12252_v0 = vcombine.high %v1909_v50, %v1913_v51  ;;  %v1917_v31 = vld [vmem:[#allocation21 + $0x580] sm:$0xff]  ;;  %v1934_v17 = vld [vmem:[#allocation21 + $0x608] sm:$0xff] }
 0x544   : > { %v1708_v11 = vmul.f32 %v1694_v1, %v1682_v7  ;;  %v1733_v13 = vadd.f32 %v1716_v3, %v1707_v6  ;;  %v12254_v1 = vcombine.high %v1910_v52, %v1914_v56  ;;  %v1921_v37 = vld [vmem:[#allocation21 + $0x5a0] sm:$0xff]  ;;  %v1922_v3 = vld [vmem:[#allocation21 + $0x5a8] sm:$0xff]  ;;  %v12253_v5 = vcombine.low %v1910_v52, %v1914_v56 }
 0x545   : > { %v1710_v12 = vmul.f32 %v1702_v2, %v1684_v10  ;;  %v15213_v34 = vadd.f32 %v1724_v4, %v1709_v9  ;;  %v1918_v2 = vld [vmem:[#allocation21 + $0x588] sm:$0xff]  ;;  %v12251_v4 = vcombine.low %v1909_v50, %v1913_v51  ;;  %v12260_v6 = vcombine.high %v1917_v31, %v1921_v37  ;;  %v1929_v9 = vld [vmem:[#allocation21 + $0x5e0] sm:$0xff] }
 0x546   : > { %v1734_v14 = vadd.f32 %v1720_v8, %v1708_v11  ;;  %v15217_v33 = vpack.c.bf16 %v1733_v13, %v1733_v13  ;;  %v12262_v7 = vcombine.high %v1918_v2, %v1922_v3  ;;  %v1925_v8 = vld [vmem:[#allocation21 + $0x5c0] sm:$0xff]  ;;  %v1926_v10 = vld [vmem:[#allocation21 + $0x5c8] sm:$0xff]  ;;  %v12259_v11 = vcombine.low %v1917_v31, %v1921_v37 }
 0x547   : > { %v1736_v16 = vadd.f32 %v1728_v32, %v1710_v12  ;;  %v1930_v32 = vld [vmem:[#allocation21 + $0x5e8] sm:$0xff]  ;;  %v12261_v12 = vcombine.low %v1918_v2, %v1922_v3  ;;  %v12268_v13 = vcombine.high %v1925_v8, %v1929_v9  ;;  %v1933_v15 = vld [vmem:[#allocation21 + $0x600] sm:$0xff]  ;;  %v12267_v19 = vcombine.low %v1925_v8, %v1929_v9 }
 0x548   : > { %v15215_v20 = vpack.c.bf16 %v1734_v14, %v1734_v14  ;;  %v12270_v14 = vcombine.high %v1926_v10, %v1930_v32  ;;  %v12269_v21 = vcombine.low %v1926_v10, %v1930_v32  ;;  %v1965_v51 = vld [vmem:[#allocation21 + $0x700] sm:$0xff]  ;;  %v1966_v56 = vld [vmem:[#allocation21 + $0x708] sm:$0xff] }
 0x549   : > { %v15223_v26 = vpack.c.bf16 %v1736_v16, %v1736_v16  ;;  %v1937_v16 = vld [vmem:[#allocation21 + $0x620] sm:$0xff]  ;;  %v1974_v3 = vld [vmem:[#allocation21 + $0x748] sm:$0xff] }
 0x54a   : > { %3351 = vmatprep.mubr.bf16.mxu0 %v15215_v20  ;;  %3433 = vmatprep.mubr.bf16.mxu1 %v15215_v20  ;;  %v1969_v52 = vld [vmem:[#allocation21 + $0x720] sm:$0xff]  ;;  %v1982_v32 = vld [vmem:[#allocation21 + $0x788] sm:$0xff] }
 0x54b   : > { %3352 = vmatmul.mubr.bf16.vlgmr.msra.gmra.mrb[8].mxu0 %v15217_v33  ;;  %3434 = vmatmul.mubr.bf16.vlgmr.msra.gmra.mrb[8].mxu1 %v15217_v33  ;;  %v1973_v37 = vld [vmem:[#allocation21 + $0x740] sm:$0xff] }
 0x54c   : > { %3361 = vmatpush1.bf16.msra.mxu0 %v12211_v58  ;;  %3443 = vmatpush1.bf16.msra.mxu1 %v12213_v59  ;;  %v1901_v58 = vld [vmem:[#allocation21 + $0x500] sm:$0xff] }
 0x54d   : > { %3392 = vmatprep.mubr.bf16.mxu0 %v15223_v26  ;;  %3474 = vmatprep.mubr.bf16.mxu1 %v15223_v26  ;;  %v1905_v59 = vld [vmem:[#allocation21 + $0x520] sm:$0xff] }
 0x54e   : > { %3362 = vmatprep.subr.bf16.mxu0 %v12220_v36  ;;  %3444 = vmatprep.subr.bf16.mxu1 %v12222_v22  ;;  %v12244_v48 = vcombine.high %v1901_v58, %v1905_v59  ;;  %v12243_v60 = vcombine.low %v1901_v58, %v1905_v59  ;;  %v12276_v36 = vcombine.high %v1933_v15, %v1937_v16  ;;  %v1957_v59 = vld [vmem:[#allocation21 + $0x6c0] sm:$0xff] }
 0x54f   : > { %v12278_v22 = vcombine.high %v1934_v17, %v1938_v18  ;;  %v1977_v2 = vld [vmem:[#allocation21 + $0x760] sm:$0xff] }
 0x550   : > { %3363 = vmatpush1.bf16.msra.mxu0 %v12219_v27  ;;  %3445 = vmatpush1.bf16.msra.mxu1 %v12221_v28  ;;  %v1946_v27 = vld [vmem:[#allocation21 + $0x668] sm:$0xff]  ;;  %v12275_v28 = vcombine.low %v1933_v15, %v1937_v16  ;;  %v1981_v9 = vld [vmem:[#allocation21 + $0x780] sm:$0xff] }
 0x551   : > { %3364 = vmatprep.subr.bf16.mxu0 %v12228_v29  ;;  %3446 = vmatprep.subr.bf16.mxu1 %v12230_v30  ;;  %v12277_v29 = vcombine.low %v1934_v17, %v1938_v18  ;;  %v12284_v30 = vcombine.high %v1941_v23, %v1945_v24  ;;  %v12286_v35 = vcombine.high %v1942_v25, %v1946_v27  ;;  %v1985_v10 = vld [vmem:[#allocation21 + $0x7a0] sm:$0xff]  ;;  %v1990_v18 = vld [vmem:[#allocation21 + $0x7c8] sm:$0xff] }
 0x552   : > { %v1989_v16 = vld [vmem:[#allocation21 + $0x7c0] sm:$0xff] }
 0x553   : > { %v1993_v17 = vld [vmem:[#allocation21 + $0x7e0] sm:$0xff] }
 0x554   : > { %3365 = vmatpush1.bf16.msra.mxu0 %v12227_v53  ;;  %3447 = vmatpush1.bf16.msra.mxu1 %v12229_v54  ;;  %v1954_v53 = vld [vmem:[#allocation21 + $0x6a8] sm:$0xff]  ;;  %v12283_v54 = vcombine.low %v1941_v23, %v1945_v24  ;;  %v1743_v24 = vld [vmem:[#allocation21 + $0x10] sm:$0xff] }
 0x555   : > { %3366 = vmatprep.subr.bf16.mxu0 %v12236_v55  ;;  %3448 = vmatprep.subr.bf16.mxu1 %v12238_v57  ;;  %v12285_v55 = vcombine.low %v1942_v25, %v1946_v27  ;;  %v12292_v57 = vcombine.high %v1949_v38, %v1953_v39  ;;  %v12294_v58 = vcombine.high %v1950_v42, %v1954_v53  ;;  %v1747_v25 = vld [vmem:[#allocation21 + $0x30] sm:$0xff]  ;;  %v1744_v27 = vld [vmem:[#allocation21 + $0x18] sm:$0xff] }
 0x558   : > { %3367 = vmatpush1.bf16.msra.mxu0 %v12235_v46  ;;  %3449 = vmatpush1.bf16.msra.mxu1 %v12237_v47  ;;  %v1962_v46 = vld [vmem:[#allocation21 + $0x6e8] sm:$0xff]  ;;  %v12291_v47 = vcombine.low %v1949_v38, %v1953_v39  ;;  %v1751_v39 = vld [vmem:[#allocation21 + $0x50] sm:$0xff] }
 0x559   : > { %3368 = vmatprep.subr.bf16.mxu0 %v12244_v48  ;;  %3450 = vmatprep.subr.bf16.mxu1 %v12246_v49  ;;  %v12293_v48 = vcombine.low %v1950_v42, %v1954_v53  ;;  %v12300_v49 = vcombine.high %v1957_v59, %v1961_v44  ;;  %v12302_v50 = vcombine.high %v1958_v45, %v1962_v46  ;;  %v1755_v42 = vld [vmem:[#allocation21 + $0x70] sm:$0xff]  ;;  %v1752_v53 = vld [vmem:[#allocation21 + $0x58] sm:$0xff] }
 0x55c   : > { %3369 = vmatpush1.bf16.msra.mxu0 %v12243_v60  ;;  %3451 = vmatpush1.bf16.msra.mxu1 %v12245_v62  ;;  %v1970_v60 = vld [vmem:[#allocation21 + $0x728] sm:$0xff]  ;;  %v12299_v62 = vcombine.low %v1957_v59, %v1961_v44  ;;  %v12096_v59 = vcombine.high %v1751_v39, %v1755_v42 }
 0x55d   : > { %3370 = vmatprep.subr.bf16.mxu0 %v12252_v0  ;;  %3452 = vmatprep.subr.bf16.mxu1 %v12254_v1  ;;  %v12301_v0 = vcombine.low %v1958_v45, %v1962_v46  ;;  %v12308_v1 = vcombine.high %v1965_v51, %v1969_v52  ;;  %v12310_v31 = vcombine.high %v1966_v56, %v1970_v60  ;;  %v1759_v45 = vld [vmem:[#allocation21 + $0x90] sm:$0xff] }
 0x55e   : > { %v1763_v46 = vld [vmem:[#allocation21 + $0xb0] sm:$0xff] }
 0x560   : > { %3371 = vmatpush1.bf16.msra.mxu0 %v12251_v4  ;;  %3453 = vmatpush1.bf16.msra.mxu1 %v12253_v5  ;;  %v1978_v4 = vld [vmem:[#allocation21 + $0x768] sm:$0xff]  ;;  %v12307_v5 = vcombine.low %v1965_v51, %v1969_v52  ;;  %v1767_v52 = vld [vmem:[#allocation21 + $0xd0] sm:$0xff] }
 0x561   : > { %3372 = vmatprep.subr.bf16.mxu0 %v12260_v6  ;;  %3454 = vmatprep.subr.bf16.mxu1 %v12262_v7  ;;  %v12309_v6 = vcombine.low %v1966_v56, %v1970_v60  ;;  %v12316_v7 = vcombine.high %v1973_v37, %v1977_v2  ;;  %v12318_v8 = vcombine.high %v1974_v3, %v1978_v4  ;;  %v1771_v56 = vld [vmem:[#allocation21 + $0xf0] sm:$0xff]  ;;  %v1768_v60 = vld [vmem:[#allocation21 + $0xd8] sm:$0xff] }
 0x564   : > { %3373 = vmatpush1.bf16.msra.mxu0 %v12259_v11  ;;  %3455 = vmatpush1.bf16.msra.mxu1 %v12261_v12  ;;  %v1986_v11 = vld [vmem:[#allocation21 + $0x7a8] sm:$0xff]  ;;  %v12315_v12 = vcombine.low %v1973_v37, %v1977_v2  ;;  %v1775_v2 = vld [vmem:[#allocation21 + $0x110] sm:$0xff] }
 0x565   : > { %3374 = vmatprep.subr.bf16.mxu0 %v12268_v13  ;;  %3456 = vmatprep.subr.bf16.mxu1 %v12270_v14  ;;  %v12317_v13 = vcombine.low %v1974_v3, %v1978_v4  ;;  %v12324_v14 = vcombine.high %v1981_v9, %v1985_v10  ;;  %v12326_v15 = vcombine.high %v1982_v32, %v1986_v11  ;;  %v1779_v3 = vld [vmem:[#allocation21 + $0x130] sm:$0xff]  ;;  %v1780_v4 = vld [vmem:[#allocation21 + $0x138] sm:$0xff] }
 0x568   : > { %3375 = vmatpush1.bf16.msra.mxu0 %v12267_v19  ;;  %3457 = vmatpush1.bf16.msra.mxu1 %v12269_v21  ;;  %v1994_v19 = vld [vmem:[#allocation21 + $0x7e8] sm:$0xff]  ;;  %v12323_v21 = vcombine.low %v1981_v9, %v1985_v10  ;;  %v1783_v9 = vld [vmem:[#allocation21 + $0x150] sm:$0xff] }
 0x569   : > { %3376 = vmatprep.subr.bf16.mxu0 %v12276_v36  ;;  %3458 = vmatprep.subr.bf16.mxu1 %v12278_v22  ;;  %v12325_v36 = vcombine.low %v1982_v32, %v1986_v11  ;;  %v12332_v22 = vcombine.high %v1989_v16, %v1993_v17  ;;  %v12334_v23 = vcombine.high %v1990_v18, %v1994_v19  ;;  %v1787_v10 = vld [vmem:[#allocation21 + $0x170] sm:$0xff]  ;;  %v1784_v32 = vld [vmem:[#allocation21 + $0x158] sm:$0xff] }
 0x56a   : > { %v1788_v11 = vld [vmem:[#allocation21 + $0x178] sm:$0xff] }
 0x56c   : > { %3377 = vmatpush1.bf16.msra.mxu0 %v12275_v28  ;;  %3459 = vmatpush1.bf16.msra.mxu1 %v12277_v29  ;;  %v1748_v28 = vld [vmem:[#allocation21 + $0x38] sm:$0xff]  ;;  %v12331_v29 = vcombine.low %v1989_v16, %v1993_v17  ;;  %v1791_v16 = vld [vmem:[#allocation21 + $0x190] sm:$0xff] }
 0x56d   : > { %3378 = vmatprep.subr.bf16.mxu0 %v12284_v30  ;;  %3460 = vmatprep.subr.bf16.mxu1 %v12286_v35  ;;  %v12333_v30 = vcombine.low %v1990_v18, %v1994_v19  ;;  %v12088_v35 = vcombine.high %v1743_v24, %v1747_v25  ;;  %v12090_v38 = vcombine.high %v1744_v27, %v1748_v28  ;;  %v1795_v17 = vld [vmem:[#allocation21 + $0x1b0] sm:$0xff]  ;;  %v1792_v18 = vld [vmem:[#allocation21 + $0x198] sm:$0xff] }
 0x56e   : > { %v1796_v19 = vld [vmem:[#allocation21 + $0x1b8] sm:$0xff] }
 0x570   : > { %3379 = vmatpush1.bf16.msra.mxu0 %v12283_v54  ;;  %3461 = vmatpush1.bf16.msra.mxu1 %v12285_v55  ;;  %v1756_v54 = vld [vmem:[#allocation21 + $0x78] sm:$0xff]  ;;  %v12087_v55 = vcombine.low %v1743_v24, %v1747_v25  ;;  %v1799_v24 = vld [vmem:[#allocation21 + $0x1d0] sm:$0xff] }
 0x571   : > { %3380 = vmatprep.subr.bf16.mxu0 %v12292_v57  ;;  %3462 = vmatprep.subr.bf16.mxu1 %v12294_v58  ;;  %v15235_v57 = vpack.c.bf16 %v15213_v34, %v15213_v34  ;;  %v12089_v58 = vcombine.low %v1744_v27, %v1748_v28  ;;  %v12098_v44 = vcombine.high %v1752_v53, %v1756_v54  ;;  %v1803_v25 = vld [vmem:[#allocation21 + $0x1f0] sm:$0xff]  ;;  %v1800_v27 = vld [vmem:[#allocation21 + $0x1d8] sm:$0xff] }
 0x572   : > { %v12097_v34 = vcombine.low %v1752_v53, %v1756_v54  ;;  %v1804_v28 = vld [vmem:[#allocation21 + $0x1f8] sm:$0xff] }
 0x573   : > { %v1808_v53 = vld [vmem:[#allocation21 + $0x218] sm:$0xff] }
 0x574   : > { %3381 = vmatpush1.bf16.msra.mxu0 %v12291_v47  ;;  %3463 = vmatpush1.bf16.msra.mxu1 %v12293_v48  ;;  %v1760_v47 = vld [vmem:[#allocation21 + $0x98] sm:$0xff] }
 0x575   : > { %3382 = vmatprep.subr.bf16.mxu0 %v12300_v49  ;;  %3464 = vmatprep.subr.bf16.mxu1 %v12302_v50  ;;  %v1764_v48 = vld [vmem:[#allocation21 + $0xb8] sm:$0xff]  ;;  %v12095_v49 = vcombine.low %v1751_v39, %v1755_v42  ;;  %v12104_v50 = vcombine.high %v1759_v45, %v1763_v46  ;;  %v1807_v39 = vld [vmem:[#allocation21 + $0x210] sm:$0xff] }
 0x576   : > { %v12106_v51 = vcombine.high %v1760_v47, %v1764_v48  ;;  %v1811_v42 = vld [vmem:[#allocation21 + $0x230] sm:$0xff]  ;;  %v1812_v54 = vld [vmem:[#allocation21 + $0x238] sm:$0xff] }
 0x578   : > { %3383 = vmatpush1.bf16.msra.mxu0 %v12299_v62  ;;  %3465 = vmatpush1.bf16.msra.mxu1 %v12301_v0  ;;  %v1772_v62 = vld [vmem:[#allocation21 + $0xf8] sm:$0xff]  ;;  %v12103_v0 = vcombine.low %v1759_v45, %v1763_v46  ;;  %v1815_v45 = vld [vmem:[#allocation21 + $0x250] sm:$0xff] }
 0x579   : > { %3384 = vmatprep.subr.bf16.mxu0 %v12308_v1  ;;  %3466 = vmatprep.subr.bf16.mxu1 %v12310_v31  ;;  %v12105_v1 = vcombine.low %v1760_v47, %v1764_v48  ;;  %v12112_v31 = vcombine.high %v1767_v52, %v1771_v56  ;;  %v12114_v37 = vcombine.high %v1768_v60, %v1772_v62  ;;  %v1819_v46 = vld [vmem:[#allocation21 + $0x270] sm:$0xff]  ;;  %v1816_v47 = vld [vmem:[#allocation21 + $0x258] sm:$0xff] }
 0x57a   : > { %v1820_v48 = vld [vmem:[#allocation21 + $0x278] sm:$0xff] }
 0x57c   : > { %3385 = vmatpush1.bf16.msra.mxu0 %v12307_v5  ;;  %3467 = vmatpush1.bf16.msra.mxu1 %v12309_v6  ;;  %v12111_v5 = vcombine.low %v1767_v52, %v1771_v56  ;;  %v12113_v6 = vcombine.low %v1768_v60, %v1772_v62  ;;  %v1823_v52 = vld [vmem:[#allocation21 + $0x290] sm:$0xff]  ;;  %v1824_v60 = vld [vmem:[#allocation21 + $0x298] sm:$0xff] }
 0x57d   : > { %3386 = vmatprep.subr.bf16.mxu0 %v12316_v7  ;;  %3468 = vmatprep.subr.bf16.mxu1 %v12318_v8  ;;  %v12120_v7 = vcombine.high %v1775_v2, %v1779_v3  ;;  %v1827_v56 = vld [vmem:[#allocation21 + $0x2b0] sm:$0xff]  ;;  %v1828_v62 = vld [vmem:[#allocation21 + $0x2b8] sm:$0xff] }
 0x580   : > { %3387 = vmatpush1.bf16.msra.mxu0 %v12315_v12  ;;  %3469 = vmatpush1.bf16.msra.mxu1 %v12317_v13  ;;  %v12119_v12 = vcombine.low %v1775_v2, %v1779_v3  ;;  %v1831_v2 = vld [vmem:[#allocation21 + $0x2d0] sm:$0xff] }
 0x581   : > { %3388 = vmatprep.subr.bf16.mxu0 %v12324_v14  ;;  %3470 = vmatprep.subr.bf16.mxu1 %v12326_v15  ;;  %v12128_v14 = vcombine.high %v1783_v9, %v1787_v10  ;;  %v12130_v15 = vcombine.high %v1784_v32, %v1788_v11  ;;  %v1835_v3 = vld [vmem:[#allocation21 + $0x2f0] sm:$0xff] }
 0x584   : > { %3389 = vmatpush1.bf16.msra.mxu0 %v12323_v21  ;;  %3471 = vmatpush1.bf16.msra.mxu1 %v12325_v36  ;;  %v12127_v21 = vcombine.low %v1783_v9, %v1787_v10  ;;  %v12129_v36 = vcombine.low %v1784_v32, %v1788_v11  ;;  %v1839_v9 = vld [vmem:[#allocation21 + $0x310] sm:$0xff]  ;;  %v1840_v32 = vld [vmem:[#allocation21 + $0x318] sm:$0xff] }
 0x585   : > { %3390 = vmatprep.subr.bf16.mxu0 %v12332_v22  ;;  %3472 = vmatprep.subr.bf16.mxu1 %v12334_v23  ;;  %v12136_v22 = vcombine.high %v1791_v16, %v1795_v17  ;;  %v12138_v23 = vcombine.high %v1792_v18, %v1796_v19  ;;  %v1843_v10 = vld [vmem:[#allocation21 + $0x330] sm:$0xff]  ;;  %v1844_v11 = vld [vmem:[#allocation21 + $0x338] sm:$0xff] }
 0x588   : > { %3391 = vmatpush1.bf16.msra.mxu0 %v12331_v29  ;;  %3473 = vmatpush1.bf16.msra.mxu1 %v12333_v30  ;;  %v12135_v29 = vcombine.low %v1791_v16, %v1795_v17  ;;  %v12137_v30 = vcombine.low %v1792_v18, %v1796_v19  ;;  %v1847_v16 = vld [vmem:[#allocation21 + $0x350] sm:$0xff]  ;;  %v1848_v18 = vld [vmem:[#allocation21 + $0x358] sm:$0xff] }
 0x589   : > { %3483 = vmatprep.subr.bf16.mxu0 %v12088_v35  ;;  %3565 = vmatprep.subr.bf16.mxu1 %v12090_v38  ;;  %v12144_v35 = vcombine.high %v1799_v24, %v1803_v25  ;;  %v12146_v38 = vcombine.high %v1800_v27, %v1804_v28  ;;  %v1851_v17 = vld [vmem:[#allocation21 + $0x370] sm:$0xff]  ;;  %v1852_v19 = vld [vmem:[#allocation21 + $0x378] sm:$0xff] }
 0x58b   : > { %3393 = vmatmul.mubr.bf16.vlgmr.msra.gmra.mrb[8].mxu0 %v15235_v57  ;;  %3475 = vmatmul.mubr.bf16.vlgmr.msra.gmra.mrb[8].mxu1 %v15235_v57 }
 0x58c   : > { %3484 = vmatpush1.bf16.msra.mxu0 %v12087_v55  ;;  %3515 = vmatprep.mubr.bf16.mxu0 %v15215_v20  ;;  %v12143_v55 = vcombine.low %v1799_v24, %v1803_v25  ;;  %v1855_v24 = vld [vmem:[#allocation21 + $0x390] sm:$0xff] }
 0x58d   : > { %3566 = vmatpush1.bf16.msra.mxu1 %v12089_v58  ;;  %3597 = vmatprep.mubr.bf16.mxu1 %v15215_v20  ;;  %v1776_v20 = vld [vmem:[#allocation21 + $0x118] sm:$0xff]  ;;  %v12145_v58 = vcombine.low %v1800_v27, %v1804_v28  ;;  %v1859_v25 = vld [vmem:[#allocation21 + $0x3b0] sm:$0xff] }
 0x58e   : > { %3485 = vmatprep.subr.bf16.mxu0 %v12096_v59  ;;  %3567 = vmatprep.subr.bf16.mxu1 %v12098_v44  ;;  %v12122_v8 = vcombine.high %v1776_v20, %v1780_v4  ;;  %v12121_v13 = vcombine.low %v1776_v20, %v1780_v4  ;;  %v12152_v59 = vcombine.high %v1807_v39, %v1811_v42  ;;  %v1832_v20 = vld [vmem:[#allocation21 + $0x2d8] sm:$0xff] }
 0x58f   : > { %v12154_v44 = vcombine.high %v1808_v53, %v1812_v54  ;;  %v1836_v4 = vld [vmem:[#allocation21 + $0x2f8] sm:$0xff] }
 0x590   : > { %3486 = vmatpush1.bf16.msra.mxu0 %v12095_v49  ;;  %v12151_v49 = vcombine.low %v1807_v39, %v1811_v42  ;;  %v1856_v27 = vld [vmem:[#allocation21 + $0x398] sm:$0xff]  ;;  %v1863_v39 = vld [vmem:[#allocation21 + $0x3d0] sm:$0xff] }
 0x591   : > { %3568 = vmatpush1.bf16.msra.mxu1 %v12097_v34  ;;  %3487 = vmatprep.subr.bf16.mxu0 %v12104_v50  ;;  %v12153_v34 = vcombine.low %v1808_v53, %v1812_v54  ;;  %v12160_v50 = vcombine.high %v1815_v45, %v1819_v46  ;;  %v1860_v28 = vld [vmem:[#allocation21 + $0x3b8] sm:$0xff]  ;;  %v1867_v42 = vld [vmem:[#allocation21 + $0x3f0] sm:$0xff] }
 0x592   : > { %3569 = vmatprep.subr.bf16.mxu1 %v12106_v51  ;;  %v12162_v51 = vcombine.high %v1816_v47, %v1820_v48  ;;  %v1864_v53 = vld [vmem:[#allocation21 + $0x3d8] sm:$0xff] }
 0x593   : > { %v1868_v54 = vld [vmem:[#allocation21 + $0x3f8] sm:$0xff] }
 0x594   : > { %3488 = vmatpush1.bf16.msra.mxu0 %v12103_v0  ;;  %v12159_v0 = vcombine.low %v1815_v45, %v1819_v46  ;;  %v1871_v45 = vld [vmem:[#allocation21 + $0x410] sm:$0xff] }
 0x595   : > { %3570 = vmatpush1.bf16.msra.mxu1 %v12105_v1  ;;  %3489 = vmatprep.subr.bf16.mxu0 %v12112_v31  ;;  %v12161_v1 = vcombine.low %v1816_v47, %v1820_v48  ;;  %v12168_v31 = vcombine.high %v1823_v52, %v1827_v56  ;;  %v1875_v46 = vld [vmem:[#allocation21 + $0x430] sm:$0xff]  ;;  %v1872_v47 = vld [vmem:[#allocation21 + $0x418] sm:$0xff] }
 0x596   : > { %3571 = vmatprep.subr.bf16.mxu1 %v12114_v37  ;;  %v12170_v37 = vcombine.high %v1824_v60, %v1828_v62  ;;  %v1876_v48 = vld [vmem:[#allocation21 + $0x438] sm:$0xff] }
 0x598   : > { %3490 = vmatpush1.bf16.msra.mxu0 %v12111_v5  ;;  %v12167_v5 = vcombine.low %v1823_v52, %v1827_v56  ;;  %v1879_v52 = vld [vmem:[#allocation21 + $0x450] sm:$0xff] }
 0x599   : > { %3572 = vmatpush1.bf16.msra.mxu1 %v12113_v6  ;;  %3491 = vmatprep.subr.bf16.mxu0 %v12120_v7  ;;  %v12169_v6 = vcombine.low %v1824_v60, %v1828_v62  ;;  %v12176_v7 = vcombine.high %v1831_v2, %v1835_v3  ;;  %v1883_v56 = vld [vmem:[#allocation21 + $0x470] sm:$0xff]  ;;  %v12215_v60 = vcombine.low %v1871_v45, %v1875_v46  ;;  %v1880_v62 = vld [vmem:[#allocation21 + $0x458] sm:$0xff] }
 0x59a   : > { %3573 = vmatprep.subr.bf16.mxu1 %v12122_v8  ;;  %v12178_v8 = vcombine.high %v1832_v20, %v1836_v4 }
 0x59c   : > { %3492 = vmatpush1.bf16.msra.mxu0 %v12119_v12  ;;  %v12175_v12 = vcombine.low %v1831_v2, %v1835_v3  ;;  %v1891_v2 = vld [vmem:[#allocation21 + $0x4b0] sm:$0xff] }
 0x59d   : > { %3574 = vmatpush1.bf16.msra.mxu1 %v12121_v13  ;;  %3493 = vmatprep.subr.bf16.mxu0 %v12128_v14  ;;  %v12177_v13 = vcombine.low %v1832_v20, %v1836_v4  ;;  %v12184_v14 = vcombine.high %v1839_v9, %v1843_v10  ;;  %v1888_v20 = vld [vmem:[#allocation21 + $0x498] sm:$0xff] }
 0x59e   : > { %3575 = vmatprep.subr.bf16.mxu1 %v12130_v15  ;;  %v12186_v15 = vcombine.high %v1840_v32, %v1844_v11  ;;  %v1892_v4 = vld [vmem:[#allocation21 + $0x4b8] sm:$0xff] }
 0x5a0   : > { %3494 = vmatpush1.bf16.msra.mxu0 %v12127_v21  ;;  %v12183_v21 = vcombine.low %v1839_v9, %v1843_v10  ;;  %v1895_v9 = vld [vmem:[#allocation21 + $0x4d0] sm:$0xff] }
 0x5a1   : > { %3576 = vmatpush1.bf16.msra.mxu1 %v12129_v36  ;;  %3495 = vmatprep.subr.bf16.mxu0 %v12136_v22  ;;  %v12185_v36 = vcombine.low %v1840_v32, %v1844_v11  ;;  %v12192_v22 = vcombine.high %v1847_v16, %v1851_v17  ;;  %v1899_v10 = vld [vmem:[#allocation21 + $0x4f0] sm:$0xff]  ;;  %v1896_v32 = vld [vmem:[#allocation21 + $0x4d8] sm:$0xff] }
 0x5a2   : > { %3577 = vmatprep.subr.bf16.mxu1 %v12138_v23  ;;  %v12194_v23 = vcombine.high %v1848_v18, %v1852_v19  ;;  %v1900_v11 = vld [vmem:[#allocation21 + $0x4f8] sm:$0xff] }
 0x5a4   : > { %3496 = vmatpush1.bf16.msra.mxu0 %v12135_v29  ;;  %v12191_v29 = vcombine.low %v1847_v16, %v1851_v17  ;;  %v1907_v16 = vld [vmem:[#allocation21 + $0x530] sm:$0xff]  ;;  %v1904_v17 = vld [vmem:[#allocation21 + $0x518] sm:$0xff] }
 0x5a5   : > { %3578 = vmatpush1.bf16.msra.mxu1 %v12137_v30  ;;  %3497 = vmatprep.subr.bf16.mxu0 %v12144_v35  ;;  %v12193_v30 = vcombine.low %v1848_v18, %v1852_v19  ;;  %v12200_v35 = vcombine.high %v1855_v24, %v1859_v25  ;;  %v1908_v18 = vld [vmem:[#allocation21 + $0x538] sm:$0xff]  ;;  %v12241_v19 = vcombine.low %v1896_v32, %v1900_v11 }
 0x5a6   : > { %3579 = vmatprep.subr.bf16.mxu1 %v12146_v38  ;;  %v12202_v38 = vcombine.high %v1856_v27, %v1860_v28 }
 0x5a8   : > { %3498 = vmatpush1.bf16.msra.mxu0 %v12143_v55  ;;  %v12199_v55 = vcombine.low %v1855_v24, %v1859_v25  ;;  %v1912_v24 = vld [vmem:[#allocation21 + $0x558] sm:$0xff] }
 0x5a9   : > { %3580 = vmatpush1.bf16.msra.mxu1 %v12145_v58  ;;  %3499 = vmatprep.subr.bf16.mxu0 %v12152_v59  ;;  %v12201_v58 = vcombine.low %v1856_v27, %v1860_v28  ;;  %v12208_v59 = vcombine.high %v1863_v39, %v1867_v42  ;;  %v1916_v25 = vld [vmem:[#allocation21 + $0x578] sm:$0xff]  ;;  %v12249_v28 = vcombine.low %v1904_v17, %v1908_v18 }
 0x5aa   : > { %3581 = vmatprep.subr.bf16.mxu1 %v12154_v44  ;;  %v12210_v44 = vcombine.high %v1864_v53, %v1868_v54 }
 0x5ac   : > { %3500 = vmatpush1.bf16.msra.mxu0 %v12151_v49  ;;  %v12207_v49 = vcombine.low %v1863_v39, %v1867_v42  ;;  %v1920_v39 = vld [vmem:[#allocation21 + $0x598] sm:$0xff] }
 0x5ad   : > { %3582 = vmatpush1.bf16.msra.mxu1 %v12153_v34  ;;  %3501 = vmatprep.subr.bf16.mxu0 %v12160_v50  ;;  %v12209_v34 = vcombine.low %v1864_v53, %v1868_v54  ;;  %v12216_v50 = vcombine.high %v1871_v45, %v1875_v46  ;;  %v1924_v42 = vld [vmem:[#allocation21 + $0x5b8] sm:$0xff]  ;;  %v12257_v54 = vcombine.low %v1912_v24, %v1916_v25 }
 0x5ae   : > { %3583 = vmatprep.subr.bf16.mxu1 %v12162_v51  ;;  %v12218_v51 = vcombine.high %v1872_v47, %v1876_v48  ;;  %v1928_v45 = vld [vmem:[#allocation21 + $0x5d8] sm:$0xff] }
 0x5af   : > { %v1932_v46 = vld [vmem:[#allocation21 + $0x5f8] sm:$0xff] }
 0x5b0   : > { %3502 = vmatpush1.bf16.msra.mxu0 %v12159_v0  ;;  %v1884_v0 = vld [vmem:[#allocation21 + $0x478] sm:$0xff] }
 0x5b1   : > { %3584 = vmatpush1.bf16.msra.mxu1 %v12161_v1  ;;  %3503 = vmatprep.subr.bf16.mxu0 %v12168_v31  ;;  %v12217_v1 = vcombine.low %v1872_v47, %v1876_v48  ;;  %v12224_v31 = vcombine.high %v1879_v52, %v1883_v56  ;;  %v12226_v3 = vcombine.high %v1880_v62, %v1884_v0 }
 0x5b2   : > { %3585 = vmatprep.subr.bf16.mxu1 %v12170_v37  ;;  %v1887_v37 = vld [vmem:[#allocation21 + $0x490] sm:$0xff]  ;;  %v12265_v48 = vcombine.low %v1920_v39, %v1924_v42 }
 0x5b4   : > { %3504 = vmatpush1.bf16.msra.mxu0 %v12167_v5  ;;  %v12223_v5 = vcombine.low %v1879_v52, %v1883_v56  ;;  %v1936_v52 = vld [vmem:[#allocation21 + $0x618] sm:$0xff] }
 0x5b5   : > { %3586 = vmatpush1.bf16.msra.mxu1 %v12169_v6  ;;  %3505 = vmatprep.subr.bf16.mxu0 %v12176_v7  ;;  %v12225_v6 = vcombine.low %v1880_v62, %v1884_v0  ;;  %v12232_v7 = vcombine.high %v1887_v37, %v1891_v2  ;;  %v1940_v56 = vld [vmem:[#allocation21 + $0x638] sm:$0xff]  ;;  %v12273_v62 = vcombine.low %v1928_v45, %v1932_v46 }
 0x5b6   : > { %3587 = vmatprep.subr.bf16.mxu1 %v12178_v8  ;;  %v12234_v8 = vcombine.high %v1888_v20, %v1892_v4 }
 0x5b8   : > { %3506 = vmatpush1.bf16.msra.mxu0 %v12175_v12  ;;  %v12231_v12 = vcombine.low %v1887_v37, %v1891_v2  ;;  %v1947_v37 = vld [vmem:[#allocation21 + $0x670] sm:$0xff]  ;;  %v1944_v2 = vld [vmem:[#allocation21 + $0x658] sm:$0xff] }
 0x5b9   : > { %3588 = vmatpush1.bf16.msra.mxu1 %v12177_v13  ;;  %3507 = vmatprep.subr.bf16.mxu0 %v12184_v14  ;;  %v12240_v13 = vcombine.high %v1895_v9, %v1899_v10  ;;  %v12242_v14 = vcombine.high %v1896_v32, %v1900_v11 }
 0x5ba   : > { %3589 = vmatprep.subr.bf16.mxu1 %v12186_v15  ;;  %v1903_v15 = vld [vmem:[#allocation21 + $0x510] sm:$0xff] }
 0x5bb   : > { %v12247_v27 = vcombine.low %v1903_v15, %v1907_v16 }
 0x5bc   : > { %3508 = vmatpush1.bf16.msra.mxu0 %v12183_v21  ;;  %v12248_v21 = vcombine.high %v1903_v15, %v1907_v16  ;;  %v1960_v15 = vld [vmem:[#allocation21 + $0x6d8] sm:$0xff] }
 0x5bd   : > { %3590 = vmatpush1.bf16.msra.mxu1 %v12185_v36  ;;  %3509 = vmatprep.subr.bf16.mxu0 %v12192_v22  ;;  %v12250_v36 = vcombine.high %v1904_v17, %v1908_v18  ;;  %v1911_v22 = vld [vmem:[#allocation21 + $0x550] sm:$0xff]  ;;  %v1964_v16 = vld [vmem:[#allocation21 + $0x6f8] sm:$0xff] }
 0x5be   : > { %3591 = vmatprep.subr.bf16.mxu1 %v12194_v23  ;;  %v1915_v23 = vld [vmem:[#allocation21 + $0x570] sm:$0xff] }
 0x5bf   : > { %v12255_v53 = vcombine.low %v1911_v22, %v1915_v23 }
 0x5c0   : > { %3510 = vmatpush1.bf16.msra.mxu0 %v12191_v29  ;;  %v12256_v29 = vcombine.high %v1911_v22, %v1915_v23  ;;  %v1968_v22 = vld [vmem:[#allocation21 + $0x718] sm:$0xff] }
 0x5c1   : > { %3592 = vmatpush1.bf16.msra.mxu1 %v12193_v30  ;;  %3511 = vmatprep.subr.bf16.mxu0 %v12200_v35  ;;  %v12258_v30 = vcombine.high %v1912_v24, %v1916_v25  ;;  %v1919_v35 = vld [vmem:[#allocation21 + $0x590] sm:$0xff]  ;;  %v1972_v23 = vld [vmem:[#allocation21 + $0x738] sm:$0xff]  ;;  %v12305_v25 = vcombine.low %v1960_v15, %v1964_v16 }
 0x5c2   : > { %3593 = vmatprep.subr.bf16.mxu1 %v12202_v38  ;;  %v1923_v38 = vld [vmem:[#allocation21 + $0x5b0] sm:$0xff] }
 0x5c3   : > { %v12263_v47 = vcombine.low %v1919_v35, %v1923_v38 }
 0x5c4   : > { %3512 = vmatpush1.bf16.msra.mxu0 %v12199_v55  ;;  %v12264_v55 = vcombine.high %v1919_v35, %v1923_v38  ;;  %v1976_v35 = vld [vmem:[#allocation21 + $0x758] sm:$0xff] }
 0x5c5   : > { %3594 = vmatpush1.bf16.msra.mxu1 %v12201_v58  ;;  %3513 = vmatprep.subr.bf16.mxu0 %v12208_v59  ;;  %v12266_v58 = vcombine.high %v1920_v39, %v1924_v42  ;;  %v1927_v59 = vld [vmem:[#allocation21 + $0x5d0] sm:$0xff]  ;;  %v1980_v38 = vld [vmem:[#allocation21 + $0x778] sm:$0xff]  ;;  %v12313_v42 = vcombine.low %v1968_v22, %v1972_v23 }
 0x5c6   : > { %3595 = vmatprep.subr.bf16.mxu1 %v12210_v44  ;;  %v1931_v44 = vld [vmem:[#allocation21 + $0x5f0] sm:$0xff] }
 0x5c8   : > { %3514 = vmatpush1.bf16.msra.mxu0 %v12207_v49  ;;  %v12272_v49 = vcombine.high %v1927_v59, %v1931_v44 }
 0x5c9   : > { %3596 = vmatpush1.bf16.msra.mxu1 %v12209_v34  ;;  %3524 = vmatprep.subr.bf16.mxu0 %v12216_v50  ;;  %v12274_v34 = vcombine.high %v1928_v45, %v1932_v46  ;;  %v1935_v50 = vld [vmem:[#allocation21 + $0x610] sm:$0xff]  ;;  %v12321_v46 = vcombine.low %v1976_v35, %v1980_v38 }
 0x5ca   : > { %3606 = vmatprep.subr.bf16.mxu1 %v12218_v51  ;;  %v1939_v51 = vld [vmem:[#allocation21 + $0x630] sm:$0xff] }
 0x5cb   : > { %3516 = vmatmul.mubr.bf16.vlgmr.msra.gmra.mrb[12].mxu0 %v15217_v33  ;;  %v12280_v0 = vcombine.high %v1935_v50, %v1939_v51 }
 0x5cc   : > { %3598 = vmatmul.mubr.bf16.vlgmr.msra.gmra.mrb[12].mxu1 %v15217_v33  ;;  %3525 = vmatpush1.bf16.msra.mxu0 %v12215_v60  ;;  %v12233_v33 = vcombine.low %v1888_v20, %v1892_v4  ;;  %v12271_v60 = vcombine.low %v1927_v59, %v1931_v44  ;;  %v12279_v20 = vcombine.low %v1935_v50, %v1939_v51  ;;  %v1984_v59 = vld [vmem:[#allocation21 + $0x798] sm:$0xff] }
 0x5cd   : > { %3556 = vmatprep.mubr.bf16.mxu0 %v15223_v26  ;;  %3607 = vmatpush1.bf16.msra.mxu1 %v12217_v1  ;;  %v12282_v1 = vcombine.high %v1936_v52, %v1940_v56  ;;  %v12281_v4 = vcombine.low %v1936_v52, %v1940_v56  ;;  %v1988_v44 = vld [vmem:[#allocation21 + $0x7b8] sm:$0xff] }
 0x5ce   : > { %3638 = vmatprep.mubr.bf16.mxu1 %v15223_v26  ;;  %3526 = vmatprep.subr.bf16.mxu0 %v12224_v31  ;;  %v12239_v26 = vcombine.low %v1895_v9, %v1899_v10  ;;  %v1943_v31 = vld [vmem:[#allocation21 + $0x650] sm:$0xff]  ;;  %v1952_v9 = vld [vmem:[#allocation21 + $0x698] sm:$0xff]  ;;  %v12329_v56 = vcombine.low %v1984_v59, %v1988_v44 }
 0x5cf   : > { %3608 = vmatprep.subr.bf16.mxu1 %v12226_v3  ;;  %v1948_v3 = vld [vmem:[#allocation21 + $0x678] sm:$0xff]  ;;  %v12287_v32 = vcombine.low %v1943_v31, %v1947_v37 }
 0x5d0   : > { %3527 = vmatpush1.bf16.msra.mxu0 %v12223_v5  ;;  %v12288_v5 = vcombine.high %v1943_v31, %v1947_v37  ;;  %v1956_v10 = vld [vmem:[#allocation21 + $0x6b8] sm:$0xff]  ;;  %v12289_v11 = vcombine.low %v1944_v2, %v1948_v3  ;;  %v15247_v31 = vld [vmem:[#allocation23] sm:$0xff] }
 0x5d1   : > { %3609 = vmatpush1.bf16.msra.mxu1 %v12225_v6  ;;  %3528 = vmatprep.subr.bf16.mxu0 %v12232_v7  ;;  %v12290_v6 = vcombine.high %v1944_v2, %v1948_v3  ;;  %v1951_v7 = vld [vmem:[#allocation21 + $0x690] sm:$0xff]  ;;  %v12297_v18 = vcombine.low %v1952_v9, %v1956_v10  ;;  %v1992_v50 = vld [vmem:[#allocation21 + $0x7d8] sm:$0xff]  ;;  %v2002_v37 = vrot.slane %v15247_v31, %v15145_v41 }
 0x5d2   : > { %3610 = vmatprep.subr.bf16.mxu1 %v12234_v8  ;;  %v1955_v8 = vld [vmem:[#allocation21 + $0x6b0] sm:$0xff]  ;;  %v1996_v51 = vld [vmem:[#allocation21 + $0x7f8] sm:$0xff]  ;;  %v2010_v2 = vrot.slane %v15247_v31, %v15183_v61  ;;  %v2006_v3 = vrot.slane %v15247_v31, %v15148_v43 }
 0x5d3   : > { %v12295_v17 = vcombine.low %v1951_v7, %v1955_v8 }
 0x5d4   : > { %3529 = vmatpush1.bf16.msra.mxu0 %v12231_v12  ;;  %v12296_v12 = vcombine.high %v1951_v7, %v1955_v8 }
 0x5d5   : > { %3611 = vmatpush1.bf16.msra.mxu1 %v12233_v33  ;;  %3530 = vmatprep.subr.bf16.mxu0 %v12240_v13  ;;  %v12298_v33 = vcombine.high %v1952_v9, %v1956_v10  ;;  %v1959_v13 = vld [vmem:[#allocation21 + $0x6d0] sm:$0xff] }
 0x5d6   : > { %3612 = vmatprep.subr.bf16.mxu1 %v12242_v14  ;;  %v1963_v14 = vld [vmem:[#allocation21 + $0x6f0] sm:$0xff] }
 0x5d7   : > { %v12303_v24 = vcombine.low %v1959_v13, %v1963_v14 }
 0x5d8   : > { %3531 = vmatpush1.bf16.msra.mxu0 %v12239_v26  ;;  %v12304_v26 = vcombine.high %v1959_v13, %v1963_v14 }
 0x5d9   : > { %3613 = vmatpush1.bf16.msra.mxu1 %v12241_v19  ;;  %3532 = vmatprep.subr.bf16.mxu0 %v12248_v21  ;;  %v12306_v19 = vcombine.high %v1960_v15, %v1964_v16  ;;  %v1967_v21 = vld [vmem:[#allocation21 + $0x710] sm:$0xff] }
 0x5da   : > { %3614 = vmatprep.subr.bf16.mxu1 %v12250_v36  ;;  %v1971_v36 = vld [vmem:[#allocation21 + $0x730] sm:$0xff] }
 0x5db   : > { %v12311_v39 = vcombine.low %v1967_v21, %v1971_v36 }
 0x5dc   : > { %3533 = vmatpush1.bf16.msra.mxu0 %v12247_v27  ;;  %v12312_v27 = vcombine.high %v1967_v21, %v1971_v36 }
 0x5dd   : > { %3615 = vmatpush1.bf16.msra.mxu1 %v12249_v28  ;;  %3534 = vmatprep.subr.bf16.mxu0 %v12256_v29  ;;  %v12314_v28 = vcombine.high %v1968_v22, %v1972_v23  ;;  %v1975_v29 = vld [vmem:[#allocation21 + $0x750] sm:$0xff] }
 0x5de   : > { %3616 = vmatprep.subr.bf16.mxu1 %v12258_v30  ;;  %v1979_v30 = vld [vmem:[#allocation21 + $0x770] sm:$0xff] }
 0x5df   : > { %v12319_v45 = vcombine.low %v1975_v29, %v1979_v30 }
 0x5e0   : > { %3535 = vmatpush1.bf16.msra.mxu0 %v12255_v53  ;;  %v12320_v53 = vcombine.high %v1975_v29, %v1979_v30 }
 0x5e1   : > { %3617 = vmatpush1.bf16.msra.mxu1 %v12257_v54  ;;  %3536 = vmatprep.subr.bf16.mxu0 %v12264_v55  ;;  %v12322_v54 = vcombine.high %v1976_v35, %v1980_v38  ;;  %v1983_v55 = vld [vmem:[#allocation21 + $0x790] sm:$0xff] }
 0x5e2   : > { %3618 = vmatprep.subr.bf16.mxu1 %v12266_v58  ;;  %v1987_v58 = vld [vmem:[#allocation21 + $0x7b0] sm:$0xff] }
 0x5e3   : > { %v12327_v52 = vcombine.low %v1983_v55, %v1987_v58 }
 0x5e4   : > { %3537 = vmatpush1.bf16.msra.mxu0 %v12263_v47  ;;  %v12328_v47 = vcombine.high %v1983_v55, %v1987_v58 }
 0x5e5   : > { %3619 = vmatpush1.bf16.msra.mxu1 %v12265_v48  ;;  %3538 = vmatprep.subr.bf16.mxu0 %v12272_v49  ;;  %v12330_v48 = vcombine.high %v1984_v59, %v1988_v44  ;;  %v1991_v49 = vld [vmem:[#allocation21 + $0x7d0] sm:$0xff] }
 0x5e6   : > { %3620 = vmatprep.subr.bf16.mxu1 %v12274_v34  ;;  %v1995_v34 = vld [vmem:[#allocation21 + $0x7f0] sm:$0xff] }
 0x5e8   : > { %3539 = vmatpush1.bf16.msra.mxu0 %v12271_v60  ;;  %v12336_v60 = vcombine.high %v1991_v49, %v1995_v34 }
 0x5e9   : > { %3621 = vmatpush1.bf16.msra.mxu1 %v12273_v62  ;;  %3540 = vmatprep.subr.bf16.mxu0 %v12280_v0  ;;  %v12338_v62 = vcombine.high %v1992_v50, %v1996_v51  ;;  %v12335_v0 = vcombine.low %v1991_v49, %v1995_v34 }
 0x5ea   : > { %3622 = vmatprep.subr.bf16.mxu1 %v12282_v1  ;;  %v12337_v1 = vcombine.low %v1992_v50, %v1996_v51 }
 0x5ec   : > { %3541 = vmatpush1.bf16.msra.mxu0 %v12279_v20  ;;  %v2014_v20 = vrot.slane %v15247_v31, %v15186_v63 }
 0x5ed   : > { %3623 = vmatpush1.bf16.msra.mxu1 %v12281_v4  ;;  %3542 = vmatprep.subr.bf16.mxu0 %v12288_v5 }
 0x5ee   : > { %3624 = vmatprep.subr.bf16.mxu1 %v12290_v6 }
 0x5f0   : > { %3543 = vmatpush1.bf16.msra.mxu0 %v12287_v32 }
 0x5f1   : > { %3625 = vmatpush1.bf16.msra.mxu1 %v12289_v11  ;;  %3544 = vmatprep.subr.bf16.mxu0 %v12296_v12 }
 0x5f2   : > { %3626 = vmatprep.subr.bf16.mxu1 %v12298_v33 }
 0x5f4   : > { %3545 = vmatpush1.bf16.msra.mxu0 %v12295_v17 }
 0x5f5   : > { %3627 = vmatpush1.bf16.msra.mxu1 %v12297_v18  ;;  %3546 = vmatprep.subr.bf16.mxu0 %v12304_v26 }
 0x5f6   : > { %3628 = vmatprep.subr.bf16.mxu1 %v12306_v19 }
 0x5f8   : > { %3547 = vmatpush1.bf16.msra.mxu0 %v12303_v24 }
 0x5f9   : > { %3629 = vmatpush1.bf16.msra.mxu1 %v12305_v25  ;;  %3548 = vmatprep.subr.bf16.mxu0 %v12312_v27 }
 0x5fa   : > { %3630 = vmatprep.subr.bf16.mxu1 %v12314_v28 }
 0x5fc   : > { %3549 = vmatpush1.bf16.msra.mxu0 %v12311_v39 }
 0x5fd   : > { %3631 = vmatpush1.bf16.msra.mxu1 %v12313_v42  ;;  %3550 = vmatprep.subr.bf16.mxu0 %v12320_v53 }
 0x5fe   : > { %3632 = vmatprep.subr.bf16.mxu1 %v12322_v54 }
 0x600   : > { %3551 = vmatpush1.bf16.msra.mxu0 %v12319_v45 }
 0x601   : > { %3633 = vmatpush1.bf16.msra.mxu1 %v12321_v46  ;;  %3552 = vmatprep.subr.bf16.mxu0 %v12328_v47 }
 0x602   : > { %3634 = vmatprep.subr.bf16.mxu1 %v12330_v48 }
 0x604   : > { %3553 = vmatpush1.bf16.msra.mxu0 %v12327_v52 }
 0x605   : > { %3635 = vmatpush1.bf16.msra.mxu1 %v12329_v56  ;;  %3554 = vmatprep.subr.bf16.mxu0 %v12336_v60 }
 0x606   : > { %3636 = vmatprep.subr.bf16.mxu1 %v12338_v62 }
 0x608   : > { %3555 = vmatpush1.bf16.msra.mxu0 %v12335_v0 }
 0x609   : > { %3637 = vmatpush1.bf16.msra.mxu1 %v12337_v1 }
 0x60b   : > { %3557 = vmatmul.mubr.bf16.vlgmr.msra.gmra.mrb[12].mxu0 %v15235_v57 }
 0x60c   : > { %3639 = vmatmul.mubr.bf16.vlgmr.msra.gmra.mrb[12].mxu1 %v15235_v57 }
 0x65e   : > { %v3394_v4 = vpop.f32.mrb[8].mxu0  ;;  %v3476_v5 = vpop.f32.mrb[8].mxu1 }
 0x65f   : > { %v13386_v6 = vadd.f32 %v3394_v4, %v2002_v37  ;;  %v13388_v7 = vadd.f32 %v3476_v5, %v2010_v2  ;;  %v3396_v8 = vpop.f32.mrb[9].mxu0  ;;  %v3478_v57 = vpop.f32.mrb[9].mxu1 }
 0x660   : > { %v13387_v9 = vadd.f32 %v3396_v8, %v2006_v3  ;;  %v13389_v10 = vadd.f32 %v3478_v57, %v2014_v20  ;;  %v3398_v32 = vpop.f32.mrb[10].mxu0  ;;  %v3480_v11 = vpop.f32.mrb[10].mxu1 }
 0x661   : > { %v3647_v12 = vmul.f32 0.2, %v13386_v6  ;;  %v3649_v33 = vmul.f32 0.2, %v13388_v7  ;;  %v3399_v13 = vpop.f32.mrb[11].mxu0  ;;  %v3481_v14 = vpop.f32.mrb[11].mxu1 }
 0x662   : > { %v3648_v15 = vmul.f32 0.2, %v13387_v9  ;;  %v3650_v16 = vmul.f32 0.2, %v13389_v10 }
 0x663   : > { %v3655_v17 = vmax.f32 %v13386_v6, %v3647_v12  ;;  %v3657_v18 = vmax.f32 %v13388_v7, %v3649_v33 }
 0x664   : > { %v3656_v26 = vmax.f32 %v13387_v9, %v3648_v15  ;;  %v3658_v19 = vmax.f32 %v13389_v10, %v3650_v16 }
 0x665   : > { %v3663_v21 = vsel %vm1031_vm2, %v3655_v17, 0.0  ;;  %v3677_v36 = vsel %vm1031_vm2, %v3657_v18, 0.0 }
 0x666   : > { %v3664_v22 = vrot.slane %v3663_v21, 4  ;;  %v3678_v23 = vrot.slane %v3677_v36, 4  ;;  %v3670_v24 = vsel %vm1031_vm2, %v3656_v26, 0.0  ;;  %v3684_v25 = vsel %vm1031_vm2, %v3658_v19, 0.0 }
 0x667   : > { %v3671_v27 = vrot.slane %v3670_v24, 4  ;;  %v3685_v28 = vrot.slane %v3684_v25, 4 }
 0x668   : > { %v3665_v29 = vadd.f32 %v3664_v22, %v3663_v21  ;;  %v3679_v30 = vadd.f32 %v3678_v23, %v3677_v36 }
 0x669   : > { %v3672_v35 = vadd.f32 %v3671_v27, %v3670_v24  ;;  %v3686_v38 = vadd.f32 %v3685_v28, %v3684_v25 }
 0x66a   : > { %v3666_v39 = vrot.slane %v3665_v29, 2  ;;  %v3680_v42 = vrot.slane %v3679_v30, 2 }
 0x66b   : > { %v3673_v53 = vrot.slane %v3672_v35, 2  ;;  %v3687_v54 = vrot.slane %v3686_v38, 2 }
 0x66c   : > { %v3667_v55 = vadd.f32 %v3666_v39, %v3665_v29  ;;  %v3681_v58 = vadd.f32 %v3680_v42, %v3679_v30 }
 0x66d   : > { %v3674_v59 = vadd.f32 %v3673_v53, %v3672_v35  ;;  %v3688_v44 = vadd.f32 %v3687_v54, %v3686_v38 }
 0x66e   : > { %v3668_v45 = vrot.slane %v3667_v55, 1  ;;  %v3682_v46 = vrot.slane %v3681_v58, 1 }
 0x66f   : > { %v3675_v47 = vrot.slane %v3674_v59, 1  ;;  %v3689_v48 = vrot.slane %v3688_v44, 1 }
 0x670   : > { %v3669_v49 = vadd.f32 %v3668_v45, %v3667_v55  ;;  %v3683_v34 = vadd.f32 %v3682_v46, %v3681_v58  ;;  %v14534_v46 = vmov 1966171168  }
 0x671   : > { %v3676_v50 = vadd.f32 %v3675_v47, %v3674_v59  ;;  %v3690_v51 = vadd.f32 %v3689_v48, %v3688_v44  ;;  %v15273_v59 = vld [vmem:[#allocation24] sm:$0xff]  ;;  %v15275_v44 = vld [vmem:[#allocation26] sm:$0xff]  ;;  %v3952_v47 = vunpack.c.l.s4 %v14534_v46 }
 0x672   : > { %v3719_v52 = vmul.f32 0.5, %v3669_v49  ;;  %v3721_v56 = vmul.f32 0.5, %v3683_v34  ;;  %v3836_v45 = vrot.slane %v15273_v59, %v15145_v41  ;;  %v3844_v49 = vrot.slane %v15273_v59, %v15183_v61 }
 0x673   : > { %v3720_v60 = vmul.f32 0.5, %v3676_v50  ;;  %v3722_v62 = vmul.f32 0.5, %v3690_v51  ;;  %v3886_v51 = vrot.slane %v15275_v44, %v15145_v41 }
 0x674   : > { %v3727_v0 = vsub.f32 %v3655_v17, %v3719_v52  ;;  %v3729_v1 = vsub.f32 %v3657_v18, %v3721_v56  ;;  %v3840_v52 = vrot.slane %v15273_v59, %v15148_v43 }
 0x675   : > { %v15261_v37 = vsub.f32 %v3656_v26, %v3720_v60  ;;  %v15263_v2 = vsub.f32 %v3658_v19, %v3722_v62  ;;  %v3894_v62 = vrot.slane %v15275_v44, %v15183_v61 }
 0x676   : > { %v3735_v3 = vmul.f32 %v3727_v0, %v3727_v0  ;;  %v3737_v20 = vmul.f32 %v3729_v1, %v3729_v1 }
 0x677   : > { %v3736_v4 = vmul.f32 %v15261_v37, %v15261_v37  ;;  %v3738_v5 = vmul.f32 %v15263_v2, %v15263_v2 }
 0x678   : > { %v3743_v6 = vsel %vm1031_vm2, %v3735_v3, 0.0  ;;  %v3757_v7 = vsel %vm1031_vm2, %v3737_v20, 0.0  ;;  %v3848_v3 = vrot.slane %v15273_v59, %v15186_v63 }
 0x679   : > { %v3744_v8 = vrot.slane %v3743_v6, 4  ;;  %v3758_v57 = vrot.slane %v3757_v7, 4  ;;  %v3750_v9 = vsel %vm1031_vm2, %v3736_v4, 0.0  ;;  %v3764_v10 = vsel %vm1031_vm2, %v3738_v5, 0.0 }
 0x67a   : > { %v3751_v32 = vrot.slane %v3750_v9, 4  ;;  %v3765_v11 = vrot.slane %v3764_v10, 4 }
 0x67b   : > { %v3745_v12 = vadd.f32 %v3744_v8, %v3743_v6  ;;  %v3759_v33 = vadd.f32 %v3758_v57, %v3757_v7  ;;  %v3953_v6 = vunpack.c.0.s8 %v3952_v47 }
 0x67c   : > { %v3752_v13 = vadd.f32 %v3751_v32, %v3750_v9  ;;  %v3766_v14 = vadd.f32 %v3765_v11, %v3764_v10 }
 0x67d   : > { %v3746_v15 = vrot.slane %v3745_v12, 2  ;;  %v3760_v16 = vrot.slane %v3759_v33, 2  ;;  %v15296_v32 = vsub.s32 %v3953_v6, %v15142_v40 }
 0x67e   : > { %v3753_v17 = vrot.slane %v3752_v13, 2  ;;  %v3767_v18 = vrot.slane %v3766_v14, 2 }
 0x67f   : > { %v3747_v26 = vadd.f32 %v3746_v15, %v3745_v12  ;;  %v3761_v19 = vadd.f32 %v3760_v16, %v3759_v33  ;;  %v15316_v15 = vsub.s32 7, %v15142_v40 }
 0x680   : > { %v3754_v21 = vadd.f32 %v3753_v17, %v3752_v13  ;;  %v3768_v36 = vadd.f32 %v3767_v18, %v3766_v14  ;;  %v15310_v13 = vsub.s32 6, %v15142_v40  ;;  %v15313_v14 = vsub.s32 5, %v15142_v40 }
 0x681   : > { %v3748_v22 = vrot.slane %v3747_v26, 1  ;;  %v3762_v23 = vrot.slane %v3761_v19, 1 }
 0x682   : > { %v3755_v24 = vrot.slane %v3754_v21, 1  ;;  %v3769_v25 = vrot.slane %v3768_v36, 1  ;;  %v2026_v17 = vrot.slane %v15247_v31, %v15310_v13  ;;  %v2022_v18 = vrot.slane %v15247_v31, %v15313_v14 }
 0x683   : > { %v3749_v27 = vadd.f32 %v3748_v22, %v3747_v26  ;;  %v3763_v28 = vadd.f32 %v3762_v23, %v3761_v19  ;;  %v2030_v26 = vrot.slane %v15247_v31, %v15316_v15 }
 0x684   : > { %v3756_v29 = vadd.f32 %v3755_v24, %v3754_v21  ;;  %v3770_v30 = vadd.f32 %v3769_v25, %v3768_v36 }
 0x685   : > { %v3799_v35 = vmul.f32 0.5, %v3749_v27  ;;  %v3801_v38 = vmul.f32 0.5, %v3763_v28 }
 0x686   : > { %v3800_v39 = vmul.f32 0.5, %v3756_v29  ;;  %v3802_v42 = vmul.f32 0.5, %v3770_v30 }
 0x687   : > { %v3807_v53 = vadd.f32 0.8, %v3799_v35  ;;  %v3809_v54 = vadd.f32 0.8, %v3801_v38 }
 0x688   : > { %v3808_v55 = vadd.f32 0.8, %v3800_v39  ;;  %v3810_v58 = vadd.f32 0.8, %v3802_v42 }
 0x689   : > { %13874 = vrsqrt.f32 %v3807_v53 }
 0x68a   : > { %13876 = vrsqrt.f32 %v3809_v54 }
 0x68b   : > { %13878 = vrsqrt.f32 %v3808_v55 }
 0x68c   : > { %13880 = vrsqrt.f32 %v3810_v58 }
 0x693   : > { %v13875_v48 = vpop.eup %13874 }
 0x694   : > { %v13877_v34 = vpop.eup %13876  ;;  %v3823_v50 = vmul.f32 %v13875_v48, %v3727_v0  ;;  %v3890_v0 = vrot.slane %v15275_v44, %v15148_v43 }
 0x695   : > { %v13879_v56 = vpop.eup %13878  ;;  %v3825_v60 = vmul.f32 %v13877_v34, %v3729_v1  ;;  %v3898_v1 = vrot.slane %v15275_v44, %v15186_v63 }
 0x696   : > { %v13881_v20 = vpop.eup %13880  ;;  %v3873_v4 = vmul.f32 %v3836_v45, %v3823_v50  ;;  %v3824_v5 = vmul.f32 %v13879_v56, %v15261_v37 }
 0x697   : > { %v3875_v41 = vmul.f32 %v3844_v49, %v3825_v60  ;;  %v3826_v7 = vmul.f32 %v13881_v20, %v15263_v2  ;;  %v15307_v2 = vsub.s32 4, %v15142_v40 }
 0x698   : > { %v3923_v8 = vadd.f32 %v3886_v51, %v3873_v4  ;;  %v3874_v57 = vmul.f32 %v3840_v52, %v3824_v5 }
 0x699   : > { %v3925_v61 = vadd.f32 %v3894_v62, %v3875_v41  ;;  %v3876_v9 = vmul.f32 %v3848_v3, %v3826_v7  ;;  %v2018_v16 = vrot.slane %v15247_v31, %v15307_v2 }
 0x69a   : > { %v3924_v10 = vadd.f32 %v3890_v0, %v3874_v57 }
 0x69b   : > { %v3926_v11 = vadd.f32 %v3898_v1, %v3876_v9 }
 0x69c   : > { %v12339_v37 = vpack.c.bf16 %v3924_v10, %v3923_v8 }
 0x69d   : > { %v12340_v12 = vpack.c.bf16 %v3926_v11, %v3925_v61 }
 0x69e   : > { %v15299_v43 = vrot.slane %v12339_v37, %v15296_v32 }
 0x69f   : > { %v15302_v33 = vrot.slane %v12340_v12, %v15296_v32 }
 0x6a1   : > { %v3979_v63 = vcombine.low %v15299_v43, %v15302_v33 }
 0x6de   : > { %v3558_v19 = vpop.f32.mrb[12].mxu0 }
 0x6df   : > { %v13390_v21 = vadd.f32 %v3558_v19, %v2018_v16  ;;  %v3640_v36 = vpop.f32.mrb[12].mxu1  ;;  %v3560_v22 = vpop.f32.mrb[13].mxu0 }
 0x6e0   : > { %v13392_v23 = vadd.f32 %v3640_v36, %v2026_v17  ;;  %v13391_v24 = vadd.f32 %v3560_v22, %v2022_v18  ;;  %v3642_v40 = vpop.f32.mrb[13].mxu1  ;;  %v3562_v25 = vpop.f32.mrb[14].mxu0 }
 0x6e1   : > { %v3651_v27 = vmul.f32 0.2, %v13390_v21  ;;  %v13393_v28 = vadd.f32 %v3642_v40, %v2030_v26  ;;  %v3644_v29 = vpop.f32.mrb[14].mxu1  ;;  %v3563_v30 = vpop.f32.mrb[15].mxu0 }
 0x6e2   : > { %v3653_v35 = vmul.f32 0.2, %v13392_v23  ;;  %v3652_v38 = vmul.f32 0.2, %v13391_v24  ;;  %v3645_v39 = vpop.f32.mrb[15].mxu1 }
 0x6e3   : > { %v3659_v42 = vmax.f32 %v13390_v21, %v3651_v27  ;;  %v3654_v53 = vmul.f32 0.2, %v13393_v28 }
 0x6e4   : > { %v3661_v54 = vmax.f32 %v13392_v23, %v3653_v35  ;;  %v3660_v55 = vmax.f32 %v13391_v24, %v3652_v38 }
 0x6e5   : > { %v3691_v31 = vsel %vm1031_vm2, %v3659_v42, 0.0  ;;  %v3662_v58 = vmax.f32 %v13393_v28, %v3654_v53 }
 0x6e6   : > { %v3692_v45 = vrot.slane %v3691_v31, 4  ;;  %v3705_v46 = vsel %vm1031_vm2, %v3661_v54, 0.0  ;;  %v3698_v47 = vsel %vm1031_vm2, %v3660_v55, 0.0 }
 0x6e7   : > { %v3706_v48 = vrot.slane %v3705_v46, 4  ;;  %v3699_v49 = vrot.slane %v3698_v47, 4  ;;  %v3712_v34 = vsel %vm1031_vm2, %v3662_v58, 0.0 }
 0x6e8   : > { %v3693_v50 = vadd.f32 %v3692_v45, %v3691_v31  ;;  %v3713_v51 = vrot.slane %v3712_v34, 4 }
 0x6e9   : > { %v3707_v52 = vadd.f32 %v3706_v48, %v3705_v46  ;;  %v3700_v56 = vadd.f32 %v3699_v49, %v3698_v47 }
 0x6ea   : > { %v3694_v60 = vrot.slane %v3693_v50, 2  ;;  %v3714_v62 = vadd.f32 %v3713_v51, %v3712_v34 }
 0x6eb   : > { %v3708_v3 = vrot.slane %v3707_v52, 2  ;;  %v3701_v20 = vrot.slane %v3700_v56, 2 }
 0x6ec   : > { %v3695_v4 = vadd.f32 %v3694_v60, %v3693_v50  ;;  %v3715_v5 = vrot.slane %v3714_v62, 2 }
 0x6ed   : > { %v3709_v0 = vadd.f32 %v3708_v3, %v3707_v52  ;;  %v3702_v6 = vadd.f32 %v3701_v20, %v3700_v56 }
 0x6ee   : > { %v3696_v41 = vrot.slane %v3695_v4, 1  ;;  %v3716_v7 = vadd.f32 %v3715_v5, %v3714_v62 }
 0x6ef   : > { %v3710_v1 = vrot.slane %v3709_v0, 1  ;;  %v3703_v8 = vrot.slane %v3702_v6, 1 }
 0x6f0   : > { %v3697_v57 = vadd.f32 %v3696_v41, %v3695_v4  ;;  %v3717_v61 = vrot.slane %v3716_v7, 1 }
 0x6f1   : > { %v3711_v9 = vadd.f32 %v3710_v1, %v3709_v0  ;;  %v3704_v10 = vadd.f32 %v3703_v8, %v3702_v6  ;;  %v3852_v8 = vrot.slane %v15273_v59, %v15307_v2 }
 0x6f2   : > { %v3723_v11 = vmul.f32 0.5, %v3697_v57  ;;  %v3718_v37 = vadd.f32 %v3717_v61, %v3716_v7  ;;  %v3860_v61 = vrot.slane %v15273_v59, %v15310_v13 }
 0x6f3   : > { %v3725_v12 = vmul.f32 0.5, %v3711_v9  ;;  %v3724_v16 = vmul.f32 0.5, %v3704_v10 }
 0x6f4   : > { %v3731_v17 = vsub.f32 %v3659_v42, %v3723_v11  ;;  %v3726_v18 = vmul.f32 0.5, %v3718_v37  ;;  %v3902_v11 = vrot.slane %v15275_v44, %v15307_v2  ;;  %v3856_v37 = vrot.slane %v15273_v59, %v15313_v14 }
 0x6f5   : > { %v3733_v26 = vsub.f32 %v3661_v54, %v3725_v12  ;;  %v3732_v19 = vsub.f32 %v3660_v55, %v3724_v16  ;;  %v3914_v2 = vrot.slane %v15275_v44, %v15316_v15 }
 0x6f6   : > { %v3739_v21 = vmul.f32 %v3731_v17, %v3731_v17  ;;  %v3734_v36 = vsub.f32 %v3662_v58, %v3726_v18  ;;  %v3910_v18 = vrot.slane %v15275_v44, %v15310_v13 }
 0x6f7   : > { %v3741_v22 = vmul.f32 %v3733_v26, %v3733_v26  ;;  %v3740_v23 = vmul.f32 %v3732_v19, %v3732_v19 }
 0x6f8   : > { %v3771_v24 = vsel %vm1031_vm2, %v3739_v21, 0.0  ;;  %v3742_v40 = vmul.f32 %v3734_v36, %v3734_v36  ;;  %v3864_v21 = vrot.slane %v15273_v59, %v15316_v15 }
 0x6f9   : > { %v3772_v25 = vrot.slane %v3771_v24, 4  ;;  %v3785_v27 = vsel %vm1031_vm2, %v3741_v22, 0.0  ;;  %v3778_v28 = vsel %vm1031_vm2, %v3740_v23, 0.0 }
 0x6fa   : > { %v3786_v29 = vrot.slane %v3785_v27, 4  ;;  %v3779_v30 = vrot.slane %v3778_v28, 4  ;;  %v3792_v35 = vsel %vm1031_vm2, %v3742_v40, 0.0 }
 0x6fb   : > { %v3773_v38 = vadd.f32 %v3772_v25, %v3771_v24  ;;  %v3793_v39 = vrot.slane %v3792_v35, 4 }
 0x6fc   : > { %v3787_v42 = vadd.f32 %v3786_v29, %v3785_v27  ;;  %v3780_v53 = vadd.f32 %v3779_v30, %v3778_v28 }
 0x6fd   : > { %v3774_v54 = vrot.slane %v3773_v38, 2  ;;  %v3794_v55 = vadd.f32 %v3793_v39, %v3792_v35 }
 0x6fe   : > { %v3788_v31 = vrot.slane %v3787_v42, 2  ;;  %v3781_v58 = vrot.slane %v3780_v53, 2 }
 0x6ff   : > { %v3775_v45 = vadd.f32 %v3774_v54, %v3773_v38  ;;  %v3795_v46 = vrot.slane %v3794_v55, 2 }
 0x700   : > { %v3789_v47 = vadd.f32 %v3788_v31, %v3787_v42  ;;  %v3782_v48 = vadd.f32 %v3781_v58, %v3780_v53 }
 0x701   : > { %v3776_v49 = vrot.slane %v3775_v45, 1  ;;  %v3796_v34 = vadd.f32 %v3795_v46, %v3794_v55 }
 0x702   : > { %v3790_v50 = vrot.slane %v3789_v47, 1  ;;  %v3783_v51 = vrot.slane %v3782_v48, 1 }
 0x703   : > { %v3777_v52 = vadd.f32 %v3776_v49, %v3775_v45  ;;  %v3797_v56 = vrot.slane %v3796_v34, 1 }
 0x704   : > { %v3791_v60 = vadd.f32 %v3790_v50, %v3789_v47  ;;  %v3784_v62 = vadd.f32 %v3783_v51, %v3782_v48 }
 0x705   : > { %v3803_v3 = vmul.f32 0.5, %v3777_v52  ;;  %v3798_v20 = vadd.f32 %v3797_v56, %v3796_v34 }
 0x706   : > { %v3805_v4 = vmul.f32 0.5, %v3791_v60  ;;  %v3804_v5 = vmul.f32 0.5, %v3784_v62 }
 0x707   : > { %v3811_v0 = vadd.f32 0.8, %v3803_v3  ;;  %v3806_v6 = vmul.f32 0.5, %v3798_v20 }
 0x708   : > { %v3813_v41 = vadd.f32 0.8, %v3805_v4  ;;  %v3812_v7 = vadd.f32 0.8, %v3804_v5 }
 0x709   : > { %13882 = vrsqrt.f32 %v3811_v0  ;;  %v3814_v1 = vadd.f32 0.8, %v3806_v6 }
 0x70a   : > { %13884 = vrsqrt.f32 %v3813_v41 }
 0x70b   : > { %13886 = vrsqrt.f32 %v3812_v7 }
 0x70c   : > { %13888 = vrsqrt.f32 %v3814_v1 }
 0x713   : > { %v13883_v57 = vpop.eup %13882 }
 0x714   : > { %v13885_v9 = vpop.eup %13884  ;;  %v3827_v10 = vmul.f32 %v13883_v57, %v3731_v17  ;;  %v3906_v17 = vrot.slane %v15275_v44, %v15313_v14  ;;  %v3987_v14 = vrot.slane %v3979_v63, %v15296_v32 }
 0x715   : > { %v13887_v12 = vpop.eup %13886  ;;  %v3829_v16 = vmul.f32 %v13885_v9, %v3733_v26 }
 0x716   : > { %v13889_v22 = vpop.eup %13888  ;;  %v3877_v23 = vmul.f32 %v3852_v8, %v3827_v10  ;;  %v3828_v24 = vmul.f32 %v13887_v12, %v3732_v19 }
 0x717   : > { %v3879_v40 = vmul.f32 %v3860_v61, %v3829_v16  ;;  %v3830_v25 = vmul.f32 %v13889_v22, %v3734_v36 }
 0x718   : > { %v3927_v27 = vadd.f32 %v3902_v11, %v3877_v23  ;;  %v3878_v28 = vmul.f32 %v3856_v37, %v3828_v24 }
 0x719   : > { %v3929_v26 = vadd.f32 %v3910_v18, %v3879_v40  ;;  %v3880_v29 = vmul.f32 %v3864_v21, %v3830_v25 }
 0x71a   : > { %v3928_v30 = vadd.f32 %v3906_v17, %v3878_v28 }
 0x71b   : > { %v3930_v13 = vadd.f32 %v3914_v2, %v3880_v29 }
 0x71c   : > { %v12341_v35 = vpack.c.bf16 %v3928_v30, %v3927_v27 }
 0x71d   : > { %v12342_v38 = vpack.c.bf16 %v3930_v13, %v3929_v26 }
 0x71e   : > { %v3971_v59 = vrot.slane %v12341_v35, %v15296_v32 }
 0x71f   : > { %v3978_v19 = vrot.slane %v12342_v38, %v15296_v32 }
 0x721   : > { %v3980_v39 = vcombine.low %v3971_v59, %v3978_v19 }
 0x723   : > { %v3994_v44 = vrot.slane %v3980_v39, %v15296_v32 }
 0x725   : > { %v3995_v15 = vcombine.low %v3987_v14, %v3994_v44 }
 0x727   : > { %3997 = vst [vmem:[#allocation2] sm:$0xff] %v3995_v15 }
 0x728 PF: > { %v3999_v36 = vld [vmem:[%s15112_s5] sm:$0xff]  ;;  %v4000_v43 = vld [vmem:[%s15112_s5 + $0x8] sm:$0xff]  ;;  %v5027_v8 = vlaneseq  ;;  %v14535_v57 = vmov 1966171168   ;;  %s13374_s6 = sshll.u32 %s14649_s0, 9  ;;  %s11720_s9 = sshll.u32 %s15122_s12, 4  ;;  %s16564_s9 = int_to_ptr.vmem [resolvable:$true] %s11720_s9 }
 0x729   : > { %v4007_v42 = vld [vmem:[%s15112_s5 + $0x40] sm:$0xff]  ;;  %v4008_v32 = vld [vmem:[%s15112_s5 + $0x48] sm:$0xff]  ;;  %v5110_v61 = vunpack.c.l.s4 %v14535_v57  ;;  %s16720_s3 = sld [smem:[#allocation61_spill]]  ;;  %s11706_s2 = scalar_lea.sflag [#allocation5], %s15109_s8 }
 0x72a   : > { %v12344_v33 = vcombine.high %v3999_v36, %v4007_v42  ;;  %v12343_v63 = vcombine.low %v3999_v36, %v4007_v42  ;;  %v4015_v53 = vld [vmem:[%s15112_s5 + $0x80] sm:$0xff]  ;;  %v12346_v55 = vcombine.high %v4000_v43, %v4008_v32  ;;  %v12345_v31 = vcombine.low %v4000_v43, %v4008_v32  ;;  %v4016_v45 = vld [vmem:[%s15112_s5 + $0x88] sm:$0xff]  ;;  %s14404_s14 = scalar_lea.vmem %s16564_s9, 512  ;;  %p16721_p11 = scmp.ne.s32.totalorder %s16681_s20, 0 }
 0x72b   : > { %v4023_v54 = vld [vmem:[%s15112_s5 + $0xc0] sm:$0xff]  ;;  %v4024_v46 = vld [vmem:[%s15112_s5 + $0xc8] sm:$0xff]  ;;  %v15379_v22 = vshrl.u32 %v5027_v8, 7  ;;  %v5111_v23 = vunpack.c.0.s8 %v5110_v61  ;;  %p14405_p0 = scmp.ne.s32.totalorder %s16564_s9, %s14404_s14  ;;  %s14537_s0 = smov [#allocation30]  }
 0x72c   : > { %v12360_v58 = vcombine.high %v4015_v53, %v4023_v54  ;;  %v4031_v47 = vld [vmem:[%s15112_s5 + $0x100] sm:$0xff]  ;;  %10285 = vmatprep.subr.bf16.mxu0 %v12344_v33  ;;  %v12362_v48 = vcombine.high %v4016_v45, %v4024_v46  ;;  %v4032_v34 = vld [vmem:[%s15112_s5 + $0x108] sm:$0xff]  ;;  %10449 = vmatprep.subr.bf16.mxu1 %v12346_v55  ;;  %v12359_v51 = vcombine.low %v4015_v53, %v4023_v54  ;;  %s14408_s21 = sshll.u32 %s14537_s0, 4  ;;  %s14409_s21 = int_to_ptr.vmem [resolvable:$false] %s14408_s21 }
 0x72d   : > { %v4039_v49 = vld [vmem:[%s15112_s5 + $0x140] sm:$0xff]  ;;  %v4040_v50 = vld [vmem:[%s15112_s5 + $0x148] sm:$0xff]  ;;  %10286 = vmatpush1.bf16.msra.mxu0 %v12343_v63  ;;  %10450 = vmatpush1.bf16.msra.mxu1 %v12345_v31  ;;  %v12361_v52 = vcombine.low %v4016_v45, %v4024_v46  ;;  %v15386_v29 = vsub.s32 %v5111_v23, %v15379_v22  ;;  %p14406_p2 = pnand %p14405_p0, %p16721_p11  ;;  %s14410_s18 = scalar_lea.vmem %s14409_s21, 1024 }
 0x72e   : > { %10287 = vmatprep.subr.bf16.mxu0 %v12360_v58  ;;  %v12376_v56 = vcombine.high %v4031_v47, %v4039_v49  ;;  %10451 = vmatprep.subr.bf16.mxu1 %v12362_v48  ;;  %v12378_v60 = vcombine.high %v4032_v34, %v4040_v50  ;;  %v4047_v62 = vld [vmem:[%s15112_s5 + $0x180] sm:$0xff]  ;;  %v4048_v20 = vld [vmem:[%s15112_s5 + $0x188] sm:$0xff]  ;;  %v12375_v5 = vcombine.low %v4031_v47, %v4039_v49  ;;  %p14411_p8 = scmp.lt.s32.totalorder %s16564_s9, %s14409_s21  ;;  %p14412_p5 = scmp.lt.s32.totalorder %s14410_s18, %s14404_s14 }
 0x72f   : > { %v4055_v3 = vld [vmem:[%s15112_s5 + $0x1c0] sm:$0xff]  ;;  %v4056_v4 = vld [vmem:[%s15112_s5 + $0x1c8] sm:$0xff]  ;;  %v12377_v0 = vcombine.low %v4032_v34, %v4040_v50  ;;  %s16562_s4 = scalar_lea.hbm %s16720_s3, %s13374_s6  ;;  %p14407_p9 = pneg %p14406_p2 }
 0x730   : > { %v12392_v6 = vcombine.high %v4047_v62, %v4055_v3  ;;  %v12394_v41 = vcombine.high %v4048_v20, %v4056_v4  ;;  %v4063_v7 = vld [vmem:[%s15112_s5 + $0x200] sm:$0xff]  ;;  %v4064_v9 = vld [vmem:[%s15112_s5 + $0x208] sm:$0xff]  ;;  %v12391_v11 = vcombine.low %v4047_v62, %v4055_v3  ;;  %v12393_v37 = vcombine.low %v4048_v20, %v4056_v4  ;;  %p14413_p7 = por %p14412_p5, %p14411_p8 }
 0x731   : > { %10288 = vmatpush1.bf16.msra.mxu0 %v12359_v51  ;;  %10452 = vmatpush1.bf16.msra.mxu1 %v12361_v52  ;;  %v4071_v1 = vld [vmem:[%s15112_s5 + $0x240] sm:$0xff]  ;;  %v4072_v10 = vld [vmem:[%s15112_s5 + $0x248] sm:$0xff] }
 0x732   : > { %10289 = vmatprep.subr.bf16.mxu0 %v12376_v56  ;;  %10453 = vmatprep.subr.bf16.mxu1 %v12378_v60  ;;  %v12408_v12 = vcombine.high %v4063_v7, %v4071_v1  ;;  %v12410_v16 = vcombine.high %v4064_v9, %v4072_v10  ;;  %v4079_v18 = vld [vmem:[%s15112_s5 + $0x280] sm:$0xff]  ;;  %v4080_v24 = vld [vmem:[%s15112_s5 + $0x288] sm:$0xff]  ;;  %v12407_v40 = vcombine.low %v4063_v7, %v4071_v1  ;;  %p14414_p4 = pnand %p14413_p7, %p14407_p9 }
 0x733   : > { %v4087_v21 = vld [vmem:[%s15112_s5 + $0x2c0] sm:$0xff]  ;;  %v4088_v17 = vld [vmem:[%s15112_s5 + $0x2c8] sm:$0xff]  ;;  %v12409_v25 = vcombine.low %v4064_v9, %v4072_v10 }
 0x734   : > { %v12424_v2 = vcombine.high %v4079_v18, %v4087_v21  ;;  %v12426_v27 = vcombine.high %v4080_v24, %v4088_v17  ;;  %v4095_v28 = vld [vmem:[%s15112_s5 + $0x300] sm:$0xff]  ;;  %v4096_v30 = vld [vmem:[%s15112_s5 + $0x308] sm:$0xff]  ;;  %v12423_v35 = vcombine.low %v4079_v18, %v4087_v21  ;;  %v12425_v38 = vcombine.low %v4080_v24, %v4088_v17 }
 0x735   : > { %10290 = vmatpush1.bf16.msra.mxu0 %v12375_v5  ;;  %10454 = vmatpush1.bf16.msra.mxu1 %v12377_v0  ;;  %v4103_v26 = vld [vmem:[%s15112_s5 + $0x340] sm:$0xff]  ;;  %v4104_v13 = vld [vmem:[%s15112_s5 + $0x348] sm:$0xff] }
 0x736   : > { %10291 = vmatprep.subr.bf16.mxu0 %v12392_v6  ;;  %10455 = vmatprep.subr.bf16.mxu1 %v12394_v41  ;;  %v12440_v59 = vcombine.high %v4095_v28, %v4103_v26  ;;  %v15390_v19 = vld [vmem:[#allocation2] sm:$0xff]  ;;  %v12442_v39 = vcombine.high %v4096_v30, %v4104_v13  ;;  %v4112_v36 = vld [vmem:[%s15112_s5 + $0x388] sm:$0xff]  ;;  %v12439_v43 = vcombine.low %v4095_v28, %v4103_v26 }
 0x737   : > { %v4111_v14 = vld [vmem:[%s15112_s5 + $0x380] sm:$0xff]  ;;  %v15396_v15 = vrot.slane %v15390_v19, %v15386_v29  ;;  %v4120_v42 = vld [vmem:[%s15112_s5 + $0x3c8] sm:$0xff]  ;;  %v12441_v32 = vcombine.low %v4096_v30, %v4104_v13 }
 0x738   : > { %v4119_v44 = vld [vmem:[%s15112_s5 + $0x3c0] sm:$0xff]  ;;  %v12458_v53 = vcombine.high %v4112_v36, %v4120_v42  ;;  %v4128_v58 = vld [vmem:[%s15112_s5 + $0x408] sm:$0xff]  ;;  %v12457_v47 = vcombine.low %v4112_v36, %v4120_v42 }
 0x739   : > { %10292 = vmatpush1.bf16.msra.mxu0 %v12391_v11  ;;  %10456 = vmatpush1.bf16.msra.mxu1 %v12393_v37  ;;  %v5123_v33 = vcombine.high %v15396_v15, %v15396_v15  ;;  %v12456_v63 = vcombine.high %v4111_v14, %v4119_v44  ;;  %v4127_v54 = vld [vmem:[%s15112_s5 + $0x400] sm:$0xff]  ;;  %v4136_v45 = vld [vmem:[%s15112_s5 + $0x448] sm:$0xff]  ;;  %v12455_v46 = vcombine.low %v4111_v14, %v4119_v44 }
 0x73a   : > { %10293 = vmatprep.subr.bf16.mxu0 %v12408_v12  ;;  %10457 = vmatprep.subr.bf16.mxu1 %v12410_v16  ;;  %v4135_v55 = vld [vmem:[%s15112_s5 + $0x440] sm:$0xff]  ;;  %v12474_v49 = vcombine.high %v4128_v58, %v4136_v45  ;;  %v4144_v51 = vld [vmem:[%s15112_s5 + $0x488] sm:$0xff]  ;;  %v12473_v60 = vcombine.low %v4128_v58, %v4136_v45 }
 0x73b   : > { %v15405_v31 = vrot.slane %v5123_v33, %v15386_v29  ;;  %v12472_v48 = vcombine.high %v4127_v54, %v4135_v55  ;;  %v4143_v34 = vld [vmem:[%s15112_s5 + $0x480] sm:$0xff]  ;;  %v4152_v52 = vld [vmem:[%s15112_s5 + $0x4c8] sm:$0xff]  ;;  %v12471_v56 = vcombine.low %v4127_v54, %v4135_v55 }
 0x73c   : > { %v4151_v50 = vld [vmem:[%s15112_s5 + $0x4c0] sm:$0xff]  ;;  %v12490_v3 = vcombine.high %v4144_v51, %v4152_v52  ;;  %v4160_v5 = vld [vmem:[%s15112_s5 + $0x508] sm:$0xff]  ;;  %v12489_v41 = vcombine.low %v4144_v51, %v4152_v52  ;;  %v5108_v51 = vcombine.high %v15390_v19, %v15390_v19 }
 0x73d   : > { %10294 = vmatpush1.bf16.msra.mxu0 %v12407_v40  ;;  %10458 = vmatpush1.bf16.msra.mxu1 %v12409_v25  ;;  %v12488_v62 = vcombine.high %v4143_v34, %v4151_v50  ;;  %v4159_v20 = vld [vmem:[%s15112_s5 + $0x500] sm:$0xff]  ;;  %v4168_v0 = vld [vmem:[%s15112_s5 + $0x548] sm:$0xff]  ;;  %v12487_v6 = vcombine.low %v4143_v34, %v4151_v50 }
 0x73e   : > { %10295 = vmatprep.subr.bf16.mxu0 %v12424_v2  ;;  %10459 = vmatprep.subr.bf16.mxu1 %v12426_v27  ;;  %v4167_v4 = vld [vmem:[%s15112_s5 + $0x540] sm:$0xff]  ;;  %v12506_v1 = vcombine.high %v4160_v5, %v4168_v0  ;;  %v4176_v61 = vld [vmem:[%s15112_s5 + $0x588] sm:$0xff]  ;;  %v12505_v11 = vcombine.low %v4160_v5, %v4168_v0 }
 0x73f   : > { %10317 = vmatprep.mubr.bf16.mxu0 %v15405_v31  ;;  %10481 = vmatprep.mubr.bf16.mxu1 %v15405_v31  ;;  %v12504_v7 = vcombine.high %v4159_v20, %v4167_v4  ;;  %v4175_v8 = vld [vmem:[%s15112_s5 + $0x580] sm:$0xff]  ;;  %v4184_v9 = vld [vmem:[%s15112_s5 + $0x5c8] sm:$0xff]  ;;  %v12503_v10 = vcombine.low %v4159_v20, %v4167_v4  ;;  %v5122_v20 = vrot.slane %v5108_v51, %v15386_v29 }
 0x740   : > { %v4183_v57 = vld [vmem:[%s15112_s5 + $0x5c0] sm:$0xff]  ;;  %v12522_v12 = vcombine.high %v4176_v61, %v4184_v9  ;;  %v4192_v21 = vld [vmem:[%s15112_s5 + $0x608] sm:$0xff]  ;;  %v12521_v17 = vcombine.low %v4176_v61, %v4184_v9  ;;  %v15450_v4 = vrot.slane %v15396_v15, %v15386_v29  ;;  %v15458_v15 = vcombine.high %v15405_v31, %v15405_v31 }
 0x741   : > { %10296 = vmatpush1.bf16.msra.mxu0 %v12423_v35  ;;  %10460 = vmatpush1.bf16.msra.mxu1 %v12425_v38  ;;  %v12520_v37 = vcombine.high %v4175_v8, %v4183_v57  ;;  %v4191_v16 = vld [vmem:[%s15112_s5 + $0x600] sm:$0xff]  ;;  %v4200_v23 = vld [vmem:[%s15112_s5 + $0x648] sm:$0xff]  ;;  %v12519_v24 = vcombine.low %v4175_v8, %v4183_v57  ;;  %v15464_v9 = vrot.slane %v5122_v20, %v15386_v29 }
 0x742   : > { %10297 = vmatprep.subr.bf16.mxu0 %v12440_v59  ;;  %10461 = vmatprep.subr.bf16.mxu1 %v12442_v39  ;;  %v4199_v18 = vld [vmem:[%s15112_s5 + $0x640] sm:$0xff]  ;;  %v12538_v25 = vcombine.high %v4192_v21, %v4200_v23  ;;  %v4208_v28 = vld [vmem:[%s15112_s5 + $0x688] sm:$0xff]  ;;  %v12537_v13 = vcombine.low %v4192_v21, %v4200_v23 }
 0x743   : > { %v12536_v40 = vcombine.high %v4191_v16, %v4199_v18  ;;  %v4207_v2 = vld [vmem:[%s15112_s5 + $0x680] sm:$0xff]  ;;  %v4216_v26 = vld [vmem:[%s15112_s5 + $0x6c8] sm:$0xff]  ;;  %v12535_v30 = vcombine.low %v4191_v16, %v4199_v18 }
 0x744   : > { %v4215_v27 = vld [vmem:[%s15112_s5 + $0x6c0] sm:$0xff]  ;;  %v12554_v38 = vcombine.high %v4208_v28, %v4216_v26  ;;  %v4224_v14 = vld [vmem:[%s15112_s5 + $0x708] sm:$0xff]  ;;  %v12553_v42 = vcombine.low %v4208_v28, %v4216_v26 }
 0x745   : > { %10298 = vmatpush1.bf16.msra.mxu0 %v12439_v43  ;;  %10462 = vmatpush1.bf16.msra.mxu1 %v12441_v32  ;;  %v12552_v35 = vcombine.high %v4207_v2, %v4215_v27  ;;  %v4223_v59 = vld [vmem:[%s15112_s5 + $0x700] sm:$0xff]  ;;  %v4232_v44 = vld [vmem:[%s15112_s5 + $0x748] sm:$0xff]  ;;  %v12551_v36 = vcombine.low %v4207_v2, %v4215_v27 }
 0x746   : > { %10299 = vmatprep.subr.bf16.mxu0 %v12456_v63  ;;  %10463 = vmatprep.subr.bf16.mxu1 %v12458_v53  ;;  %v4231_v39 = vld [vmem:[%s15112_s5 + $0x740] sm:$0xff]  ;;  %v12570_v33 = vcombine.high %v4224_v14, %v4232_v44  ;;  %v4240_v53 = vld [vmem:[%s15112_s5 + $0x788] sm:$0xff]  ;;  %v12569_v58 = vcombine.low %v4224_v14, %v4232_v44 }
 0x747   : > { %v12568_v43 = vcombine.high %v4223_v59, %v4231_v39  ;;  %v4239_v32 = vld [vmem:[%s15112_s5 + $0x780] sm:$0xff]  ;;  %v4248_v54 = vld [vmem:[%s15112_s5 + $0x7c8] sm:$0xff]  ;;  %v12567_v55 = vcombine.low %v4223_v59, %v4231_v39 }
 0x748   : > { %v4247_v63 = vld [vmem:[%s15112_s5 + $0x7c0] sm:$0xff]  ;;  %v4264_v34 = vld [vmem:[%s15112_s5 + $0x848] sm:$0xff]  ;;  %v12585_v52 = vcombine.low %v4240_v53, %v4248_v54 }
 0x749   : > { %10300 = vmatpush1.bf16.msra.mxu0 %v12455_v46  ;;  %10464 = vmatpush1.bf16.msra.mxu1 %v12457_v47  ;;  %v12584_v45 = vcombine.high %v4239_v32, %v4247_v63  ;;  %v12586_v46 = vcombine.high %v4240_v53, %v4248_v54  ;;  %v4255_v47 = vld [vmem:[%s15112_s5 + $0x800] sm:$0xff]  ;;  %v12583_v50 = vcombine.low %v4239_v32, %v4247_v63  ;;  %v4272_v5 = vld [vmem:[%s15112_s5 + $0x888] sm:$0xff] }
 0x74a   : > { %10301 = vmatprep.subr.bf16.mxu0 %v12472_v48  ;;  %10465 = vmatprep.subr.bf16.mxu1 %v12474_v49  ;;  %v4263_v48 = vld [vmem:[%s15112_s5 + $0x840] sm:$0xff]  ;;  %v4256_v49 = vld [vmem:[%s15112_s5 + $0x808] sm:$0xff] }
 0x74b   : > { %v4280_v0 = vld [vmem:[%s15112_s5 + $0x8c8] sm:$0xff]  ;;  %v12599_v19 = vcombine.low %v4255_v47, %v4263_v48  ;;  %v4287_v8 = vld [vmem:[%s15112_s5 + $0x900] sm:$0xff] }
 0x74c   : > { %v4295_v57 = vld [vmem:[%s15112_s5 + $0x940] sm:$0xff]  ;;  %v4304_v23 = vld [vmem:[%s15112_s5 + $0x988] sm:$0xff] }
 0x74d   : > { %10302 = vmatpush1.bf16.msra.mxu0 %v12471_v56  ;;  %10466 = vmatpush1.bf16.msra.mxu1 %v12473_v60  ;;  %v12600_v56 = vcombine.high %v4255_v47, %v4263_v48  ;;  %v12602_v60 = vcombine.high %v4256_v49, %v4264_v34  ;;  %v12632_v16 = vcombine.high %v4287_v8, %v4295_v57  ;;  %v4311_v21 = vld [vmem:[%s15112_s5 + $0x9c0] sm:$0xff]  ;;  %v4320_v26 = vld [vmem:[%s15112_s5 + $0xa08] sm:$0xff] }
 0x74e   : > { %10303 = vmatprep.subr.bf16.mxu0 %v12488_v62  ;;  %10467 = vmatprep.subr.bf16.mxu1 %v12490_v3  ;;  %v4271_v62 = vld [vmem:[%s15112_s5 + $0x880] sm:$0xff]  ;;  %v4336_v44 = vld [vmem:[%s15112_s5 + $0xa88] sm:$0xff] }
 0x74f   : > { %v4279_v3 = vld [vmem:[%s15112_s5 + $0x8c0] sm:$0xff]  ;;  %v4352_v54 = vld [vmem:[%s15112_s5 + $0xb08] sm:$0xff] }
 0x750   : > { %v4319_v27 = vld [vmem:[%s15112_s5 + $0xa00] sm:$0xff] }
 0x751   : > { %10304 = vmatpush1.bf16.msra.mxu0 %v12487_v6  ;;  %10468 = vmatpush1.bf16.msra.mxu1 %v12489_v41  ;;  %v5124_v6 = vcombine.high %v5122_v20, %v5122_v20  ;;  %v12601_v41 = vcombine.low %v4256_v49, %v4264_v34  ;;  %v4327_v28 = vld [vmem:[%s15112_s5 + $0xa40] sm:$0xff]  ;;  %v4368_v34 = vld [vmem:[%s15112_s5 + $0xb88] sm:$0xff] }
 0x752   : > { %10305 = vmatprep.subr.bf16.mxu0 %v12504_v7  ;;  %10469 = vmatprep.subr.bf16.mxu1 %v12506_v1  ;;  %v12616_v7 = vcombine.high %v4271_v62, %v4279_v3  ;;  %v12618_v1 = vcombine.high %v4272_v5, %v4280_v0  ;;  %v4335_v39 = vld [vmem:[%s15112_s5 + $0xa80] sm:$0xff]  ;;  %v4384_v20 = vld [vmem:[%s15112_s5 + $0xc08] sm:$0xff] }
 0x753   : > { %v15461_v61 = vrot.slane %v5124_v6, %v15386_v29  ;;  %v4303_v29 = vld [vmem:[%s15112_s5 + $0x980] sm:$0xff] }
 0x754   : > { %v4343_v14 = vld [vmem:[%s15112_s5 + $0xac0] sm:$0xff] }
 0x755   : > { %10306 = vmatpush1.bf16.msra.mxu0 %v12503_v10  ;;  %10470 = vmatpush1.bf16.msra.mxu1 %v12505_v11  ;;  %v4288_v10 = vld [vmem:[%s15112_s5 + $0x908] sm:$0xff]  ;;  %v4351_v63 = vld [vmem:[%s15112_s5 + $0xb00] sm:$0xff] }
 0x756   : > { %10307 = vmatprep.subr.bf16.mxu0 %v12520_v37  ;;  %10471 = vmatprep.subr.bf16.mxu1 %v12522_v12  ;;  %v4296_v11 = vld [vmem:[%s15112_s5 + $0x948] sm:$0xff]  ;;  %v12615_v37 = vcombine.low %v4271_v62, %v4279_v3  ;;  %v12617_v12 = vcombine.low %v4272_v5, %v4280_v0  ;;  %v4359_v53 = vld [vmem:[%s15112_s5 + $0xb40] sm:$0xff] }
 0x757   : > { %v12634_v18 = vcombine.high %v4288_v10, %v4296_v11  ;;  %v4367_v48 = vld [vmem:[%s15112_s5 + $0xb80] sm:$0xff]  ;;  %v12695_v51 = vcombine.low %v4351_v63, %v4359_v53  ;;  %v4392_v5 = vld [vmem:[%s15112_s5 + $0xc48] sm:$0xff] }
 0x758   : > { %v4375_v49 = vld [vmem:[%s15112_s5 + $0xbc0] sm:$0xff] }
 0x759   : > { %10308 = vmatpush1.bf16.msra.mxu0 %v12519_v24  ;;  %10472 = vmatpush1.bf16.msra.mxu1 %v12521_v17  ;;  %v4312_v24 = vld [vmem:[%s15112_s5 + $0x9c8] sm:$0xff]  ;;  %v12631_v17 = vcombine.low %v4287_v8, %v4295_v57  ;;  %v4383_v62 = vld [vmem:[%s15112_s5 + $0xc00] sm:$0xff]  ;;  %v12711_v0 = vcombine.low %v4367_v48, %v4375_v49 }
 0x75a   : > { %10309 = vmatprep.subr.bf16.mxu0 %v12536_v40  ;;  %10473 = vmatprep.subr.bf16.mxu1 %v12538_v25  ;;  %v12633_v40 = vcombine.low %v4288_v10, %v4296_v11  ;;  %v12648_v25 = vcombine.high %v4303_v29, %v4311_v21  ;;  %v12650_v2 = vcombine.high %v4304_v23, %v4312_v24  ;;  %v4391_v3 = vld [vmem:[%s15112_s5 + $0xc40] sm:$0xff]  ;;  %v4400_v8 = vld [vmem:[%s15112_s5 + $0xc88] sm:$0xff] }
 0x75b   : > { %v12728_v6 = vcombine.high %v4383_v62, %v4391_v3  ;;  %v4408_v57 = vld [vmem:[%s15112_s5 + $0xcc8] sm:$0xff]  ;;  %v12727_v10 = vcombine.low %v4383_v62, %v4391_v3  ;;  %v12729_v11 = vcombine.low %v4384_v20, %v4392_v5 }
 0x75c   : > { %v4496_v62 = vld [vmem:[%s15112_s5 + $0xf88] sm:$0xff] }
 0x75d   : > { %10310 = vmatpush1.bf16.msra.mxu0 %v12535_v30  ;;  %10474 = vmatpush1.bf16.msra.mxu1 %v12537_v13  ;;  %v4328_v30 = vld [vmem:[%s15112_s5 + $0xa48] sm:$0xff]  ;;  %v12647_v13 = vcombine.low %v4303_v29, %v4311_v21 }
 0x75e   : > { %10311 = vmatprep.subr.bf16.mxu0 %v12552_v35  ;;  %10475 = vmatprep.subr.bf16.mxu1 %v12554_v38  ;;  %v12649_v35 = vcombine.low %v4304_v23, %v4312_v24  ;;  %v12664_v38 = vcombine.high %v4319_v27, %v4327_v28  ;;  %v12666_v59 = vcombine.high %v4320_v26, %v4328_v30  ;;  %v4416_v29 = vld [vmem:[%s15112_s5 + $0xd08] sm:$0xff] }
 0x75f   : > { %v4424_v21 = vld [vmem:[%s15112_s5 + $0xd48] sm:$0xff]  ;;  %v12745_v24 = vcombine.low %v4400_v8, %v4408_v57 }
 0x760   : > { %v4504_v3 = vld [vmem:[%s15112_s5 + $0xfc8] sm:$0xff] }
 0x761   : > { %10312 = vmatpush1.bf16.msra.mxu0 %v12551_v36  ;;  %10476 = vmatpush1.bf16.msra.mxu1 %v12553_v42  ;;  %v4344_v36 = vld [vmem:[%s15112_s5 + $0xac8] sm:$0xff]  ;;  %v12663_v42 = vcombine.low %v4319_v27, %v4327_v28 }
 0x762   : > { %10313 = vmatprep.subr.bf16.mxu0 %v12568_v43  ;;  %10477 = vmatprep.subr.bf16.mxu1 %v12570_v33  ;;  %v12665_v43 = vcombine.low %v4320_v26, %v4328_v30  ;;  %v12680_v33 = vcombine.high %v4335_v39, %v4343_v14  ;;  %v12682_v32 = vcombine.high %v4336_v44, %v4344_v36  ;;  %v4432_v27 = vld [vmem:[%s15112_s5 + $0xd88] sm:$0xff] }
 0x763   : > { %v4440_v28 = vld [vmem:[%s15112_s5 + $0xdc8] sm:$0xff]  ;;  %v12761_v30 = vcombine.low %v4416_v29, %v4424_v21 }
 0x765   : > { %10314 = vmatpush1.bf16.msra.mxu0 %v12567_v55  ;;  %10478 = vmatpush1.bf16.msra.mxu1 %v12569_v58  ;;  %v4360_v55 = vld [vmem:[%s15112_s5 + $0xb48] sm:$0xff]  ;;  %v12679_v58 = vcombine.low %v4335_v39, %v4343_v14 }
 0x766   : > { %10315 = vmatprep.subr.bf16.mxu0 %v12584_v45  ;;  %10479 = vmatprep.subr.bf16.mxu1 %v12586_v46  ;;  %v12681_v45 = vcombine.low %v4336_v44, %v4344_v36  ;;  %v12696_v46 = vcombine.high %v4351_v63, %v4359_v53  ;;  %v12698_v47 = vcombine.high %v4352_v54, %v4360_v55  ;;  %v4448_v39 = vld [vmem:[%s15112_s5 + $0xe08] sm:$0xff] }
 0x767   : > { %v4456_v14 = vld [vmem:[%s15112_s5 + $0xe48] sm:$0xff]  ;;  %v12777_v36 = vcombine.low %v4432_v27, %v4440_v28 }
 0x768   : > { %v4464_v63 = vld [vmem:[%s15112_s5 + $0xe88] sm:$0xff] }
 0x769   : > { %10316 = vmatpush1.bf16.msra.mxu0 %v12583_v50  ;;  %10480 = vmatpush1.bf16.msra.mxu1 %v12585_v52  ;;  %v4376_v50 = vld [vmem:[%s15112_s5 + $0xbc8] sm:$0xff]  ;;  %v12697_v52 = vcombine.low %v4352_v54, %v4360_v55  ;;  %v12793_v55 = vcombine.low %v4448_v39, %v4456_v14 }
 0x76a   : > { %10326 = vmatprep.subr.bf16.mxu0 %v12600_v56  ;;  %10490 = vmatprep.subr.bf16.mxu1 %v12602_v60  ;;  %v12712_v56 = vcombine.high %v4367_v48, %v4375_v49  ;;  %v12714_v60 = vcombine.high %v4368_v34, %v4376_v50  ;;  %v4472_v53 = vld [vmem:[%s15112_s5 + $0xec8] sm:$0xff] }
 0x76b   : > { %v4480_v48 = vld [vmem:[%s15112_s5 + $0xf08] sm:$0xff] }
 0x76c   : > { %10318 = vmatmul.mubr.bf16.vlgmr.msra.gmra.mrb[0].mxu0 %v15450_v4  ;;  %10482 = vmatmul.mubr.bf16.vlgmr.msra.gmra.mrb[0].mxu1 %v15450_v4  ;;  %v4488_v49 = vld [vmem:[%s15112_s5 + $0xf48] sm:$0xff] }
 0x76d   : > { %10327 = vmatpush1.bf16.msra.mxu0 %v12599_v19  ;;  %10491 = vmatpush1.bf16.msra.mxu1 %v12601_v41  ;;  %v12713_v19 = vcombine.low %v4368_v34, %v4376_v50  ;;  %v12730_v41 = vcombine.high %v4384_v20, %v4392_v5  ;;  %v12809_v50 = vcombine.low %v4464_v63, %v4472_v53 }
 0x76e   : > { %10328 = vmatprep.subr.bf16.mxu0 %v12616_v7  ;;  %10492 = vmatprep.subr.bf16.mxu1 %v12618_v1  ;;  %v4399_v7 = vld [vmem:[%s15112_s5 + $0xc80] sm:$0xff]  ;;  %v12825_v5 = vcombine.low %v4480_v48, %v4488_v49 }
 0x76f   : > { %10358 = vmatprep.mubr.bf16.mxu0 %v15458_v15  ;;  %10522 = vmatprep.mubr.bf16.mxu1 %v15458_v15  ;;  %v4407_v1 = vld [vmem:[%s15112_s5 + $0xcc0] sm:$0xff] }
 0x770   : > { %v12743_v23 = vcombine.low %v4399_v7, %v4407_v1 }
 0x771   : > { %10329 = vmatpush1.bf16.msra.mxu0 %v12615_v37  ;;  %10493 = vmatpush1.bf16.msra.mxu1 %v12617_v12  ;;  %v12744_v37 = vcombine.high %v4399_v7, %v4407_v1  ;;  %v12746_v12 = vcombine.high %v4400_v8, %v4408_v57  ;;  %v4512_v7 = vld [vmem:[%s15112_s5 + $0x1008] sm:$0xff]  ;;  %v12841_v57 = vcombine.low %v4496_v62, %v4504_v3 }
 0x772   : > { %10330 = vmatprep.subr.bf16.mxu0 %v12632_v16  ;;  %10494 = vmatprep.subr.bf16.mxu1 %v12634_v18  ;;  %v4415_v16 = vld [vmem:[%s15112_s5 + $0xd00] sm:$0xff]  ;;  %v4520_v1 = vld [vmem:[%s15112_s5 + $0x1048] sm:$0xff] }
 0x773   : > { %v4423_v18 = vld [vmem:[%s15112_s5 + $0xd40] sm:$0xff] }
 0x774   : > { %v12759_v26 = vcombine.low %v4415_v16, %v4423_v18 }
 0x775   : > { %10331 = vmatpush1.bf16.msra.mxu0 %v12631_v17  ;;  %10495 = vmatpush1.bf16.msra.mxu1 %v12633_v40  ;;  %v12760_v17 = vcombine.high %v4415_v16, %v4423_v18  ;;  %v12762_v40 = vcombine.high %v4416_v29, %v4424_v21  ;;  %v15532_v16 = vcombine.high %v15450_v4, %v15450_v4  ;;  %v4528_v18 = vld [vmem:[%s15112_s5 + $0x1088] sm:$0xff] }
 0x776   : > { %10332 = vmatprep.subr.bf16.mxu0 %v12648_v25  ;;  %10496 = vmatprep.subr.bf16.mxu1 %v12650_v2  ;;  %v4431_v25 = vld [vmem:[%s15112_s5 + $0xd80] sm:$0xff]  ;;  %v4536_v29 = vld [vmem:[%s15112_s5 + $0x10c8] sm:$0xff] }
 0x777   : > { %v4439_v2 = vld [vmem:[%s15112_s5 + $0xdc0] sm:$0xff] }
 0x778   : > { %v12775_v44 = vcombine.low %v4431_v25, %v4439_v2 }
 0x779   : > { %10333 = vmatpush1.bf16.msra.mxu0 %v12647_v13  ;;  %10497 = vmatpush1.bf16.msra.mxu1 %v12649_v35  ;;  %v12776_v13 = vcombine.high %v4431_v25, %v4439_v2  ;;  %v12778_v35 = vcombine.high %v4432_v27, %v4440_v28  ;;  %v4551_v25 = vld [vmem:[%s15112_s5 + $0x1140] sm:$0xff]  ;;  %v4544_v2 = vld [vmem:[%s15112_s5 + $0x1108] sm:$0xff] }
 0x77a   : > { %10334 = vmatprep.subr.bf16.mxu0 %v12664_v38  ;;  %10498 = vmatprep.subr.bf16.mxu1 %v12666_v59  ;;  %v4447_v38 = vld [vmem:[%s15112_s5 + $0xe00] sm:$0xff]  ;;  %v4552_v27 = vld [vmem:[%s15112_s5 + $0x1148] sm:$0xff] }
 0x77b   : > { %v4455_v59 = vld [vmem:[%s15112_s5 + $0xe40] sm:$0xff] }
 0x77c   : > { %v12791_v54 = vcombine.low %v4447_v38, %v4455_v59 }
 0x77d   : > { %10335 = vmatpush1.bf16.msra.mxu0 %v12663_v42  ;;  %10499 = vmatpush1.bf16.msra.mxu1 %v12665_v43  ;;  %v12792_v42 = vcombine.high %v4447_v38, %v4455_v59  ;;  %v12794_v43 = vcombine.high %v4448_v39, %v4456_v14  ;;  %v4567_v38 = vld [vmem:[%s15112_s5 + $0x11c0] sm:$0xff]  ;;  %v4560_v59 = vld [vmem:[%s15112_s5 + $0x1188] sm:$0xff] }
 0x77e   : > { %10336 = vmatprep.subr.bf16.mxu0 %v12680_v33  ;;  %10500 = vmatprep.subr.bf16.mxu1 %v12682_v32  ;;  %v4463_v33 = vld [vmem:[%s15112_s5 + $0xe80] sm:$0xff]  ;;  %v4568_v39 = vld [vmem:[%s15112_s5 + $0x11c8] sm:$0xff] }
 0x77f   : > { %v4471_v32 = vld [vmem:[%s15112_s5 + $0xec0] sm:$0xff] }
 0x780   : > { %v12807_v34 = vcombine.low %v4463_v33, %v4471_v32 }
 0x781   : > { %10337 = vmatpush1.bf16.msra.mxu0 %v12679_v58  ;;  %10501 = vmatpush1.bf16.msra.mxu1 %v12681_v45  ;;  %v12808_v58 = vcombine.high %v4463_v33, %v4471_v32  ;;  %v12810_v45 = vcombine.high %v4464_v63, %v4472_v53  ;;  %v4583_v33 = vld [vmem:[%s15112_s5 + $0x1240] sm:$0xff]  ;;  %v4576_v32 = vld [vmem:[%s15112_s5 + $0x1208] sm:$0xff] }
 0x782   : > { %10338 = vmatprep.subr.bf16.mxu0 %v12696_v46  ;;  %10502 = vmatprep.subr.bf16.mxu1 %v12698_v47  ;;  %v4479_v46 = vld [vmem:[%s15112_s5 + $0xf00] sm:$0xff]  ;;  %v4584_v63 = vld [vmem:[%s15112_s5 + $0x1248] sm:$0xff] }
 0x783   : > { %v4487_v47 = vld [vmem:[%s15112_s5 + $0xf40] sm:$0xff] }
 0x784   : > { %v12823_v20 = vcombine.low %v4479_v46, %v4487_v47 }
 0x785   : > { %10339 = vmatpush1.bf16.msra.mxu0 %v12695_v51  ;;  %10503 = vmatpush1.bf16.msra.mxu1 %v12697_v52  ;;  %v12824_v51 = vcombine.high %v4479_v46, %v4487_v47  ;;  %v12826_v52 = vcombine.high %v4480_v48, %v4488_v49  ;;  %v4599_v46 = vld [vmem:[%s15112_s5 + $0x12c0] sm:$0xff]  ;;  %v4592_v47 = vld [vmem:[%s15112_s5 + $0x1288] sm:$0xff] }
 0x786   : > { %10340 = vmatprep.subr.bf16.mxu0 %v12712_v56  ;;  %10504 = vmatprep.subr.bf16.mxu1 %v12714_v60  ;;  %v4495_v56 = vld [vmem:[%s15112_s5 + $0xf80] sm:$0xff]  ;;  %v4600_v48 = vld [vmem:[%s15112_s5 + $0x12c8] sm:$0xff] }
 0x787   : > { %v4503_v60 = vld [vmem:[%s15112_s5 + $0xfc0] sm:$0xff] }
 0x788   : > { %v12839_v8 = vcombine.low %v4495_v56, %v4503_v60 }
 0x789   : > { %10341 = vmatpush1.bf16.msra.mxu0 %v12711_v0  ;;  %10505 = vmatpush1.bf16.msra.mxu1 %v12713_v19  ;;  %v12840_v0 = vcombine.high %v4495_v56, %v4503_v60  ;;  %v12842_v19 = vcombine.high %v4496_v62, %v4504_v3  ;;  %v4615_v56 = vld [vmem:[%s15112_s5 + $0x1340] sm:$0xff]  ;;  %v4608_v60 = vld [vmem:[%s15112_s5 + $0x1308] sm:$0xff] }
 0x78a   : > { %10342 = vmatprep.subr.bf16.mxu0 %v12728_v6  ;;  %10506 = vmatprep.subr.bf16.mxu1 %v12730_v41  ;;  %v4511_v6 = vld [vmem:[%s15112_s5 + $0x1000] sm:$0xff]  ;;  %v4616_v62 = vld [vmem:[%s15112_s5 + $0x1348] sm:$0xff] }
 0x78b   : > { %v4519_v41 = vld [vmem:[%s15112_s5 + $0x1040] sm:$0xff] }
 0x78c   : > { %v12855_v21 = vcombine.low %v4511_v6, %v4519_v41 }
 0x78d   : > { %10343 = vmatpush1.bf16.msra.mxu0 %v12727_v10  ;;  %10507 = vmatpush1.bf16.msra.mxu1 %v12729_v11  ;;  %v12856_v10 = vcombine.high %v4511_v6, %v4519_v41  ;;  %v12858_v11 = vcombine.high %v4512_v7, %v4520_v1  ;;  %v4631_v6 = vld [vmem:[%s15112_s5 + $0x13c0] sm:$0xff]  ;;  %v4624_v41 = vld [vmem:[%s15112_s5 + $0x1388] sm:$0xff] }
 0x78e   : > { %10344 = vmatprep.subr.bf16.mxu0 %v12744_v37  ;;  %10508 = vmatprep.subr.bf16.mxu1 %v12746_v12  ;;  %v4527_v37 = vld [vmem:[%s15112_s5 + $0x1080] sm:$0xff] }
 0x78f   : > { %v4535_v12 = vld [vmem:[%s15112_s5 + $0x10c0] sm:$0xff] }
 0x790   : > { %v12871_v28 = vcombine.low %v4527_v37, %v4535_v12 }
 0x791   : > { %10345 = vmatpush1.bf16.msra.mxu0 %v12743_v23  ;;  %10509 = vmatpush1.bf16.msra.mxu1 %v12745_v24  ;;  %v12857_v23 = vcombine.low %v4512_v7, %v4520_v1  ;;  %v12872_v24 = vcombine.high %v4527_v37, %v4535_v12  ;;  %v4632_v7 = vld [vmem:[%s15112_s5 + $0x13c8] sm:$0xff]  ;;  %v4647_v37 = vld [vmem:[%s15112_s5 + $0x1440] sm:$0xff] }
 0x792   : > { %10346 = vmatprep.subr.bf16.mxu0 %v12760_v17  ;;  %10510 = vmatprep.subr.bf16.mxu1 %v12762_v40  ;;  %v12874_v17 = vcombine.high %v4528_v18, %v4536_v29  ;;  %v4543_v40 = vld [vmem:[%s15112_s5 + $0x1100] sm:$0xff]  ;;  %v4640_v12 = vld [vmem:[%s15112_s5 + $0x1408] sm:$0xff] }
 0x793   : > { %v12887_v14 = vcombine.low %v4543_v40, %v4551_v25 }
 0x795   : > { %10347 = vmatpush1.bf16.msra.mxu0 %v12759_v26  ;;  %10511 = vmatpush1.bf16.msra.mxu1 %v12761_v30  ;;  %v12873_v26 = vcombine.low %v4528_v18, %v4536_v29  ;;  %v12888_v30 = vcombine.high %v4543_v40, %v4551_v25  ;;  %v4648_v18 = vld [vmem:[%s15112_s5 + $0x1448] sm:$0xff]  ;;  %v4663_v40 = vld [vmem:[%s15112_s5 + $0x14c0] sm:$0xff] }
 0x796   : > { %10348 = vmatprep.subr.bf16.mxu0 %v12776_v13  ;;  %10512 = vmatprep.subr.bf16.mxu1 %v12778_v35  ;;  %v12890_v13 = vcombine.high %v4544_v2, %v4552_v27  ;;  %v4559_v35 = vld [vmem:[%s15112_s5 + $0x1180] sm:$0xff]  ;;  %v4656_v25 = vld [vmem:[%s15112_s5 + $0x1488] sm:$0xff] }
 0x797   : > { %v12903_v53 = vcombine.low %v4559_v35, %v4567_v38 }
 0x799   : > { %10349 = vmatpush1.bf16.msra.mxu0 %v12775_v44  ;;  %10513 = vmatpush1.bf16.msra.mxu1 %v12777_v36  ;;  %v12889_v44 = vcombine.low %v4544_v2, %v4552_v27  ;;  %v12904_v36 = vcombine.high %v4559_v35, %v4567_v38  ;;  %v4664_v2 = vld [vmem:[%s15112_s5 + $0x14c8] sm:$0xff]  ;;  %v4679_v35 = vld [vmem:[%s15112_s5 + $0x1540] sm:$0xff] }
 0x79a   : > { %10350 = vmatprep.subr.bf16.mxu0 %v12792_v42  ;;  %10514 = vmatprep.subr.bf16.mxu1 %v12794_v43  ;;  %v12906_v42 = vcombine.high %v4560_v59, %v4568_v39  ;;  %v4575_v43 = vld [vmem:[%s15112_s5 + $0x1200] sm:$0xff]  ;;  %v4672_v38 = vld [vmem:[%s15112_s5 + $0x1508] sm:$0xff] }
 0x79b   : > { %v12919_v49 = vcombine.low %v4575_v43, %v4583_v33 }
 0x79d   : > { %10351 = vmatpush1.bf16.msra.mxu0 %v12791_v54  ;;  %10515 = vmatpush1.bf16.msra.mxu1 %v12793_v55  ;;  %v12905_v54 = vcombine.low %v4560_v59, %v4568_v39  ;;  %v12920_v55 = vcombine.high %v4575_v43, %v4583_v33  ;;  %v4680_v59 = vld [vmem:[%s15112_s5 + $0x1548] sm:$0xff]  ;;  %v4695_v43 = vld [vmem:[%s15112_s5 + $0x15c0] sm:$0xff] }
 0x79e   : > { %10352 = vmatprep.subr.bf16.mxu0 %v12808_v58  ;;  %10516 = vmatprep.subr.bf16.mxu1 %v12810_v45  ;;  %v12922_v58 = vcombine.high %v4576_v32, %v4584_v63  ;;  %v4591_v45 = vld [vmem:[%s15112_s5 + $0x1280] sm:$0xff]  ;;  %v4688_v33 = vld [vmem:[%s15112_s5 + $0x1588] sm:$0xff] }
 0x79f   : > { %v12935_v3 = vcombine.low %v4591_v45, %v4599_v46 }
 0x7a1   : > { %10353 = vmatpush1.bf16.msra.mxu0 %v12807_v34  ;;  %10517 = vmatpush1.bf16.msra.mxu1 %v12809_v50  ;;  %v12921_v34 = vcombine.low %v4576_v32, %v4584_v63  ;;  %v12936_v50 = vcombine.high %v4591_v45, %v4599_v46  ;;  %v4696_v32 = vld [vmem:[%s15112_s5 + $0x15c8] sm:$0xff]  ;;  %v4711_v45 = vld [vmem:[%s15112_s5 + $0x1640] sm:$0xff] }
 0x7a2   : > { %10354 = vmatprep.subr.bf16.mxu0 %v12824_v51  ;;  %10518 = vmatprep.subr.bf16.mxu1 %v12826_v52  ;;  %v12938_v51 = vcombine.high %v4592_v47, %v4600_v48  ;;  %v4607_v52 = vld [vmem:[%s15112_s5 + $0x1300] sm:$0xff]  ;;  %v4704_v46 = vld [vmem:[%s15112_s5 + $0x1608] sm:$0xff] }
 0x7a3   : > { %v12951_v1 = vcombine.low %v4607_v52, %v4615_v56 }
 0x7a5   : > { %10355 = vmatpush1.bf16.msra.mxu0 %v12823_v20  ;;  %10519 = vmatpush1.bf16.msra.mxu1 %v12825_v5  ;;  %v12937_v20 = vcombine.low %v4592_v47, %v4600_v48  ;;  %v12952_v5 = vcombine.high %v4607_v52, %v4615_v56  ;;  %v4712_v47 = vld [vmem:[%s15112_s5 + $0x1648] sm:$0xff]  ;;  %v4727_v52 = vld [vmem:[%s15112_s5 + $0x16c0] sm:$0xff] }
 0x7a6   : > { %10356 = vmatprep.subr.bf16.mxu0 %v12840_v0  ;;  %10520 = vmatprep.subr.bf16.mxu1 %v12842_v19  ;;  %v12954_v0 = vcombine.high %v4608_v60, %v4616_v62  ;;  %v4623_v19 = vld [vmem:[%s15112_s5 + $0x1380] sm:$0xff]  ;;  %v4720_v56 = vld [vmem:[%s15112_s5 + $0x1688] sm:$0xff] }
 0x7a7   : > { %v12967_v29 = vcombine.low %v4623_v19, %v4631_v6 }
 0x7a9   : > { %10357 = vmatpush1.bf16.msra.mxu0 %v12839_v8  ;;  %10521 = vmatpush1.bf16.msra.mxu1 %v12841_v57  ;;  %v12953_v8 = vcombine.low %v4608_v60, %v4616_v62  ;;  %v12968_v57 = vcombine.high %v4623_v19, %v4631_v6  ;;  %v4728_v60 = vld [vmem:[%s15112_s5 + $0x16c8] sm:$0xff]  ;;  %v4743_v19 = vld [vmem:[%s15112_s5 + $0x1740] sm:$0xff] }
 0x7aa   : > { %10367 = vmatprep.subr.bf16.mxu0 %v12856_v10  ;;  %10531 = vmatprep.subr.bf16.mxu1 %v12858_v11  ;;  %v12970_v10 = vcombine.high %v4624_v41, %v4632_v7  ;;  %v4639_v11 = vld [vmem:[%s15112_s5 + $0x1400] sm:$0xff]  ;;  %v4736_v6 = vld [vmem:[%s15112_s5 + $0x1708] sm:$0xff] }
 0x7ab   : > { %v12983_v27 = vcombine.low %v4639_v11, %v4647_v37 }
 0x7ac   : > { %10359 = vmatmul.mubr.bf16.vlgmr.msra.gmra.mrb[0].mxu0 %v15532_v16  ;;  %10523 = vmatmul.mubr.bf16.vlgmr.msra.gmra.mrb[0].mxu1 %v15532_v16 }
 0x7ad   : > { %10368 = vmatpush1.bf16.msra.mxu0 %v12855_v21  ;;  %10532 = vmatpush1.bf16.msra.mxu1 %v12857_v23  ;;  %v12969_v21 = vcombine.low %v4624_v41, %v4632_v7  ;;  %v12984_v23 = vcombine.high %v4639_v11, %v4647_v37  ;;  %v4744_v41 = vld [vmem:[%s15112_s5 + $0x1748] sm:$0xff]  ;;  %v4759_v11 = vld [vmem:[%s15112_s5 + $0x17c0] sm:$0xff] }
 0x7ae   : > { %10369 = vmatprep.subr.bf16.mxu0 %v12872_v24  ;;  %10533 = vmatprep.subr.bf16.mxu1 %v12874_v17  ;;  %v12986_v24 = vcombine.high %v4640_v12, %v4648_v18  ;;  %v4655_v17 = vld [vmem:[%s15112_s5 + $0x1480] sm:$0xff]  ;;  %v4752_v37 = vld [vmem:[%s15112_s5 + $0x1788] sm:$0xff] }
 0x7af   : > { %10399 = vmatprep.mubr.bf16.mxu0 %v15461_v61  ;;  %10563 = vmatprep.mubr.bf16.mxu1 %v15461_v61  ;;  %v12999_v39 = vcombine.low %v4655_v17, %v4663_v40 }
 0x7b1   : > { %10370 = vmatpush1.bf16.msra.mxu0 %v12871_v28  ;;  %10534 = vmatpush1.bf16.msra.mxu1 %v12873_v26  ;;  %v12985_v28 = vcombine.low %v4640_v12, %v4648_v18  ;;  %v13000_v26 = vcombine.high %v4655_v17, %v4663_v40  ;;  %v4760_v12 = vld [vmem:[%s15112_s5 + $0x17c8] sm:$0xff]  ;;  %v4775_v17 = vld [vmem:[%s15112_s5 + $0x1840] sm:$0xff] }
 0x7b2   : > { %10371 = vmatprep.subr.bf16.mxu0 %v12888_v30  ;;  %10535 = vmatprep.subr.bf16.mxu1 %v12890_v13  ;;  %v13002_v30 = vcombine.high %v4656_v25, %v4664_v2  ;;  %v4671_v13 = vld [vmem:[%s15112_s5 + $0x1500] sm:$0xff]  ;;  %v4768_v40 = vld [vmem:[%s15112_s5 + $0x1808] sm:$0xff] }
 0x7b3   : > { %v13015_v63 = vcombine.low %v4671_v13, %v4679_v35 }
 0x7b5   : > { %10372 = vmatpush1.bf16.msra.mxu0 %v12887_v14  ;;  %10536 = vmatpush1.bf16.msra.mxu1 %v12889_v44  ;;  %v13001_v14 = vcombine.low %v4656_v25, %v4664_v2  ;;  %v13016_v44 = vcombine.high %v4671_v13, %v4679_v35  ;;  %v4776_v25 = vld [vmem:[%s15112_s5 + $0x1848] sm:$0xff]  ;;  %v4791_v13 = vld [vmem:[%s15112_s5 + $0x18c0] sm:$0xff] }
 0x7b6   : > { %10373 = vmatprep.subr.bf16.mxu0 %v12904_v36  ;;  %10537 = vmatprep.subr.bf16.mxu1 %v12906_v42  ;;  %v13018_v36 = vcombine.high %v4672_v38, %v4680_v59  ;;  %v4687_v42 = vld [vmem:[%s15112_s5 + $0x1580] sm:$0xff]  ;;  %v4784_v35 = vld [vmem:[%s15112_s5 + $0x1888] sm:$0xff] }
 0x7b7   : > { %v13031_v48 = vcombine.low %v4687_v42, %v4695_v43 }
 0x7b9   : > { %10374 = vmatpush1.bf16.msra.mxu0 %v12903_v53  ;;  %10538 = vmatpush1.bf16.msra.mxu1 %v12905_v54  ;;  %v13017_v53 = vcombine.low %v4672_v38, %v4680_v59  ;;  %v13032_v54 = vcombine.high %v4687_v42, %v4695_v43  ;;  %v4792_v38 = vld [vmem:[%s15112_s5 + $0x18c8] sm:$0xff]  ;;  %v4807_v42 = vld [vmem:[%s15112_s5 + $0x1940] sm:$0xff]  ;;  %v15608_v43 = vcombine.high %v15461_v61, %v15461_v61 }
 0x7ba   : > { %10375 = vmatprep.subr.bf16.mxu0 %v12920_v55  ;;  %10539 = vmatprep.subr.bf16.mxu1 %v12922_v58  ;;  %v13034_v55 = vcombine.high %v4688_v33, %v4696_v32  ;;  %v4703_v58 = vld [vmem:[%s15112_s5 + $0x1600] sm:$0xff] }
 0x7bb   : > { %v13047_v62 = vcombine.low %v4703_v58, %v4711_v45 }
 0x7bd   : > { %10376 = vmatpush1.bf16.msra.mxu0 %v12919_v49  ;;  %10540 = vmatpush1.bf16.msra.mxu1 %v12921_v34  ;;  %v13033_v49 = vcombine.low %v4688_v33, %v4696_v32  ;;  %v13048_v34 = vcombine.high %v4703_v58, %v4711_v45  ;;  %v4800_v33 = vld [vmem:[%s15112_s5 + $0x1908] sm:$0xff]  ;;  %v4815_v58 = vld [vmem:[%s15112_s5 + $0x1980] sm:$0xff] }
 0x7be   : > { %10377 = vmatprep.subr.bf16.mxu0 %v12936_v50  ;;  %10541 = vmatprep.subr.bf16.mxu1 %v12938_v51  ;;  %v13050_v50 = vcombine.high %v4704_v46, %v4712_v47  ;;  %v4719_v51 = vld [vmem:[%s15112_s5 + $0x1680] sm:$0xff]  ;;  %v4808_v32 = vld [vmem:[%s15112_s5 + $0x1948] sm:$0xff] }
 0x7bf   : > { %v13063_v7 = vcombine.low %v4719_v51, %v4727_v52  ;;  %v4823_v45 = vld [vmem:[%s15112_s5 + $0x19c0] sm:$0xff] }
 0x7c1   : > { %10378 = vmatpush1.bf16.msra.mxu0 %v12935_v3  ;;  %10542 = vmatpush1.bf16.msra.mxu1 %v12937_v20  ;;  %v13049_v3 = vcombine.low %v4704_v46, %v4712_v47  ;;  %v13064_v20 = vcombine.high %v4719_v51, %v4727_v52  ;;  %v4816_v46 = vld [vmem:[%s15112_s5 + $0x1988] sm:$0xff]  ;;  %v4831_v51 = vld [vmem:[%s15112_s5 + $0x1a00] sm:$0xff] }
 0x7c2   : > { %10379 = vmatprep.subr.bf16.mxu0 %v12952_v5  ;;  %10543 = vmatprep.subr.bf16.mxu1 %v12954_v0  ;;  %v13066_v5 = vcombine.high %v4720_v56, %v4728_v60  ;;  %v4735_v0 = vld [vmem:[%s15112_s5 + $0x1700] sm:$0xff]  ;;  %v4824_v47 = vld [vmem:[%s15112_s5 + $0x19c8] sm:$0xff] }
 0x7c3   : > { %v13079_v18 = vcombine.low %v4735_v0, %v4743_v19  ;;  %v4839_v52 = vld [vmem:[%s15112_s5 + $0x1a40] sm:$0xff] }
 0x7c5   : > { %10380 = vmatpush1.bf16.msra.mxu0 %v12951_v1  ;;  %10544 = vmatpush1.bf16.msra.mxu1 %v12953_v8  ;;  %v13065_v1 = vcombine.low %v4720_v56, %v4728_v60  ;;  %v13080_v8 = vcombine.high %v4735_v0, %v4743_v19  ;;  %v4832_v56 = vld [vmem:[%s15112_s5 + $0x1a08] sm:$0xff]  ;;  %v4847_v0 = vld [vmem:[%s15112_s5 + $0x1a80] sm:$0xff] }
 0x7c6   : > { %10381 = vmatprep.subr.bf16.mxu0 %v12968_v57  ;;  %10545 = vmatprep.subr.bf16.mxu1 %v12970_v10  ;;  %v13082_v57 = vcombine.high %v4736_v6, %v4744_v41  ;;  %v4751_v10 = vld [vmem:[%s15112_s5 + $0x1780] sm:$0xff]  ;;  %v4840_v60 = vld [vmem:[%s15112_s5 + $0x1a48] sm:$0xff] }
 0x7c7   : > { %v13095_v2 = vcombine.low %v4751_v10, %v4759_v11  ;;  %v4855_v19 = vld [vmem:[%s15112_s5 + $0x1ac0] sm:$0xff] }
 0x7c9   : > { %10382 = vmatpush1.bf16.msra.mxu0 %v12967_v29  ;;  %10546 = vmatpush1.bf16.msra.mxu1 %v12969_v21  ;;  %v13081_v29 = vcombine.low %v4736_v6, %v4744_v41  ;;  %v13096_v21 = vcombine.high %v4751_v10, %v4759_v11  ;;  %v4848_v6 = vld [vmem:[%s15112_s5 + $0x1a88] sm:$0xff]  ;;  %v4863_v10 = vld [vmem:[%s15112_s5 + $0x1b00] sm:$0xff] }
 0x7ca   : > { %10383 = vmatprep.subr.bf16.mxu0 %v12984_v23  ;;  %10547 = vmatprep.subr.bf16.mxu1 %v12986_v24  ;;  %v13098_v23 = vcombine.high %v4752_v37, %v4760_v12  ;;  %v4767_v24 = vld [vmem:[%s15112_s5 + $0x1800] sm:$0xff]  ;;  %v4856_v41 = vld [vmem:[%s15112_s5 + $0x1ac8] sm:$0xff] }
 0x7cb   : > { %v13111_v59 = vcombine.low %v4767_v24, %v4775_v17  ;;  %v4871_v11 = vld [vmem:[%s15112_s5 + $0x1b40] sm:$0xff] }
 0x7cd   : > { %10384 = vmatpush1.bf16.msra.mxu0 %v12983_v27  ;;  %10548 = vmatpush1.bf16.msra.mxu1 %v12985_v28  ;;  %v13097_v27 = vcombine.low %v4752_v37, %v4760_v12  ;;  %v13112_v28 = vcombine.high %v4767_v24, %v4775_v17  ;;  %v4864_v37 = vld [vmem:[%s15112_s5 + $0x1b08] sm:$0xff]  ;;  %v4879_v24 = vld [vmem:[%s15112_s5 + $0x1b80] sm:$0xff] }
 0x7ce   : > { %10385 = vmatprep.subr.bf16.mxu0 %v13000_v26  ;;  %10549 = vmatprep.subr.bf16.mxu1 %v13002_v30  ;;  %v13114_v26 = vcombine.high %v4768_v40, %v4776_v25  ;;  %v4783_v30 = vld [vmem:[%s15112_s5 + $0x1880] sm:$0xff]  ;;  %v4872_v12 = vld [vmem:[%s15112_s5 + $0x1b48] sm:$0xff] }
 0x7cf   : > { %v4887_v17 = vld [vmem:[%s15112_s5 + $0x1bc0] sm:$0xff] }
 0x7d1   : > { %10386 = vmatpush1.bf16.msra.mxu0 %v12999_v39  ;;  %10550 = vmatpush1.bf16.msra.mxu1 %v13001_v14  ;;  %v13113_v39 = vcombine.low %v4768_v40, %v4776_v25  ;;  %v13128_v14 = vcombine.high %v4783_v30, %v4791_v13  ;;  %v4880_v40 = vld [vmem:[%s15112_s5 + $0x1b88] sm:$0xff] }
 0x7d2   : > { %10387 = vmatprep.subr.bf16.mxu0 %v13016_v44  ;;  %10551 = vmatprep.subr.bf16.mxu1 %v13018_v36  ;;  %v13130_v44 = vcombine.high %v4784_v35, %v4792_v38  ;;  %v4799_v36 = vld [vmem:[%s15112_s5 + $0x1900] sm:$0xff]  ;;  %v4888_v25 = vld [vmem:[%s15112_s5 + $0x1bc8] sm:$0xff] }
 0x7d5   : > { %10388 = vmatpush1.bf16.msra.mxu0 %v13015_v63  ;;  %10552 = vmatpush1.bf16.msra.mxu1 %v13017_v53  ;;  %v13127_v63 = vcombine.low %v4783_v30, %v4791_v13  ;;  %v13129_v53 = vcombine.low %v4784_v35, %v4792_v38  ;;  %v4895_v30 = vld [vmem:[%s15112_s5 + $0x1c00] sm:$0xff]  ;;  %v4896_v35 = vld [vmem:[%s15112_s5 + $0x1c08] sm:$0xff] }
 0x7d6   : > { %10389 = vmatprep.subr.bf16.mxu0 %v13032_v54  ;;  %10553 = vmatprep.subr.bf16.mxu1 %v13034_v55  ;;  %v13144_v54 = vcombine.high %v4799_v36, %v4807_v42  ;;  %v13146_v55 = vcombine.high %v4800_v33, %v4808_v32  ;;  %v4903_v13 = vld [vmem:[%s15112_s5 + $0x1c40] sm:$0xff]  ;;  %v4904_v38 = vld [vmem:[%s15112_s5 + $0x1c48] sm:$0xff] }
 0x7d9   : > { %10390 = vmatpush1.bf16.msra.mxu0 %v13031_v48  ;;  %10554 = vmatpush1.bf16.msra.mxu1 %v13033_v49  ;;  %v13143_v48 = vcombine.low %v4799_v36, %v4807_v42  ;;  %v13145_v49 = vcombine.low %v4800_v33, %v4808_v32  ;;  %v4911_v36 = vld [vmem:[%s15112_s5 + $0x1c80] sm:$0xff]  ;;  %v4912_v33 = vld [vmem:[%s15112_s5 + $0x1c88] sm:$0xff] }
 0x7da   : > { %10391 = vmatprep.subr.bf16.mxu0 %v13048_v34  ;;  %10555 = vmatprep.subr.bf16.mxu1 %v13050_v50  ;;  %v13160_v34 = vcombine.high %v4815_v58, %v4823_v45  ;;  %v13162_v50 = vcombine.high %v4816_v46, %v4824_v47  ;;  %v4919_v42 = vld [vmem:[%s15112_s5 + $0x1cc0] sm:$0xff]  ;;  %v4920_v32 = vld [vmem:[%s15112_s5 + $0x1cc8] sm:$0xff] }
 0x7dd   : > { %10392 = vmatpush1.bf16.msra.mxu0 %v13047_v62  ;;  %10556 = vmatpush1.bf16.msra.mxu1 %v13049_v3  ;;  %v13159_v62 = vcombine.low %v4815_v58, %v4823_v45  ;;  %v13161_v3 = vcombine.low %v4816_v46, %v4824_v47  ;;  %v4927_v58 = vld [vmem:[%s15112_s5 + $0x1d00] sm:$0xff]  ;;  %v4928_v46 = vld [vmem:[%s15112_s5 + $0x1d08] sm:$0xff] }
 0x7de   : > { %10393 = vmatprep.subr.bf16.mxu0 %v13064_v20  ;;  %10557 = vmatprep.subr.bf16.mxu1 %v13066_v5  ;;  %v13176_v20 = vcombine.high %v4831_v51, %v4839_v52  ;;  %v13178_v5 = vcombine.high %v4832_v56, %v4840_v60  ;;  %v4935_v45 = vld [vmem:[%s15112_s5 + $0x1d40] sm:$0xff]  ;;  %v4936_v47 = vld [vmem:[%s15112_s5 + $0x1d48] sm:$0xff] }
 0x7e1   : > { %10394 = vmatpush1.bf16.msra.mxu0 %v13063_v7  ;;  %10558 = vmatpush1.bf16.msra.mxu1 %v13065_v1  ;;  %v13175_v7 = vcombine.low %v4831_v51, %v4839_v52  ;;  %v13177_v1 = vcombine.low %v4832_v56, %v4840_v60  ;;  %v4943_v51 = vld [vmem:[%s15112_s5 + $0x1d80] sm:$0xff]  ;;  %v4944_v56 = vld [vmem:[%s15112_s5 + $0x1d88] sm:$0xff] }
 0x7e2   : > { %10395 = vmatprep.subr.bf16.mxu0 %v13080_v8  ;;  %10559 = vmatprep.subr.bf16.mxu1 %v13082_v57  ;;  %v13192_v8 = vcombine.high %v4847_v0, %v4855_v19  ;;  %v13194_v57 = vcombine.high %v4848_v6, %v4856_v41  ;;  %v4951_v52 = vld [vmem:[%s15112_s5 + $0x1dc0] sm:$0xff]  ;;  %v4952_v60 = vld [vmem:[%s15112_s5 + $0x1dc8] sm:$0xff] }
 0x7e5   : > { %10396 = vmatpush1.bf16.msra.mxu0 %v13079_v18  ;;  %10560 = vmatpush1.bf16.msra.mxu1 %v13081_v29  ;;  %v13191_v18 = vcombine.low %v4847_v0, %v4855_v19  ;;  %v13193_v29 = vcombine.low %v4848_v6, %v4856_v41  ;;  %v4959_v0 = vld [vmem:[%s15112_s5 + $0x1e00] sm:$0xff]  ;;  %v4960_v6 = vld [vmem:[%s15112_s5 + $0x1e08] sm:$0xff] }
 0x7e6   : > { %10397 = vmatprep.subr.bf16.mxu0 %v13096_v21  ;;  %10561 = vmatprep.subr.bf16.mxu1 %v13098_v23  ;;  %v13208_v21 = vcombine.high %v4863_v10, %v4871_v11  ;;  %v13210_v23 = vcombine.high %v4864_v37, %v4872_v12  ;;  %v4967_v19 = vld [vmem:[%s15112_s5 + $0x1e40] sm:$0xff]  ;;  %v4968_v41 = vld [vmem:[%s15112_s5 + $0x1e48] sm:$0xff] }
 0x7e9   : > { %10398 = vmatpush1.bf16.msra.mxu0 %v13095_v2  ;;  %10562 = vmatpush1.bf16.msra.mxu1 %v13097_v27  ;;  %v13207_v2 = vcombine.low %v4863_v10, %v4871_v11  ;;  %v13209_v27 = vcombine.low %v4864_v37, %v4872_v12  ;;  %v4975_v10 = vld [vmem:[%s15112_s5 + $0x1e80] sm:$0xff]  ;;  %v4976_v37 = vld [vmem:[%s15112_s5 + $0x1e88] sm:$0xff] }
 0x7ea   : > { %10408 = vmatprep.subr.bf16.mxu0 %v13112_v28  ;;  %10572 = vmatprep.subr.bf16.mxu1 %v13114_v26  ;;  %v13224_v28 = vcombine.high %v4879_v24, %v4887_v17  ;;  %v13226_v26 = vcombine.high %v4880_v40, %v4888_v25  ;;  %v4983_v11 = vld [vmem:[%s15112_s5 + $0x1ec0] sm:$0xff]  ;;  %v4984_v12 = vld [vmem:[%s15112_s5 + $0x1ec8] sm:$0xff] }
 0x7ec   : > { %10400 = vmatmul.mubr.bf16.vlgmr.msra.gmra.mrb[0].mxu0 %v15464_v9  ;;  %10564 = vmatmul.mubr.bf16.vlgmr.msra.gmra.mrb[0].mxu1 %v15464_v9 }
 0x7ed   : > { %10409 = vmatpush1.bf16.msra.mxu0 %v13111_v59  ;;  %10573 = vmatpush1.bf16.msra.mxu1 %v13113_v39  ;;  %v13223_v59 = vcombine.low %v4879_v24, %v4887_v17  ;;  %v13225_v39 = vcombine.low %v4880_v40, %v4888_v25  ;;  %v4991_v24 = vld [vmem:[%s15112_s5 + $0x1f00] sm:$0xff]  ;;  %v4992_v40 = vld [vmem:[%s15112_s5 + $0x1f08] sm:$0xff] }
 0x7ee   : > { %10410 = vmatprep.subr.bf16.mxu0 %v13128_v14  ;;  %10574 = vmatprep.subr.bf16.mxu1 %v13130_v44  ;;  %v13240_v14 = vcombine.high %v4895_v30, %v4903_v13  ;;  %v13242_v44 = vcombine.high %v4896_v35, %v4904_v38  ;;  %v4999_v17 = vld [vmem:[%s15112_s5 + $0x1f40] sm:$0xff]  ;;  %v5000_v25 = vld [vmem:[%s15112_s5 + $0x1f48] sm:$0xff] }
 0x7ef   : > { %10440 = vmatprep.mubr.bf16.mxu0 %v15608_v43  ;;  %10604 = vmatprep.mubr.bf16.mxu1 %v15608_v43 }
 0x7f1   : > { %10411 = vmatpush1.bf16.msra.mxu0 %v13127_v63  ;;  %10575 = vmatpush1.bf16.msra.mxu1 %v13129_v53  ;;  %v13239_v63 = vcombine.low %v4895_v30, %v4903_v13  ;;  %v13241_v53 = vcombine.low %v4896_v35, %v4904_v38  ;;  %v5007_v30 = vld [vmem:[%s15112_s5 + $0x1f80] sm:$0xff]  ;;  %v5008_v35 = vld [vmem:[%s15112_s5 + $0x1f88] sm:$0xff] }
 0x7f2   : > { %10412 = vmatprep.subr.bf16.mxu0 %v13144_v54  ;;  %10576 = vmatprep.subr.bf16.mxu1 %v13146_v55  ;;  %v13256_v54 = vcombine.high %v4911_v36, %v4919_v42  ;;  %v13258_v55 = vcombine.high %v4912_v33, %v4920_v32  ;;  %v5015_v13 = vld [vmem:[%s15112_s5 + $0x1fc0] sm:$0xff]  ;;  %v5016_v38 = vld [vmem:[%s15112_s5 + $0x1fc8] sm:$0xff] }
 0x7f5   : > { %10413 = vmatpush1.bf16.msra.mxu0 %v13143_v48  ;;  %10577 = vmatpush1.bf16.msra.mxu1 %v13145_v49  ;;  %v13255_v48 = vcombine.low %v4911_v36, %v4919_v42  ;;  %v13257_v49 = vcombine.low %v4912_v33, %v4920_v32  ;;  %v4001_v36 = vld [vmem:[%s15112_s5 + $0x10] sm:$0xff]  ;;  %v4002_v33 = vld [vmem:[%s15112_s5 + $0x18] sm:$0xff] }
 0x7f6   : > { %10414 = vmatprep.subr.bf16.mxu0 %v13160_v34  ;;  %10578 = vmatprep.subr.bf16.mxu1 %v13162_v50  ;;  %v13272_v34 = vcombine.high %v4927_v58, %v4935_v45  ;;  %v13274_v50 = vcombine.high %v4928_v46, %v4936_v47  ;;  %v4009_v42 = vld [vmem:[%s15112_s5 + $0x50] sm:$0xff]  ;;  %v4010_v32 = vld [vmem:[%s15112_s5 + $0x58] sm:$0xff] }
 0x7f9   : > { %10415 = vmatpush1.bf16.msra.mxu0 %v13159_v62  ;;  %10579 = vmatpush1.bf16.msra.mxu1 %v13161_v3  ;;  %v13271_v62 = vcombine.low %v4927_v58, %v4935_v45  ;;  %v13273_v3 = vcombine.low %v4928_v46, %v4936_v47  ;;  %v4017_v58 = vld [vmem:[%s15112_s5 + $0x90] sm:$0xff]  ;;  %v15676_v46 = vcombine.high %v15464_v9, %v15464_v9  ;;  %v4018_v47 = vld [vmem:[%s15112_s5 + $0x98] sm:$0xff] }
 0x7fa   : > { %10416 = vmatprep.subr.bf16.mxu0 %v13176_v20  ;;  %10580 = vmatprep.subr.bf16.mxu1 %v13178_v5  ;;  %v13288_v20 = vcombine.high %v4943_v51, %v4951_v52  ;;  %v13290_v5 = vcombine.high %v4944_v56, %v4952_v60  ;;  %v4025_v45 = vld [vmem:[%s15112_s5 + $0xd0] sm:$0xff] }
 0x7fd   : > { %10417 = vmatpush1.bf16.msra.mxu0 %v13175_v7  ;;  %10581 = vmatpush1.bf16.msra.mxu1 %v13177_v1  ;;  %v13287_v7 = vcombine.low %v4943_v51, %v4951_v52  ;;  %v13289_v1 = vcombine.low %v4944_v56, %v4952_v60  ;;  %v4033_v52 = vld [vmem:[%s15112_s5 + $0x110] sm:$0xff]  ;;  %v4034_v60 = vld [vmem:[%s15112_s5 + $0x118] sm:$0xff] }
 0x7fe   : > { %10418 = vmatprep.subr.bf16.mxu0 %v13192_v8  ;;  %10582 = vmatprep.subr.bf16.mxu1 %v13194_v57  ;;  %v13304_v8 = vcombine.high %v4959_v0, %v4967_v19  ;;  %v13306_v57 = vcombine.high %v4960_v6, %v4968_v41  ;;  %v4041_v56 = vld [vmem:[%s15112_s5 + $0x150] sm:$0xff] }
 0x801   : > { %10419 = vmatpush1.bf16.msra.mxu0 %v13191_v18  ;;  %10583 = vmatpush1.bf16.msra.mxu1 %v13193_v29  ;;  %v13303_v18 = vcombine.low %v4959_v0, %v4967_v19  ;;  %v13305_v29 = vcombine.low %v4960_v6, %v4968_v41  ;;  %v4049_v19 = vld [vmem:[%s15112_s5 + $0x190] sm:$0xff]  ;;  %v4050_v41 = vld [vmem:[%s15112_s5 + $0x198] sm:$0xff] }
 0x802   : > { %10420 = vmatprep.subr.bf16.mxu0 %v13208_v21  ;;  %10584 = vmatprep.subr.bf16.mxu1 %v13210_v23  ;;  %v13320_v21 = vcombine.high %v4975_v10, %v4983_v11  ;;  %v13322_v23 = vcombine.high %v4976_v37, %v4984_v12  ;;  %v4057_v6 = vld [vmem:[%s15112_s5 + $0x1d0] sm:$0xff] }
 0x805   : > { %10421 = vmatpush1.bf16.msra.mxu0 %v13207_v2  ;;  %10585 = vmatpush1.bf16.msra.mxu1 %v13209_v27  ;;  %v13319_v2 = vcombine.low %v4975_v10, %v4983_v11  ;;  %v13321_v27 = vcombine.low %v4976_v37, %v4984_v12  ;;  %v4065_v11 = vld [vmem:[%s15112_s5 + $0x210] sm:$0xff]  ;;  %v4066_v12 = vld [vmem:[%s15112_s5 + $0x218] sm:$0xff] }
 0x806   : > { %10422 = vmatprep.subr.bf16.mxu0 %v13224_v28  ;;  %10586 = vmatprep.subr.bf16.mxu1 %v13226_v26  ;;  %v13336_v28 = vcombine.high %v4991_v24, %v4999_v17  ;;  %v13338_v26 = vcombine.high %v4992_v40, %v5000_v25  ;;  %v4073_v37 = vld [vmem:[%s15112_s5 + $0x250] sm:$0xff] }
 0x809   : > { %10423 = vmatpush1.bf16.msra.mxu0 %v13223_v59  ;;  %10587 = vmatpush1.bf16.msra.mxu1 %v13225_v39  ;;  %v13335_v59 = vcombine.low %v4991_v24, %v4999_v17  ;;  %v13337_v39 = vcombine.low %v4992_v40, %v5000_v25  ;;  %v4081_v17 = vld [vmem:[%s15112_s5 + $0x290] sm:$0xff]  ;;  %v4082_v25 = vld [vmem:[%s15112_s5 + $0x298] sm:$0xff] }
 0x80a   : > { %10424 = vmatprep.subr.bf16.mxu0 %v13240_v14  ;;  %10588 = vmatprep.subr.bf16.mxu1 %v13242_v44  ;;  %v13352_v14 = vcombine.high %v5007_v30, %v5015_v13  ;;  %v13354_v44 = vcombine.high %v5008_v35, %v5016_v38  ;;  %v4089_v40 = vld [vmem:[%s15112_s5 + $0x2d0] sm:$0xff] }
 0x80d   : > { %10425 = vmatpush1.bf16.msra.mxu0 %v13239_v63  ;;  %10589 = vmatpush1.bf16.msra.mxu1 %v13241_v53  ;;  %v13351_v63 = vcombine.low %v5007_v30, %v5015_v13  ;;  %v13353_v53 = vcombine.low %v5008_v35, %v5016_v38  ;;  %v4097_v13 = vld [vmem:[%s15112_s5 + $0x310] sm:$0xff]  ;;  %v4098_v38 = vld [vmem:[%s15112_s5 + $0x318] sm:$0xff] }
 0x80e   : > { %10426 = vmatprep.subr.bf16.mxu0 %v13256_v54  ;;  %10590 = vmatprep.subr.bf16.mxu1 %v13258_v55  ;;  %v12348_v54 = vcombine.high %v4001_v36, %v4009_v42  ;;  %v12350_v55 = vcombine.high %v4002_v33, %v4010_v32  ;;  %v4105_v35 = vld [vmem:[%s15112_s5 + $0x350] sm:$0xff] }
 0x811   : > { %10427 = vmatpush1.bf16.msra.mxu0 %v13255_v48  ;;  %10591 = vmatpush1.bf16.msra.mxu1 %v13257_v49  ;;  %v4026_v48 = vld [vmem:[%s15112_s5 + $0xd8] sm:$0xff]  ;;  %v12347_v49 = vcombine.low %v4001_v36, %v4009_v42  ;;  %v4113_v42 = vld [vmem:[%s15112_s5 + $0x390] sm:$0xff] }
 0x812   : > { %10428 = vmatprep.subr.bf16.mxu0 %v13272_v34  ;;  %10592 = vmatprep.subr.bf16.mxu1 %v13274_v50  ;;  %v12349_v34 = vcombine.low %v4002_v33, %v4010_v32  ;;  %v12364_v50 = vcombine.high %v4017_v58, %v4025_v45  ;;  %v12366_v51 = vcombine.high %v4018_v47, %v4026_v48  ;;  %v4121_v33 = vld [vmem:[%s15112_s5 + $0x3d0] sm:$0xff]  ;;  %v4114_v32 = vld [vmem:[%s15112_s5 + $0x398] sm:$0xff] }
 0x815   : > { %10429 = vmatpush1.bf16.msra.mxu0 %v13271_v62  ;;  %10593 = vmatpush1.bf16.msra.mxu1 %v13273_v3  ;;  %v4042_v62 = vld [vmem:[%s15112_s5 + $0x158] sm:$0xff]  ;;  %v12363_v3 = vcombine.low %v4017_v58, %v4025_v45  ;;  %v4129_v45 = vld [vmem:[%s15112_s5 + $0x410] sm:$0xff] }
 0x816   : > { %10430 = vmatprep.subr.bf16.mxu0 %v13288_v20  ;;  %10594 = vmatprep.subr.bf16.mxu1 %v13290_v5  ;;  %v12365_v20 = vcombine.low %v4018_v47, %v4026_v48  ;;  %v12380_v5 = vcombine.high %v4033_v52, %v4041_v56  ;;  %v12382_v0 = vcombine.high %v4034_v60, %v4042_v62  ;;  %v4137_v47 = vld [vmem:[%s15112_s5 + $0x450] sm:$0xff]  ;;  %v4130_v48 = vld [vmem:[%s15112_s5 + $0x418] sm:$0xff] }
 0x819   : > { %10431 = vmatpush1.bf16.msra.mxu0 %v13287_v7  ;;  %10595 = vmatpush1.bf16.msra.mxu1 %v13289_v1  ;;  %v4058_v7 = vld [vmem:[%s15112_s5 + $0x1d8] sm:$0xff]  ;;  %v12379_v1 = vcombine.low %v4033_v52, %v4041_v56  ;;  %v4145_v56 = vld [vmem:[%s15112_s5 + $0x490] sm:$0xff] }
 0x81a   : > { %10432 = vmatprep.subr.bf16.mxu0 %v13304_v8  ;;  %10596 = vmatprep.subr.bf16.mxu1 %v13306_v57  ;;  %v12381_v8 = vcombine.low %v4034_v60, %v4042_v62  ;;  %v12396_v57 = vcombine.high %v4049_v19, %v4057_v6  ;;  %v12398_v10 = vcombine.high %v4050_v41, %v4058_v7  ;;  %v4153_v60 = vld [vmem:[%s15112_s5 + $0x4d0] sm:$0xff]  ;;  %v4146_v62 = vld [vmem:[%s15112_s5 + $0x498] sm:$0xff] }
 0x81d   : > { %10433 = vmatpush1.bf16.msra.mxu0 %v13303_v18  ;;  %10597 = vmatpush1.bf16.msra.mxu1 %v13305_v29  ;;  %v4074_v18 = vld [vmem:[%s15112_s5 + $0x258] sm:$0xff]  ;;  %v12395_v29 = vcombine.low %v4049_v19, %v4057_v6  ;;  %v4161_v6 = vld [vmem:[%s15112_s5 + $0x510] sm:$0xff] }
 0x81e   : > { %10434 = vmatprep.subr.bf16.mxu0 %v13320_v21  ;;  %10598 = vmatprep.subr.bf16.mxu1 %v13322_v23  ;;  %v12397_v21 = vcombine.low %v4050_v41, %v4058_v7  ;;  %v12412_v23 = vcombine.high %v4065_v11, %v4073_v37  ;;  %v12414_v24 = vcombine.high %v4066_v12, %v4074_v18  ;;  %v4169_v41 = vld [vmem:[%s15112_s5 + $0x550] sm:$0xff]  ;;  %v4162_v7 = vld [vmem:[%s15112_s5 + $0x518] sm:$0xff] }
 0x821   : > { %10435 = vmatpush1.bf16.msra.mxu0 %v13319_v2  ;;  %10599 = vmatpush1.bf16.msra.mxu1 %v13321_v27  ;;  %v4090_v2 = vld [vmem:[%s15112_s5 + $0x2d8] sm:$0xff]  ;;  %v12411_v27 = vcombine.low %v4065_v11, %v4073_v37  ;;  %v4177_v37 = vld [vmem:[%s15112_s5 + $0x590] sm:$0xff] }
 0x822   : > { %10436 = vmatprep.subr.bf16.mxu0 %v13336_v28  ;;  %10600 = vmatprep.subr.bf16.mxu1 %v13338_v26  ;;  %v12413_v28 = vcombine.low %v4066_v12, %v4074_v18  ;;  %v12428_v26 = vcombine.high %v4081_v17, %v4089_v40  ;;  %v12430_v30 = vcombine.high %v4082_v25, %v4090_v2  ;;  %v4185_v12 = vld [vmem:[%s15112_s5 + $0x5d0] sm:$0xff]  ;;  %v4178_v18 = vld [vmem:[%s15112_s5 + $0x598] sm:$0xff] }
 0x825   : > { %10437 = vmatpush1.bf16.msra.mxu0 %v13335_v59  ;;  %10601 = vmatpush1.bf16.msra.mxu1 %v13337_v39  ;;  %v4106_v59 = vld [vmem:[%s15112_s5 + $0x358] sm:$0xff]  ;;  %v12427_v39 = vcombine.low %v4081_v17, %v4089_v40  ;;  %v4193_v40 = vld [vmem:[%s15112_s5 + $0x610] sm:$0xff] }
 0x826   : > { %10438 = vmatprep.subr.bf16.mxu0 %v13352_v14  ;;  %10602 = vmatprep.subr.bf16.mxu1 %v13354_v44  ;;  %v12429_v14 = vcombine.low %v4082_v25, %v4090_v2  ;;  %v12444_v44 = vcombine.high %v4097_v13, %v4105_v35  ;;  %v12446_v36 = vcombine.high %v4098_v38, %v4106_v59  ;;  %v4201_v25 = vld [vmem:[%s15112_s5 + $0x650] sm:$0xff]  ;;  %v4194_v2 = vld [vmem:[%s15112_s5 + $0x618] sm:$0xff] }
 0x829   : > { %10439 = vmatpush1.bf16.msra.mxu0 %v13351_v63  ;;  %10603 = vmatpush1.bf16.msra.mxu1 %v13353_v53  ;;  %v4122_v63 = vld [vmem:[%s15112_s5 + $0x3d8] sm:$0xff]  ;;  %v12443_v53 = vcombine.low %v4097_v13, %v4105_v35  ;;  %v4209_v35 = vld [vmem:[%s15112_s5 + $0x690] sm:$0xff] }
 0x82a   : > { %10613 = vmatprep.subr.bf16.mxu0 %v12348_v54  ;;  %10777 = vmatprep.subr.bf16.mxu1 %v12350_v55  ;;  %v12445_v54 = vcombine.low %v4098_v38, %v4106_v59  ;;  %v12460_v55 = vcombine.high %v4113_v42, %v4121_v33  ;;  %v12462_v58 = vcombine.high %v4114_v32, %v4122_v63  ;;  %v4217_v38 = vld [vmem:[%s15112_s5 + $0x6d0] sm:$0xff]  ;;  %v4210_v59 = vld [vmem:[%s15112_s5 + $0x698] sm:$0xff] }
 0x82c   : > { %10441 = vmatmul.mubr.bf16.vlgmr.msra.gmra.mrb[0].mxu0 %v15676_v46  ;;  %10605 = vmatmul.mubr.bf16.vlgmr.msra.gmra.mrb[0].mxu1 %v15676_v46 }
 0x82d   : > { %10614 = vmatpush1.bf16.msra.mxu0 %v12347_v49  ;;  %10778 = vmatpush1.bf16.msra.mxu1 %v12349_v34  ;;  %v4138_v49 = vld [vmem:[%s15112_s5 + $0x458] sm:$0xff]  ;;  %v12459_v34 = vcombine.low %v4113_v42, %v4121_v33  ;;  %v4225_v33 = vld [vmem:[%s15112_s5 + $0x710] sm:$0xff] }
 0x82e   : > { %10615 = vmatprep.subr.bf16.mxu0 %v12364_v50  ;;  %10779 = vmatprep.subr.bf16.mxu1 %v12366_v51  ;;  %v12461_v50 = vcombine.low %v4114_v32, %v4122_v63  ;;  %v12476_v51 = vcombine.high %v4129_v45, %v4137_v47  ;;  %v12478_v52 = vcombine.high %v4130_v48, %v4138_v49  ;;  %v4233_v32 = vld [vmem:[%s15112_s5 + $0x750] sm:$0xff]  ;;  %v4226_v63 = vld [vmem:[%s15112_s5 + $0x718] sm:$0xff] }
 0x82f   : > { %10645 = vmatprep.mubr.bf16.mxu0 %v15405_v31  ;;  %10809 = vmatprep.mubr.bf16.mxu1 %v15405_v31 }
 0x831   : > { %10616 = vmatpush1.bf16.msra.mxu0 %v12363_v3  ;;  %10780 = vmatpush1.bf16.msra.mxu1 %v12365_v20  ;;  %v4154_v3 = vld [vmem:[%s15112_s5 + $0x4d8] sm:$0xff]  ;;  %v12475_v20 = vcombine.low %v4129_v45, %v4137_v47  ;;  %v4241_v47 = vld [vmem:[%s15112_s5 + $0x790] sm:$0xff] }
 0x832   : > { %10617 = vmatprep.subr.bf16.mxu0 %v12380_v5  ;;  %10781 = vmatprep.subr.bf16.mxu1 %v12382_v0  ;;  %v12477_v5 = vcombine.low %v4130_v48, %v4138_v49  ;;  %v12492_v0 = vcombine.high %v4145_v56, %v4153_v60  ;;  %v12494_v19 = vcombine.high %v4146_v62, %v4154_v3  ;;  %v4249_v48 = vld [vmem:[%s15112_s5 + $0x7d0] sm:$0xff]  ;;  %v4242_v49 = vld [vmem:[%s15112_s5 + $0x798] sm:$0xff] }
 0x835   : > { %10618 = vmatpush1.bf16.msra.mxu0 %v12379_v1  ;;  %10782 = vmatpush1.bf16.msra.mxu1 %v12381_v8  ;;  %v4170_v1 = vld [vmem:[%s15112_s5 + $0x558] sm:$0xff]  ;;  %v12491_v8 = vcombine.low %v4145_v56, %v4153_v60  ;;  %v4257_v60 = vld [vmem:[%s15112_s5 + $0x810] sm:$0xff] }
 0x836   : > { %10619 = vmatprep.subr.bf16.mxu0 %v12396_v57  ;;  %10783 = vmatprep.subr.bf16.mxu1 %v12398_v10  ;;  %v12493_v57 = vcombine.low %v4146_v62, %v4154_v3  ;;  %v12508_v10 = vcombine.high %v4161_v6, %v4169_v41  ;;  %v12510_v11 = vcombine.high %v4162_v7, %v4170_v1  ;;  %v4265_v62 = vld [vmem:[%s15112_s5 + $0x850] sm:$0xff]  ;;  %v4258_v3 = vld [vmem:[%s15112_s5 + $0x818] sm:$0xff] }
 0x839   : > { %10620 = vmatpush1.bf16.msra.mxu0 %v12395_v29  ;;  %10784 = vmatpush1.bf16.msra.mxu1 %v12397_v21  ;;  %v4186_v29 = vld [vmem:[%s15112_s5 + $0x5d8] sm:$0xff]  ;;  %v12507_v21 = vcombine.low %v4161_v6, %v4169_v41  ;;  %v4273_v41 = vld [vmem:[%s15112_s5 + $0x890] sm:$0xff] }
 0x83a   : > { %10621 = vmatprep.subr.bf16.mxu0 %v12412_v23  ;;  %10785 = vmatprep.subr.bf16.mxu1 %v12414_v24  ;;  %v12509_v23 = vcombine.low %v4162_v7, %v4170_v1  ;;  %v12524_v24 = vcombine.high %v4177_v37, %v4185_v12  ;;  %v12526_v17 = vcombine.high %v4178_v18, %v4186_v29  ;;  %v4281_v7 = vld [vmem:[%s15112_s5 + $0x8d0] sm:$0xff]  ;;  %v4274_v1 = vld [vmem:[%s15112_s5 + $0x898] sm:$0xff] }
 0x83d   : > { %10622 = vmatpush1.bf16.msra.mxu0 %v12411_v27  ;;  %10786 = vmatpush1.bf16.msra.mxu1 %v12413_v28  ;;  %v4202_v27 = vld [vmem:[%s15112_s5 + $0x658] sm:$0xff]  ;;  %v12523_v28 = vcombine.low %v4177_v37, %v4185_v12  ;;  %v4289_v12 = vld [vmem:[%s15112_s5 + $0x910] sm:$0xff] }
 0x83e   : > { %10623 = vmatprep.subr.bf16.mxu0 %v12428_v26  ;;  %10787 = vmatprep.subr.bf16.mxu1 %v12430_v30  ;;  %v12525_v26 = vcombine.low %v4178_v18, %v4186_v29  ;;  %v12540_v30 = vcombine.high %v4193_v40, %v4201_v25  ;;  %v12542_v13 = vcombine.high %v4194_v2, %v4202_v27  ;;  %v4297_v18 = vld [vmem:[%s15112_s5 + $0x950] sm:$0xff]  ;;  %v4290_v29 = vld [vmem:[%s15112_s5 + $0x918] sm:$0xff] }
 0x841   : > { %10624 = vmatpush1.bf16.msra.mxu0 %v12427_v39  ;;  %10788 = vmatpush1.bf16.msra.mxu1 %v12429_v14  ;;  %v4218_v39 = vld [vmem:[%s15112_s5 + $0x6d8] sm:$0xff]  ;;  %v12539_v14 = vcombine.low %v4193_v40, %v4201_v25  ;;  %v4305_v25 = vld [vmem:[%s15112_s5 + $0x990] sm:$0xff] }
 0x842   : > { %10625 = vmatprep.subr.bf16.mxu0 %v12444_v44  ;;  %10789 = vmatprep.subr.bf16.mxu1 %v12446_v36  ;;  %v12541_v44 = vcombine.low %v4194_v2, %v4202_v27  ;;  %v12556_v36 = vcombine.high %v4209_v35, %v4217_v38  ;;  %v12558_v42 = vcombine.high %v4210_v59, %v4218_v39  ;;  %v4313_v2 = vld [vmem:[%s15112_s5 + $0x9d0] sm:$0xff]  ;;  %v4306_v27 = vld [vmem:[%s15112_s5 + $0x998] sm:$0xff] }
 0x845   : > { %10626 = vmatpush1.bf16.msra.mxu0 %v12443_v53  ;;  %10790 = vmatpush1.bf16.msra.mxu1 %v12445_v54  ;;  %v4234_v53 = vld [vmem:[%s15112_s5 + $0x758] sm:$0xff]  ;;  %v12555_v54 = vcombine.low %v4209_v35, %v4217_v38  ;;  %v4321_v38 = vld [vmem:[%s15112_s5 + $0xa10] sm:$0xff] }
 0x846   : > { %10627 = vmatprep.subr.bf16.mxu0 %v12460_v55  ;;  %10791 = vmatprep.subr.bf16.mxu1 %v12462_v58  ;;  %v12557_v55 = vcombine.low %v4210_v59, %v4218_v39  ;;  %v12572_v58 = vcombine.high %v4225_v33, %v4233_v32  ;;  %v12574_v45 = vcombine.high %v4226_v63, %v4234_v53  ;;  %v4329_v59 = vld [vmem:[%s15112_s5 + $0xa50] sm:$0xff]  ;;  %v4322_v39 = vld [vmem:[%s15112_s5 + $0xa18] sm:$0xff] }
 0x849   : > { %10628 = vmatpush1.bf16.msra.mxu0 %v12459_v34  ;;  %10792 = vmatpush1.bf16.msra.mxu1 %v12461_v50  ;;  %v4250_v34 = vld [vmem:[%s15112_s5 + $0x7d8] sm:$0xff]  ;;  %v12571_v50 = vcombine.low %v4225_v33, %v4233_v32  ;;  %v4337_v32 = vld [vmem:[%s15112_s5 + $0xa90] sm:$0xff] }
 0x84a   : > { %10629 = vmatprep.subr.bf16.mxu0 %v12476_v51  ;;  %10793 = vmatprep.subr.bf16.mxu1 %v12478_v52  ;;  %v12573_v51 = vcombine.low %v4226_v63, %v4234_v53  ;;  %v12588_v52 = vcombine.high %v4241_v47, %v4249_v48  ;;  %v12590_v56 = vcombine.high %v4242_v49, %v4250_v34  ;;  %v4345_v63 = vld [vmem:[%s15112_s5 + $0xad0] sm:$0xff]  ;;  %v4338_v53 = vld [vmem:[%s15112_s5 + $0xa98] sm:$0xff] }
 0x84d   : > { %10630 = vmatpush1.bf16.msra.mxu0 %v12475_v20  ;;  %10794 = vmatpush1.bf16.msra.mxu1 %v12477_v5  ;;  %v4266_v20 = vld [vmem:[%s15112_s5 + $0x858] sm:$0xff]  ;;  %v12587_v5 = vcombine.low %v4241_v47, %v4249_v48  ;;  %v4353_v48 = vld [vmem:[%s15112_s5 + $0xb10] sm:$0xff] }
 0x84e   : > { %10631 = vmatprep.subr.bf16.mxu0 %v12492_v0  ;;  %10795 = vmatprep.subr.bf16.mxu1 %v12494_v19  ;;  %v12589_v0 = vcombine.low %v4242_v49, %v4250_v34  ;;  %v12604_v19 = vcombine.high %v4257_v60, %v4265_v62  ;;  %v12606_v6 = vcombine.high %v4258_v3, %v4266_v20  ;;  %v4361_v49 = vld [vmem:[%s15112_s5 + $0xb50] sm:$0xff]  ;;  %v4354_v34 = vld [vmem:[%s15112_s5 + $0xb18] sm:$0xff] }
 0x851   : > { %10632 = vmatpush1.bf16.msra.mxu0 %v12491_v8  ;;  %10796 = vmatpush1.bf16.msra.mxu1 %v12493_v57  ;;  %v4282_v8 = vld [vmem:[%s15112_s5 + $0x8d8] sm:$0xff]  ;;  %v12603_v57 = vcombine.low %v4257_v60, %v4265_v62  ;;  %v4369_v62 = vld [vmem:[%s15112_s5 + $0xb90] sm:$0xff] }
 0x852   : > { %10633 = vmatprep.subr.bf16.mxu0 %v12508_v10  ;;  %10797 = vmatprep.subr.bf16.mxu1 %v12510_v11  ;;  %v12605_v10 = vcombine.low %v4258_v3, %v4266_v20  ;;  %v12620_v11 = vcombine.high %v4273_v41, %v4281_v7  ;;  %v12622_v37 = vcombine.high %v4274_v1, %v4282_v8  ;;  %v4377_v3 = vld [vmem:[%s15112_s5 + $0xbd0] sm:$0xff]  ;;  %v4370_v20 = vld [vmem:[%s15112_s5 + $0xb98] sm:$0xff] }
 0x855   : > { %10634 = vmatpush1.bf16.msra.mxu0 %v12507_v21  ;;  %10798 = vmatpush1.bf16.msra.mxu1 %v12509_v23  ;;  %v4298_v21 = vld [vmem:[%s15112_s5 + $0x958] sm:$0xff]  ;;  %v12619_v23 = vcombine.low %v4273_v41, %v4281_v7  ;;  %v4385_v7 = vld [vmem:[%s15112_s5 + $0xc10] sm:$0xff] }
 0x856   : > { %10635 = vmatprep.subr.bf16.mxu0 %v12524_v24  ;;  %10799 = vmatprep.subr.bf16.mxu1 %v12526_v17  ;;  %v12621_v24 = vcombine.low %v4274_v1, %v4282_v8  ;;  %v12636_v17 = vcombine.high %v4289_v12, %v4297_v18  ;;  %v12638_v40 = vcombine.high %v4290_v29, %v4298_v21  ;;  %v4393_v1 = vld [vmem:[%s15112_s5 + $0xc50] sm:$0xff]  ;;  %v4386_v8 = vld [vmem:[%s15112_s5 + $0xc18] sm:$0xff] }
 0x859   : > { %10636 = vmatpush1.bf16.msra.mxu0 %v12523_v28  ;;  %10800 = vmatpush1.bf16.msra.mxu1 %v12525_v26  ;;  %v4314_v28 = vld [vmem:[%s15112_s5 + $0x9d8] sm:$0xff]  ;;  %v12635_v26 = vcombine.low %v4289_v12, %v4297_v18  ;;  %v4401_v18 = vld [vmem:[%s15112_s5 + $0xc90] sm:$0xff] }
 0x85a   : > { %10637 = vmatprep.subr.bf16.mxu0 %v12540_v30  ;;  %10801 = vmatprep.subr.bf16.mxu1 %v12542_v13  ;;  %v12637_v30 = vcombine.low %v4290_v29, %v4298_v21  ;;  %v12652_v13 = vcombine.high %v4305_v25, %v4313_v2  ;;  %v12654_v35 = vcombine.high %v4306_v27, %v4314_v28  ;;  %v4409_v29 = vld [vmem:[%s15112_s5 + $0xcd0] sm:$0xff]  ;;  %v4402_v21 = vld [vmem:[%s15112_s5 + $0xc98] sm:$0xff] }
 0x85d   : > { %10638 = vmatpush1.bf16.msra.mxu0 %v12539_v14  ;;  %10802 = vmatpush1.bf16.msra.mxu1 %v12541_v44  ;;  %v4330_v14 = vld [vmem:[%s15112_s5 + $0xa58] sm:$0xff]  ;;  %v12651_v44 = vcombine.low %v4305_v25, %v4313_v2  ;;  %v4417_v2 = vld [vmem:[%s15112_s5 + $0xd10] sm:$0xff] }
 0x85e   : > { %10639 = vmatprep.subr.bf16.mxu0 %v12556_v36  ;;  %10803 = vmatprep.subr.bf16.mxu1 %v12558_v42  ;;  %v12653_v36 = vcombine.low %v4306_v27, %v4314_v28  ;;  %v12668_v42 = vcombine.high %v4321_v38, %v4329_v59  ;;  %v12670_v33 = vcombine.high %v4322_v39, %v4330_v14  ;;  %v4425_v27 = vld [vmem:[%s15112_s5 + $0xd50] sm:$0xff]  ;;  %v4418_v28 = vld [vmem:[%s15112_s5 + $0xd18] sm:$0xff] }
 0x861   : > { %10640 = vmatpush1.bf16.msra.mxu0 %v12555_v54  ;;  %10804 = vmatpush1.bf16.msra.mxu1 %v12557_v55  ;;  %v4346_v54 = vld [vmem:[%s15112_s5 + $0xad8] sm:$0xff]  ;;  %v12667_v55 = vcombine.low %v4321_v38, %v4329_v59  ;;  %v4433_v59 = vld [vmem:[%s15112_s5 + $0xd90] sm:$0xff] }
 0x862   : > { %10641 = vmatprep.subr.bf16.mxu0 %v12572_v58  ;;  %10805 = vmatprep.subr.bf16.mxu1 %v12574_v45  ;;  %v12669_v58 = vcombine.low %v4322_v39, %v4330_v14  ;;  %v12684_v45 = vcombine.high %v4337_v32, %v4345_v63  ;;  %v12686_v47 = vcombine.high %v4338_v53, %v4346_v54  ;;  %v4441_v39 = vld [vmem:[%s15112_s5 + $0xdd0] sm:$0xff]  ;;  %v4434_v14 = vld [vmem:[%s15112_s5 + $0xd98] sm:$0xff] }
 0x865   : > { %10642 = vmatpush1.bf16.msra.mxu0 %v12571_v50  ;;  %10806 = vmatpush1.bf16.msra.mxu1 %v12573_v51  ;;  %v4362_v50 = vld [vmem:[%s15112_s5 + $0xb58] sm:$0xff]  ;;  %v12683_v51 = vcombine.low %v4337_v32, %v4345_v63  ;;  %v4449_v63 = vld [vmem:[%s15112_s5 + $0xe10] sm:$0xff] }
 0x866   : > { %10643 = vmatprep.subr.bf16.mxu0 %v12588_v52  ;;  %10807 = vmatprep.subr.bf16.mxu1 %v12590_v56  ;;  %v12685_v52 = vcombine.low %v4338_v53, %v4346_v54  ;;  %v12700_v56 = vcombine.high %v4353_v48, %v4361_v49  ;;  %v12702_v60 = vcombine.high %v4354_v34, %v4362_v50  ;;  %v4457_v53 = vld [vmem:[%s15112_s5 + $0xe50] sm:$0xff]  ;;  %v4450_v54 = vld [vmem:[%s15112_s5 + $0xe18] sm:$0xff] }
 0x869   : > { %10644 = vmatpush1.bf16.msra.mxu0 %v12587_v5  ;;  %10808 = vmatpush1.bf16.msra.mxu1 %v12589_v0  ;;  %v4378_v5 = vld [vmem:[%s15112_s5 + $0xbd8] sm:$0xff]  ;;  %v12699_v0 = vcombine.low %v4353_v48, %v4361_v49  ;;  %v4465_v49 = vld [vmem:[%s15112_s5 + $0xe90] sm:$0xff] }
 0x86a   : > { %10654 = vmatprep.subr.bf16.mxu0 %v12604_v19  ;;  %10818 = vmatprep.subr.bf16.mxu1 %v12606_v6  ;;  %v12701_v19 = vcombine.low %v4354_v34, %v4362_v50  ;;  %v12716_v6 = vcombine.high %v4369_v62, %v4377_v3  ;;  %v12718_v41 = vcombine.high %v4370_v20, %v4378_v5  ;;  %v4473_v34 = vld [vmem:[%s15112_s5 + $0xed0] sm:$0xff]  ;;  %v4466_v50 = vld [vmem:[%s15112_s5 + $0xe98] sm:$0xff] }
 0x86c   : > { %10646 = vmatmul.mubr.bf16.vlgmr.msra.gmra.mrb[4].mxu0 %v15450_v4  ;;  %10810 = vmatmul.mubr.bf16.vlgmr.msra.gmra.mrb[4].mxu1 %v15450_v4 }
 0x86d   : > { %10655 = vmatpush1.bf16.msra.mxu0 %v12603_v57  ;;  %10819 = vmatpush1.bf16.msra.mxu1 %v12605_v10  ;;  %v4394_v57 = vld [vmem:[%s15112_s5 + $0xc58] sm:$0xff]  ;;  %v12715_v10 = vcombine.low %v4369_v62, %v4377_v3  ;;  %v4481_v3 = vld [vmem:[%s15112_s5 + $0xf10] sm:$0xff] }
 0x86e   : > { %10656 = vmatprep.subr.bf16.mxu0 %v12620_v11  ;;  %10820 = vmatprep.subr.bf16.mxu1 %v12622_v37  ;;  %v12717_v11 = vcombine.low %v4370_v20, %v4378_v5  ;;  %v12732_v37 = vcombine.high %v4385_v7, %v4393_v1  ;;  %v12734_v12 = vcombine.high %v4386_v8, %v4394_v57  ;;  %v4489_v20 = vld [vmem:[%s15112_s5 + $0xf50] sm:$0xff]  ;;  %v4482_v5 = vld [vmem:[%s15112_s5 + $0xf18] sm:$0xff] }
 0x86f   : > { %10686 = vmatprep.mubr.bf16.mxu0 %v15458_v15  ;;  %10850 = vmatprep.mubr.bf16.mxu1 %v15458_v15 }
 0x871   : > { %10657 = vmatpush1.bf16.msra.mxu0 %v12619_v23  ;;  %10821 = vmatpush1.bf16.msra.mxu1 %v12621_v24  ;;  %v4410_v23 = vld [vmem:[%s15112_s5 + $0xcd8] sm:$0xff]  ;;  %v12731_v24 = vcombine.low %v4385_v7, %v4393_v1  ;;  %v4497_v1 = vld [vmem:[%s15112_s5 + $0xf90] sm:$0xff] }
 0x872   : > { %10658 = vmatprep.subr.bf16.mxu0 %v12636_v17  ;;  %10822 = vmatprep.subr.bf16.mxu1 %v12638_v40  ;;  %v12733_v17 = vcombine.low %v4386_v8, %v4394_v57  ;;  %v12748_v40 = vcombine.high %v4401_v18, %v4409_v29  ;;  %v12750_v25 = vcombine.high %v4402_v21, %v4410_v23  ;;  %v4505_v8 = vld [vmem:[%s15112_s5 + $0xfd0] sm:$0xff]  ;;  %v4498_v57 = vld [vmem:[%s15112_s5 + $0xf98] sm:$0xff] }
 0x875   : > { %10659 = vmatpush1.bf16.msra.mxu0 %v12635_v26  ;;  %10823 = vmatpush1.bf16.msra.mxu1 %v12637_v30  ;;  %v4426_v26 = vld [vmem:[%s15112_s5 + $0xd58] sm:$0xff]  ;;  %v12747_v30 = vcombine.low %v4401_v18, %v4409_v29  ;;  %v4513_v29 = vld [vmem:[%s15112_s5 + $0x1010] sm:$0xff] }
 0x876   : > { %10660 = vmatprep.subr.bf16.mxu0 %v12652_v13  ;;  %10824 = vmatprep.subr.bf16.mxu1 %v12654_v35  ;;  %v12749_v13 = vcombine.low %v4402_v21, %v4410_v23  ;;  %v12764_v35 = vcombine.high %v4417_v2, %v4425_v27  ;;  %v12766_v38 = vcombine.high %v4418_v28, %v4426_v26  ;;  %v4521_v21 = vld [vmem:[%s15112_s5 + $0x1050] sm:$0xff]  ;;  %v4514_v23 = vld [vmem:[%s15112_s5 + $0x1018] sm:$0xff] }
 0x879   : > { %10661 = vmatpush1.bf16.msra.mxu0 %v12651_v44  ;;  %10825 = vmatpush1.bf16.msra.mxu1 %v12653_v36  ;;  %v4442_v44 = vld [vmem:[%s15112_s5 + $0xdd8] sm:$0xff]  ;;  %v12763_v36 = vcombine.low %v4417_v2, %v4425_v27  ;;  %v4529_v27 = vld [vmem:[%s15112_s5 + $0x1090] sm:$0xff] }
 0x87a   : > { %10662 = vmatprep.subr.bf16.mxu0 %v12668_v42  ;;  %10826 = vmatprep.subr.bf16.mxu1 %v12670_v33  ;;  %v12765_v42 = vcombine.low %v4418_v28, %v4426_v26  ;;  %v12780_v33 = vcombine.high %v4433_v59, %v4441_v39  ;;  %v12782_v32 = vcombine.high %v4434_v14, %v4442_v44  ;;  %v4537_v28 = vld [vmem:[%s15112_s5 + $0x10d0] sm:$0xff]  ;;  %v4530_v26 = vld [vmem:[%s15112_s5 + $0x1098] sm:$0xff] }
 0x87d   : > { %10663 = vmatpush1.bf16.msra.mxu0 %v12667_v55  ;;  %10827 = vmatpush1.bf16.msra.mxu1 %v12669_v58  ;;  %v4458_v55 = vld [vmem:[%s15112_s5 + $0xe58] sm:$0xff]  ;;  %v12779_v58 = vcombine.low %v4433_v59, %v4441_v39  ;;  %v4545_v39 = vld [vmem:[%s15112_s5 + $0x1110] sm:$0xff] }
 0x87e   : > { %10664 = vmatprep.subr.bf16.mxu0 %v12684_v45  ;;  %10828 = vmatprep.subr.bf16.mxu1 %v12686_v47  ;;  %v12781_v45 = vcombine.low %v4434_v14, %v4442_v44  ;;  %v12796_v47 = vcombine.high %v4449_v63, %v4457_v53  ;;  %v12798_v48 = vcombine.high %v4450_v54, %v4458_v55  ;;  %v4553_v14 = vld [vmem:[%s15112_s5 + $0x1150] sm:$0xff]  ;;  %v4546_v44 = vld [vmem:[%s15112_s5 + $0x1118] sm:$0xff] }
 0x881   : > { %10665 = vmatpush1.bf16.msra.mxu0 %v12683_v51  ;;  %10829 = vmatpush1.bf16.msra.mxu1 %v12685_v52  ;;  %v4474_v51 = vld [vmem:[%s15112_s5 + $0xed8] sm:$0xff]  ;;  %v12795_v52 = vcombine.low %v4449_v63, %v4457_v53  ;;  %v4561_v53 = vld [vmem:[%s15112_s5 + $0x1190] sm:$0xff] }
 0x882   : > { %10666 = vmatprep.subr.bf16.mxu0 %v12700_v56  ;;  %10830 = vmatprep.subr.bf16.mxu1 %v12702_v60  ;;  %v12797_v56 = vcombine.low %v4450_v54, %v4458_v55  ;;  %v12812_v60 = vcombine.high %v4465_v49, %v4473_v34  ;;  %v12814_v62 = vcombine.high %v4466_v50, %v4474_v51  ;;  %v4569_v54 = vld [vmem:[%s15112_s5 + $0x11d0] sm:$0xff]  ;;  %v4562_v55 = vld [vmem:[%s15112_s5 + $0x1198] sm:$0xff] }
 0x885   : > { %10667 = vmatpush1.bf16.msra.mxu0 %v12699_v0  ;;  %10831 = vmatpush1.bf16.msra.mxu1 %v12701_v19  ;;  %v4490_v0 = vld [vmem:[%s15112_s5 + $0xf58] sm:$0xff]  ;;  %v12811_v19 = vcombine.low %v4465_v49, %v4473_v34  ;;  %v4577_v34 = vld [vmem:[%s15112_s5 + $0x1210] sm:$0xff] }
 0x886   : > { %10668 = vmatprep.subr.bf16.mxu0 %v12716_v6  ;;  %10832 = vmatprep.subr.bf16.mxu1 %v12718_v41  ;;  %v12813_v6 = vcombine.low %v4466_v50, %v4474_v51  ;;  %v12828_v41 = vcombine.high %v4481_v3, %v4489_v20  ;;  %v12830_v7 = vcombine.high %v4482_v5, %v4490_v0  ;;  %v4585_v50 = vld [vmem:[%s15112_s5 + $0x1250] sm:$0xff]  ;;  %v4578_v51 = vld [vmem:[%s15112_s5 + $0x1218] sm:$0xff] }
 0x889   : > { %10669 = vmatpush1.bf16.msra.mxu0 %v12715_v10  ;;  %10833 = vmatpush1.bf16.msra.mxu1 %v12717_v11  ;;  %v4506_v10 = vld [vmem:[%s15112_s5 + $0xfd8] sm:$0xff]  ;;  %v12827_v11 = vcombine.low %v4481_v3, %v4489_v20  ;;  %v4593_v20 = vld [vmem:[%s15112_s5 + $0x1290] sm:$0xff] }
 0x88a   : > { %10670 = vmatprep.subr.bf16.mxu0 %v12732_v37  ;;  %10834 = vmatprep.subr.bf16.mxu1 %v12734_v12  ;;  %v12829_v37 = vcombine.low %v4482_v5, %v4490_v0  ;;  %v12844_v12 = vcombine.high %v4497_v1, %v4505_v8  ;;  %v12846_v18 = vcombine.high %v4498_v57, %v4506_v10  ;;  %v4601_v5 = vld [vmem:[%s15112_s5 + $0x12d0] sm:$0xff]  ;;  %v4594_v0 = vld [vmem:[%s15112_s5 + $0x1298] sm:$0xff] }
 0x88d   : > { %10671 = vmatpush1.bf16.msra.mxu0 %v12731_v24  ;;  %10835 = vmatpush1.bf16.msra.mxu1 %v12733_v17  ;;  %v4522_v24 = vld [vmem:[%s15112_s5 + $0x1058] sm:$0xff]  ;;  %v12843_v17 = vcombine.low %v4497_v1, %v4505_v8  ;;  %v4609_v8 = vld [vmem:[%s15112_s5 + $0x1310] sm:$0xff] }
 0x88e   : > { %10672 = vmatprep.subr.bf16.mxu0 %v12748_v40  ;;  %10836 = vmatprep.subr.bf16.mxu1 %v12750_v25  ;;  %v12845_v40 = vcombine.low %v4498_v57, %v4506_v10  ;;  %v12860_v25 = vcombine.high %v4513_v29, %v4521_v21  ;;  %v12862_v2 = vcombine.high %v4514_v23, %v4522_v24  ;;  %v4617_v57 = vld [vmem:[%s15112_s5 + $0x1350] sm:$0xff]  ;;  %v4610_v10 = vld [vmem:[%s15112_s5 + $0x1318] sm:$0xff] }
 0x891   : > { %10673 = vmatpush1.bf16.msra.mxu0 %v12747_v30  ;;  %10837 = vmatpush1.bf16.msra.mxu1 %v12749_v13  ;;  %v4538_v30 = vld [vmem:[%s15112_s5 + $0x10d8] sm:$0xff]  ;;  %v12859_v13 = vcombine.low %v4513_v29, %v4521_v21  ;;  %v4625_v21 = vld [vmem:[%s15112_s5 + $0x1390] sm:$0xff] }
 0x892   : > { %10674 = vmatprep.subr.bf16.mxu0 %v12764_v35  ;;  %10838 = vmatprep.subr.bf16.mxu1 %v12766_v38  ;;  %v12861_v35 = vcombine.low %v4514_v23, %v4522_v24  ;;  %v12876_v38 = vcombine.high %v4529_v27, %v4537_v28  ;;  %v12878_v59 = vcombine.high %v4530_v26, %v4538_v30  ;;  %v4633_v23 = vld [vmem:[%s15112_s5 + $0x13d0] sm:$0xff]  ;;  %v4626_v24 = vld [vmem:[%s15112_s5 + $0x1398] sm:$0xff] }
 0x895   : > { %10675 = vmatpush1.bf16.msra.mxu0 %v12763_v36  ;;  %10839 = vmatpush1.bf16.msra.mxu1 %v12765_v42  ;;  %v4554_v36 = vld [vmem:[%s15112_s5 + $0x1158] sm:$0xff]  ;;  %v12875_v42 = vcombine.low %v4529_v27, %v4537_v28  ;;  %v4641_v28 = vld [vmem:[%s15112_s5 + $0x1410] sm:$0xff] }
 0x896   : > { %10676 = vmatprep.subr.bf16.mxu0 %v12780_v33  ;;  %10840 = vmatprep.subr.bf16.mxu1 %v12782_v32  ;;  %v12877_v33 = vcombine.low %v4530_v26, %v4538_v30  ;;  %v12892_v32 = vcombine.high %v4545_v39, %v4553_v14  ;;  %v12894_v63 = vcombine.high %v4546_v44, %v4554_v36  ;;  %v4649_v26 = vld [vmem:[%s15112_s5 + $0x1450] sm:$0xff]  ;;  %v4642_v30 = vld [vmem:[%s15112_s5 + $0x1418] sm:$0xff] }
 0x899   : > { %10677 = vmatpush1.bf16.msra.mxu0 %v12779_v58  ;;  %10841 = vmatpush1.bf16.msra.mxu1 %v12781_v45  ;;  %v4570_v58 = vld [vmem:[%s15112_s5 + $0x11d8] sm:$0xff]  ;;  %v12891_v45 = vcombine.low %v4545_v39, %v4553_v14  ;;  %v4657_v14 = vld [vmem:[%s15112_s5 + $0x1490] sm:$0xff] }
 0x89a   : > { %10678 = vmatprep.subr.bf16.mxu0 %v12796_v47  ;;  %10842 = vmatprep.subr.bf16.mxu1 %v12798_v48  ;;  %v12893_v47 = vcombine.low %v4546_v44, %v4554_v36  ;;  %v12908_v48 = vcombine.high %v4561_v53, %v4569_v54  ;;  %v12910_v49 = vcombine.high %v4562_v55, %v4570_v58  ;;  %v4665_v44 = vld [vmem:[%s15112_s5 + $0x14d0] sm:$0xff]  ;;  %v4658_v36 = vld [vmem:[%s15112_s5 + $0x1498] sm:$0xff] }
 0x89d   : > { %10679 = vmatpush1.bf16.msra.mxu0 %v12795_v52  ;;  %10843 = vmatpush1.bf16.msra.mxu1 %v12797_v56  ;;  %v4586_v52 = vld [vmem:[%s15112_s5 + $0x1258] sm:$0xff]  ;;  %v12907_v56 = vcombine.low %v4561_v53, %v4569_v54  ;;  %v4673_v54 = vld [vmem:[%s15112_s5 + $0x1510] sm:$0xff] }
 0x89e   : > { %10680 = vmatprep.subr.bf16.mxu0 %v12812_v60  ;;  %10844 = vmatprep.subr.bf16.mxu1 %v12814_v62  ;;  %v12909_v60 = vcombine.low %v4562_v55, %v4570_v58  ;;  %v12924_v62 = vcombine.high %v4577_v34, %v4585_v50  ;;  %v12926_v3 = vcombine.high %v4578_v51, %v4586_v52  ;;  %v4681_v55 = vld [vmem:[%s15112_s5 + $0x1550] sm:$0xff]  ;;  %v4674_v58 = vld [vmem:[%s15112_s5 + $0x1518] sm:$0xff] }
 0x8a1   : > { %10681 = vmatpush1.bf16.msra.mxu0 %v12811_v19  ;;  %10845 = vmatpush1.bf16.msra.mxu1 %v12813_v6  ;;  %v4602_v19 = vld [vmem:[%s15112_s5 + $0x12d8] sm:$0xff]  ;;  %v12923_v6 = vcombine.low %v4577_v34, %v4585_v50  ;;  %v4689_v50 = vld [vmem:[%s15112_s5 + $0x1590] sm:$0xff] }
 0x8a2   : > { %10682 = vmatprep.subr.bf16.mxu0 %v12828_v41  ;;  %10846 = vmatprep.subr.bf16.mxu1 %v12830_v7  ;;  %v12925_v41 = vcombine.low %v4578_v51, %v4586_v52  ;;  %v12940_v7 = vcombine.high %v4593_v20, %v4601_v5  ;;  %v12942_v1 = vcombine.high %v4594_v0, %v4602_v19  ;;  %v4697_v51 = vld [vmem:[%s15112_s5 + $0x15d0] sm:$0xff]  ;;  %v4690_v52 = vld [vmem:[%s15112_s5 + $0x1598] sm:$0xff] }
 0x8a5   : > { %10683 = vmatpush1.bf16.msra.mxu0 %v12827_v11  ;;  %10847 = vmatpush1.bf16.msra.mxu1 %v12829_v37  ;;  %v4618_v11 = vld [vmem:[%s15112_s5 + $0x1358] sm:$0xff]  ;;  %v12939_v37 = vcombine.low %v4593_v20, %v4601_v5  ;;  %v4705_v5 = vld [vmem:[%s15112_s5 + $0x1610] sm:$0xff] }
 0x8a6   : > { %10684 = vmatprep.subr.bf16.mxu0 %v12844_v12  ;;  %10848 = vmatprep.subr.bf16.mxu1 %v12846_v18  ;;  %v12941_v12 = vcombine.low %v4594_v0, %v4602_v19  ;;  %v12956_v18 = vcombine.high %v4609_v8, %v4617_v57  ;;  %v12958_v29 = vcombine.high %v4610_v10, %v4618_v11  ;;  %v4713_v0 = vld [vmem:[%s15112_s5 + $0x1650] sm:$0xff]  ;;  %v4706_v19 = vld [vmem:[%s15112_s5 + $0x1618] sm:$0xff] }
 0x8a9   : > { %10685 = vmatpush1.bf16.msra.mxu0 %v12843_v17  ;;  %10849 = vmatpush1.bf16.msra.mxu1 %v12845_v40  ;;  %v4634_v17 = vld [vmem:[%s15112_s5 + $0x13d8] sm:$0xff]  ;;  %v12955_v40 = vcombine.low %v4609_v8, %v4617_v57  ;;  %v4721_v57 = vld [vmem:[%s15112_s5 + $0x1690] sm:$0xff] }
 0x8aa   : > { %10695 = vmatprep.subr.bf16.mxu0 %v12860_v25  ;;  %10859 = vmatprep.subr.bf16.mxu1 %v12862_v2  ;;  %v12957_v25 = vcombine.low %v4610_v10, %v4618_v11  ;;  %v12972_v2 = vcombine.high %v4625_v21, %v4633_v23  ;;  %v12974_v27 = vcombine.high %v4626_v24, %v4634_v17  ;;  %v4729_v10 = vld [vmem:[%s15112_s5 + $0x16d0] sm:$0xff]  ;;  %v4722_v11 = vld [vmem:[%s15112_s5 + $0x1698] sm:$0xff] }
 0x8ac   : > { %10687 = vmatmul.mubr.bf16.vlgmr.msra.gmra.mrb[4].mxu0 %v15532_v16  ;;  %10851 = vmatmul.mubr.bf16.vlgmr.msra.gmra.mrb[4].mxu1 %v15532_v16 }
 0x8ad   : > { %10696 = vmatpush1.bf16.msra.mxu0 %v12859_v13  ;;  %10860 = vmatpush1.bf16.msra.mxu1 %v12861_v35  ;;  %v4650_v13 = vld [vmem:[%s15112_s5 + $0x1458] sm:$0xff]  ;;  %v12971_v35 = vcombine.low %v4625_v21, %v4633_v23  ;;  %v4737_v23 = vld [vmem:[%s15112_s5 + $0x1710] sm:$0xff] }
 0x8ae   : > { %10697 = vmatprep.subr.bf16.mxu0 %v12876_v38  ;;  %10861 = vmatprep.subr.bf16.mxu1 %v12878_v59  ;;  %v12973_v38 = vcombine.low %v4626_v24, %v4634_v17  ;;  %v12988_v59 = vcombine.high %v4641_v28, %v4649_v26  ;;  %v12990_v39 = vcombine.high %v4642_v30, %v4650_v13  ;;  %v4745_v24 = vld [vmem:[%s15112_s5 + $0x1750] sm:$0xff]  ;;  %v4738_v17 = vld [vmem:[%s15112_s5 + $0x1718] sm:$0xff] }
 0x8af   : > { %10727 = vmatprep.mubr.bf16.mxu0 %v15461_v61  ;;  %10891 = vmatprep.mubr.bf16.mxu1 %v15461_v61 }
 0x8b1   : > { %10698 = vmatpush1.bf16.msra.mxu0 %v12875_v42  ;;  %10862 = vmatpush1.bf16.msra.mxu1 %v12877_v33  ;;  %v4666_v42 = vld [vmem:[%s15112_s5 + $0x14d8] sm:$0xff]  ;;  %v12987_v33 = vcombine.low %v4641_v28, %v4649_v26  ;;  %v4753_v26 = vld [vmem:[%s15112_s5 + $0x1790] sm:$0xff] }
 0x8b2   : > { %10699 = vmatprep.subr.bf16.mxu0 %v12892_v32  ;;  %10863 = vmatprep.subr.bf16.mxu1 %v12894_v63  ;;  %v12989_v32 = vcombine.low %v4642_v30, %v4650_v13  ;;  %v13004_v63 = vcombine.high %v4657_v14, %v4665_v44  ;;  %v13006_v53 = vcombine.high %v4658_v36, %v4666_v42  ;;  %v4761_v30 = vld [vmem:[%s15112_s5 + $0x17d0] sm:$0xff]  ;;  %v4754_v13 = vld [vmem:[%s15112_s5 + $0x1798] sm:$0xff] }
 0x8b5   : > { %10700 = vmatpush1.bf16.msra.mxu0 %v12891_v45  ;;  %10864 = vmatpush1.bf16.msra.mxu1 %v12893_v47  ;;  %v4682_v45 = vld [vmem:[%s15112_s5 + $0x1558] sm:$0xff]  ;;  %v13003_v47 = vcombine.low %v4657_v14, %v4665_v44  ;;  %v4769_v44 = vld [vmem:[%s15112_s5 + $0x1810] sm:$0xff] }
 0x8b6   : > { %10701 = vmatprep.subr.bf16.mxu0 %v12908_v48  ;;  %10865 = vmatprep.subr.bf16.mxu1 %v12910_v49  ;;  %v13005_v48 = vcombine.low %v4658_v36, %v4666_v42  ;;  %v13020_v49 = vcombine.high %v4673_v54, %v4681_v55  ;;  %v13022_v34 = vcombine.high %v4674_v58, %v4682_v45  ;;  %v4777_v36 = vld [vmem:[%s15112_s5 + $0x1850] sm:$0xff]  ;;  %v4770_v42 = vld [vmem:[%s15112_s5 + $0x1818] sm:$0xff] }
 0x8b9   : > { %10702 = vmatpush1.bf16.msra.mxu0 %v12907_v56  ;;  %10866 = vmatpush1.bf16.msra.mxu1 %v12909_v60  ;;  %v4698_v56 = vld [vmem:[%s15112_s5 + $0x15d8] sm:$0xff]  ;;  %v13019_v60 = vcombine.low %v4673_v54, %v4681_v55  ;;  %v4785_v55 = vld [vmem:[%s15112_s5 + $0x1890] sm:$0xff] }
 0x8ba   : > { %10703 = vmatprep.subr.bf16.mxu0 %v12924_v62  ;;  %10867 = vmatprep.subr.bf16.mxu1 %v12926_v3  ;;  %v13021_v62 = vcombine.low %v4674_v58, %v4682_v45  ;;  %v13036_v3 = vcombine.high %v4689_v50, %v4697_v51  ;;  %v13038_v20 = vcombine.high %v4690_v52, %v4698_v56  ;;  %v4793_v58 = vld [vmem:[%s15112_s5 + $0x18d0] sm:$0xff]  ;;  %v4786_v45 = vld [vmem:[%s15112_s5 + $0x1898] sm:$0xff] }
 0x8bd   : > { %10704 = vmatpush1.bf16.msra.mxu0 %v12923_v6  ;;  %10868 = vmatpush1.bf16.msra.mxu1 %v12925_v41  ;;  %v4714_v6 = vld [vmem:[%s15112_s5 + $0x1658] sm:$0xff]  ;;  %v13035_v41 = vcombine.low %v4689_v50, %v4697_v51  ;;  %v4801_v51 = vld [vmem:[%s15112_s5 + $0x1910] sm:$0xff] }
 0x8be   : > { %10705 = vmatprep.subr.bf16.mxu0 %v12940_v7  ;;  %10869 = vmatprep.subr.bf16.mxu1 %v12942_v1  ;;  %v13037_v7 = vcombine.low %v4690_v52, %v4698_v56  ;;  %v13052_v1 = vcombine.high %v4705_v5, %v4713_v0  ;;  %v13054_v8 = vcombine.high %v4706_v19, %v4714_v6  ;;  %v4809_v52 = vld [vmem:[%s15112_s5 + $0x1950] sm:$0xff]  ;;  %v4802_v56 = vld [vmem:[%s15112_s5 + $0x1918] sm:$0xff] }
 0x8c1   : > { %10706 = vmatpush1.bf16.msra.mxu0 %v12939_v37  ;;  %10870 = vmatpush1.bf16.msra.mxu1 %v12941_v12  ;;  %v4730_v37 = vld [vmem:[%s15112_s5 + $0x16d8] sm:$0xff]  ;;  %v13051_v12 = vcombine.low %v4705_v5, %v4713_v0  ;;  %v4817_v0 = vld [vmem:[%s15112_s5 + $0x1990] sm:$0xff] }
 0x8c2   : > { %10707 = vmatprep.subr.bf16.mxu0 %v12956_v18  ;;  %10871 = vmatprep.subr.bf16.mxu1 %v12958_v29  ;;  %v13053_v18 = vcombine.low %v4706_v19, %v4714_v6  ;;  %v13068_v29 = vcombine.high %v4721_v57, %v4729_v10  ;;  %v13070_v21 = vcombine.high %v4722_v11, %v4730_v37  ;;  %v4825_v19 = vld [vmem:[%s15112_s5 + $0x19d0] sm:$0xff]  ;;  %v4818_v6 = vld [vmem:[%s15112_s5 + $0x1998] sm:$0xff] }
 0x8c5   : > { %10708 = vmatpush1.bf16.msra.mxu0 %v12955_v40  ;;  %10872 = vmatpush1.bf16.msra.mxu1 %v12957_v25  ;;  %v4746_v40 = vld [vmem:[%s15112_s5 + $0x1758] sm:$0xff]  ;;  %v13067_v25 = vcombine.low %v4721_v57, %v4729_v10  ;;  %v4833_v10 = vld [vmem:[%s15112_s5 + $0x1a10] sm:$0xff] }
 0x8c6   : > { %10709 = vmatprep.subr.bf16.mxu0 %v12972_v2  ;;  %10873 = vmatprep.subr.bf16.mxu1 %v12974_v27  ;;  %v13069_v2 = vcombine.low %v4722_v11, %v4730_v37  ;;  %v13084_v27 = vcombine.high %v4737_v23, %v4745_v24  ;;  %v13086_v28 = vcombine.high %v4738_v17, %v4746_v40  ;;  %v4841_v11 = vld [vmem:[%s15112_s5 + $0x1a50] sm:$0xff]  ;;  %v4834_v37 = vld [vmem:[%s15112_s5 + $0x1a18] sm:$0xff] }
 0x8c9   : > { %10710 = vmatpush1.bf16.msra.mxu0 %v12971_v35  ;;  %10874 = vmatpush1.bf16.msra.mxu1 %v12973_v38  ;;  %v4762_v35 = vld [vmem:[%s15112_s5 + $0x17d8] sm:$0xff]  ;;  %v13083_v38 = vcombine.low %v4737_v23, %v4745_v24  ;;  %v4849_v24 = vld [vmem:[%s15112_s5 + $0x1a90] sm:$0xff] }
 0x8ca   : > { %10711 = vmatprep.subr.bf16.mxu0 %v12988_v59  ;;  %10875 = vmatprep.subr.bf16.mxu1 %v12990_v39  ;;  %v13085_v59 = vcombine.low %v4738_v17, %v4746_v40  ;;  %v13100_v39 = vcombine.high %v4753_v26, %v4761_v30  ;;  %v13102_v14 = vcombine.high %v4754_v13, %v4762_v35  ;;  %v4857_v17 = vld [vmem:[%s15112_s5 + $0x1ad0] sm:$0xff]  ;;  %v5029_v40 = vsub.s32 0, %v15379_v22 }
 0x8cd   : > { %10712 = vmatpush1.bf16.msra.mxu0 %v12987_v33  ;;  %10876 = vmatpush1.bf16.msra.mxu1 %v12989_v32  ;;  %v4778_v33 = vld [vmem:[%s15112_s5 + $0x1858] sm:$0xff]  ;;  %v13099_v32 = vcombine.low %v4753_v26, %v4761_v30  ;;  %v5037_v26 = vsub.s32 2, %v15379_v22  ;;  %v5033_v30 = vsub.s32 1, %v15379_v22 }
 0x8ce   : > { %10713 = vmatprep.subr.bf16.mxu0 %v13004_v63  ;;  %10877 = vmatprep.subr.bf16.mxu1 %v13006_v53  ;;  %v13101_v63 = vcombine.low %v4754_v13, %v4762_v35  ;;  %v13116_v53 = vcombine.high %v4769_v44, %v4777_v36  ;;  %v13118_v54 = vcombine.high %v4770_v42, %v4778_v33  ;;  %v5041_v35 = vsub.s32 3, %v15379_v22 }
 0x8d1   : > { %10714 = vmatpush1.bf16.msra.mxu0 %v13003_v47  ;;  %10878 = vmatpush1.bf16.msra.mxu1 %v13005_v48  ;;  %v4794_v47 = vld [vmem:[%s15112_s5 + $0x18d8] sm:$0xff]  ;;  %v13115_v48 = vcombine.low %v4769_v44, %v4777_v36 }
 0x8d2   : > { %10715 = vmatprep.subr.bf16.mxu0 %v13020_v49  ;;  %10879 = vmatprep.subr.bf16.mxu1 %v13022_v34  ;;  %v13117_v49 = vcombine.low %v4770_v42, %v4778_v33  ;;  %v13132_v34 = vcombine.high %v4785_v55, %v4793_v58  ;;  %v13134_v50 = vcombine.high %v4786_v45, %v4794_v47  ;;  %v4866_v36 = vld [vmem:[%s15112_s5 + $0x1b18] sm:$0xff] }
 0x8d3   : > { %v4874_v42 = vld [vmem:[%s15112_s5 + $0x1b58] sm:$0xff] }
 0x8d5   : > { %10716 = vmatpush1.bf16.msra.mxu0 %v13019_v60  ;;  %10880 = vmatpush1.bf16.msra.mxu1 %v13021_v62  ;;  %v4810_v60 = vld [vmem:[%s15112_s5 + $0x1958] sm:$0xff]  ;;  %v13131_v62 = vcombine.low %v4785_v55, %v4793_v58 }
 0x8d6   : > { %10717 = vmatprep.subr.bf16.mxu0 %v13036_v3  ;;  %10881 = vmatprep.subr.bf16.mxu1 %v13038_v20  ;;  %v13133_v3 = vcombine.low %v4786_v45, %v4794_v47  ;;  %v13148_v20 = vcombine.high %v4801_v51, %v4809_v52  ;;  %v13150_v5 = vcombine.high %v4802_v56, %v4810_v60  ;;  %v4881_v47 = vld [vmem:[%s15112_s5 + $0x1b90] sm:$0xff] }
 0x8d7   : > { %v13214_v45 = vcombine.high %v4866_v36, %v4874_v42 }
 0x8d9   : > { %10718 = vmatpush1.bf16.msra.mxu0 %v13035_v41  ;;  %10882 = vmatpush1.bf16.msra.mxu1 %v13037_v7  ;;  %v4826_v41 = vld [vmem:[%s15112_s5 + $0x19d8] sm:$0xff]  ;;  %v13147_v7 = vcombine.low %v4801_v51, %v4809_v52 }
 0x8da   : > { %10719 = vmatprep.subr.bf16.mxu0 %v13052_v1  ;;  %10883 = vmatprep.subr.bf16.mxu1 %v13054_v8  ;;  %v13149_v1 = vcombine.low %v4802_v56, %v4810_v60  ;;  %v13164_v8 = vcombine.high %v4817_v0, %v4825_v19  ;;  %v13166_v57 = vcombine.high %v4818_v6, %v4826_v41  ;;  %v4882_v51 = vld [vmem:[%s15112_s5 + $0x1b98] sm:$0xff] }
 0x8db   : > { %v4890_v52 = vld [vmem:[%s15112_s5 + $0x1bd8] sm:$0xff] }
 0x8dd   : > { %10720 = vmatpush1.bf16.msra.mxu0 %v13051_v12  ;;  %10884 = vmatpush1.bf16.msra.mxu1 %v13053_v18  ;;  %v4842_v12 = vld [vmem:[%s15112_s5 + $0x1a58] sm:$0xff]  ;;  %v13163_v18 = vcombine.low %v4817_v0, %v4825_v19 }
 0x8de   : > { %10721 = vmatprep.subr.bf16.mxu0 %v13068_v29  ;;  %10885 = vmatprep.subr.bf16.mxu1 %v13070_v21  ;;  %v13165_v29 = vcombine.low %v4818_v6, %v4826_v41  ;;  %v13180_v21 = vcombine.high %v4833_v10, %v4841_v11  ;;  %v13182_v23 = vcombine.high %v4834_v37, %v4842_v12 }
 0x8df   : > { %v13181_v13 = vcombine.low %v4834_v37, %v4842_v12  ;;  %v14536_v37 = vmov 1983009808  }
 0x8e0   : > { %v11632_v12 = vunpack.c.l.s4 %v14536_v37  ;;  %v4978_v37 = vld [vmem:[%s15112_s5 + $0x1e98] sm:$0xff] }
 0x8e1   : > { %10722 = vmatpush1.bf16.msra.mxu0 %v13067_v25  ;;  %10886 = vmatpush1.bf16.msra.mxu1 %v13069_v2  ;;  %v4850_v25 = vld [vmem:[%s15112_s5 + $0x1a98] sm:$0xff] }
 0x8e2   : > { %10723 = vmatprep.subr.bf16.mxu0 %v13084_v27  ;;  %10887 = vmatprep.subr.bf16.mxu1 %v13086_v28  ;;  %v4858_v2 = vld [vmem:[%s15112_s5 + $0x1ad8] sm:$0xff]  ;;  %v13179_v27 = vcombine.low %v4833_v10, %v4841_v11  ;;  %v5023_v28 = vld [vmem:[%s15120_s11] sm:$0xff] }
 0x8e3   : > { %v5030_v44 = vrot.slane %v5023_v28, %v5029_v40  ;;  %v5038_v33 = vrot.slane %v5023_v28, %v5037_v26  ;;  %v4898_v10 = vld [vmem:[%s15112_s5 + $0x1c18] sm:$0xff] }
 0x8e4   : > { %v4906_v11 = vld [vmem:[%s15112_s5 + $0x1c58] sm:$0xff] }
 0x8e5   : > { %10724 = vmatpush1.bf16.msra.mxu0 %v13083_v38  ;;  %10888 = vmatpush1.bf16.msra.mxu1 %v13085_v59  ;;  %v13196_v38 = vcombine.high %v4849_v24, %v4857_v17  ;;  %v13198_v59 = vcombine.high %v4850_v25, %v4858_v2 }
 0x8e6   : > { %10725 = vmatprep.subr.bf16.mxu0 %v13100_v39  ;;  %10889 = vmatprep.subr.bf16.mxu1 %v13102_v14  ;;  %v4865_v39 = vld [vmem:[%s15112_s5 + $0x1b10] sm:$0xff] }
 0x8e7   : > { %v4873_v14 = vld [vmem:[%s15112_s5 + $0x1b50] sm:$0xff] }
 0x8e8   : > { %v13212_v55 = vcombine.high %v4865_v39, %v4873_v14 }
 0x8e9   : > { %10726 = vmatpush1.bf16.msra.mxu0 %v13099_v32  ;;  %10890 = vmatpush1.bf16.msra.mxu1 %v13101_v63  ;;  %v5034_v32 = vrot.slane %v5023_v28, %v5033_v30  ;;  %v13195_v63 = vcombine.low %v4849_v24, %v4857_v17  ;;  %v4913_v24 = vld [vmem:[%s15112_s5 + $0x1c90] sm:$0xff] }
 0x8ea   : > { %10736 = vmatprep.subr.bf16.mxu0 %v13116_v53  ;;  %10900 = vmatprep.subr.bf16.mxu1 %v13118_v54  ;;  %v5042_v53 = vrot.slane %v5023_v28, %v5041_v35  ;;  %v13197_v54 = vcombine.low %v4850_v25, %v4858_v2  ;;  %v4921_v17 = vld [vmem:[%s15112_s5 + $0x1cd0] sm:$0xff]  ;;  %v4914_v25 = vld [vmem:[%s15112_s5 + $0x1c98] sm:$0xff] }
 0x8eb   : > { %v4922_v2 = vld [vmem:[%s15112_s5 + $0x1cd8] sm:$0xff] }
 0x8ec   : > { %10728 = vmatmul.mubr.bf16.vlgmr.msra.gmra.mrb[4].mxu0 %v15464_v9  ;;  %10892 = vmatmul.mubr.bf16.vlgmr.msra.gmra.mrb[4].mxu1 %v15464_v9 }
 0x8ed   : > { %10737 = vmatpush1.bf16.msra.mxu0 %v13115_v48  ;;  %10901 = vmatpush1.bf16.msra.mxu1 %v13117_v49  ;;  %v4889_v48 = vld [vmem:[%s15112_s5 + $0x1bd0] sm:$0xff] }
 0x8ee   : > { %10738 = vmatprep.subr.bf16.mxu0 %v13132_v34  ;;  %10902 = vmatprep.subr.bf16.mxu1 %v13134_v50  ;;  %v13228_v41 = vcombine.high %v4881_v47, %v4889_v48 }
 0x8ef   : > { %10768 = vmatprep.mubr.bf16.mxu0 %v15608_v43  ;;  %10932 = vmatprep.mubr.bf16.mxu1 %v15608_v43 }
 0x8f1   : > { %10739 = vmatpush1.bf16.msra.mxu0 %v13131_v62  ;;  %10903 = vmatpush1.bf16.msra.mxu1 %v13133_v3 }
 0x8f2   : > { %10740 = vmatprep.subr.bf16.mxu0 %v13148_v20  ;;  %10904 = vmatprep.subr.bf16.mxu1 %v13150_v5  ;;  %v13211_v20 = vcombine.low %v4865_v39, %v4873_v14  ;;  %v13213_v5 = vcombine.low %v4866_v36, %v4874_v42  ;;  %v4929_v39 = vld [vmem:[%s15112_s5 + $0x1d10] sm:$0xff]  ;;  %v4930_v36 = vld [vmem:[%s15112_s5 + $0x1d18] sm:$0xff] }
 0x8f3   : > { %v4937_v14 = vld [vmem:[%s15112_s5 + $0x1d50] sm:$0xff]  ;;  %v4938_v42 = vld [vmem:[%s15112_s5 + $0x1d58] sm:$0xff] }
 0x8f5   : > { %10741 = vmatpush1.bf16.msra.mxu0 %v13147_v7  ;;  %10905 = vmatpush1.bf16.msra.mxu1 %v13149_v1  ;;  %v13230_v1 = vcombine.high %v4882_v51, %v4890_v52 }
 0x8f6   : > { %10742 = vmatprep.subr.bf16.mxu0 %v13164_v8  ;;  %10906 = vmatprep.subr.bf16.mxu1 %v13166_v57  ;;  %v4897_v8 = vld [vmem:[%s15112_s5 + $0x1c10] sm:$0xff] }
 0x8f7   : > { %v4905_v57 = vld [vmem:[%s15112_s5 + $0x1c50] sm:$0xff] }
 0x8f8   : > { %v13243_v28 = vcombine.low %v4897_v8, %v4905_v57 }
 0x8f9   : > { %10743 = vmatpush1.bf16.msra.mxu0 %v13163_v18  ;;  %10907 = vmatpush1.bf16.msra.mxu1 %v13165_v29  ;;  %v13227_v18 = vcombine.low %v4881_v47, %v4889_v48  ;;  %v13229_v29 = vcombine.low %v4882_v51, %v4890_v52  ;;  %v13278_v47 = vcombine.high %v4930_v36, %v4938_v42  ;;  %v4945_v48 = vld [vmem:[%s15112_s5 + $0x1d90] sm:$0xff]  ;;  %v4954_v51 = vld [vmem:[%s15112_s5 + $0x1dd8] sm:$0xff] }
 0x8fa   : > { %10744 = vmatprep.subr.bf16.mxu0 %v13180_v21  ;;  %10908 = vmatprep.subr.bf16.mxu1 %v13182_v23  ;;  %v13244_v21 = vcombine.high %v4897_v8, %v4905_v57  ;;  %v13246_v23 = vcombine.high %v4898_v10, %v4906_v11 }
 0x8fd   : > { %10745 = vmatpush1.bf16.msra.mxu0 %v13179_v27  ;;  %10909 = vmatpush1.bf16.msra.mxu1 %v13181_v13  ;;  %v11633_v27 = vunpack.c.0.s8 %v11632_v12  ;;  %v13245_v13 = vcombine.low %v4898_v10, %v4906_v11  ;;  %v4977_v10 = vld [vmem:[%s15112_s5 + $0x1e90] sm:$0xff]  ;;  %v4986_v12 = vld [vmem:[%s15112_s5 + $0x1ed8] sm:$0xff] }
 0x8fe   : > { %10746 = vmatprep.subr.bf16.mxu0 %v13196_v38  ;;  %10910 = vmatprep.subr.bf16.mxu1 %v13198_v59  ;;  %v13260_v38 = vcombine.high %v4913_v24, %v4921_v17  ;;  %v13262_v59 = vcombine.high %v4914_v25, %v4922_v2  ;;  %v4985_v11 = vld [vmem:[%s15112_s5 + $0x1ed0] sm:$0xff] }
 0x8ff   : > { %v10442_v58 = vpop.f32.mrb[0].mxu0  ;;  %v10606_v34 = vpop.f32.mrb[0].mxu1 }
 0x900   : > { %v13410_v49 = vadd.f32 %v10442_v58, %v5030_v44  ;;  %v10444_v50 = vpop.f32.mrb[1].mxu0  ;;  %v13412_v56 = vadd.f32 %v10606_v34, %v5038_v33  ;;  %v10608_v62 = vpop.f32.mrb[1].mxu1 }
 0x901   : > { %v13411_v60 = vadd.f32 %v10444_v50, %v5034_v32  ;;  %v10446_v3 = vpop.f32.mrb[2].mxu0  ;;  %10747 = vmatpush1.bf16.msra.mxu0 %v13195_v63  ;;  %v13413_v0 = vadd.f32 %v10608_v62, %v5042_v53  ;;  %v10610_v19 = vpop.f32.mrb[2].mxu1  ;;  %10911 = vmatpush1.bf16.msra.mxu1 %v13197_v54  ;;  %v15938_v32 = vsub.s32 %v11633_v27, %v15379_v22  ;;  %v4946_v50 = vld [vmem:[%s15112_s5 + $0x1d98] sm:$0xff] }
 0x902   : > { %13891 = vtanh.f32 %v13410_v49  ;;  %v10447_v6 = vpop.f32.mrb[3].mxu0  ;;  %10748 = vmatprep.subr.bf16.mxu0 %v13212_v55  ;;  %v10611_v7 = vpop.f32.mrb[3].mxu1  ;;  %10912 = vmatprep.subr.bf16.mxu1 %v13214_v45  ;;  %v13259_v63 = vcombine.low %v4913_v24, %v4921_v17  ;;  %v13261_v54 = vcombine.low %v4914_v25, %v4922_v2  ;;  %v13276_v55 = vcombine.high %v4929_v39, %v4937_v14  ;;  %v4953_v49 = vld [vmem:[%s15112_s5 + $0x1dd0] sm:$0xff]  ;;  %v4962_v19 = vld [vmem:[%s15112_s5 + $0x1e18] sm:$0xff] }
 0x903   : > { %13893 = vtanh.f32 %v13412_v56  ;;  %v13275_v56 = vcombine.low %v4929_v39, %v4937_v14  ;;  %v13277_v62 = vcombine.low %v4930_v36, %v4938_v42  ;;  %v13292_v3 = vcombine.high %v4945_v48, %v4953_v49  ;;  %v4970_v6 = vld [vmem:[%s15112_s5 + $0x1e58] sm:$0xff]  ;;  %v4993_v24 = vld [vmem:[%s15112_s5 + $0x1f10] sm:$0xff] }
 0x904   : > { %13895 = vtanh.f32 %v13411_v60  ;;  %v13291_v7 = vcombine.low %v4945_v48, %v4953_v49  ;;  %v13310_v57 = vcombine.high %v4962_v19, %v4970_v6  ;;  %v5001_v17 = vld [vmem:[%s15112_s5 + $0x1f50] sm:$0xff]  ;;  %v4994_v25 = vld [vmem:[%s15112_s5 + $0x1f18] sm:$0xff]  ;;  %v13323_v27 = vcombine.low %v4977_v10, %v4985_v11 }
 0x905   : > { %13897 = vtanh.f32 %v13413_v0  ;;  %10749 = vmatpush1.bf16.msra.mxu0 %v13211_v20  ;;  %10913 = vmatpush1.bf16.msra.mxu1 %v13213_v5  ;;  %v13294_v20 = vcombine.high %v4946_v50, %v4954_v51  ;;  %v4961_v5 = vld [vmem:[%s15112_s5 + $0x1e10] sm:$0xff]  ;;  %v5002_v2 = vld [vmem:[%s15112_s5 + $0x1f58] sm:$0xff]  ;;  %v13339_v36 = vcombine.low %v4993_v24, %v5001_v17 }
 0x906   : > { %10750 = vmatprep.subr.bf16.mxu0 %v13228_v41  ;;  %10914 = vmatprep.subr.bf16.mxu1 %v13230_v1  ;;  %v4969_v0 = vld [vmem:[%s15112_s5 + $0x1e50] sm:$0xff]  ;;  %v13293_v1 = vcombine.low %v4946_v50, %v4954_v51  ;;  %v5010_v14 = vld [vmem:[%s15112_s5 + $0x1f98] sm:$0xff]  ;;  %v13341_v42 = vcombine.low %v4994_v25, %v5002_v2  ;;  %v4027_v50 = vld [vmem:[%s15112_s5 + $0xe0] sm:$0xff] }
 0x907   : > { %v13308_v8 = vcombine.high %v4961_v5, %v4969_v0  ;;  %v5017_v39 = vld [vmem:[%s15112_s5 + $0x1fd0] sm:$0xff]  ;;  %v4020_v51 = vld [vmem:[%s15112_s5 + $0xa8] sm:$0xff] }
 0x909   : > { %10751 = vmatpush1.bf16.msra.mxu0 %v13227_v18  ;;  %10915 = vmatpush1.bf16.msra.mxu1 %v13229_v29  ;;  %v13307_v18 = vcombine.low %v4961_v5, %v4969_v0  ;;  %v13309_v29 = vcombine.low %v4962_v19, %v4970_v6  ;;  %v4043_v5 = vld [vmem:[%s15112_s5 + $0x160] sm:$0xff]  ;;  %v4036_v0 = vld [vmem:[%s15112_s5 + $0x128] sm:$0xff] }
 0x90a   : > { %10752 = vmatprep.subr.bf16.mxu0 %v13244_v21  ;;  %10916 = vmatprep.subr.bf16.mxu1 %v13246_v23  ;;  %v13324_v21 = vcombine.high %v4977_v10, %v4985_v11  ;;  %v13326_v23 = vcombine.high %v4978_v37, %v4986_v12  ;;  %v4044_v19 = vld [vmem:[%s15112_s5 + $0x168] sm:$0xff] }
 0x90b   : > { %v4052_v10 = vld [vmem:[%s15112_s5 + $0x1a8] sm:$0xff] }
 0x90c   : > { %v13892_v44 = vpop.eup %13891  ;;  %v4060_v11 = vld [vmem:[%s15112_s5 + $0x1e8] sm:$0xff] }
 0x90d   : > { %v13894_v33 = vpop.eup %13893  ;;  %10753 = vmatpush1.bf16.msra.mxu0 %v13243_v28  ;;  %10917 = vmatpush1.bf16.msra.mxu1 %v13245_v13  ;;  %v13325_v28 = vcombine.low %v4978_v37, %v4986_v12  ;;  %v13340_v13 = vcombine.high %v4993_v24, %v5001_v17  ;;  %v12385_v12 = vcombine.low %v4036_v0, %v4044_v19  ;;  %v4068_v24 = vld [vmem:[%s15112_s5 + $0x228] sm:$0xff] }
 0x90e   : > { %v13896_v53 = vpop.eup %13895  ;;  %10754 = vmatprep.subr.bf16.mxu0 %v13260_v38  ;;  %10918 = vmatprep.subr.bf16.mxu1 %v13262_v59  ;;  %v13342_v38 = vcombine.high %v4994_v25, %v5002_v2  ;;  %v5009_v59 = vld [vmem:[%s15112_s5 + $0x1f90] sm:$0xff]  ;;  %v4076_v17 = vld [vmem:[%s15112_s5 + $0x268] sm:$0xff]  ;;  %v12401_v2 = vcombine.low %v4052_v10, %v4060_v11 }
 0x90f   : > { %v13898_v58 = vpop.eup %13897  ;;  %v11629_v45 = vcombine.low %v13892_v44, %v13896_v53  ;;  %v5018_v44 = vld [vmem:[%s15112_s5 + $0x1fd8] sm:$0xff]  ;;  %v4003_v53 = vld [vmem:[%s15112_s5 + $0x20] sm:$0xff] }
 0x910   : > { %v11630_v34 = vcombine.low %v13894_v33, %v13898_v58  ;;  %v13356_v33 = vcombine.high %v5009_v59, %v5017_v39  ;;  %v4012_v58 = vld [vmem:[%s15112_s5 + $0x68] sm:$0xff] }
 0x911   : > { %v11637_v52 = vrot.slane %v11629_v45, %v15938_v32  ;;  %10755 = vmatpush1.bf16.msra.mxu0 %v13259_v63  ;;  %10919 = vmatpush1.bf16.msra.mxu1 %v13261_v54  ;;  %v13358_v63 = vcombine.high %v5010_v14, %v5018_v44  ;;  %v4011_v54 = vld [vmem:[%s15112_s5 + $0x60] sm:$0xff]  ;;  %v13355_v45 = vcombine.low %v5009_v59, %v5017_v39  ;;  %v4084_v59 = vld [vmem:[%s15112_s5 + $0x2a8] sm:$0xff] }
 0x912   : > { %v11644_v60 = vrot.slane %v11630_v34, %v15938_v32  ;;  %10756 = vmatprep.subr.bf16.mxu0 %v13276_v55  ;;  %10920 = vmatprep.subr.bf16.mxu1 %v13278_v47  ;;  %v4004_v55 = vld [vmem:[%s15112_s5 + $0x28] sm:$0xff]  ;;  %v13357_v47 = vcombine.low %v5010_v14, %v5018_v44  ;;  %v12352_v48 = vcombine.high %v4003_v53, %v4011_v54  ;;  %v4019_v34 = vld [vmem:[%s15112_s5 + $0xa0] sm:$0xff] }
 0x913   : > { %v12354_v49 = vcombine.high %v4004_v55, %v4012_v58  ;;  %v12367_v6 = vcombine.low %v4019_v34, %v4027_v50  ;;  %v4092_v39 = vld [vmem:[%s15112_s5 + $0x2e8] sm:$0xff]  ;;  %v12417_v44 = vcombine.low %v4068_v24, %v4076_v17 }
 0x914   : > { %v11645_v41 = vcombine.low %v11637_v52, %v11644_v60  ;;  %v4028_v52 = vld [vmem:[%s15112_s5 + $0xe8] sm:$0xff]  ;;  %v12353_v60 = vcombine.low %v4004_v55, %v4012_v58  ;;  %v12433_v58 = vcombine.low %v4084_v59, %v4092_v39 }
 0x915   : > { %10757 = vmatpush1.bf16.msra.mxu0 %v13275_v56  ;;  %10921 = vmatpush1.bf16.msra.mxu1 %v13277_v62  ;;  %v12351_v56 = vcombine.low %v4003_v53, %v4011_v54  ;;  %v12368_v62 = vcombine.high %v4019_v34, %v4027_v50  ;;  %v4100_v53 = vld [vmem:[%s15112_s5 + $0x328] sm:$0xff] }
 0x916   : > { %10758 = vmatprep.subr.bf16.mxu0 %v13292_v3  ;;  %11701 = vst [vmem:[%s15122_s12] sm:$0xff] %v11645_v41  ;;  %10922 = vmatprep.subr.bf16.mxu1 %v13294_v20  ;;  %v12370_v3 = vcombine.high %v4020_v51, %v4028_v52  ;;  %v4035_v20 = vld [vmem:[%s15112_s5 + $0x120] sm:$0xff]  ;;  %v12369_v41 = vcombine.low %v4020_v51, %v4028_v52  ;;  %v4108_v54 = vld [vmem:[%s15112_s5 + $0x368] sm:$0xff] }
 0x917   : > { %v12383_v37 = vcombine.low %v4035_v20, %v4043_v5  ;;  %v4116_v34 = vld [vmem:[%s15112_s5 + $0x3a8] sm:$0xff]  ;;  %v12449_v52 = vcombine.low %v4100_v53, %v4108_v54 }
 0x918   : > { %v4124_v50 = vld [vmem:[%s15112_s5 + $0x3e8] sm:$0xff] }
 0x919   : > { %10759 = vmatpush1.bf16.msra.mxu0 %v13291_v7  ;;  %10923 = vmatpush1.bf16.msra.mxu1 %v13293_v1  ;;  %v12384_v7 = vcombine.high %v4035_v20, %v4043_v5  ;;  %v12386_v1 = vcombine.high %v4036_v0, %v4044_v19  ;;  %v4132_v20 = vld [vmem:[%s15112_s5 + $0x428] sm:$0xff]  ;;  %v12465_v19 = vcombine.low %v4116_v34, %v4124_v50 }
 0x91a   : > { %10760 = vmatprep.subr.bf16.mxu0 %v13308_v8  ;;  %10924 = vmatprep.subr.bf16.mxu1 %v13310_v57  ;;  %v4051_v8 = vld [vmem:[%s15112_s5 + $0x1a0] sm:$0xff]  ;;  %v4140_v5 = vld [vmem:[%s15112_s5 + $0x468] sm:$0xff] }
 0x91b   : > { %v4059_v57 = vld [vmem:[%s15112_s5 + $0x1e0] sm:$0xff] }
 0x91c   : > { %v12399_v25 = vcombine.low %v4051_v8, %v4059_v57 }
 0x91d   : > { %10761 = vmatpush1.bf16.msra.mxu0 %v13307_v18  ;;  %10925 = vmatpush1.bf16.msra.mxu1 %v13309_v29  ;;  %v12400_v18 = vcombine.high %v4051_v8, %v4059_v57  ;;  %v12402_v29 = vcombine.high %v4052_v10, %v4060_v11  ;;  %v4148_v8 = vld [vmem:[%s15112_s5 + $0x4a8] sm:$0xff]  ;;  %v12481_v11 = vcombine.low %v4132_v20, %v4140_v5 }
 0x91e   : > { %10762 = vmatprep.subr.bf16.mxu0 %v13324_v21  ;;  %10926 = vmatprep.subr.bf16.mxu1 %v13326_v23  ;;  %v4067_v21 = vld [vmem:[%s15112_s5 + $0x220] sm:$0xff]  ;;  %v4156_v57 = vld [vmem:[%s15112_s5 + $0x4e8] sm:$0xff] }
 0x91f   : > { %v4075_v23 = vld [vmem:[%s15112_s5 + $0x260] sm:$0xff] }
 0x920   : > { %v12415_v14 = vcombine.low %v4067_v21, %v4075_v23 }
 0x921   : > { %10763 = vmatpush1.bf16.msra.mxu0 %v13323_v27  ;;  %10927 = vmatpush1.bf16.msra.mxu1 %v13325_v28  ;;  %v12416_v27 = vcombine.high %v4067_v21, %v4075_v23  ;;  %v12418_v28 = vcombine.high %v4068_v24, %v4076_v17  ;;  %v4164_v21 = vld [vmem:[%s15112_s5 + $0x528] sm:$0xff]  ;;  %v12497_v17 = vcombine.low %v4148_v8, %v4156_v57 }
 0x922   : > { %10764 = vmatprep.subr.bf16.mxu0 %v13340_v13  ;;  %10928 = vmatprep.subr.bf16.mxu1 %v13342_v38  ;;  %v4083_v13 = vld [vmem:[%s15112_s5 + $0x2a0] sm:$0xff]  ;;  %v4172_v23 = vld [vmem:[%s15112_s5 + $0x568] sm:$0xff] }
 0x923   : > { %v4091_v38 = vld [vmem:[%s15112_s5 + $0x2e0] sm:$0xff] }
 0x924   : > { %v12431_v55 = vcombine.low %v4083_v13, %v4091_v38 }
 0x925   : > { %10765 = vmatpush1.bf16.msra.mxu0 %v13339_v36  ;;  %10929 = vmatpush1.bf16.msra.mxu1 %v13341_v42  ;;  %v12432_v36 = vcombine.high %v4083_v13, %v4091_v38  ;;  %v12434_v42 = vcombine.high %v4084_v59, %v4092_v39  ;;  %v4180_v13 = vld [vmem:[%s15112_s5 + $0x5a8] sm:$0xff]  ;;  %v12513_v39 = vcombine.low %v4164_v21, %v4172_v23 }
 0x926   : > { %10766 = vmatprep.subr.bf16.mxu0 %v13356_v33  ;;  %10930 = vmatprep.subr.bf16.mxu1 %v13358_v63  ;;  %v4099_v33 = vld [vmem:[%s15112_s5 + $0x320] sm:$0xff]  ;;  %v4188_v38 = vld [vmem:[%s15112_s5 + $0x5e8] sm:$0xff] }
 0x927   : > { %v4107_v63 = vld [vmem:[%s15112_s5 + $0x360] sm:$0xff] }
 0x928   : > { %v12447_v51 = vcombine.low %v4099_v33, %v4107_v63 }
 0x929   : > { %10767 = vmatpush1.bf16.msra.mxu0 %v13355_v45  ;;  %10931 = vmatpush1.bf16.msra.mxu1 %v13357_v47  ;;  %v12448_v45 = vcombine.high %v4099_v33, %v4107_v63  ;;  %v12450_v47 = vcombine.high %v4100_v53, %v4108_v54  ;;  %v4196_v33 = vld [vmem:[%s15112_s5 + $0x628] sm:$0xff]  ;;  %v12529_v54 = vcombine.low %v4180_v13, %v4188_v38 }
 0x92a   : > { %10941 = vmatprep.subr.bf16.mxu0 %v12352_v48  ;;  %11105 = vmatprep.subr.bf16.mxu1 %v12354_v49  ;;  %v4115_v48 = vld [vmem:[%s15112_s5 + $0x3a0] sm:$0xff]  ;;  %v4204_v63 = vld [vmem:[%s15112_s5 + $0x668] sm:$0xff] }
 0x92b   : > { %v4123_v49 = vld [vmem:[%s15112_s5 + $0x3e0] sm:$0xff] }
 0x92c   : > { %10769 = vmatmul.mubr.bf16.vlgmr.msra.gmra.mrb[4].mxu0 %v15676_v46  ;;  %10933 = vmatmul.mubr.bf16.vlgmr.msra.gmra.mrb[4].mxu1 %v15676_v46  ;;  %v12463_v0 = vcombine.low %v4115_v48, %v4123_v49 }
 0x92d   : > { %10942 = vmatpush1.bf16.msra.mxu0 %v12351_v56  ;;  %11106 = vmatpush1.bf16.msra.mxu1 %v12353_v60  ;;  %v12464_v56 = vcombine.high %v4115_v48, %v4123_v49  ;;  %v12466_v60 = vcombine.high %v4116_v34, %v4124_v50  ;;  %v4212_v48 = vld [vmem:[%s15112_s5 + $0x6a8] sm:$0xff]  ;;  %v12545_v50 = vcombine.low %v4196_v33, %v4204_v63 }
 0x92e   : > { %10943 = vmatprep.subr.bf16.mxu0 %v12368_v62  ;;  %11107 = vmatprep.subr.bf16.mxu1 %v12370_v3  ;;  %v4131_v62 = vld [vmem:[%s15112_s5 + $0x420] sm:$0xff]  ;;  %v4220_v49 = vld [vmem:[%s15112_s5 + $0x6e8] sm:$0xff] }
 0x92f   : > { %10973 = vmatprep.mubr.bf16.mxu0 %v15405_v31  ;;  %11137 = vmatprep.mubr.bf16.mxu1 %v15405_v31  ;;  %v4139_v3 = vld [vmem:[%s15112_s5 + $0x460] sm:$0xff] }
 0x930   : > { %v12479_v10 = vcombine.low %v4131_v62, %v4139_v3 }
 0x931   : > { %10944 = vmatpush1.bf16.msra.mxu0 %v12367_v6  ;;  %11108 = vmatpush1.bf16.msra.mxu1 %v12369_v41  ;;  %v12480_v6 = vcombine.high %v4131_v62, %v4139_v3  ;;  %v12482_v41 = vcombine.high %v4132_v20, %v4140_v5  ;;  %v4228_v62 = vld [vmem:[%s15112_s5 + $0x728] sm:$0xff]  ;;  %v12561_v5 = vcombine.low %v4212_v48, %v4220_v49 }
 0x932   : > { %10945 = vmatprep.subr.bf16.mxu0 %v12384_v7  ;;  %11109 = vmatprep.subr.bf16.mxu1 %v12386_v1  ;;  %v4147_v7 = vld [vmem:[%s15112_s5 + $0x4a0] sm:$0xff]  ;;  %v4236_v3 = vld [vmem:[%s15112_s5 + $0x768] sm:$0xff] }
 0x933   : > { %v4155_v1 = vld [vmem:[%s15112_s5 + $0x4e0] sm:$0xff] }
 0x934   : > { %v12495_v24 = vcombine.low %v4147_v7, %v4155_v1 }
 0x935   : > { %10946 = vmatpush1.bf16.msra.mxu0 %v12383_v37  ;;  %11110 = vmatpush1.bf16.msra.mxu1 %v12385_v12  ;;  %v12496_v37 = vcombine.high %v4147_v7, %v4155_v1  ;;  %v12498_v12 = vcombine.high %v4148_v8, %v4156_v57  ;;  %v4244_v7 = vld [vmem:[%s15112_s5 + $0x7a8] sm:$0xff]  ;;  %v12577_v57 = vcombine.low %v4228_v62, %v4236_v3 }
 0x936   : > { %10947 = vmatprep.subr.bf16.mxu0 %v12400_v18  ;;  %11111 = vmatprep.subr.bf16.mxu1 %v12402_v29  ;;  %v4163_v18 = vld [vmem:[%s15112_s5 + $0x520] sm:$0xff]  ;;  %v4252_v1 = vld [vmem:[%s15112_s5 + $0x7e8] sm:$0xff] }
 0x937   : > { %v4171_v29 = vld [vmem:[%s15112_s5 + $0x560] sm:$0xff] }
 0x938   : > { %v12511_v59 = vcombine.low %v4163_v18, %v4171_v29 }
 0x939   : > { %10948 = vmatpush1.bf16.msra.mxu0 %v12399_v25  ;;  %11112 = vmatpush1.bf16.msra.mxu1 %v12401_v2  ;;  %v12512_v25 = vcombine.high %v4163_v18, %v4171_v29  ;;  %v12514_v2 = vcombine.high %v4164_v21, %v4172_v23  ;;  %v4260_v18 = vld [vmem:[%s15112_s5 + $0x828] sm:$0xff]  ;;  %v12593_v23 = vcombine.low %v4244_v7, %v4252_v1 }
 0x93a   : > { %10949 = vmatprep.subr.bf16.mxu0 %v12416_v27  ;;  %11113 = vmatprep.subr.bf16.mxu1 %v12418_v28  ;;  %v4179_v27 = vld [vmem:[%s15112_s5 + $0x5a0] sm:$0xff]  ;;  %v4268_v29 = vld [vmem:[%s15112_s5 + $0x868] sm:$0xff] }
 0x93b   : > { %v4187_v28 = vld [vmem:[%s15112_s5 + $0x5e0] sm:$0xff] }
 0x93c   : > { %v12527_v53 = vcombine.low %v4179_v27, %v4187_v28 }
 0x93d   : > { %10950 = vmatpush1.bf16.msra.mxu0 %v12415_v14  ;;  %11114 = vmatpush1.bf16.msra.mxu1 %v12417_v44  ;;  %v12528_v14 = vcombine.high %v4179_v27, %v4187_v28  ;;  %v12530_v44 = vcombine.high %v4180_v13, %v4188_v38  ;;  %v4276_v27 = vld [vmem:[%s15112_s5 + $0x8a8] sm:$0xff]  ;;  %v12609_v38 = vcombine.low %v4260_v18, %v4268_v29 }
 0x93e   : > { %10951 = vmatprep.subr.bf16.mxu0 %v12432_v36  ;;  %11115 = vmatprep.subr.bf16.mxu1 %v12434_v42  ;;  %v4195_v36 = vld [vmem:[%s15112_s5 + $0x620] sm:$0xff]  ;;  %v4284_v28 = vld [vmem:[%s15112_s5 + $0x8e8] sm:$0xff] }
 0x93f   : > { %v4203_v42 = vld [vmem:[%s15112_s5 + $0x660] sm:$0xff] }
 0x940   : > { %v12543_v34 = vcombine.low %v4195_v36, %v4203_v42 }
 0x941   : > { %10952 = vmatpush1.bf16.msra.mxu0 %v12431_v55  ;;  %11116 = vmatpush1.bf16.msra.mxu1 %v12433_v58  ;;  %v12544_v55 = vcombine.high %v4195_v36, %v4203_v42  ;;  %v12546_v58 = vcombine.high %v4196_v33, %v4204_v63  ;;  %v4292_v36 = vld [vmem:[%s15112_s5 + $0x928] sm:$0xff]  ;;  %v12625_v63 = vcombine.low %v4276_v27, %v4284_v28 }
 0x942   : > { %10953 = vmatprep.subr.bf16.mxu0 %v12448_v45  ;;  %11117 = vmatprep.subr.bf16.mxu1 %v12450_v47  ;;  %v4211_v45 = vld [vmem:[%s15112_s5 + $0x6a0] sm:$0xff]  ;;  %v4300_v42 = vld [vmem:[%s15112_s5 + $0x968] sm:$0xff] }
 0x943   : > { %v4219_v47 = vld [vmem:[%s15112_s5 + $0x6e0] sm:$0xff] }
 0x944   : > { %v12559_v20 = vcombine.low %v4211_v45, %v4219_v47 }
 0x945   : > { %10954 = vmatpush1.bf16.msra.mxu0 %v12447_v51  ;;  %11118 = vmatpush1.bf16.msra.mxu1 %v12449_v52  ;;  %v12560_v51 = vcombine.high %v4211_v45, %v4219_v47  ;;  %v12562_v52 = vcombine.high %v4212_v48, %v4220_v49  ;;  %v4308_v45 = vld [vmem:[%s15112_s5 + $0x9a8] sm:$0xff]  ;;  %v12641_v49 = vcombine.low %v4292_v36, %v4300_v42 }
 0x946   : > { %10955 = vmatprep.subr.bf16.mxu0 %v12464_v56  ;;  %11119 = vmatprep.subr.bf16.mxu1 %v12466_v60  ;;  %v4227_v56 = vld [vmem:[%s15112_s5 + $0x720] sm:$0xff]  ;;  %v4316_v47 = vld [vmem:[%s15112_s5 + $0x9e8] sm:$0xff] }
 0x947   : > { %v4235_v60 = vld [vmem:[%s15112_s5 + $0x760] sm:$0xff] }
 0x948   : > { %v12575_v8 = vcombine.low %v4227_v56, %v4235_v60 }
 0x949   : > { %10956 = vmatpush1.bf16.msra.mxu0 %v12463_v0  ;;  %11120 = vmatpush1.bf16.msra.mxu1 %v12465_v19  ;;  %v12576_v0 = vcombine.high %v4227_v56, %v4235_v60  ;;  %v12578_v19 = vcombine.high %v4228_v62, %v4236_v3  ;;  %v4324_v56 = vld [vmem:[%s15112_s5 + $0xa28] sm:$0xff]  ;;  %v12657_v3 = vcombine.low %v4308_v45, %v4316_v47 }
 0x94a   : > { %10957 = vmatprep.subr.bf16.mxu0 %v12480_v6  ;;  %11121 = vmatprep.subr.bf16.mxu1 %v12482_v41  ;;  %v4243_v6 = vld [vmem:[%s15112_s5 + $0x7a0] sm:$0xff]  ;;  %v4332_v60 = vld [vmem:[%s15112_s5 + $0xa68] sm:$0xff] }
 0x94b   : > { %v4251_v41 = vld [vmem:[%s15112_s5 + $0x7e0] sm:$0xff] }
 0x94c   : > { %v12591_v21 = vcombine.low %v4243_v6, %v4251_v41 }
 0x94d   : > { %10958 = vmatpush1.bf16.msra.mxu0 %v12479_v10  ;;  %11122 = vmatpush1.bf16.msra.mxu1 %v12481_v11  ;;  %v12592_v10 = vcombine.high %v4243_v6, %v4251_v41  ;;  %v12594_v11 = vcombine.high %v4244_v7, %v4252_v1  ;;  %v4340_v6 = vld [vmem:[%s15112_s5 + $0xaa8] sm:$0xff]  ;;  %v12673_v1 = vcombine.low %v4324_v56, %v4332_v60 }
 0x94e   : > { %10959 = vmatprep.subr.bf16.mxu0 %v12496_v37  ;;  %11123 = vmatprep.subr.bf16.mxu1 %v12498_v12  ;;  %v4259_v37 = vld [vmem:[%s15112_s5 + $0x820] sm:$0xff]  ;;  %v4348_v41 = vld [vmem:[%s15112_s5 + $0xae8] sm:$0xff] }
 0x94f   : > { %v4267_v12 = vld [vmem:[%s15112_s5 + $0x860] sm:$0xff] }
 0x950   : > { %v12607_v13 = vcombine.low %v4259_v37, %v4267_v12 }
 0x951   : > { %10960 = vmatpush1.bf16.msra.mxu0 %v12495_v24  ;;  %11124 = vmatpush1.bf16.msra.mxu1 %v12497_v17  ;;  %v12608_v24 = vcombine.high %v4259_v37, %v4267_v12  ;;  %v12610_v17 = vcombine.high %v4260_v18, %v4268_v29  ;;  %v4356_v37 = vld [vmem:[%s15112_s5 + $0xb28] sm:$0xff]  ;;  %v12689_v29 = vcombine.low %v4340_v6, %v4348_v41 }
 0x952   : > { %10961 = vmatprep.subr.bf16.mxu0 %v12512_v25  ;;  %11125 = vmatprep.subr.bf16.mxu1 %v12514_v2  ;;  %v4275_v25 = vld [vmem:[%s15112_s5 + $0x8a0] sm:$0xff]  ;;  %v4364_v12 = vld [vmem:[%s15112_s5 + $0xb68] sm:$0xff] }
 0x953   : > { %v4283_v2 = vld [vmem:[%s15112_s5 + $0x8e0] sm:$0xff] }
 0x954   : > { %v12623_v33 = vcombine.low %v4275_v25, %v4283_v2 }
 0x955   : > { %10962 = vmatpush1.bf16.msra.mxu0 %v12511_v59  ;;  %11126 = vmatpush1.bf16.msra.mxu1 %v12513_v39  ;;  %v12624_v59 = vcombine.high %v4275_v25, %v4283_v2  ;;  %v12626_v39 = vcombine.high %v4276_v27, %v4284_v28  ;;  %v4372_v25 = vld [vmem:[%s15112_s5 + $0xba8] sm:$0xff]  ;;  %v12705_v28 = vcombine.low %v4356_v37, %v4364_v12 }
 0x956   : > { %10963 = vmatprep.subr.bf16.mxu0 %v12528_v14  ;;  %11127 = vmatprep.subr.bf16.mxu1 %v12530_v44  ;;  %v4291_v14 = vld [vmem:[%s15112_s5 + $0x920] sm:$0xff]  ;;  %v4380_v2 = vld [vmem:[%s15112_s5 + $0xbe8] sm:$0xff] }
 0x957   : > { %v4299_v44 = vld [vmem:[%s15112_s5 + $0x960] sm:$0xff] }
 0x958   : > { %v12639_v48 = vcombine.low %v4291_v14, %v4299_v44 }
 0x959   : > { %10964 = vmatpush1.bf16.msra.mxu0 %v12527_v53  ;;  %11128 = vmatpush1.bf16.msra.mxu1 %v12529_v54  ;;  %v12640_v53 = vcombine.high %v4291_v14, %v4299_v44  ;;  %v12642_v54 = vcombine.high %v4292_v36, %v4300_v42  ;;  %v4388_v14 = vld [vmem:[%s15112_s5 + $0xc28] sm:$0xff]  ;;  %v12721_v42 = vcombine.low %v4372_v25, %v4380_v2 }
 0x95a   : > { %10965 = vmatprep.subr.bf16.mxu0 %v12544_v55  ;;  %11129 = vmatprep.subr.bf16.mxu1 %v12546_v58  ;;  %v4307_v55 = vld [vmem:[%s15112_s5 + $0x9a0] sm:$0xff]  ;;  %v4396_v44 = vld [vmem:[%s15112_s5 + $0xc68] sm:$0xff] }
 0x95b   : > { %v4315_v58 = vld [vmem:[%s15112_s5 + $0x9e0] sm:$0xff] }
 0x95c   : > { %v12655_v62 = vcombine.low %v4307_v55, %v4315_v58 }
 0x95d   : > { %10966 = vmatpush1.bf16.msra.mxu0 %v12543_v34  ;;  %11130 = vmatpush1.bf16.msra.mxu1 %v12545_v50  ;;  %v12656_v34 = vcombine.high %v4307_v55, %v4315_v58  ;;  %v12658_v50 = vcombine.high %v4308_v45, %v4316_v47  ;;  %v4404_v55 = vld [vmem:[%s15112_s5 + $0xca8] sm:$0xff]  ;;  %v12737_v47 = vcombine.low %v4388_v14, %v4396_v44 }
 0x95e   : > { %10967 = vmatprep.subr.bf16.mxu0 %v12560_v51  ;;  %11131 = vmatprep.subr.bf16.mxu1 %v12562_v52  ;;  %v4323_v51 = vld [vmem:[%s15112_s5 + $0xa20] sm:$0xff]  ;;  %v4412_v58 = vld [vmem:[%s15112_s5 + $0xce8] sm:$0xff] }
 0x95f   : > { %v4331_v52 = vld [vmem:[%s15112_s5 + $0xa60] sm:$0xff] }
 0x960   : > { %v12671_v7 = vcombine.low %v4323_v51, %v4331_v52 }
 0x961   : > { %10968 = vmatpush1.bf16.msra.mxu0 %v12559_v20  ;;  %11132 = vmatpush1.bf16.msra.mxu1 %v12561_v5  ;;  %v12672_v20 = vcombine.high %v4323_v51, %v4331_v52  ;;  %v12674_v5 = vcombine.high %v4324_v56, %v4332_v60  ;;  %v4420_v51 = vld [vmem:[%s15112_s5 + $0xd28] sm:$0xff]  ;;  %v12753_v60 = vcombine.low %v4404_v55, %v4412_v58 }
 0x962   : > { %10969 = vmatprep.subr.bf16.mxu0 %v12576_v0  ;;  %11133 = vmatprep.subr.bf16.mxu1 %v12578_v19  ;;  %v4339_v0 = vld [vmem:[%s15112_s5 + $0xaa0] sm:$0xff]  ;;  %v4428_v52 = vld [vmem:[%s15112_s5 + $0xd68] sm:$0xff] }
 0x963   : > { %v4347_v19 = vld [vmem:[%s15112_s5 + $0xae0] sm:$0xff] }
 0x964   : > { %v12687_v18 = vcombine.low %v4339_v0, %v4347_v19 }
 0x965   : > { %10970 = vmatpush1.bf16.msra.mxu0 %v12575_v8  ;;  %11134 = vmatpush1.bf16.msra.mxu1 %v12577_v57  ;;  %v12688_v8 = vcombine.high %v4339_v0, %v4347_v19  ;;  %v12690_v57 = vcombine.high %v4340_v6, %v4348_v41  ;;  %v4436_v0 = vld [vmem:[%s15112_s5 + $0xda8] sm:$0xff]  ;;  %v12769_v41 = vcombine.low %v4420_v51, %v4428_v52 }
 0x966   : > { %10971 = vmatprep.subr.bf16.mxu0 %v12592_v10  ;;  %11135 = vmatprep.subr.bf16.mxu1 %v12594_v11  ;;  %v4355_v10 = vld [vmem:[%s15112_s5 + $0xb20] sm:$0xff]  ;;  %v4444_v19 = vld [vmem:[%s15112_s5 + $0xde8] sm:$0xff] }
 0x967   : > { %v4363_v11 = vld [vmem:[%s15112_s5 + $0xb60] sm:$0xff] }
 0x968   : > { %v12703_v27 = vcombine.low %v4355_v10, %v4363_v11 }
 0x969   : > { %10972 = vmatpush1.bf16.msra.mxu0 %v12591_v21  ;;  %11136 = vmatpush1.bf16.msra.mxu1 %v12593_v23  ;;  %v12704_v21 = vcombine.high %v4355_v10, %v4363_v11  ;;  %v12706_v23 = vcombine.high %v4356_v37, %v4364_v12  ;;  %v4452_v10 = vld [vmem:[%s15112_s5 + $0xe28] sm:$0xff]  ;;  %v12785_v12 = vcombine.low %v4436_v0, %v4444_v19 }
 0x96a   : > { %10982 = vmatprep.subr.bf16.mxu0 %v12608_v24  ;;  %11146 = vmatprep.subr.bf16.mxu1 %v12610_v17  ;;  %v4371_v24 = vld [vmem:[%s15112_s5 + $0xba0] sm:$0xff]  ;;  %v4460_v11 = vld [vmem:[%s15112_s5 + $0xe68] sm:$0xff] }
 0x96b   : > { %v4379_v17 = vld [vmem:[%s15112_s5 + $0xbe0] sm:$0xff] }
 0x96c   : > { %10974 = vmatmul.mubr.bf16.vlgmr.msra.gmra.mrb[8].mxu0 %v15450_v4  ;;  %11138 = vmatmul.mubr.bf16.vlgmr.msra.gmra.mrb[8].mxu1 %v15450_v4  ;;  %v12719_v36 = vcombine.low %v4371_v24, %v4379_v17 }
 0x96d   : > { %10983 = vmatpush1.bf16.msra.mxu0 %v12607_v13  ;;  %11147 = vmatpush1.bf16.msra.mxu1 %v12609_v38  ;;  %v12720_v13 = vcombine.high %v4371_v24, %v4379_v17  ;;  %v12722_v38 = vcombine.high %v4372_v25, %v4380_v2  ;;  %v4468_v24 = vld [vmem:[%s15112_s5 + $0xea8] sm:$0xff]  ;;  %v12801_v2 = vcombine.low %v4452_v10, %v4460_v11 }
 0x96e   : > { %10984 = vmatprep.subr.bf16.mxu0 %v12624_v59  ;;  %11148 = vmatprep.subr.bf16.mxu1 %v12626_v39  ;;  %v4387_v59 = vld [vmem:[%s15112_s5 + $0xc20] sm:$0xff]  ;;  %v4476_v17 = vld [vmem:[%s15112_s5 + $0xee8] sm:$0xff] }
 0x96f   : > { %11014 = vmatprep.mubr.bf16.mxu0 %v15458_v15  ;;  %11178 = vmatprep.mubr.bf16.mxu1 %v15458_v15  ;;  %v4395_v39 = vld [vmem:[%s15112_s5 + $0xc60] sm:$0xff] }
 0x970   : > { %v12735_v45 = vcombine.low %v4387_v59, %v4395_v39 }
 0x971   : > { %10985 = vmatpush1.bf16.msra.mxu0 %v12623_v33  ;;  %11149 = vmatpush1.bf16.msra.mxu1 %v12625_v63  ;;  %v12736_v33 = vcombine.high %v4387_v59, %v4395_v39  ;;  %v12738_v63 = vcombine.high %v4388_v14, %v4396_v44  ;;  %v4484_v59 = vld [vmem:[%s15112_s5 + $0xf28] sm:$0xff]  ;;  %v12817_v44 = vcombine.low %v4468_v24, %v4476_v17 }
 0x972   : > { %10986 = vmatprep.subr.bf16.mxu0 %v12640_v53  ;;  %11150 = vmatprep.subr.bf16.mxu1 %v12642_v54  ;;  %v4403_v53 = vld [vmem:[%s15112_s5 + $0xca0] sm:$0xff]  ;;  %v4492_v39 = vld [vmem:[%s15112_s5 + $0xf68] sm:$0xff] }
 0x973   : > { %v4411_v54 = vld [vmem:[%s15112_s5 + $0xce0] sm:$0xff] }
 0x974   : > { %v12751_v56 = vcombine.low %v4403_v53, %v4411_v54 }
 0x975   : > { %10987 = vmatpush1.bf16.msra.mxu0 %v12639_v48  ;;  %11151 = vmatpush1.bf16.msra.mxu1 %v12641_v49  ;;  %v12752_v48 = vcombine.high %v4403_v53, %v4411_v54  ;;  %v12754_v49 = vcombine.high %v4404_v55, %v4412_v58  ;;  %v4500_v53 = vld [vmem:[%s15112_s5 + $0xfa8] sm:$0xff]  ;;  %v12833_v58 = vcombine.low %v4484_v59, %v4492_v39 }
 0x976   : > { %10988 = vmatprep.subr.bf16.mxu0 %v12656_v34  ;;  %11152 = vmatprep.subr.bf16.mxu1 %v12658_v50  ;;  %v4419_v34 = vld [vmem:[%s15112_s5 + $0xd20] sm:$0xff]  ;;  %v4508_v54 = vld [vmem:[%s15112_s5 + $0xfe8] sm:$0xff] }
 0x977   : > { %v4427_v50 = vld [vmem:[%s15112_s5 + $0xd60] sm:$0xff] }
 0x978   : > { %v12767_v6 = vcombine.low %v4419_v34, %v4427_v50 }
 0x979   : > { %10989 = vmatpush1.bf16.msra.mxu0 %v12655_v62  ;;  %11153 = vmatpush1.bf16.msra.mxu1 %v12657_v3  ;;  %v12768_v62 = vcombine.high %v4419_v34, %v4427_v50  ;;  %v12770_v3 = vcombine.high %v4420_v51, %v4428_v52  ;;  %v4516_v34 = vld [vmem:[%s15112_s5 + $0x1028] sm:$0xff]  ;;  %v12849_v52 = vcombine.low %v4500_v53, %v4508_v54 }
 0x97a   : > { %10990 = vmatprep.subr.bf16.mxu0 %v12672_v20  ;;  %11154 = vmatprep.subr.bf16.mxu1 %v12674_v5  ;;  %v4435_v20 = vld [vmem:[%s15112_s5 + $0xda0] sm:$0xff]  ;;  %v4524_v50 = vld [vmem:[%s15112_s5 + $0x1068] sm:$0xff] }
 0x97b   : > { %v4443_v5 = vld [vmem:[%s15112_s5 + $0xde0] sm:$0xff] }
 0x97c   : > { %v12783_v37 = vcombine.low %v4435_v20, %v4443_v5 }
 0x97d   : > { %10991 = vmatpush1.bf16.msra.mxu0 %v12671_v7  ;;  %11155 = vmatpush1.bf16.msra.mxu1 %v12673_v1  ;;  %v12784_v7 = vcombine.high %v4435_v20, %v4443_v5  ;;  %v12786_v1 = vcombine.high %v4436_v0, %v4444_v19  ;;  %v4532_v20 = vld [vmem:[%s15112_s5 + $0x10a8] sm:$0xff]  ;;  %v12865_v19 = vcombine.low %v4516_v34, %v4524_v50 }
 0x97e   : > { %10992 = vmatprep.subr.bf16.mxu0 %v12688_v8  ;;  %11156 = vmatprep.subr.bf16.mxu1 %v12690_v57  ;;  %v4451_v8 = vld [vmem:[%s15112_s5 + $0xe20] sm:$0xff]  ;;  %v4540_v5 = vld [vmem:[%s15112_s5 + $0x10e8] sm:$0xff] }
 0x97f   : > { %v4459_v57 = vld [vmem:[%s15112_s5 + $0xe60] sm:$0xff] }
 0x980   : > { %v12799_v25 = vcombine.low %v4451_v8, %v4459_v57 }
 0x981   : > { %10993 = vmatpush1.bf16.msra.mxu0 %v12687_v18  ;;  %11157 = vmatpush1.bf16.msra.mxu1 %v12689_v29  ;;  %v12800_v18 = vcombine.high %v4451_v8, %v4459_v57  ;;  %v12802_v29 = vcombine.high %v4452_v10, %v4460_v11  ;;  %v4548_v8 = vld [vmem:[%s15112_s5 + $0x1128] sm:$0xff]  ;;  %v12881_v11 = vcombine.low %v4532_v20, %v4540_v5 }
 0x982   : > { %10994 = vmatprep.subr.bf16.mxu0 %v12704_v21  ;;  %11158 = vmatprep.subr.bf16.mxu1 %v12706_v23  ;;  %v4467_v21 = vld [vmem:[%s15112_s5 + $0xea0] sm:$0xff]  ;;  %v4556_v57 = vld [vmem:[%s15112_s5 + $0x1168] sm:$0xff] }
 0x983   : > { %v4475_v23 = vld [vmem:[%s15112_s5 + $0xee0] sm:$0xff] }
 0x984   : > { %v12815_v14 = vcombine.low %v4467_v21, %v4475_v23 }
 0x985   : > { %10995 = vmatpush1.bf16.msra.mxu0 %v12703_v27  ;;  %11159 = vmatpush1.bf16.msra.mxu1 %v12705_v28  ;;  %v12816_v27 = vcombine.high %v4467_v21, %v4475_v23  ;;  %v12818_v28 = vcombine.high %v4468_v24, %v4476_v17  ;;  %v4564_v21 = vld [vmem:[%s15112_s5 + $0x11a8] sm:$0xff]  ;;  %v12897_v17 = vcombine.low %v4548_v8, %v4556_v57 }
 0x986   : > { %10996 = vmatprep.subr.bf16.mxu0 %v12720_v13  ;;  %11160 = vmatprep.subr.bf16.mxu1 %v12722_v38  ;;  %v4483_v13 = vld [vmem:[%s15112_s5 + $0xf20] sm:$0xff]  ;;  %v4572_v23 = vld [vmem:[%s15112_s5 + $0x11e8] sm:$0xff] }
 0x987   : > { %v4491_v38 = vld [vmem:[%s15112_s5 + $0xf60] sm:$0xff] }
 0x988   : > { %v12831_v55 = vcombine.low %v4483_v13, %v4491_v38 }
 0x989   : > { %10997 = vmatpush1.bf16.msra.mxu0 %v12719_v36  ;;  %11161 = vmatpush1.bf16.msra.mxu1 %v12721_v42  ;;  %v12832_v36 = vcombine.high %v4483_v13, %v4491_v38  ;;  %v12834_v42 = vcombine.high %v4484_v59, %v4492_v39  ;;  %v4580_v13 = vld [vmem:[%s15112_s5 + $0x1228] sm:$0xff]  ;;  %v12913_v39 = vcombine.low %v4564_v21, %v4572_v23 }
 0x98a   : > { %10998 = vmatprep.subr.bf16.mxu0 %v12736_v33  ;;  %11162 = vmatprep.subr.bf16.mxu1 %v12738_v63  ;;  %v4499_v33 = vld [vmem:[%s15112_s5 + $0xfa0] sm:$0xff]  ;;  %v4588_v38 = vld [vmem:[%s15112_s5 + $0x1268] sm:$0xff] }
 0x98b   : > { %v4507_v63 = vld [vmem:[%s15112_s5 + $0xfe0] sm:$0xff] }
 0x98c   : > { %v12847_v51 = vcombine.low %v4499_v33, %v4507_v63 }
 0x98d   : > { %10999 = vmatpush1.bf16.msra.mxu0 %v12735_v45  ;;  %11163 = vmatpush1.bf16.msra.mxu1 %v12737_v47  ;;  %v12848_v45 = vcombine.high %v4499_v33, %v4507_v63  ;;  %v12850_v47 = vcombine.high %v4500_v53, %v4508_v54  ;;  %v4596_v33 = vld [vmem:[%s15112_s5 + $0x12a8] sm:$0xff]  ;;  %v12929_v54 = vcombine.low %v4580_v13, %v4588_v38 }
 0x98e   : > { %11000 = vmatprep.subr.bf16.mxu0 %v12752_v48  ;;  %11164 = vmatprep.subr.bf16.mxu1 %v12754_v49  ;;  %v4515_v48 = vld [vmem:[%s15112_s5 + $0x1020] sm:$0xff]  ;;  %v4604_v63 = vld [vmem:[%s15112_s5 + $0x12e8] sm:$0xff] }
 0x98f   : > { %v4523_v49 = vld [vmem:[%s15112_s5 + $0x1060] sm:$0xff] }
 0x990   : > { %v12863_v0 = vcombine.low %v4515_v48, %v4523_v49 }
 0x991   : > { %11001 = vmatpush1.bf16.msra.mxu0 %v12751_v56  ;;  %11165 = vmatpush1.bf16.msra.mxu1 %v12753_v60  ;;  %v12864_v56 = vcombine.high %v4515_v48, %v4523_v49  ;;  %v12866_v60 = vcombine.high %v4516_v34, %v4524_v50  ;;  %v4612_v48 = vld [vmem:[%s15112_s5 + $0x1328] sm:$0xff]  ;;  %v12945_v50 = vcombine.low %v4596_v33, %v4604_v63 }
 0x992   : > { %11002 = vmatprep.subr.bf16.mxu0 %v12768_v62  ;;  %11166 = vmatprep.subr.bf16.mxu1 %v12770_v3  ;;  %v4531_v62 = vld [vmem:[%s15112_s5 + $0x10a0] sm:$0xff]  ;;  %v4620_v49 = vld [vmem:[%s15112_s5 + $0x1368] sm:$0xff] }
 0x993   : > { %v4539_v3 = vld [vmem:[%s15112_s5 + $0x10e0] sm:$0xff] }
 0x994   : > { %v12879_v10 = vcombine.low %v4531_v62, %v4539_v3 }
 0x995   : > { %11003 = vmatpush1.bf16.msra.mxu0 %v12767_v6  ;;  %11167 = vmatpush1.bf16.msra.mxu1 %v12769_v41  ;;  %v12880_v6 = vcombine.high %v4531_v62, %v4539_v3  ;;  %v12882_v41 = vcombine.high %v4532_v20, %v4540_v5  ;;  %v4628_v62 = vld [vmem:[%s15112_s5 + $0x13a8] sm:$0xff]  ;;  %v12961_v5 = vcombine.low %v4612_v48, %v4620_v49 }
 0x996   : > { %11004 = vmatprep.subr.bf16.mxu0 %v12784_v7  ;;  %11168 = vmatprep.subr.bf16.mxu1 %v12786_v1  ;;  %v4547_v7 = vld [vmem:[%s15112_s5 + $0x1120] sm:$0xff]  ;;  %v4636_v3 = vld [vmem:[%s15112_s5 + $0x13e8] sm:$0xff] }
 0x997   : > { %v4555_v1 = vld [vmem:[%s15112_s5 + $0x1160] sm:$0xff] }
 0x998   : > { %v12895_v24 = vcombine.low %v4547_v7, %v4555_v1 }
 0x999   : > { %11005 = vmatpush1.bf16.msra.mxu0 %v12783_v37  ;;  %11169 = vmatpush1.bf16.msra.mxu1 %v12785_v12  ;;  %v12896_v37 = vcombine.high %v4547_v7, %v4555_v1  ;;  %v12898_v12 = vcombine.high %v4548_v8, %v4556_v57  ;;  %v4644_v7 = vld [vmem:[%s15112_s5 + $0x1428] sm:$0xff]  ;;  %v12977_v57 = vcombine.low %v4628_v62, %v4636_v3 }
 0x99a   : > { %11006 = vmatprep.subr.bf16.mxu0 %v12800_v18  ;;  %11170 = vmatprep.subr.bf16.mxu1 %v12802_v29  ;;  %v4563_v18 = vld [vmem:[%s15112_s5 + $0x11a0] sm:$0xff]  ;;  %v4652_v1 = vld [vmem:[%s15112_s5 + $0x1468] sm:$0xff] }
 0x99b   : > { %v4571_v29 = vld [vmem:[%s15112_s5 + $0x11e0] sm:$0xff] }
 0x99c   : > { %v12911_v59 = vcombine.low %v4563_v18, %v4571_v29 }
 0x99d   : > { %11007 = vmatpush1.bf16.msra.mxu0 %v12799_v25  ;;  %11171 = vmatpush1.bf16.msra.mxu1 %v12801_v2  ;;  %v12912_v25 = vcombine.high %v4563_v18, %v4571_v29  ;;  %v12914_v2 = vcombine.high %v4564_v21, %v4572_v23  ;;  %v4660_v18 = vld [vmem:[%s15112_s5 + $0x14a8] sm:$0xff]  ;;  %v12993_v23 = vcombine.low %v4644_v7, %v4652_v1 }
 0x99e   : > { %11008 = vmatprep.subr.bf16.mxu0 %v12816_v27  ;;  %11172 = vmatprep.subr.bf16.mxu1 %v12818_v28  ;;  %v4579_v27 = vld [vmem:[%s15112_s5 + $0x1220] sm:$0xff]  ;;  %v4668_v29 = vld [vmem:[%s15112_s5 + $0x14e8] sm:$0xff] }
 0x99f   : > { %v4587_v28 = vld [vmem:[%s15112_s5 + $0x1260] sm:$0xff] }
 0x9a0   : > { %v12927_v53 = vcombine.low %v4579_v27, %v4587_v28 }
 0x9a1   : > { %11009 = vmatpush1.bf16.msra.mxu0 %v12815_v14  ;;  %11173 = vmatpush1.bf16.msra.mxu1 %v12817_v44  ;;  %v12928_v14 = vcombine.high %v4579_v27, %v4587_v28  ;;  %v12930_v44 = vcombine.high %v4580_v13, %v4588_v38  ;;  %v4676_v27 = vld [vmem:[%s15112_s5 + $0x1528] sm:$0xff]  ;;  %v13009_v38 = vcombine.low %v4660_v18, %v4668_v29 }
 0x9a2   : > { %11010 = vmatprep.subr.bf16.mxu0 %v12832_v36  ;;  %11174 = vmatprep.subr.bf16.mxu1 %v12834_v42  ;;  %v4595_v36 = vld [vmem:[%s15112_s5 + $0x12a0] sm:$0xff]  ;;  %v4684_v28 = vld [vmem:[%s15112_s5 + $0x1568] sm:$0xff] }
 0x9a3   : > { %v4603_v42 = vld [vmem:[%s15112_s5 + $0x12e0] sm:$0xff] }
 0x9a4   : > { %v12943_v34 = vcombine.low %v4595_v36, %v4603_v42 }
 0x9a5   : > { %11011 = vmatpush1.bf16.msra.mxu0 %v12831_v55  ;;  %11175 = vmatpush1.bf16.msra.mxu1 %v12833_v58  ;;  %v12944_v55 = vcombine.high %v4595_v36, %v4603_v42  ;;  %v12946_v58 = vcombine.high %v4596_v33, %v4604_v63  ;;  %v4692_v36 = vld [vmem:[%s15112_s5 + $0x15a8] sm:$0xff]  ;;  %v13025_v63 = vcombine.low %v4676_v27, %v4684_v28 }
 0x9a6   : > { %11012 = vmatprep.subr.bf16.mxu0 %v12848_v45  ;;  %11176 = vmatprep.subr.bf16.mxu1 %v12850_v47  ;;  %v4611_v45 = vld [vmem:[%s15112_s5 + $0x1320] sm:$0xff]  ;;  %v4700_v42 = vld [vmem:[%s15112_s5 + $0x15e8] sm:$0xff] }
 0x9a7   : > { %v4619_v47 = vld [vmem:[%s15112_s5 + $0x1360] sm:$0xff] }
 0x9a8   : > { %v12959_v20 = vcombine.low %v4611_v45, %v4619_v47 }
 0x9a9   : > { %11013 = vmatpush1.bf16.msra.mxu0 %v12847_v51  ;;  %11177 = vmatpush1.bf16.msra.mxu1 %v12849_v52  ;;  %v12960_v51 = vcombine.high %v4611_v45, %v4619_v47  ;;  %v12962_v52 = vcombine.high %v4612_v48, %v4620_v49  ;;  %v4708_v45 = vld [vmem:[%s15112_s5 + $0x1628] sm:$0xff]  ;;  %v13041_v49 = vcombine.low %v4692_v36, %v4700_v42 }
 0x9aa   : > { %11023 = vmatprep.subr.bf16.mxu0 %v12864_v56  ;;  %11187 = vmatprep.subr.bf16.mxu1 %v12866_v60  ;;  %v4627_v56 = vld [vmem:[%s15112_s5 + $0x13a0] sm:$0xff]  ;;  %v4716_v47 = vld [vmem:[%s15112_s5 + $0x1668] sm:$0xff] }
 0x9ab   : > { %v4635_v60 = vld [vmem:[%s15112_s5 + $0x13e0] sm:$0xff] }
 0x9ac   : > { %11015 = vmatmul.mubr.bf16.vlgmr.msra.gmra.mrb[8].mxu0 %v15532_v16  ;;  %11179 = vmatmul.mubr.bf16.vlgmr.msra.gmra.mrb[8].mxu1 %v15532_v16  ;;  %v12975_v8 = vcombine.low %v4627_v56, %v4635_v60 }
 0x9ad   : > { %11024 = vmatpush1.bf16.msra.mxu0 %v12863_v0  ;;  %11188 = vmatpush1.bf16.msra.mxu1 %v12865_v19  ;;  %v12976_v0 = vcombine.high %v4627_v56, %v4635_v60  ;;  %v12978_v19 = vcombine.high %v4628_v62, %v4636_v3  ;;  %v4724_v56 = vld [vmem:[%s15112_s5 + $0x16a8] sm:$0xff]  ;;  %v13057_v3 = vcombine.low %v4708_v45, %v4716_v47 }
 0x9ae   : > { %11025 = vmatprep.subr.bf16.mxu0 %v12880_v6  ;;  %11189 = vmatprep.subr.bf16.mxu1 %v12882_v41  ;;  %v4643_v6 = vld [vmem:[%s15112_s5 + $0x1420] sm:$0xff]  ;;  %v4732_v60 = vld [vmem:[%s15112_s5 + $0x16e8] sm:$0xff] }
 0x9af   : > { %11055 = vmatprep.mubr.bf16.mxu0 %v15461_v61  ;;  %11219 = vmatprep.mubr.bf16.mxu1 %v15461_v61  ;;  %v4651_v41 = vld [vmem:[%s15112_s5 + $0x1460] sm:$0xff] }
 0x9b0   : > { %v12991_v21 = vcombine.low %v4643_v6, %v4651_v41 }
 0x9b1   : > { %11026 = vmatpush1.bf16.msra.mxu0 %v12879_v10  ;;  %11190 = vmatpush1.bf16.msra.mxu1 %v12881_v11  ;;  %v12992_v10 = vcombine.high %v4643_v6, %v4651_v41  ;;  %v12994_v11 = vcombine.high %v4644_v7, %v4652_v1  ;;  %v4740_v6 = vld [vmem:[%s15112_s5 + $0x1728] sm:$0xff]  ;;  %v13073_v1 = vcombine.low %v4724_v56, %v4732_v60 }
 0x9b2   : > { %11027 = vmatprep.subr.bf16.mxu0 %v12896_v37  ;;  %11191 = vmatprep.subr.bf16.mxu1 %v12898_v12  ;;  %v4659_v37 = vld [vmem:[%s15112_s5 + $0x14a0] sm:$0xff]  ;;  %v4748_v41 = vld [vmem:[%s15112_s5 + $0x1768] sm:$0xff] }
 0x9b3   : > { %v4667_v12 = vld [vmem:[%s15112_s5 + $0x14e0] sm:$0xff] }
 0x9b4   : > { %v13007_v13 = vcombine.low %v4659_v37, %v4667_v12 }
 0x9b5   : > { %11028 = vmatpush1.bf16.msra.mxu0 %v12895_v24  ;;  %11192 = vmatpush1.bf16.msra.mxu1 %v12897_v17  ;;  %v13008_v24 = vcombine.high %v4659_v37, %v4667_v12  ;;  %v13010_v17 = vcombine.high %v4660_v18, %v4668_v29  ;;  %v4756_v37 = vld [vmem:[%s15112_s5 + $0x17a8] sm:$0xff]  ;;  %v13089_v29 = vcombine.low %v4740_v6, %v4748_v41 }
 0x9b6   : > { %11029 = vmatprep.subr.bf16.mxu0 %v12912_v25  ;;  %11193 = vmatprep.subr.bf16.mxu1 %v12914_v2  ;;  %v4675_v25 = vld [vmem:[%s15112_s5 + $0x1520] sm:$0xff]  ;;  %v4764_v12 = vld [vmem:[%s15112_s5 + $0x17e8] sm:$0xff] }
 0x9b7   : > { %v4683_v2 = vld [vmem:[%s15112_s5 + $0x1560] sm:$0xff] }
 0x9b8   : > { %v13023_v33 = vcombine.low %v4675_v25, %v4683_v2 }
 0x9b9   : > { %11030 = vmatpush1.bf16.msra.mxu0 %v12911_v59  ;;  %11194 = vmatpush1.bf16.msra.mxu1 %v12913_v39  ;;  %v13024_v59 = vcombine.high %v4675_v25, %v4683_v2  ;;  %v13026_v39 = vcombine.high %v4676_v27, %v4684_v28  ;;  %v4772_v25 = vld [vmem:[%s15112_s5 + $0x1828] sm:$0xff]  ;;  %v13105_v28 = vcombine.low %v4756_v37, %v4764_v12 }
 0x9ba   : > { %11031 = vmatprep.subr.bf16.mxu0 %v12928_v14  ;;  %11195 = vmatprep.subr.bf16.mxu1 %v12930_v44  ;;  %v4691_v14 = vld [vmem:[%s15112_s5 + $0x15a0] sm:$0xff]  ;;  %v4780_v2 = vld [vmem:[%s15112_s5 + $0x1868] sm:$0xff] }
 0x9bb   : > { %v4699_v44 = vld [vmem:[%s15112_s5 + $0x15e0] sm:$0xff] }
 0x9bc   : > { %v13039_v48 = vcombine.low %v4691_v14, %v4699_v44 }
 0x9bd   : > { %11032 = vmatpush1.bf16.msra.mxu0 %v12927_v53  ;;  %11196 = vmatpush1.bf16.msra.mxu1 %v12929_v54  ;;  %v13040_v53 = vcombine.high %v4691_v14, %v4699_v44  ;;  %v13042_v54 = vcombine.high %v4692_v36, %v4700_v42  ;;  %v4788_v14 = vld [vmem:[%s15112_s5 + $0x18a8] sm:$0xff]  ;;  %v13121_v42 = vcombine.low %v4772_v25, %v4780_v2 }
 0x9be   : > { %11033 = vmatprep.subr.bf16.mxu0 %v12944_v55  ;;  %11197 = vmatprep.subr.bf16.mxu1 %v12946_v58  ;;  %v4707_v55 = vld [vmem:[%s15112_s5 + $0x1620] sm:$0xff]  ;;  %v4796_v44 = vld [vmem:[%s15112_s5 + $0x18e8] sm:$0xff] }
 0x9bf   : > { %v4715_v58 = vld [vmem:[%s15112_s5 + $0x1660] sm:$0xff] }
 0x9c0   : > { %v13055_v62 = vcombine.low %v4707_v55, %v4715_v58 }
 0x9c1   : > { %11034 = vmatpush1.bf16.msra.mxu0 %v12943_v34  ;;  %11198 = vmatpush1.bf16.msra.mxu1 %v12945_v50  ;;  %v13056_v34 = vcombine.high %v4707_v55, %v4715_v58  ;;  %v13058_v50 = vcombine.high %v4708_v45, %v4716_v47  ;;  %v4804_v55 = vld [vmem:[%s15112_s5 + $0x1928] sm:$0xff]  ;;  %v13137_v47 = vcombine.low %v4788_v14, %v4796_v44 }
 0x9c2   : > { %11035 = vmatprep.subr.bf16.mxu0 %v12960_v51  ;;  %11199 = vmatprep.subr.bf16.mxu1 %v12962_v52  ;;  %v4723_v51 = vld [vmem:[%s15112_s5 + $0x16a0] sm:$0xff]  ;;  %v4812_v58 = vld [vmem:[%s15112_s5 + $0x1968] sm:$0xff] }
 0x9c3   : > { %v4731_v52 = vld [vmem:[%s15112_s5 + $0x16e0] sm:$0xff] }
 0x9c4   : > { %v13071_v7 = vcombine.low %v4723_v51, %v4731_v52 }
 0x9c5   : > { %11036 = vmatpush1.bf16.msra.mxu0 %v12959_v20  ;;  %11200 = vmatpush1.bf16.msra.mxu1 %v12961_v5  ;;  %v13072_v20 = vcombine.high %v4723_v51, %v4731_v52  ;;  %v13074_v5 = vcombine.high %v4724_v56, %v4732_v60  ;;  %v4820_v51 = vld [vmem:[%s15112_s5 + $0x19a8] sm:$0xff]  ;;  %v13153_v60 = vcombine.low %v4804_v55, %v4812_v58 }
 0x9c6   : > { %11037 = vmatprep.subr.bf16.mxu0 %v12976_v0  ;;  %11201 = vmatprep.subr.bf16.mxu1 %v12978_v19  ;;  %v4739_v0 = vld [vmem:[%s15112_s5 + $0x1720] sm:$0xff]  ;;  %v4828_v52 = vld [vmem:[%s15112_s5 + $0x19e8] sm:$0xff] }
 0x9c7   : > { %v4747_v19 = vld [vmem:[%s15112_s5 + $0x1760] sm:$0xff] }
 0x9c8   : > { %v13087_v18 = vcombine.low %v4739_v0, %v4747_v19 }
 0x9c9   : > { %11038 = vmatpush1.bf16.msra.mxu0 %v12975_v8  ;;  %11202 = vmatpush1.bf16.msra.mxu1 %v12977_v57  ;;  %v13088_v8 = vcombine.high %v4739_v0, %v4747_v19  ;;  %v13090_v57 = vcombine.high %v4740_v6, %v4748_v41  ;;  %v4836_v0 = vld [vmem:[%s15112_s5 + $0x1a28] sm:$0xff]  ;;  %v13169_v41 = vcombine.low %v4820_v51, %v4828_v52 }
 0x9ca   : > { %11039 = vmatprep.subr.bf16.mxu0 %v12992_v10  ;;  %11203 = vmatprep.subr.bf16.mxu1 %v12994_v11  ;;  %v4755_v10 = vld [vmem:[%s15112_s5 + $0x17a0] sm:$0xff]  ;;  %v4844_v19 = vld [vmem:[%s15112_s5 + $0x1a68] sm:$0xff] }
 0x9cb   : > { %v4763_v11 = vld [vmem:[%s15112_s5 + $0x17e0] sm:$0xff] }
 0x9cc   : > { %v13103_v27 = vcombine.low %v4755_v10, %v4763_v11 }
 0x9cd   : > { %11040 = vmatpush1.bf16.msra.mxu0 %v12991_v21  ;;  %11204 = vmatpush1.bf16.msra.mxu1 %v12993_v23  ;;  %v13104_v21 = vcombine.high %v4755_v10, %v4763_v11  ;;  %v13106_v23 = vcombine.high %v4756_v37, %v4764_v12  ;;  %v5045_v10 = vsub.s32 4, %v15379_v22  ;;  %v4852_v11 = vld [vmem:[%s15112_s5 + $0x1aa8] sm:$0xff] }
 0x9ce   : > { %11041 = vmatprep.subr.bf16.mxu0 %v13008_v24  ;;  %11205 = vmatprep.subr.bf16.mxu1 %v13010_v17  ;;  %v4771_v24 = vld [vmem:[%s15112_s5 + $0x1820] sm:$0xff]  ;;  %v4860_v37 = vld [vmem:[%s15112_s5 + $0x1ae8] sm:$0xff] }
 0x9cf   : > { %v4779_v17 = vld [vmem:[%s15112_s5 + $0x1860] sm:$0xff] }
 0x9d0   : > { %v13119_v36 = vcombine.low %v4771_v24, %v4779_v17 }
 0x9d1   : > { %11042 = vmatpush1.bf16.msra.mxu0 %v13007_v13  ;;  %11206 = vmatpush1.bf16.msra.mxu1 %v13009_v38  ;;  %v13120_v13 = vcombine.high %v4771_v24, %v4779_v17  ;;  %v13122_v38 = vcombine.high %v4772_v25, %v4780_v2  ;;  %v13202_v17 = vcombine.high %v4852_v11, %v4860_v37  ;;  %v4867_v25 = vld [vmem:[%s15112_s5 + $0x1b20] sm:$0xff] }
 0x9d2   : > { %11043 = vmatprep.subr.bf16.mxu0 %v13024_v59  ;;  %11207 = vmatprep.subr.bf16.mxu1 %v13026_v39  ;;  %v4787_v59 = vld [vmem:[%s15112_s5 + $0x18a0] sm:$0xff] }
 0x9d3   : > { %v4795_v39 = vld [vmem:[%s15112_s5 + $0x18e0] sm:$0xff] }
 0x9d4   : > { %v13135_v45 = vcombine.low %v4787_v59, %v4795_v39  ;;  %v4875_v2 = vld [vmem:[%s15112_s5 + $0x1b60] sm:$0xff] }
 0x9d5   : > { %11044 = vmatpush1.bf16.msra.mxu0 %v13023_v33  ;;  %11208 = vmatpush1.bf16.msra.mxu1 %v13025_v63  ;;  %v13136_v33 = vcombine.high %v4787_v59, %v4795_v39  ;;  %v13138_v63 = vcombine.high %v4788_v14, %v4796_v44 }
 0x9d6   : > { %11045 = vmatprep.subr.bf16.mxu0 %v13040_v53  ;;  %11209 = vmatprep.subr.bf16.mxu1 %v13042_v54  ;;  %v4803_v53 = vld [vmem:[%s15112_s5 + $0x1920] sm:$0xff] }
 0x9d7   : > { %v4811_v54 = vld [vmem:[%s15112_s5 + $0x1960] sm:$0xff] }
 0x9d8   : > { %v13151_v56 = vcombine.low %v4803_v53, %v4811_v54 }
 0x9d9   : > { %11046 = vmatpush1.bf16.msra.mxu0 %v13039_v48  ;;  %11210 = vmatpush1.bf16.msra.mxu1 %v13041_v49  ;;  %v13152_v48 = vcombine.high %v4803_v53, %v4811_v54  ;;  %v13154_v49 = vcombine.high %v4804_v55, %v4812_v58  ;;  %v4883_v53 = vld [vmem:[%s15112_s5 + $0x1ba0] sm:$0xff] }
 0x9da   : > { %11047 = vmatprep.subr.bf16.mxu0 %v13056_v34  ;;  %11211 = vmatprep.subr.bf16.mxu1 %v13058_v50  ;;  %v4819_v34 = vld [vmem:[%s15112_s5 + $0x19a0] sm:$0xff] }
 0x9db   : > { %v4827_v50 = vld [vmem:[%s15112_s5 + $0x19e0] sm:$0xff] }
 0x9dc   : > { %v13167_v6 = vcombine.low %v4819_v34, %v4827_v50  ;;  %v4891_v54 = vld [vmem:[%s15112_s5 + $0x1be0] sm:$0xff] }
 0x9dd   : > { %11048 = vmatpush1.bf16.msra.mxu0 %v13055_v62  ;;  %11212 = vmatpush1.bf16.msra.mxu1 %v13057_v3  ;;  %v13168_v62 = vcombine.high %v4819_v34, %v4827_v50  ;;  %v13170_v3 = vcombine.high %v4820_v51, %v4828_v52  ;;  %v13215_v52 = vcombine.low %v4867_v25, %v4875_v2 }
 0x9de   : > { %11049 = vmatprep.subr.bf16.mxu0 %v13072_v20  ;;  %11213 = vmatprep.subr.bf16.mxu1 %v13074_v5  ;;  %v4835_v20 = vld [vmem:[%s15112_s5 + $0x1a20] sm:$0xff] }
 0x9df   : > { %v4843_v5 = vld [vmem:[%s15112_s5 + $0x1a60] sm:$0xff] }
 0x9e0   : > { %v13183_v12 = vcombine.low %v4835_v20, %v4843_v5 }
 0x9e1   : > { %11050 = vmatpush1.bf16.msra.mxu0 %v13071_v7  ;;  %11214 = vmatpush1.bf16.msra.mxu1 %v13073_v1  ;;  %v13184_v7 = vcombine.high %v4835_v20, %v4843_v5  ;;  %v13186_v1 = vcombine.high %v4836_v0, %v4844_v19  ;;  %v13232_v20 = vcombine.high %v4883_v53, %v4891_v54 }
 0x9e2   : > { %11051 = vmatprep.subr.bf16.mxu0 %v13088_v8  ;;  %11215 = vmatprep.subr.bf16.mxu1 %v13090_v57  ;;  %v4851_v8 = vld [vmem:[%s15112_s5 + $0x1aa0] sm:$0xff] }
 0x9e3   : > { %v4859_v57 = vld [vmem:[%s15112_s5 + $0x1ae0] sm:$0xff] }
 0x9e4   : > { %v13200_v24 = vcombine.high %v4851_v8, %v4859_v57  ;;  %v13199_v14 = vcombine.low %v4851_v8, %v4859_v57 }
 0x9e5   : > { %11052 = vmatpush1.bf16.msra.mxu0 %v13087_v18  ;;  %11216 = vmatpush1.bf16.msra.mxu1 %v13089_v29  ;;  %v5053_v18 = vsub.s32 6, %v15379_v22  ;;  %v5049_v29 = vsub.s32 5, %v15379_v22 }
 0x9e6   : > { %11053 = vmatprep.subr.bf16.mxu0 %v13104_v21  ;;  %11217 = vmatprep.subr.bf16.mxu1 %v13106_v23  ;;  %v13185_v21 = vcombine.low %v4836_v0, %v4844_v19  ;;  %v5057_v23 = vsub.s32 7, %v15379_v22  ;;  %v4899_v19 = vld [vmem:[%s15112_s5 + $0x1c20] sm:$0xff] }
 0x9e9   : > { %11054 = vmatpush1.bf16.msra.mxu0 %v13103_v27  ;;  %11218 = vmatpush1.bf16.msra.mxu1 %v13105_v28  ;;  %v13923_v27 = vld [vmem:[%s15120_s11] sm:$0xff] }
 0x9ea   : > { %11064 = vmatprep.subr.bf16.mxu0 %v13120_v13  ;;  %11228 = vmatprep.subr.bf16.mxu1 %v13122_v38  ;;  %v5046_v28 = vrot.slane %v13923_v27, %v5045_v10  ;;  %v4868_v13 = vld [vmem:[%s15112_s5 + $0x1b28] sm:$0xff]  ;;  %v5054_v59 = vrot.slane %v13923_v27, %v5053_v18  ;;  %v5050_v39 = vrot.slane %v13923_v27, %v5049_v29 }
 0x9eb   : > { %v4876_v38 = vld [vmem:[%s15112_s5 + $0x1b68] sm:$0xff]  ;;  %v5058_v44 = vrot.slane %v13923_v27, %v5057_v23 }
 0x9ec   : > { %11056 = vmatmul.mubr.bf16.vlgmr.msra.gmra.mrb[8].mxu0 %v15464_v9  ;;  %11220 = vmatmul.mubr.bf16.vlgmr.msra.gmra.mrb[8].mxu1 %v15464_v9 }
 0x9ed   : > { %11065 = vmatpush1.bf16.msra.mxu0 %v13119_v36  ;;  %11229 = vmatpush1.bf16.msra.mxu1 %v13121_v42  ;;  %v13201_v36 = vcombine.low %v4852_v11, %v4860_v37  ;;  %v13216_v42 = vcombine.high %v4867_v25, %v4875_v2  ;;  %v4915_v37 = vld [vmem:[%s15112_s5 + $0x1ca0] sm:$0xff] }
 0x9ee   : > { %11066 = vmatprep.subr.bf16.mxu0 %v13136_v33  ;;  %11230 = vmatprep.subr.bf16.mxu1 %v13138_v63  ;;  %v13218_v63 = vcombine.high %v4868_v13, %v4876_v38 }
 0x9ef   : > { %11096 = vmatprep.mubr.bf16.mxu0 %v15608_v43  ;;  %11260 = vmatprep.mubr.bf16.mxu1 %v15608_v43 }
 0x9f1   : > { %11067 = vmatpush1.bf16.msra.mxu0 %v13135_v45  ;;  %11231 = vmatpush1.bf16.msra.mxu1 %v13137_v47  ;;  %v4884_v47 = vld [vmem:[%s15112_s5 + $0x1ba8] sm:$0xff] }
 0x9f2   : > { %11068 = vmatprep.subr.bf16.mxu0 %v13152_v48  ;;  %11232 = vmatprep.subr.bf16.mxu1 %v13154_v49  ;;  %v4892_v48 = vld [vmem:[%s15112_s5 + $0x1be8] sm:$0xff] }
 0x9f3   : > { %v13234_v0 = vcombine.high %v4884_v47, %v4892_v48  ;;  %v13233_v8 = vcombine.low %v4884_v47, %v4892_v48  ;;  %v4948_v47 = vld [vmem:[%s15112_s5 + $0x1da8] sm:$0xff] }
 0x9f4   : > { %v4956_v48 = vld [vmem:[%s15112_s5 + $0x1de8] sm:$0xff] }
 0x9f5   : > { %11069 = vmatpush1.bf16.msra.mxu0 %v13151_v56  ;;  %11233 = vmatpush1.bf16.msra.mxu1 %v13153_v60 }
 0x9f6   : > { %11070 = vmatprep.subr.bf16.mxu0 %v13168_v62  ;;  %11234 = vmatprep.subr.bf16.mxu1 %v13170_v3  ;;  %v13217_v3 = vcombine.low %v4868_v13, %v4876_v38  ;;  %v4939_v13 = vld [vmem:[%s15112_s5 + $0x1d60] sm:$0xff] }
 0x9f9   : > { %11071 = vmatpush1.bf16.msra.mxu0 %v13167_v6  ;;  %11235 = vmatpush1.bf16.msra.mxu1 %v13169_v41  ;;  %v4907_v6 = vld [vmem:[%s15112_s5 + $0x1c60] sm:$0xff]  ;;  %v4900_v41 = vld [vmem:[%s15112_s5 + $0x1c28] sm:$0xff] }
 0x9fa   : > { %11072 = vmatprep.subr.bf16.mxu0 %v13184_v7  ;;  %11236 = vmatprep.subr.bf16.mxu1 %v13186_v1  ;;  %v4908_v7 = vld [vmem:[%s15112_s5 + $0x1c68] sm:$0xff]  ;;  %v13231_v1 = vcombine.low %v4883_v53, %v4891_v54  ;;  %v13248_v57 = vcombine.high %v4899_v19, %v4907_v6 }
 0x9fb   : > { %v13250_v11 = vcombine.high %v4900_v41, %v4908_v7  ;;  %v13249_v25 = vcombine.low %v4900_v41, %v4908_v7  ;;  %v4979_v7 = vld [vmem:[%s15112_s5 + $0x1ea0] sm:$0xff] }
 0x9fd   : > { %11073 = vmatpush1.bf16.msra.mxu0 %v13183_v12  ;;  %11237 = vmatpush1.bf16.msra.mxu1 %v13185_v21  ;;  %v4923_v12 = vld [vmem:[%s15112_s5 + $0x1ce0] sm:$0xff]  ;;  %v4916_v21 = vld [vmem:[%s15112_s5 + $0x1ca8] sm:$0xff] }
 0x9fe   : > { %11074 = vmatprep.subr.bf16.mxu0 %v13200_v24  ;;  %11238 = vmatprep.subr.bf16.mxu1 %v13202_v17  ;;  %v4924_v24 = vld [vmem:[%s15112_s5 + $0x1ce8] sm:$0xff]  ;;  %v13247_v17 = vcombine.low %v4899_v19, %v4907_v6  ;;  %v13264_v2 = vcombine.high %v4915_v37, %v4923_v12  ;;  %v13297_v19 = vcombine.low %v4948_v47, %v4956_v48 }
 0x9ff   : > { %v10770_v33 = vpop.f32.mrb[4].mxu0  ;;  %v10934_v58 = vpop.f32.mrb[4].mxu1  ;;  %v13266_v27 = vcombine.high %v4916_v21, %v4924_v24 }
 0xa00   : > { %v13414_v55 = vadd.f32 %v10770_v33, %v5046_v28  ;;  %v10772_v45 = vpop.f32.mrb[5].mxu0  ;;  %v13416_v49 = vadd.f32 %v10934_v58, %v5054_v59  ;;  %v10936_v50 = vpop.f32.mrb[5].mxu1  ;;  %v4931_v28 = vld [vmem:[%s15112_s5 + $0x1d20] sm:$0xff]  ;;  %v4932_v59 = vld [vmem:[%s15112_s5 + $0x1d28] sm:$0xff] }
 0xa01   : > { %v13415_v34 = vadd.f32 %v10772_v45, %v5050_v39  ;;  %v10774_v51 = vpop.f32.mrb[6].mxu0  ;;  %11075 = vmatpush1.bf16.msra.mxu0 %v13199_v14  ;;  %v13417_v56 = vadd.f32 %v10936_v50, %v5058_v44  ;;  %v10938_v60 = vpop.f32.mrb[6].mxu1  ;;  %11239 = vmatpush1.bf16.msra.mxu1 %v13201_v36  ;;  %v4940_v39 = vld [vmem:[%s15112_s5 + $0x1d68] sm:$0xff]  ;;  %v13263_v44 = vcombine.low %v4915_v37, %v4923_v12  ;;  %v4955_v58 = vld [vmem:[%s15112_s5 + $0x1de0] sm:$0xff] }
 0xa02   : > { %13899 = vtanh.f32 %v13414_v55  ;;  %v10775_v62 = vpop.f32.mrb[7].mxu0  ;;  %11076 = vmatprep.subr.bf16.mxu0 %v13216_v42  ;;  %v10939_v5 = vpop.f32.mrb[7].mxu1  ;;  %11240 = vmatprep.subr.bf16.mxu1 %v13218_v63  ;;  %v13265_v42 = vcombine.low %v4916_v21, %v4924_v24  ;;  %v13280_v33 = vcombine.high %v4931_v28, %v4939_v13  ;;  %v13282_v54 = vcombine.high %v4932_v59, %v4940_v39  ;;  %v4947_v55 = vld [vmem:[%s15112_s5 + $0x1da0] sm:$0xff] }
 0xa03   : > { %13901 = vtanh.f32 %v13416_v49  ;;  %v13281_v51 = vcombine.low %v4932_v59, %v4940_v39  ;;  %v4963_v60 = vld [vmem:[%s15112_s5 + $0x1e20] sm:$0xff] }
 0xa04   : > { %13903 = vtanh.f32 %v13415_v34  ;;  %v13279_v34 = vcombine.low %v4931_v28, %v4939_v13  ;;  %v4971_v62 = vld [vmem:[%s15112_s5 + $0x1e60] sm:$0xff] }
 0xa05   : > { %13905 = vtanh.f32 %v13417_v56  ;;  %11077 = vmatpush1.bf16.msra.mxu0 %v13215_v52  ;;  %11241 = vmatpush1.bf16.msra.mxu1 %v13217_v3  ;;  %v13296_v52 = vcombine.high %v4947_v55, %v4955_v58  ;;  %v13298_v56 = vcombine.high %v4948_v47, %v4956_v48  ;;  %v4964_v3 = vld [vmem:[%s15112_s5 + $0x1e28] sm:$0xff]  ;;  %v13312_v6 = vcombine.high %v4963_v60, %v4971_v62  ;;  %v4995_v24 = vld [vmem:[%s15112_s5 + $0x1f20] sm:$0xff] }
 0xa06   : > { %11078 = vmatprep.subr.bf16.mxu0 %v13232_v20  ;;  %11242 = vmatprep.subr.bf16.mxu1 %v13234_v0  ;;  %v4972_v20 = vld [vmem:[%s15112_s5 + $0x1e68] sm:$0xff]  ;;  %v13295_v0 = vcombine.low %v4947_v55, %v4955_v58  ;;  %v5011_v59 = vld [vmem:[%s15112_s5 + $0x1fa0] sm:$0xff]  ;;  %v4006_v55 = vld [vmem:[%s15112_s5 + $0x38] sm:$0xff] }
 0xa07   : > { %v13314_v41 = vcombine.high %v4964_v3, %v4972_v20  ;;  %v13313_v37 = vcombine.low %v4964_v3, %v4972_v20  ;;  %v5019_v39 = vld [vmem:[%s15112_s5 + $0x1fe0] sm:$0xff]  ;;  %v4014_v58 = vld [vmem:[%s15112_s5 + $0x78] sm:$0xff]  ;;  %v4037_v20 = vld [vmem:[%s15112_s5 + $0x130] sm:$0xff] }
 0xa09   : > { %11079 = vmatpush1.bf16.msra.mxu0 %v13231_v1  ;;  %11243 = vmatpush1.bf16.msra.mxu1 %v13233_v8  ;;  %v4987_v1 = vld [vmem:[%s15112_s5 + $0x1ee0] sm:$0xff]  ;;  %v4980_v8 = vld [vmem:[%s15112_s5 + $0x1ea8] sm:$0xff] }
 0xa0a   : > { %11080 = vmatprep.subr.bf16.mxu0 %v13248_v57  ;;  %11244 = vmatprep.subr.bf16.mxu1 %v13250_v11  ;;  %v4988_v57 = vld [vmem:[%s15112_s5 + $0x1ee8] sm:$0xff]  ;;  %v13311_v11 = vcombine.low %v4963_v60, %v4971_v62  ;;  %v13328_v12 = vcombine.high %v4979_v7, %v4987_v1  ;;  %v12357_v60 = vcombine.low %v4006_v55, %v4014_v58 }
 0xa0b   : > { %v13330_v21 = vcombine.high %v4980_v8, %v4988_v57  ;;  %v13329_v28 = vcombine.low %v4980_v8, %v4988_v57  ;;  %v4053_v8 = vld [vmem:[%s15112_s5 + $0x1b0] sm:$0xff] }
 0xa0c   : > { %v13900_v38 = vpop.eup %13899  ;;  %v4061_v57 = vld [vmem:[%s15112_s5 + $0x1f0] sm:$0xff] }
 0xa0d   : > { %v13902_v14 = vpop.eup %13901  ;;  %11081 = vmatpush1.bf16.msra.mxu0 %v13247_v17  ;;  %11245 = vmatpush1.bf16.msra.mxu1 %v13249_v25  ;;  %v5003_v17 = vld [vmem:[%s15112_s5 + $0x1f60] sm:$0xff]  ;;  %v4996_v25 = vld [vmem:[%s15112_s5 + $0x1f28] sm:$0xff] }
 0xa0e   : > { %v13904_v36 = vpop.eup %13903  ;;  %11082 = vmatprep.subr.bf16.mxu0 %v13264_v2  ;;  %11246 = vmatprep.subr.bf16.mxu1 %v13266_v27  ;;  %v5004_v2 = vld [vmem:[%s15112_s5 + $0x1f68] sm:$0xff]  ;;  %v13327_v27 = vcombine.low %v4979_v7, %v4987_v1  ;;  %v13344_v13 = vcombine.high %v4995_v24, %v5003_v17 }
 0xa0f   : > { %v13906_v63 = vpop.eup %13905  ;;  %v11646_v53 = vcombine.low %v13900_v38, %v13904_v36  ;;  %v13346_v38 = vcombine.high %v4996_v25, %v5004_v2  ;;  %v13343_v36 = vcombine.low %v4995_v24, %v5003_v17  ;;  %v12404_v24 = vcombine.high %v4053_v8, %v4061_v57 }
 0xa10   : > { %v11647_v45 = vcombine.low %v13902_v14, %v13906_v63  ;;  %v5012_v14 = vld [vmem:[%s15112_s5 + $0x1fa8] sm:$0xff] }
 0xa11   : > { %v11654_v49 = vrot.slane %v11646_v53, %v15938_v32  ;;  %11083 = vmatpush1.bf16.msra.mxu0 %v13263_v44  ;;  %11247 = vmatpush1.bf16.msra.mxu1 %v13265_v42  ;;  %v5020_v44 = vld [vmem:[%s15112_s5 + $0x1fe8] sm:$0xff]  ;;  %v13345_v42 = vcombine.low %v4996_v25, %v5004_v2  ;;  %v4005_v53 = vld [vmem:[%s15112_s5 + $0x30] sm:$0xff] }
 0xa12   : > { %v11661_v50 = vrot.slane %v11647_v45, %v15938_v32  ;;  %11084 = vmatprep.subr.bf16.mxu0 %v13280_v33  ;;  %11248 = vmatprep.subr.bf16.mxu1 %v13282_v54  ;;  %v13360_v33 = vcombine.high %v5011_v59, %v5019_v39  ;;  %v13362_v63 = vcombine.high %v5012_v14, %v5020_v44  ;;  %v4013_v54 = vld [vmem:[%s15112_s5 + $0x70] sm:$0xff] }
 0xa13   : > { %v13359_v45 = vcombine.low %v5011_v59, %v5019_v39  ;;  %v13361_v47 = vcombine.low %v5012_v14, %v5020_v44  ;;  %v12356_v48 = vcombine.high %v4005_v53, %v4013_v54  ;;  %v4069_v25 = vld [vmem:[%s15112_s5 + $0x230] sm:$0xff]  ;;  %v4086_v44 = vld [vmem:[%s15112_s5 + $0x2b8] sm:$0xff] }
 0xa14   : > { %v11662_v5 = vcombine.low %v11654_v49, %v11661_v50  ;;  %v12358_v49 = vcombine.high %v4006_v55, %v4014_v58  ;;  %v4029_v50 = vld [vmem:[%s15112_s5 + $0xf0] sm:$0xff]  ;;  %v4102_v58 = vld [vmem:[%s15112_s5 + $0x338] sm:$0xff] }
 0xa15   : > { %11085 = vmatpush1.bf16.msra.mxu0 %v13279_v34  ;;  %11249 = vmatpush1.bf16.msra.mxu1 %v13281_v51  ;;  %v4021_v34 = vld [vmem:[%s15112_s5 + $0xb0] sm:$0xff]  ;;  %v4022_v51 = vld [vmem:[%s15112_s5 + $0xb8] sm:$0xff] }
 0xa16   : > { %11086 = vmatprep.subr.bf16.mxu0 %v13296_v52  ;;  %11702 = vst [vmem:[%s15122_s12 + $0x8] sm:$0xff] %v11662_v5  ;;  %11250 = vmatprep.subr.bf16.mxu1 %v13298_v56  ;;  %v4030_v52 = vld [vmem:[%s15112_s5 + $0xf8] sm:$0xff]  ;;  %v12355_v56 = vcombine.low %v4005_v53, %v4013_v54  ;;  %v12372_v62 = vcombine.high %v4021_v34, %v4029_v50  ;;  %v4045_v5 = vld [vmem:[%s15112_s5 + $0x170] sm:$0xff] }
 0xa17   : > { %v12374_v3 = vcombine.high %v4022_v51, %v4030_v52  ;;  %v12388_v7 = vcombine.high %v4037_v20, %v4045_v5  ;;  %v4077_v2 = vld [vmem:[%s15112_s5 + $0x270] sm:$0xff] }
 0xa18   : > { %v4085_v39 = vld [vmem:[%s15112_s5 + $0x2b0] sm:$0xff] }
 0xa19   : > { %11087 = vmatpush1.bf16.msra.mxu0 %v13295_v0  ;;  %11251 = vmatpush1.bf16.msra.mxu1 %v13297_v19  ;;  %v4038_v0 = vld [vmem:[%s15112_s5 + $0x138] sm:$0xff]  ;;  %v4093_v14 = vld [vmem:[%s15112_s5 + $0x2f0] sm:$0xff] }
 0xa1a   : > { %11088 = vmatprep.subr.bf16.mxu0 %v13312_v6  ;;  %11252 = vmatprep.subr.bf16.mxu1 %v13314_v41  ;;  %v4046_v19 = vld [vmem:[%s15112_s5 + $0x178] sm:$0xff]  ;;  %v12371_v6 = vcombine.low %v4021_v34, %v4029_v50  ;;  %v12373_v41 = vcombine.low %v4022_v51, %v4030_v52  ;;  %v4101_v54 = vld [vmem:[%s15112_s5 + $0x330] sm:$0xff] }
 0xa1b   : > { %v12390_v1 = vcombine.high %v4038_v0, %v4046_v19  ;;  %v4109_v55 = vld [vmem:[%s15112_s5 + $0x370] sm:$0xff]  ;;  %v4118_v52 = vld [vmem:[%s15112_s5 + $0x3b8] sm:$0xff] }
 0xa1c   : > { %v4117_v50 = vld [vmem:[%s15112_s5 + $0x3b0] sm:$0xff] }
 0xa1d   : > { %11089 = vmatpush1.bf16.msra.mxu0 %v13311_v11  ;;  %11253 = vmatpush1.bf16.msra.mxu1 %v13313_v37  ;;  %v4054_v11 = vld [vmem:[%s15112_s5 + $0x1b8] sm:$0xff]  ;;  %v4125_v51 = vld [vmem:[%s15112_s5 + $0x3f0] sm:$0xff] }
 0xa1e   : > { %11090 = vmatprep.subr.bf16.mxu0 %v13328_v12  ;;  %11254 = vmatprep.subr.bf16.mxu1 %v13330_v21  ;;  %v4062_v37 = vld [vmem:[%s15112_s5 + $0x1f8] sm:$0xff]  ;;  %v12387_v12 = vcombine.low %v4037_v20, %v4045_v5  ;;  %v12389_v21 = vcombine.low %v4038_v0, %v4046_v19  ;;  %v4133_v5 = vld [vmem:[%s15112_s5 + $0x430] sm:$0xff] }
 0xa1f   : > { %v12406_v17 = vcombine.high %v4054_v11, %v4062_v37  ;;  %v4141_v0 = vld [vmem:[%s15112_s5 + $0x470] sm:$0xff]  ;;  %v4134_v19 = vld [vmem:[%s15112_s5 + $0x438] sm:$0xff] }
 0xa21   : > { %11091 = vmatpush1.bf16.msra.mxu0 %v13327_v27  ;;  %11255 = vmatpush1.bf16.msra.mxu1 %v13329_v28  ;;  %v4070_v27 = vld [vmem:[%s15112_s5 + $0x238] sm:$0xff] }
 0xa22   : > { %11092 = vmatprep.subr.bf16.mxu0 %v13344_v13  ;;  %11256 = vmatprep.subr.bf16.mxu1 %v13346_v38  ;;  %v4078_v28 = vld [vmem:[%s15112_s5 + $0x278] sm:$0xff]  ;;  %v12403_v13 = vcombine.low %v4053_v8, %v4061_v57  ;;  %v12420_v38 = vcombine.high %v4069_v25, %v4077_v2  ;;  %v4149_v57 = vld [vmem:[%s15112_s5 + $0x4b0] sm:$0xff] }
 0xa23   : > { %v12422_v59 = vcombine.high %v4070_v27, %v4078_v28 }
 0xa25   : > { %11093 = vmatpush1.bf16.msra.mxu0 %v13343_v36  ;;  %11257 = vmatpush1.bf16.msra.mxu1 %v13345_v42  ;;  %v4094_v36 = vld [vmem:[%s15112_s5 + $0x2f8] sm:$0xff]  ;;  %v12419_v42 = vcombine.low %v4069_v25, %v4077_v2  ;;  %v4165_v2 = vld [vmem:[%s15112_s5 + $0x530] sm:$0xff] }
 0xa26   : > { %11094 = vmatprep.subr.bf16.mxu0 %v13360_v33  ;;  %11258 = vmatprep.subr.bf16.mxu1 %v13362_v63  ;;  %v12421_v33 = vcombine.low %v4070_v27, %v4078_v28  ;;  %v12436_v63 = vcombine.high %v4085_v39, %v4093_v14  ;;  %v12438_v53 = vcombine.high %v4086_v44, %v4094_v36  ;;  %v4173_v27 = vld [vmem:[%s15112_s5 + $0x570] sm:$0xff]  ;;  %v4166_v28 = vld [vmem:[%s15112_s5 + $0x538] sm:$0xff] }
 0xa29   : > { %11095 = vmatpush1.bf16.msra.mxu0 %v13359_v45  ;;  %11259 = vmatpush1.bf16.msra.mxu1 %v13361_v47  ;;  %v4110_v45 = vld [vmem:[%s15112_s5 + $0x378] sm:$0xff]  ;;  %v12435_v47 = vcombine.low %v4085_v39, %v4093_v14  ;;  %v4181_v14 = vld [vmem:[%s15112_s5 + $0x5b0] sm:$0xff] }
 0xa2a   : > { %11269 = vmatprep.subr.bf16.mxu0 %v12356_v48  ;;  %11433 = vmatprep.subr.bf16.mxu1 %v12358_v49  ;;  %v12437_v48 = vcombine.low %v4086_v44, %v4094_v36  ;;  %v12452_v49 = vcombine.high %v4101_v54, %v4109_v55  ;;  %v12454_v34 = vcombine.high %v4102_v58, %v4110_v45  ;;  %v4189_v44 = vld [vmem:[%s15112_s5 + $0x5f0] sm:$0xff]  ;;  %v4182_v36 = vld [vmem:[%s15112_s5 + $0x5b8] sm:$0xff] }
 0xa2c   : > { %11097 = vmatmul.mubr.bf16.vlgmr.msra.gmra.mrb[8].mxu0 %v15676_v46  ;;  %11261 = vmatmul.mubr.bf16.vlgmr.msra.gmra.mrb[8].mxu1 %v15676_v46 }
 0xa2d   : > { %11270 = vmatpush1.bf16.msra.mxu0 %v12355_v56  ;;  %11434 = vmatpush1.bf16.msra.mxu1 %v12357_v60  ;;  %v4126_v56 = vld [vmem:[%s15112_s5 + $0x3f8] sm:$0xff]  ;;  %v12451_v60 = vcombine.low %v4101_v54, %v4109_v55  ;;  %v4197_v55 = vld [vmem:[%s15112_s5 + $0x630] sm:$0xff] }
 0xa2e   : > { %11271 = vmatprep.subr.bf16.mxu0 %v12372_v62  ;;  %11435 = vmatprep.subr.bf16.mxu1 %v12374_v3  ;;  %v12453_v62 = vcombine.low %v4102_v58, %v4110_v45  ;;  %v12468_v3 = vcombine.high %v4117_v50, %v4125_v51  ;;  %v12470_v20 = vcombine.high %v4118_v52, %v4126_v56  ;;  %v4205_v58 = vld [vmem:[%s15112_s5 + $0x670] sm:$0xff]  ;;  %v4198_v45 = vld [vmem:[%s15112_s5 + $0x638] sm:$0xff] }
 0xa2f   : > { %11301 = vmatprep.mubr.bf16.mxu0 %v15405_v31  ;;  %11465 = vmatprep.mubr.bf16.mxu1 %v15405_v31  ;;  %v12405_v31 = vcombine.low %v4054_v11, %v4062_v37  ;;  %v4157_v11 = vld [vmem:[%s15112_s5 + $0x4f0] sm:$0xff]  ;;  %v4150_v37 = vld [vmem:[%s15112_s5 + $0x4b8] sm:$0xff] }
 0xa31   : > { %11272 = vmatpush1.bf16.msra.mxu0 %v12371_v6  ;;  %11436 = vmatpush1.bf16.msra.mxu1 %v12373_v41  ;;  %v4142_v6 = vld [vmem:[%s15112_s5 + $0x478] sm:$0xff]  ;;  %v12467_v41 = vcombine.low %v4117_v50, %v4125_v51  ;;  %v4213_v51 = vld [vmem:[%s15112_s5 + $0x6b0] sm:$0xff] }
 0xa32   : > { %11273 = vmatprep.subr.bf16.mxu0 %v12388_v7  ;;  %11437 = vmatprep.subr.bf16.mxu1 %v12390_v1  ;;  %v12469_v7 = vcombine.low %v4118_v52, %v4126_v56  ;;  %v12484_v1 = vcombine.high %v4133_v5, %v4141_v0  ;;  %v12486_v8 = vcombine.high %v4134_v19, %v4142_v6  ;;  %v4221_v52 = vld [vmem:[%s15112_s5 + $0x6f0] sm:$0xff]  ;;  %v4214_v56 = vld [vmem:[%s15112_s5 + $0x6b8] sm:$0xff] }
 0xa35   : > { %11274 = vmatpush1.bf16.msra.mxu0 %v12387_v12  ;;  %11438 = vmatpush1.bf16.msra.mxu1 %v12389_v21  ;;  %v4158_v12 = vld [vmem:[%s15112_s5 + $0x4f8] sm:$0xff]  ;;  %v12483_v21 = vcombine.low %v4133_v5, %v4141_v0  ;;  %v4229_v0 = vld [vmem:[%s15112_s5 + $0x730] sm:$0xff] }
 0xa36   : > { %11275 = vmatprep.subr.bf16.mxu0 %v12404_v24  ;;  %11439 = vmatprep.subr.bf16.mxu1 %v12406_v17  ;;  %v12485_v24 = vcombine.low %v4134_v19, %v4142_v6  ;;  %v12500_v17 = vcombine.high %v4149_v57, %v4157_v11  ;;  %v12502_v25 = vcombine.high %v4150_v37, %v4158_v12  ;;  %v4237_v19 = vld [vmem:[%s15112_s5 + $0x770] sm:$0xff]  ;;  %v4230_v6 = vld [vmem:[%s15112_s5 + $0x738] sm:$0xff] }
 0xa39   : > { %11276 = vmatpush1.bf16.msra.mxu0 %v12403_v13  ;;  %11440 = vmatpush1.bf16.msra.mxu1 %v12405_v31  ;;  %v4174_v13 = vld [vmem:[%s15112_s5 + $0x578] sm:$0xff]  ;;  %v12499_v31 = vcombine.low %v4149_v57, %v4157_v11  ;;  %v4245_v11 = vld [vmem:[%s15112_s5 + $0x7b0] sm:$0xff] }
 0xa3a   : > { %11277 = vmatprep.subr.bf16.mxu0 %v12420_v38  ;;  %11441 = vmatprep.subr.bf16.mxu1 %v12422_v59  ;;  %v12501_v38 = vcombine.low %v4150_v37, %v4158_v12  ;;  %v12516_v59 = vcombine.high %v4165_v2, %v4173_v27  ;;  %v12518_v39 = vcombine.high %v4166_v28, %v4174_v13  ;;  %v4253_v37 = vld [vmem:[%s15112_s5 + $0x7f0] sm:$0xff]  ;;  %v4246_v12 = vld [vmem:[%s15112_s5 + $0x7b8] sm:$0xff] }
 0xa3d   : > { %11278 = vmatpush1.bf16.msra.mxu0 %v12419_v42  ;;  %11442 = vmatpush1.bf16.msra.mxu1 %v12421_v33  ;;  %v4190_v42 = vld [vmem:[%s15112_s5 + $0x5f8] sm:$0xff]  ;;  %v12515_v33 = vcombine.low %v4165_v2, %v4173_v27  ;;  %v4261_v27 = vld [vmem:[%s15112_s5 + $0x830] sm:$0xff] }
 0xa3e   : > { %11279 = vmatprep.subr.bf16.mxu0 %v12436_v63  ;;  %11443 = vmatprep.subr.bf16.mxu1 %v12438_v53  ;;  %v12517_v63 = vcombine.low %v4166_v28, %v4174_v13  ;;  %v12532_v53 = vcombine.high %v4181_v14, %v4189_v44  ;;  %v12534_v54 = vcombine.high %v4182_v36, %v4190_v42  ;;  %v4269_v28 = vld [vmem:[%s15112_s5 + $0x870] sm:$0xff]  ;;  %v4262_v13 = vld [vmem:[%s15112_s5 + $0x838] sm:$0xff] }
 0xa41   : > { %11280 = vmatpush1.bf16.msra.mxu0 %v12435_v47  ;;  %11444 = vmatpush1.bf16.msra.mxu1 %v12437_v48  ;;  %v4206_v47 = vld [vmem:[%s15112_s5 + $0x678] sm:$0xff]  ;;  %v12531_v48 = vcombine.low %v4181_v14, %v4189_v44  ;;  %v4277_v44 = vld [vmem:[%s15112_s5 + $0x8b0] sm:$0xff] }
 0xa42   : > { %11281 = vmatprep.subr.bf16.mxu0 %v12452_v49  ;;  %11445 = vmatprep.subr.bf16.mxu1 %v12454_v34  ;;  %v12533_v49 = vcombine.low %v4182_v36, %v4190_v42  ;;  %v12548_v34 = vcombine.high %v4197_v55, %v4205_v58  ;;  %v12550_v50 = vcombine.high %v4198_v45, %v4206_v47  ;;  %v4285_v36 = vld [vmem:[%s15112_s5 + $0x8f0] sm:$0xff]  ;;  %v4278_v42 = vld [vmem:[%s15112_s5 + $0x8b8] sm:$0xff] }
 0xa45   : > { %11282 = vmatpush1.bf16.msra.mxu0 %v12451_v60  ;;  %11446 = vmatpush1.bf16.msra.mxu1 %v12453_v62  ;;  %v4222_v60 = vld [vmem:[%s15112_s5 + $0x6f8] sm:$0xff]  ;;  %v12547_v62 = vcombine.low %v4197_v55, %v4205_v58  ;;  %v4293_v58 = vld [vmem:[%s15112_s5 + $0x930] sm:$0xff] }
 0xa46   : > { %11283 = vmatprep.subr.bf16.mxu0 %v12468_v3  ;;  %11447 = vmatprep.subr.bf16.mxu1 %v12470_v20  ;;  %v12549_v3 = vcombine.low %v4198_v45, %v4206_v47  ;;  %v12564_v20 = vcombine.high %v4213_v51, %v4221_v52  ;;  %v12566_v5 = vcombine.high %v4214_v56, %v4222_v60  ;;  %v4301_v45 = vld [vmem:[%s15112_s5 + $0x970] sm:$0xff]  ;;  %v4294_v47 = vld [vmem:[%s15112_s5 + $0x938] sm:$0xff] }
 0xa49   : > { %11284 = vmatpush1.bf16.msra.mxu0 %v12467_v41  ;;  %11448 = vmatpush1.bf16.msra.mxu1 %v12469_v7  ;;  %v4238_v41 = vld [vmem:[%s15112_s5 + $0x778] sm:$0xff]  ;;  %v12563_v7 = vcombine.low %v4213_v51, %v4221_v52  ;;  %v4309_v52 = vld [vmem:[%s15112_s5 + $0x9b0] sm:$0xff] }
 0xa4a   : > { %11285 = vmatprep.subr.bf16.mxu0 %v12484_v1  ;;  %11449 = vmatprep.subr.bf16.mxu1 %v12486_v8  ;;  %v12565_v1 = vcombine.low %v4214_v56, %v4222_v60  ;;  %v12580_v8 = vcombine.high %v4229_v0, %v4237_v19  ;;  %v12582_v57 = vcombine.high %v4230_v6, %v4238_v41  ;;  %v4317_v56 = vld [vmem:[%s15112_s5 + $0x9f0] sm:$0xff]  ;;  %v4310_v60 = vld [vmem:[%s15112_s5 + $0x9b8] sm:$0xff] }
 0xa4d   : > { %11286 = vmatpush1.bf16.msra.mxu0 %v12483_v21  ;;  %11450 = vmatpush1.bf16.msra.mxu1 %v12485_v24  ;;  %v4254_v21 = vld [vmem:[%s15112_s5 + $0x7f8] sm:$0xff]  ;;  %v12579_v24 = vcombine.low %v4229_v0, %v4237_v19  ;;  %v4325_v0 = vld [vmem:[%s15112_s5 + $0xa30] sm:$0xff] }
 0xa4e   : > { %11287 = vmatprep.subr.bf16.mxu0 %v12500_v17  ;;  %11451 = vmatprep.subr.bf16.mxu1 %v12502_v25  ;;  %v12581_v17 = vcombine.low %v4230_v6, %v4238_v41  ;;  %v12596_v25 = vcombine.high %v4245_v11, %v4253_v37  ;;  %v12598_v2 = vcombine.high %v4246_v12, %v4254_v21  ;;  %v4333_v19 = vld [vmem:[%s15112_s5 + $0xa70] sm:$0xff]  ;;  %v4326_v6 = vld [vmem:[%s15112_s5 + $0xa38] sm:$0xff] }
 0xa4f   : > { %v4334_v41 = vld [vmem:[%s15112_s5 + $0xa78] sm:$0xff] }
 0xa51   : > { %11288 = vmatpush1.bf16.msra.mxu0 %v12499_v31  ;;  %11452 = vmatpush1.bf16.msra.mxu1 %v12501_v38  ;;  %v4270_v31 = vld [vmem:[%s15112_s5 + $0x878] sm:$0xff]  ;;  %v12595_v38 = vcombine.low %v4245_v11, %v4253_v37  ;;  %v4349_v11 = vld [vmem:[%s15112_s5 + $0xaf0] sm:$0xff] }
 0xa52   : > { %11289 = vmatprep.subr.bf16.mxu0 %v12516_v59  ;;  %11453 = vmatprep.subr.bf16.mxu1 %v12518_v39  ;;  %v12597_v59 = vcombine.low %v4246_v12, %v4254_v21  ;;  %v12612_v39 = vcombine.high %v4261_v27, %v4269_v28  ;;  %v12614_v14 = vcombine.high %v4262_v13, %v4270_v31  ;;  %v4342_v37 = vld [vmem:[%s15112_s5 + $0xab8] sm:$0xff] }
 0xa53   : > { %v4350_v12 = vld [vmem:[%s15112_s5 + $0xaf8] sm:$0xff]  ;;  %v12675_v21 = vcombine.low %v4325_v0, %v4333_v19 }
 0xa55   : > { %11290 = vmatpush1.bf16.msra.mxu0 %v12515_v33  ;;  %11454 = vmatpush1.bf16.msra.mxu1 %v12517_v63  ;;  %v4286_v33 = vld [vmem:[%s15112_s5 + $0x8f8] sm:$0xff]  ;;  %v12611_v63 = vcombine.low %v4261_v27, %v4269_v28  ;;  %v4365_v27 = vld [vmem:[%s15112_s5 + $0xb70] sm:$0xff] }
 0xa56   : > { %11291 = vmatprep.subr.bf16.mxu0 %v12532_v53  ;;  %11455 = vmatprep.subr.bf16.mxu1 %v12534_v54  ;;  %v12613_v53 = vcombine.low %v4262_v13, %v4270_v31  ;;  %v12628_v54 = vcombine.high %v4277_v44, %v4285_v36  ;;  %v12630_v55 = vcombine.high %v4278_v42, %v4286_v33  ;;  %v4358_v28 = vld [vmem:[%s15112_s5 + $0xb38] sm:$0xff] }
 0xa57   : > { %v4366_v13 = vld [vmem:[%s15112_s5 + $0xb78] sm:$0xff] }
 0xa59   : > { %11292 = vmatpush1.bf16.msra.mxu0 %v12531_v48  ;;  %11456 = vmatpush1.bf16.msra.mxu1 %v12533_v49  ;;  %v4302_v48 = vld [vmem:[%s15112_s5 + $0x978] sm:$0xff]  ;;  %v12627_v49 = vcombine.low %v4277_v44, %v4285_v36  ;;  %v4381_v44 = vld [vmem:[%s15112_s5 + $0xbf0] sm:$0xff] }
 0xa5a   : > { %11293 = vmatprep.subr.bf16.mxu0 %v12548_v34  ;;  %11457 = vmatprep.subr.bf16.mxu1 %v12550_v50  ;;  %v12629_v34 = vcombine.low %v4278_v42, %v4286_v33  ;;  %v12644_v50 = vcombine.high %v4293_v58, %v4301_v45  ;;  %v12646_v51 = vcombine.high %v4294_v47, %v4302_v48  ;;  %v4374_v36 = vld [vmem:[%s15112_s5 + $0xbb8] sm:$0xff] }
 0xa5b   : > { %v4382_v42 = vld [vmem:[%s15112_s5 + $0xbf8] sm:$0xff] }
 0xa5d   : > { %11294 = vmatpush1.bf16.msra.mxu0 %v12547_v62  ;;  %11458 = vmatpush1.bf16.msra.mxu1 %v12549_v3  ;;  %v4318_v62 = vld [vmem:[%s15112_s5 + $0x9f8] sm:$0xff]  ;;  %v12645_v3 = vcombine.low %v4294_v47, %v4302_v48 }
 0xa5e   : > { %11295 = vmatprep.subr.bf16.mxu0 %v12564_v20  ;;  %11459 = vmatprep.subr.bf16.mxu1 %v12566_v5  ;;  %v12660_v20 = vcombine.high %v4309_v52, %v4317_v56  ;;  %v12662_v5 = vcombine.high %v4310_v60, %v4318_v62  ;;  %v4398_v47 = vld [vmem:[%s15112_s5 + $0xc78] sm:$0xff] }
 0xa61   : > { %11296 = vmatpush1.bf16.msra.mxu0 %v12563_v7  ;;  %11460 = vmatpush1.bf16.msra.mxu1 %v12565_v1  ;;  %v12659_v7 = vcombine.low %v4309_v52, %v4317_v56  ;;  %v12676_v1 = vcombine.high %v4325_v0, %v4333_v19  ;;  %v4413_v52 = vld [vmem:[%s15112_s5 + $0xcf0] sm:$0xff]  ;;  %v4406_v56 = vld [vmem:[%s15112_s5 + $0xcb8] sm:$0xff] }
 0xa62   : > { %11297 = vmatprep.subr.bf16.mxu0 %v12580_v8  ;;  %11461 = vmatprep.subr.bf16.mxu1 %v12582_v57  ;;  %v12678_v8 = vcombine.high %v4326_v6, %v4334_v41  ;;  %v4341_v57 = vld [vmem:[%s15112_s5 + $0xab0] sm:$0xff]  ;;  %v4422_v19 = vld [vmem:[%s15112_s5 + $0xd38] sm:$0xff] }
 0xa63   : > { %v12691_v31 = vcombine.low %v4341_v57, %v4349_v11  ;;  %v4429_v0 = vld [vmem:[%s15112_s5 + $0xd70] sm:$0xff] }
 0xa65   : > { %11298 = vmatpush1.bf16.msra.mxu0 %v12579_v24  ;;  %11462 = vmatpush1.bf16.msra.mxu1 %v12581_v17  ;;  %v12677_v24 = vcombine.low %v4326_v6, %v4334_v41  ;;  %v12692_v17 = vcombine.high %v4341_v57, %v4349_v11  ;;  %v4430_v6 = vld [vmem:[%s15112_s5 + $0xd78] sm:$0xff]  ;;  %v4445_v57 = vld [vmem:[%s15112_s5 + $0xdf0] sm:$0xff] }
 0xa66   : > { %11299 = vmatprep.subr.bf16.mxu0 %v12596_v25  ;;  %11463 = vmatprep.subr.bf16.mxu1 %v12598_v2  ;;  %v12694_v25 = vcombine.high %v4342_v37, %v4350_v12  ;;  %v4357_v2 = vld [vmem:[%s15112_s5 + $0xb30] sm:$0xff]  ;;  %v4438_v11 = vld [vmem:[%s15112_s5 + $0xdb8] sm:$0xff] }
 0xa67   : > { %v12707_v33 = vcombine.low %v4357_v2, %v4365_v27 }
 0xa69   : > { %11300 = vmatpush1.bf16.msra.mxu0 %v12595_v38  ;;  %11464 = vmatpush1.bf16.msra.mxu1 %v12597_v59  ;;  %v12693_v38 = vcombine.low %v4342_v37, %v4350_v12  ;;  %v12708_v59 = vcombine.high %v4357_v2, %v4365_v27  ;;  %v4446_v37 = vld [vmem:[%s15112_s5 + $0xdf8] sm:$0xff]  ;;  %v4461_v2 = vld [vmem:[%s15112_s5 + $0xe70] sm:$0xff] }
 0xa6a   : > { %11310 = vmatprep.subr.bf16.mxu0 %v12612_v39  ;;  %11474 = vmatprep.subr.bf16.mxu1 %v12614_v14  ;;  %v12710_v39 = vcombine.high %v4358_v28, %v4366_v13  ;;  %v4373_v14 = vld [vmem:[%s15112_s5 + $0xbb0] sm:$0xff]  ;;  %v4454_v27 = vld [vmem:[%s15112_s5 + $0xe38] sm:$0xff] }
 0xa6b   : > { %v12723_v48 = vcombine.low %v4373_v14, %v4381_v44 }
 0xa6c   : > { %11302 = vmatmul.mubr.bf16.vlgmr.msra.gmra.mrb[12].mxu0 %v15450_v4  ;;  %11466 = vmatmul.mubr.bf16.vlgmr.msra.gmra.mrb[12].mxu1 %v15450_v4  ;;  %v12643_v4 = vcombine.low %v4293_v58, %v4301_v45  ;;  %v4397_v58 = vld [vmem:[%s15112_s5 + $0xc70] sm:$0xff]  ;;  %v4390_v45 = vld [vmem:[%s15112_s5 + $0xc38] sm:$0xff] }
 0xa6d   : > { %11311 = vmatpush1.bf16.msra.mxu0 %v12611_v63  ;;  %11475 = vmatpush1.bf16.msra.mxu1 %v12613_v53  ;;  %v12709_v63 = vcombine.low %v4358_v28, %v4366_v13  ;;  %v12724_v53 = vcombine.high %v4373_v14, %v4381_v44  ;;  %v4462_v28 = vld [vmem:[%s15112_s5 + $0xe78] sm:$0xff]  ;;  %v4477_v14 = vld [vmem:[%s15112_s5 + $0xef0] sm:$0xff] }
 0xa6e   : > { %11312 = vmatprep.subr.bf16.mxu0 %v12628_v54  ;;  %11476 = vmatprep.subr.bf16.mxu1 %v12630_v55  ;;  %v12726_v54 = vcombine.high %v4374_v36, %v4382_v42  ;;  %v4389_v55 = vld [vmem:[%s15112_s5 + $0xc30] sm:$0xff]  ;;  %v4470_v44 = vld [vmem:[%s15112_s5 + $0xeb8] sm:$0xff] }
 0xa6f   : > { %11342 = vmatprep.mubr.bf16.mxu0 %v15458_v15  ;;  %11506 = vmatprep.mubr.bf16.mxu1 %v15458_v15  ;;  %v12661_v15 = vcombine.low %v4310_v60, %v4318_v62  ;;  %v4414_v60 = vld [vmem:[%s15112_s5 + $0xcf8] sm:$0xff]  ;;  %v12739_v62 = vcombine.low %v4389_v55, %v4397_v58 }
 0xa71   : > { %11313 = vmatpush1.bf16.msra.mxu0 %v12627_v49  ;;  %11477 = vmatpush1.bf16.msra.mxu1 %v12629_v34  ;;  %v12725_v49 = vcombine.low %v4374_v36, %v4382_v42  ;;  %v12740_v34 = vcombine.high %v4389_v55, %v4397_v58  ;;  %v4478_v36 = vld [vmem:[%s15112_s5 + $0xef8] sm:$0xff]  ;;  %v4493_v55 = vld [vmem:[%s15112_s5 + $0xf70] sm:$0xff] }
 0xa72   : > { %11314 = vmatprep.subr.bf16.mxu0 %v12644_v50  ;;  %11478 = vmatprep.subr.bf16.mxu1 %v12646_v51  ;;  %v12742_v50 = vcombine.high %v4390_v45, %v4398_v47  ;;  %v4405_v51 = vld [vmem:[%s15112_s5 + $0xcb0] sm:$0xff]  ;;  %v4486_v58 = vld [vmem:[%s15112_s5 + $0xf38] sm:$0xff] }
 0xa73   : > { %v12755_v41 = vcombine.low %v4405_v51, %v4413_v52 }
 0xa75   : > { %11315 = vmatpush1.bf16.msra.mxu0 %v12643_v4  ;;  %11479 = vmatpush1.bf16.msra.mxu1 %v12645_v3  ;;  %v12741_v4 = vcombine.low %v4390_v45, %v4398_v47  ;;  %v12756_v3 = vcombine.high %v4405_v51, %v4413_v52  ;;  %v4494_v45 = vld [vmem:[%s15112_s5 + $0xf78] sm:$0xff]  ;;  %v4509_v51 = vld [vmem:[%s15112_s5 + $0xff0] sm:$0xff] }
 0xa76   : > { %11316 = vmatprep.subr.bf16.mxu0 %v12660_v20  ;;  %11480 = vmatprep.subr.bf16.mxu1 %v12662_v5  ;;  %v12758_v20 = vcombine.high %v4406_v56, %v4414_v60  ;;  %v4421_v5 = vld [vmem:[%s15112_s5 + $0xd30] sm:$0xff]  ;;  %v4502_v52 = vld [vmem:[%s15112_s5 + $0xfb8] sm:$0xff] }
 0xa77   : > { %v12771_v12 = vcombine.low %v4421_v5, %v4429_v0 }
 0xa79   : > { %11317 = vmatpush1.bf16.msra.mxu0 %v12659_v7  ;;  %11481 = vmatpush1.bf16.msra.mxu1 %v12661_v15  ;;  %v12757_v7 = vcombine.low %v4406_v56, %v4414_v60  ;;  %v12772_v15 = vcombine.high %v4421_v5, %v4429_v0  ;;  %v4510_v56 = vld [vmem:[%s15112_s5 + $0xff8] sm:$0xff]  ;;  %v4525_v5 = vld [vmem:[%s15112_s5 + $0x1070] sm:$0xff] }
 0xa7a   : > { %11318 = vmatprep.subr.bf16.mxu0 %v12676_v1  ;;  %11482 = vmatprep.subr.bf16.mxu1 %v12678_v8  ;;  %v12774_v1 = vcombine.high %v4422_v19, %v4430_v6  ;;  %v4437_v8 = vld [vmem:[%s15112_s5 + $0xdb0] sm:$0xff]  ;;  %v4518_v0 = vld [vmem:[%s15112_s5 + $0x1038] sm:$0xff] }
 0xa7b   : > { %v12787_v13 = vcombine.low %v4437_v8, %v4445_v57 }
 0xa7d   : > { %11319 = vmatpush1.bf16.msra.mxu0 %v12675_v21  ;;  %11483 = vmatpush1.bf16.msra.mxu1 %v12677_v24  ;;  %v12773_v21 = vcombine.low %v4422_v19, %v4430_v6  ;;  %v12788_v24 = vcombine.high %v4437_v8, %v4445_v57  ;;  %v4526_v19 = vld [vmem:[%s15112_s5 + $0x1078] sm:$0xff]  ;;  %v4541_v8 = vld [vmem:[%s15112_s5 + $0x10f0] sm:$0xff] }
 0xa7e   : > { %11320 = vmatprep.subr.bf16.mxu0 %v12692_v17  ;;  %11484 = vmatprep.subr.bf16.mxu1 %v12694_v25  ;;  %v12790_v17 = vcombine.high %v4438_v11, %v4446_v37  ;;  %v4453_v25 = vld [vmem:[%s15112_s5 + $0xe30] sm:$0xff]  ;;  %v4534_v57 = vld [vmem:[%s15112_s5 + $0x10b8] sm:$0xff] }
 0xa7f   : > { %v12803_v42 = vcombine.low %v4453_v25, %v4461_v2 }
 0xa81   : > { %11321 = vmatpush1.bf16.msra.mxu0 %v12691_v31  ;;  %11485 = vmatpush1.bf16.msra.mxu1 %v12693_v38  ;;  %v12789_v31 = vcombine.low %v4438_v11, %v4446_v37  ;;  %v12804_v38 = vcombine.high %v4453_v25, %v4461_v2  ;;  %v4542_v11 = vld [vmem:[%s15112_s5 + $0x10f8] sm:$0xff]  ;;  %v4557_v25 = vld [vmem:[%s15112_s5 + $0x1170] sm:$0xff] }
 0xa82   : > { %11322 = vmatprep.subr.bf16.mxu0 %v12708_v59  ;;  %11486 = vmatprep.subr.bf16.mxu1 %v12710_v39  ;;  %v12806_v59 = vcombine.high %v4454_v27, %v4462_v28  ;;  %v4469_v39 = vld [vmem:[%s15112_s5 + $0xeb0] sm:$0xff]  ;;  %v4550_v2 = vld [vmem:[%s15112_s5 + $0x1138] sm:$0xff] }
 0xa83   : > { %v12819_v47 = vcombine.low %v4469_v39, %v4477_v14 }
 0xa85   : > { %11323 = vmatpush1.bf16.msra.mxu0 %v12707_v33  ;;  %11487 = vmatpush1.bf16.msra.mxu1 %v12709_v63  ;;  %v12805_v33 = vcombine.low %v4454_v27, %v4462_v28  ;;  %v12820_v63 = vcombine.high %v4469_v39, %v4477_v14  ;;  %v4558_v27 = vld [vmem:[%s15112_s5 + $0x1178] sm:$0xff]  ;;  %v4573_v39 = vld [vmem:[%s15112_s5 + $0x11f0] sm:$0xff] }
 0xa86   : > { %11324 = vmatprep.subr.bf16.mxu0 %v12724_v53  ;;  %11488 = vmatprep.subr.bf16.mxu1 %v12726_v54  ;;  %v12822_v53 = vcombine.high %v4470_v44, %v4478_v36  ;;  %v4485_v54 = vld [vmem:[%s15112_s5 + $0xf30] sm:$0xff]  ;;  %v4566_v14 = vld [vmem:[%s15112_s5 + $0x11b8] sm:$0xff] }
 0xa87   : > { %v12835_v60 = vcombine.low %v4485_v54, %v4493_v55 }
 0xa89   : > { %11325 = vmatpush1.bf16.msra.mxu0 %v12723_v48  ;;  %11489 = vmatpush1.bf16.msra.mxu1 %v12725_v49  ;;  %v12821_v48 = vcombine.low %v4470_v44, %v4478_v36  ;;  %v12836_v49 = vcombine.high %v4485_v54, %v4493_v55  ;;  %v4574_v44 = vld [vmem:[%s15112_s5 + $0x11f8] sm:$0xff]  ;;  %v12901_v36 = vcombine.low %v4550_v2, %v4558_v27 }
 0xa8a   : > { %11326 = vmatprep.subr.bf16.mxu0 %v12740_v34  ;;  %11490 = vmatprep.subr.bf16.mxu1 %v12742_v50  ;;  %v12838_v34 = vcombine.high %v4486_v58, %v4494_v45  ;;  %v4501_v50 = vld [vmem:[%s15112_s5 + $0xfb0] sm:$0xff]  ;;  %v4582_v54 = vld [vmem:[%s15112_s5 + $0x1238] sm:$0xff] }
 0xa8b   : > { %v12851_v6 = vcombine.low %v4501_v50, %v4509_v51  ;;  %v4590_v55 = vld [vmem:[%s15112_s5 + $0x1278] sm:$0xff] }
 0xa8d   : > { %11327 = vmatpush1.bf16.msra.mxu0 %v12739_v62  ;;  %11491 = vmatpush1.bf16.msra.mxu1 %v12741_v4  ;;  %v12837_v62 = vcombine.low %v4486_v58, %v4494_v45  ;;  %v12852_v4 = vcombine.high %v4501_v50, %v4509_v51  ;;  %v4606_v50 = vld [vmem:[%s15112_s5 + $0x12f8] sm:$0xff] }
 0xa8e   : > { %11328 = vmatprep.subr.bf16.mxu0 %v12756_v3  ;;  %11492 = vmatprep.subr.bf16.mxu1 %v12758_v20  ;;  %v12854_v3 = vcombine.high %v4502_v52, %v4510_v56  ;;  %v4517_v20 = vld [vmem:[%s15112_s5 + $0x1030] sm:$0xff] }
 0xa8f   : > { %v12867_v37 = vcombine.low %v4517_v20, %v4525_v5 }
 0xa91   : > { %11329 = vmatpush1.bf16.msra.mxu0 %v12755_v41  ;;  %11493 = vmatpush1.bf16.msra.mxu1 %v12757_v7  ;;  %v12853_v41 = vcombine.low %v4502_v52, %v4510_v56  ;;  %v12868_v7 = vcombine.high %v4517_v20, %v4525_v5  ;;  %v12933_v52 = vcombine.low %v4582_v54, %v4590_v55  ;;  %v4622_v20 = vld [vmem:[%s15112_s5 + $0x1378] sm:$0xff] }
 0xa92   : > { %11330 = vmatprep.subr.bf16.mxu0 %v12772_v15  ;;  %11494 = vmatprep.subr.bf16.mxu1 %v12774_v1  ;;  %v12870_v15 = vcombine.high %v4518_v0, %v4526_v19  ;;  %v4533_v1 = vld [vmem:[%s15112_s5 + $0x10b0] sm:$0xff] }
 0xa93   : > { %v12883_v28 = vcombine.low %v4533_v1, %v4541_v8 }
 0xa95   : > { %11331 = vmatpush1.bf16.msra.mxu0 %v12771_v12  ;;  %11495 = vmatpush1.bf16.msra.mxu1 %v12773_v21  ;;  %v12869_v12 = vcombine.low %v4518_v0, %v4526_v19  ;;  %v12884_v21 = vcombine.high %v4533_v1, %v4541_v8  ;;  %v4638_v1 = vld [vmem:[%s15112_s5 + $0x13f8] sm:$0xff] }
 0xa96   : > { %11332 = vmatprep.subr.bf16.mxu0 %v12788_v24  ;;  %11496 = vmatprep.subr.bf16.mxu1 %v12790_v17  ;;  %v12886_v24 = vcombine.high %v4534_v57, %v4542_v11  ;;  %v4549_v17 = vld [vmem:[%s15112_s5 + $0x1130] sm:$0xff] }
 0xa99   : > { %11333 = vmatpush1.bf16.msra.mxu0 %v12787_v13  ;;  %11497 = vmatpush1.bf16.msra.mxu1 %v12789_v31  ;;  %v12885_v13 = vcombine.low %v4534_v57, %v4542_v11  ;;  %v12900_v31 = vcombine.high %v4549_v17, %v4557_v25 }
 0xa9a   : > { %11334 = vmatprep.subr.bf16.mxu0 %v12804_v38  ;;  %11498 = vmatprep.subr.bf16.mxu1 %v12806_v59  ;;  %v12902_v38 = vcombine.high %v4550_v2, %v4558_v27  ;;  %v4565_v59 = vld [vmem:[%s15112_s5 + $0x11b0] sm:$0xff] }
 0xa9b   : > { %v12915_v58 = vcombine.low %v4565_v59, %v4573_v39 }
 0xa9d   : > { %11335 = vmatpush1.bf16.msra.mxu0 %v12803_v42  ;;  %11499 = vmatpush1.bf16.msra.mxu1 %v12805_v33  ;;  %v12916_v42 = vcombine.high %v4565_v59, %v4573_v39  ;;  %v12918_v33 = vcombine.high %v4566_v14, %v4574_v44  ;;  %v4670_v59 = vld [vmem:[%s15112_s5 + $0x14f8] sm:$0xff] }
 0xa9e   : > { %11336 = vmatprep.subr.bf16.mxu0 %v12820_v63  ;;  %11500 = vmatprep.subr.bf16.mxu1 %v12822_v53  ;;  %v4581_v63 = vld [vmem:[%s15112_s5 + $0x1230] sm:$0xff] }
 0xa9f   : > { %v4589_v53 = vld [vmem:[%s15112_s5 + $0x1270] sm:$0xff] }
 0xaa0   : > { %v12932_v45 = vcombine.high %v4581_v63, %v4589_v53  ;;  %v12931_v51 = vcombine.low %v4581_v63, %v4589_v53  ;;  %v4686_v63 = vld [vmem:[%s15112_s5 + $0x1578] sm:$0xff] }
 0xaa1   : > { %11337 = vmatpush1.bf16.msra.mxu0 %v12819_v47  ;;  %11501 = vmatpush1.bf16.msra.mxu1 %v12821_v48  ;;  %v12934_v47 = vcombine.high %v4582_v54, %v4590_v55  ;;  %v4597_v48 = vld [vmem:[%s15112_s5 + $0x12b0] sm:$0xff] }
 0xaa2   : > { %11338 = vmatprep.subr.bf16.mxu0 %v12836_v49  ;;  %11502 = vmatprep.subr.bf16.mxu1 %v12838_v34  ;;  %v4605_v49 = vld [vmem:[%s15112_s5 + $0x12f0] sm:$0xff]  ;;  %v4598_v34 = vld [vmem:[%s15112_s5 + $0x12b8] sm:$0xff] }
 0xaa3   : > { %v12948_v56 = vcombine.high %v4597_v48, %v4605_v49  ;;  %v12947_v5 = vcombine.low %v4597_v48, %v4605_v49  ;;  %v12949_v0 = vcombine.low %v4598_v34, %v4606_v50  ;;  %v4702_v48 = vld [vmem:[%s15112_s5 + $0x15f8] sm:$0xff] }
 0xaa5   : > { %11339 = vmatpush1.bf16.msra.mxu0 %v12835_v60  ;;  %11503 = vmatpush1.bf16.msra.mxu1 %v12837_v62  ;;  %v12950_v60 = vcombine.high %v4598_v34, %v4606_v50  ;;  %v4613_v62 = vld [vmem:[%s15112_s5 + $0x1330] sm:$0xff] }
 0xaa6   : > { %11340 = vmatprep.subr.bf16.mxu0 %v12852_v4  ;;  %11504 = vmatprep.subr.bf16.mxu1 %v12854_v3  ;;  %v4621_v4 = vld [vmem:[%s15112_s5 + $0x1370] sm:$0xff]  ;;  %v4614_v3 = vld [vmem:[%s15112_s5 + $0x1338] sm:$0xff] }
 0xaa7   : > { %v12964_v19 = vcombine.high %v4613_v62, %v4621_v4  ;;  %v12963_v8 = vcombine.low %v4613_v62, %v4621_v4  ;;  %v12965_v57 = vcombine.low %v4614_v3, %v4622_v20  ;;  %v4718_v62 = vld [vmem:[%s15112_s5 + $0x1678] sm:$0xff] }
 0xaa9   : > { %11341 = vmatpush1.bf16.msra.mxu0 %v12851_v6  ;;  %11505 = vmatpush1.bf16.msra.mxu1 %v12853_v41  ;;  %v12966_v6 = vcombine.high %v4614_v3, %v4622_v20  ;;  %v4629_v41 = vld [vmem:[%s15112_s5 + $0x13b0] sm:$0xff] }
 0xaaa   : > { %11351 = vmatprep.subr.bf16.mxu0 %v12868_v7  ;;  %11515 = vmatprep.subr.bf16.mxu1 %v12870_v15  ;;  %v4637_v7 = vld [vmem:[%s15112_s5 + $0x13f0] sm:$0xff]  ;;  %v4630_v15 = vld [vmem:[%s15112_s5 + $0x13b8] sm:$0xff] }
 0xaab   : > { %v12980_v11 = vcombine.high %v4629_v41, %v4637_v7  ;;  %v12981_v2 = vcombine.low %v4630_v15, %v4638_v1 }
 0xaac   : > { %11343 = vmatmul.mubr.bf16.vlgmr.msra.gmra.mrb[12].mxu0 %v15532_v16  ;;  %11507 = vmatmul.mubr.bf16.vlgmr.msra.gmra.mrb[12].mxu1 %v15532_v16  ;;  %v12899_v16 = vcombine.low %v4549_v17, %v4557_v25  ;;  %v4654_v17 = vld [vmem:[%s15112_s5 + $0x1478] sm:$0xff]  ;;  %v12979_v25 = vcombine.low %v4629_v41, %v4637_v7 }
 0xaad   : > { %11352 = vmatpush1.bf16.msra.mxu0 %v12867_v37  ;;  %11516 = vmatpush1.bf16.msra.mxu1 %v12869_v12  ;;  %v12982_v37 = vcombine.high %v4630_v15, %v4638_v1  ;;  %v4645_v12 = vld [vmem:[%s15112_s5 + $0x1430] sm:$0xff]  ;;  %v4734_v41 = vld [vmem:[%s15112_s5 + $0x16f8] sm:$0xff] }
 0xaae   : > { %11353 = vmatprep.subr.bf16.mxu0 %v12884_v21  ;;  %11517 = vmatprep.subr.bf16.mxu1 %v12886_v24  ;;  %v4653_v21 = vld [vmem:[%s15112_s5 + $0x1470] sm:$0xff]  ;;  %v4646_v24 = vld [vmem:[%s15112_s5 + $0x1438] sm:$0xff] }
 0xaaf   : > { %11383 = vmatprep.mubr.bf16.mxu0 %v15461_v61  ;;  %11547 = vmatprep.mubr.bf16.mxu1 %v15461_v61  ;;  %v12917_v61 = vcombine.low %v4566_v14, %v4574_v44  ;;  %v12996_v27 = vcombine.high %v4645_v12, %v4653_v21  ;;  %v12995_v39 = vcombine.low %v4645_v12, %v4653_v21  ;;  %v4750_v12 = vld [vmem:[%s15112_s5 + $0x1778] sm:$0xff] }
 0xab0   : > { %v12997_v14 = vcombine.low %v4646_v24, %v4654_v17 }
 0xab1   : > { %11354 = vmatpush1.bf16.msra.mxu0 %v12883_v28  ;;  %11518 = vmatpush1.bf16.msra.mxu1 %v12885_v13  ;;  %v12998_v28 = vcombine.high %v4646_v24, %v4654_v17  ;;  %v4661_v13 = vld [vmem:[%s15112_s5 + $0x14b0] sm:$0xff] }
 0xab2   : > { %11355 = vmatprep.subr.bf16.mxu0 %v12900_v31  ;;  %11519 = vmatprep.subr.bf16.mxu1 %v12902_v38  ;;  %v4669_v31 = vld [vmem:[%s15112_s5 + $0x14f0] sm:$0xff]  ;;  %v4662_v38 = vld [vmem:[%s15112_s5 + $0x14b8] sm:$0xff] }
 0xab3   : > { %v13012_v44 = vcombine.high %v4661_v13, %v4669_v31  ;;  %v13011_v53 = vcombine.low %v4661_v13, %v4669_v31  ;;  %v13013_v54 = vcombine.low %v4662_v38, %v4670_v59  ;;  %v4766_v13 = vld [vmem:[%s15112_s5 + $0x17f8] sm:$0xff] }
 0xab5   : > { %11356 = vmatpush1.bf16.msra.mxu0 %v12899_v16  ;;  %11520 = vmatpush1.bf16.msra.mxu1 %v12901_v36  ;;  %v13014_v16 = vcombine.high %v4662_v38, %v4670_v59  ;;  %v4677_v36 = vld [vmem:[%s15112_s5 + $0x1530] sm:$0xff] }
 0xab6   : > { %11357 = vmatprep.subr.bf16.mxu0 %v12916_v42  ;;  %11521 = vmatprep.subr.bf16.mxu1 %v12918_v33  ;;  %v4685_v42 = vld [vmem:[%s15112_s5 + $0x1570] sm:$0xff]  ;;  %v4678_v33 = vld [vmem:[%s15112_s5 + $0x1538] sm:$0xff] }
 0xab7   : > { %v13028_v55 = vcombine.high %v4677_v36, %v4685_v42  ;;  %v13027_v49 = vcombine.low %v4677_v36, %v4685_v42  ;;  %v13029_v34 = vcombine.low %v4678_v33, %v4686_v63  ;;  %v4782_v36 = vld [vmem:[%s15112_s5 + $0x1878] sm:$0xff] }
 0xab9   : > { %11358 = vmatpush1.bf16.msra.mxu0 %v12915_v58  ;;  %11522 = vmatpush1.bf16.msra.mxu1 %v12917_v61  ;;  %v13030_v58 = vcombine.high %v4678_v33, %v4686_v63  ;;  %v4693_v61 = vld [vmem:[%s15112_s5 + $0x15b0] sm:$0xff] }
 0xaba   : > { %11359 = vmatprep.subr.bf16.mxu0 %v12932_v45  ;;  %11523 = vmatprep.subr.bf16.mxu1 %v12934_v47  ;;  %v4701_v45 = vld [vmem:[%s15112_s5 + $0x15f0] sm:$0xff]  ;;  %v4694_v47 = vld [vmem:[%s15112_s5 + $0x15b8] sm:$0xff] }
 0xabb   : > { %v13044_v50 = vcombine.high %v4693_v61, %v4701_v45  ;;  %v13043_v4 = vcombine.low %v4693_v61, %v4701_v45  ;;  %v13045_v3 = vcombine.low %v4694_v47, %v4702_v48  ;;  %v4798_v61 = vld [vmem:[%s15112_s5 + $0x18f8] sm:$0xff] }
 0xabd   : > { %11360 = vmatpush1.bf16.msra.mxu0 %v12931_v51  ;;  %11524 = vmatpush1.bf16.msra.mxu1 %v12933_v52  ;;  %v13046_v51 = vcombine.high %v4694_v47, %v4702_v48  ;;  %v4709_v52 = vld [vmem:[%s15112_s5 + $0x1630] sm:$0xff] }
 0xabe   : > { %11361 = vmatprep.subr.bf16.mxu0 %v12948_v56  ;;  %11525 = vmatprep.subr.bf16.mxu1 %v12950_v60  ;;  %v4717_v56 = vld [vmem:[%s15112_s5 + $0x1670] sm:$0xff]  ;;  %v4710_v60 = vld [vmem:[%s15112_s5 + $0x1638] sm:$0xff] }
 0xabf   : > { %v13060_v20 = vcombine.high %v4709_v52, %v4717_v56  ;;  %v13059_v7 = vcombine.low %v4709_v52, %v4717_v56  ;;  %v13061_v15 = vcombine.low %v4710_v60, %v4718_v62  ;;  %v4814_v52 = vld [vmem:[%s15112_s5 + $0x1978] sm:$0xff] }
 0xac1   : > { %11362 = vmatpush1.bf16.msra.mxu0 %v12947_v5  ;;  %11526 = vmatpush1.bf16.msra.mxu1 %v12949_v0  ;;  %v13062_v5 = vcombine.high %v4710_v60, %v4718_v62  ;;  %v4725_v0 = vld [vmem:[%s15112_s5 + $0x16b0] sm:$0xff] }
 0xac2   : > { %11363 = vmatprep.subr.bf16.mxu0 %v12964_v19  ;;  %11527 = vmatprep.subr.bf16.mxu1 %v12966_v6  ;;  %v4733_v19 = vld [vmem:[%s15112_s5 + $0x16f0] sm:$0xff]  ;;  %v4726_v6 = vld [vmem:[%s15112_s5 + $0x16b8] sm:$0xff] }
 0xac3   : > { %v13076_v1 = vcombine.high %v4725_v0, %v4733_v19  ;;  %v13075_v21 = vcombine.low %v4725_v0, %v4733_v19  ;;  %v13077_v24 = vcombine.low %v4726_v6, %v4734_v41  ;;  %v4830_v0 = vld [vmem:[%s15112_s5 + $0x19f8] sm:$0xff] }
 0xac5   : > { %11364 = vmatpush1.bf16.msra.mxu0 %v12963_v8  ;;  %11528 = vmatpush1.bf16.msra.mxu1 %v12965_v57  ;;  %v13078_v8 = vcombine.high %v4726_v6, %v4734_v41  ;;  %v4741_v57 = vld [vmem:[%s15112_s5 + $0x1730] sm:$0xff] }
 0xac6   : > { %11365 = vmatprep.subr.bf16.mxu0 %v12980_v11  ;;  %11529 = vmatprep.subr.bf16.mxu1 %v12982_v37  ;;  %v4749_v11 = vld [vmem:[%s15112_s5 + $0x1770] sm:$0xff]  ;;  %v4742_v37 = vld [vmem:[%s15112_s5 + $0x1738] sm:$0xff] }
 0xac7   : > { %v13092_v17 = vcombine.high %v4741_v57, %v4749_v11  ;;  %v13091_v31 = vcombine.low %v4741_v57, %v4749_v11  ;;  %v13093_v38 = vcombine.low %v4742_v37, %v4750_v12 }
 0xac9   : > { %11366 = vmatpush1.bf16.msra.mxu0 %v12979_v25  ;;  %11530 = vmatpush1.bf16.msra.mxu1 %v12981_v2  ;;  %v13094_v25 = vcombine.high %v4742_v37, %v4750_v12  ;;  %v4757_v2 = vld [vmem:[%s15112_s5 + $0x17b0] sm:$0xff] }
 0xaca   : > { %11367 = vmatprep.subr.bf16.mxu0 %v12996_v27  ;;  %11531 = vmatprep.subr.bf16.mxu1 %v12998_v28  ;;  %v4765_v27 = vld [vmem:[%s15112_s5 + $0x17f0] sm:$0xff]  ;;  %v4758_v28 = vld [vmem:[%s15112_s5 + $0x17b8] sm:$0xff] }
 0xacb   : > { %v13108_v59 = vcombine.high %v4757_v2, %v4765_v27  ;;  %v13107_v42 = vcombine.low %v4757_v2, %v4765_v27  ;;  %v13109_v33 = vcombine.low %v4758_v28, %v4766_v13  ;;  %v4853_v12 = vld [vmem:[%s15112_s5 + $0x1ab0] sm:$0xff]  ;;  %v16484_v2 = vld [vmem:[%s15120_s11 + $0x8] sm:$0xff] }
 0xacd   : > { %11368 = vmatpush1.bf16.msra.mxu0 %v12995_v39  ;;  %11532 = vmatpush1.bf16.msra.mxu1 %v12997_v14  ;;  %v13110_v39 = vcombine.high %v4758_v28, %v4766_v13  ;;  %v4773_v14 = vld [vmem:[%s15112_s5 + $0x1830] sm:$0xff] }
 0xace   : > { %11369 = vmatprep.subr.bf16.mxu0 %v13012_v44  ;;  %11533 = vmatprep.subr.bf16.mxu1 %v13014_v16  ;;  %v4781_v44 = vld [vmem:[%s15112_s5 + $0x1870] sm:$0xff]  ;;  %v4774_v16 = vld [vmem:[%s15112_s5 + $0x1838] sm:$0xff] }
 0xacf   : > { %v13124_v63 = vcombine.high %v4773_v14, %v4781_v44  ;;  %v13123_v45 = vcombine.low %v4773_v14, %v4781_v44  ;;  %v13125_v47 = vcombine.low %v4774_v16, %v4782_v36  ;;  %v4878_v14 = vld [vmem:[%s15112_s5 + $0x1b78] sm:$0xff]  ;;  %v5070_v44 = vrot.slane %v16484_v2, %v5037_v26  ;;  %v4893_v26 = vld [vmem:[%s15112_s5 + $0x1bf0] sm:$0xff] }
 0xad1   : > { %11370 = vmatpush1.bf16.msra.mxu0 %v13011_v53  ;;  %11534 = vmatpush1.bf16.msra.mxu1 %v13013_v54  ;;  %v13126_v53 = vcombine.high %v4774_v16, %v4782_v36  ;;  %v4789_v54 = vld [vmem:[%s15112_s5 + $0x18b0] sm:$0xff]  ;;  %v5066_v16 = vrot.slane %v16484_v2, %v5033_v30  ;;  %v4894_v30 = vld [vmem:[%s15112_s5 + $0x1bf8] sm:$0xff] }
 0xad2   : > { %11371 = vmatprep.subr.bf16.mxu0 %v13028_v55  ;;  %11535 = vmatprep.subr.bf16.mxu1 %v13030_v58  ;;  %v4797_v55 = vld [vmem:[%s15112_s5 + $0x18f0] sm:$0xff]  ;;  %v4790_v58 = vld [vmem:[%s15112_s5 + $0x18b8] sm:$0xff] }
 0xad3   : > { %v13140_v48 = vcombine.high %v4789_v54, %v4797_v55  ;;  %v13139_v56 = vcombine.low %v4789_v54, %v4797_v55  ;;  %v13141_v60 = vcombine.low %v4790_v58, %v4798_v61  ;;  %v4885_v54 = vld [vmem:[%s15112_s5 + $0x1bb0] sm:$0xff] }
 0xad5   : > { %11372 = vmatpush1.bf16.msra.mxu0 %v13027_v49  ;;  %11536 = vmatpush1.bf16.msra.mxu1 %v13029_v34  ;;  %v13142_v49 = vcombine.high %v4790_v58, %v4798_v61  ;;  %v4805_v34 = vld [vmem:[%s15112_s5 + $0x1930] sm:$0xff] }
 0xad6   : > { %11373 = vmatprep.subr.bf16.mxu0 %v13044_v50  ;;  %11537 = vmatprep.subr.bf16.mxu1 %v13046_v51  ;;  %v4813_v50 = vld [vmem:[%s15112_s5 + $0x1970] sm:$0xff]  ;;  %v4806_v51 = vld [vmem:[%s15112_s5 + $0x1938] sm:$0xff] }
 0xad7   : > { %v13156_v62 = vcombine.high %v4805_v34, %v4813_v50  ;;  %v13157_v19 = vcombine.low %v4806_v51, %v4814_v52 }
 0xad9   : > { %11374 = vmatpush1.bf16.msra.mxu0 %v13043_v4  ;;  %11538 = vmatpush1.bf16.msra.mxu1 %v13045_v3  ;;  %v13158_v4 = vcombine.high %v4806_v51, %v4814_v52  ;;  %v4821_v3 = vld [vmem:[%s15112_s5 + $0x19b0] sm:$0xff] }
 0xada   : > { %11375 = vmatprep.subr.bf16.mxu0 %v13060_v20  ;;  %11539 = vmatprep.subr.bf16.mxu1 %v13062_v5  ;;  %v4829_v20 = vld [vmem:[%s15112_s5 + $0x19f0] sm:$0xff]  ;;  %v4822_v5 = vld [vmem:[%s15112_s5 + $0x19b8] sm:$0xff] }
 0xadb   : > { %v13172_v6 = vcombine.high %v4821_v3, %v4829_v20  ;;  %v13174_v41 = vcombine.high %v4822_v5, %v4830_v0  ;;  %v13171_v57 = vcombine.low %v4821_v3, %v4829_v20  ;;  %v4901_v3 = vld [vmem:[%s15112_s5 + $0x1c30] sm:$0xff] }
 0xadc   : > { %v4909_v20 = vld [vmem:[%s15112_s5 + $0x1c70] sm:$0xff] }
 0xadd   : > { %11376 = vmatpush1.bf16.msra.mxu0 %v13059_v7  ;;  %11540 = vmatpush1.bf16.msra.mxu1 %v13061_v15  ;;  %v4837_v7 = vld [vmem:[%s15112_s5 + $0x1a30] sm:$0xff] }
 0xade   : > { %11377 = vmatprep.subr.bf16.mxu0 %v13076_v1  ;;  %11541 = vmatprep.subr.bf16.mxu1 %v13078_v8  ;;  %v4845_v15 = vld [vmem:[%s15112_s5 + $0x1a70] sm:$0xff]  ;;  %v4838_v1 = vld [vmem:[%s15112_s5 + $0x1a38] sm:$0xff] }
 0xadf   : > { %v4846_v8 = vld [vmem:[%s15112_s5 + $0x1a78] sm:$0xff]  ;;  %v13188_v11 = vcombine.high %v4837_v7, %v4845_v15 }
 0xae0   : > { %v13190_v37 = vcombine.high %v4838_v1, %v4846_v8  ;;  %v13189_v27 = vcombine.low %v4838_v1, %v4846_v8  ;;  %v4918_v1 = vld [vmem:[%s15112_s5 + $0x1cb8] sm:$0xff] }
 0xae1   : > { %11378 = vmatpush1.bf16.msra.mxu0 %v13075_v21  ;;  %11542 = vmatpush1.bf16.msra.mxu1 %v13077_v24  ;;  %v4861_v21 = vld [vmem:[%s15112_s5 + $0x1af0] sm:$0xff]  ;;  %v4854_v24 = vld [vmem:[%s15112_s5 + $0x1ab8] sm:$0xff] }
 0xae2   : > { %11379 = vmatprep.subr.bf16.mxu0 %v13092_v17  ;;  %11543 = vmatprep.subr.bf16.mxu1 %v13094_v25  ;;  %v4862_v17 = vld [vmem:[%s15112_s5 + $0x1af8] sm:$0xff]  ;;  %v13187_v25 = vcombine.low %v4837_v7, %v4845_v15  ;;  %v13204_v28 = vcombine.high %v4853_v12, %v4861_v21  ;;  %v13203_v36 = vcombine.low %v4853_v12, %v4861_v21  ;;  %v4917_v7 = vld [vmem:[%s15112_s5 + $0x1cb0] sm:$0xff] }
 0xae3   : > { %v13206_v13 = vcombine.high %v4854_v24, %v4862_v17  ;;  %v4925_v15 = vld [vmem:[%s15112_s5 + $0x1cf0] sm:$0xff]  ;;  %v4926_v8 = vld [vmem:[%s15112_s5 + $0x1cf8] sm:$0xff] }
 0xae4   : > { %v4933_v12 = vld [vmem:[%s15112_s5 + $0x1d30] sm:$0xff] }
 0xae5   : > { %11380 = vmatpush1.bf16.msra.mxu0 %v13091_v31  ;;  %11544 = vmatpush1.bf16.msra.mxu1 %v13093_v38  ;;  %v4869_v31 = vld [vmem:[%s15112_s5 + $0x1b30] sm:$0xff] }
 0xae6   : > { %11381 = vmatprep.subr.bf16.mxu0 %v13108_v59  ;;  %11545 = vmatprep.subr.bf16.mxu1 %v13110_v39  ;;  %v4877_v38 = vld [vmem:[%s15112_s5 + $0x1b70] sm:$0xff]  ;;  %v5062_v59 = vrot.slane %v16484_v2, %v5029_v40  ;;  %v4870_v39 = vld [vmem:[%s15112_s5 + $0x1b38] sm:$0xff]  ;;  %v5074_v40 = vrot.slane %v16484_v2, %v5041_v35 }
 0xae7   : > { %v13219_v35 = vcombine.low %v4869_v31, %v4877_v38  ;;  %v4941_v21 = vld [vmem:[%s15112_s5 + $0x1d70] sm:$0xff] }
 0xae9   : > { %11382 = vmatpush1.bf16.msra.mxu0 %v13107_v42  ;;  %11546 = vmatpush1.bf16.msra.mxu1 %v13109_v33  ;;  %v13205_v42 = vcombine.low %v4854_v24, %v4862_v17  ;;  %v13220_v33 = vcombine.high %v4869_v31, %v4877_v38  ;;  %v4934_v17 = vld [vmem:[%s15112_s5 + $0x1d38] sm:$0xff]  ;;  %v13269_v31 = vcombine.low %v4918_v1, %v4926_v8 }
 0xaea   : > { %11392 = vmatprep.subr.bf16.mxu0 %v13124_v63  ;;  %11556 = vmatprep.subr.bf16.mxu1 %v13126_v53  ;;  %v13222_v53 = vcombine.high %v4870_v39, %v4878_v14  ;;  %v13284_v38 = vcombine.high %v4933_v12, %v4941_v21 }
 0xaec   : > { %11384 = vmatmul.mubr.bf16.vlgmr.msra.gmra.mrb[12].mxu0 %v15464_v9  ;;  %11548 = vmatmul.mubr.bf16.vlgmr.msra.gmra.mrb[12].mxu1 %v15464_v9  ;;  %v13155_v9 = vcombine.low %v4805_v34, %v4813_v50 }
 0xaed   : > { %11393 = vmatpush1.bf16.msra.mxu0 %v13123_v45  ;;  %11557 = vmatpush1.bf16.msra.mxu1 %v13125_v47  ;;  %v4886_v45 = vld [vmem:[%s15112_s5 + $0x1bb8] sm:$0xff] }
 0xaee   : > { %11394 = vmatprep.subr.bf16.mxu0 %v13140_v48  ;;  %11558 = vmatprep.subr.bf16.mxu1 %v13142_v49 }
 0xaef   : > { %11424 = vmatprep.mubr.bf16.mxu0 %v15608_v43  ;;  %11588 = vmatprep.mubr.bf16.mxu1 %v15608_v43  ;;  %v13173_v43 = vcombine.low %v4822_v5, %v4830_v0  ;;  %v4902_v5 = vld [vmem:[%s15112_s5 + $0x1c38] sm:$0xff] }
 0xaf0   : > { %v4910_v0 = vld [vmem:[%s15112_s5 + $0x1c78] sm:$0xff] }
 0xaf1   : > { %11395 = vmatpush1.bf16.msra.mxu0 %v13139_v56  ;;  %11559 = vmatpush1.bf16.msra.mxu1 %v13141_v60  ;;  %v13221_v56 = vcombine.low %v4870_v39, %v4878_v14  ;;  %v13236_v60 = vcombine.high %v4885_v54, %v4893_v26 }
 0xaf2   : > { %11396 = vmatprep.subr.bf16.mxu0 %v13156_v62  ;;  %11560 = vmatprep.subr.bf16.mxu1 %v13158_v4  ;;  %v13238_v4 = vcombine.high %v4886_v45, %v4894_v30 }
 0xaf5   : > { %11397 = vmatpush1.bf16.msra.mxu0 %v13155_v9  ;;  %11561 = vmatpush1.bf16.msra.mxu1 %v13157_v19  ;;  %v13235_v9 = vcombine.low %v4885_v54, %v4893_v26  ;;  %v13237_v19 = vcombine.low %v4886_v45, %v4894_v30  ;;  %v4966_v45 = vld [vmem:[%s15112_s5 + $0x1e38] sm:$0xff] }
 0xaf6   : > { %11398 = vmatprep.subr.bf16.mxu0 %v13172_v6  ;;  %11562 = vmatprep.subr.bf16.mxu1 %v13174_v41  ;;  %v13252_v6 = vcombine.high %v4901_v3, %v4909_v20  ;;  %v13254_v41 = vcombine.high %v4902_v5, %v4910_v0  ;;  %v4974_v30 = vld [vmem:[%s15112_s5 + $0x1e78] sm:$0xff] }
 0xaf9   : > { %11399 = vmatpush1.bf16.msra.mxu0 %v13171_v57  ;;  %11563 = vmatpush1.bf16.msra.mxu1 %v13173_v43  ;;  %v13251_v57 = vcombine.low %v4901_v3, %v4909_v20  ;;  %v13253_v43 = vcombine.low %v4902_v5, %v4910_v0  ;;  %v4997_v20 = vld [vmem:[%s15112_s5 + $0x1f30] sm:$0xff]  ;;  %v4998_v0 = vld [vmem:[%s15112_s5 + $0x1f38] sm:$0xff] }
 0xafa   : > { %11400 = vmatprep.subr.bf16.mxu0 %v13188_v11  ;;  %11564 = vmatprep.subr.bf16.mxu1 %v13190_v37  ;;  %v13268_v11 = vcombine.high %v4917_v7, %v4925_v15  ;;  %v13270_v37 = vcombine.high %v4918_v1, %v4926_v8  ;;  %v5005_v5 = vld [vmem:[%s15112_s5 + $0x1f70] sm:$0xff]  ;;  %v5014_v8 = vld [vmem:[%s15112_s5 + $0x1fb8] sm:$0xff] }
 0xafb   : > { %v5021_v1 = vld [vmem:[%s15112_s5 + $0x1ff0] sm:$0xff] }
 0xafd   : > { %11401 = vmatpush1.bf16.msra.mxu0 %v13187_v25  ;;  %11565 = vmatpush1.bf16.msra.mxu1 %v13189_v27  ;;  %v4942_v25 = vld [vmem:[%s15112_s5 + $0x1d78] sm:$0xff] }
 0xafe   : > { %11402 = vmatprep.subr.bf16.mxu0 %v13204_v28  ;;  %11566 = vmatprep.subr.bf16.mxu1 %v13206_v13  ;;  %v13267_v28 = vcombine.low %v4917_v7, %v4925_v15  ;;  %v13286_v14 = vcombine.high %v4934_v17, %v4942_v25  ;;  %v13285_v54 = vcombine.low %v4934_v17, %v4942_v25  ;;  %v5013_v15 = vld [vmem:[%s15112_s5 + $0x1fb0] sm:$0xff] }
 0xaff   : > { %v11098_v63 = vpop.f32.mrb[8].mxu0  ;;  %v11262_v58 = vpop.f32.mrb[8].mxu1  ;;  %v5078_v17 = vrot.slane %v16484_v2, %v5045_v10  ;;  %v5086_v25 = vrot.slane %v16484_v2, %v5053_v18 }
 0xb00   : > { %v13418_v55 = vadd.f32 %v11098_v63, %v5062_v59  ;;  %v11100_v61 = vpop.f32.mrb[9].mxu0  ;;  %v13420_v47 = vadd.f32 %v11262_v58, %v5070_v44  ;;  %v11264_v49 = vpop.f32.mrb[9].mxu1  ;;  %v4949_v44 = vld [vmem:[%s15112_s5 + $0x1db0] sm:$0xff]  ;;  %v13283_v63 = vcombine.low %v4933_v12, %v4941_v21  ;;  %v13363_v21 = vcombine.low %v5013_v15, %v5021_v1 }
 0xb01   : > { %v13419_v48 = vadd.f32 %v11100_v61, %v5066_v16  ;;  %v11102_v34 = vpop.f32.mrb[10].mxu0  ;;  %11403 = vmatpush1.bf16.msra.mxu0 %v13203_v36  ;;  %v13421_v50 = vadd.f32 %v11264_v49, %v5074_v40  ;;  %v11266_v51 = vpop.f32.mrb[10].mxu1  ;;  %11567 = vmatpush1.bf16.msra.mxu1 %v13205_v42  ;;  %v4957_v16 = vld [vmem:[%s15112_s5 + $0x1df0] sm:$0xff]  ;;  %v4950_v40 = vld [vmem:[%s15112_s5 + $0x1db8] sm:$0xff] }
 0xb02   : > { %13907 = vtanh.f32 %v13418_v55  ;;  %v11103_v52 = vpop.f32.mrb[11].mxu0  ;;  %11404 = vmatprep.subr.bf16.mxu0 %v13220_v33  ;;  %v11267_v62 = vpop.f32.mrb[11].mxu1  ;;  %11568 = vmatprep.subr.bf16.mxu1 %v13222_v53  ;;  %v4958_v42 = vld [vmem:[%s15112_s5 + $0x1df8] sm:$0xff]  ;;  %v13300_v26 = vcombine.high %v4949_v44, %v4957_v16  ;;  %v4965_v58 = vld [vmem:[%s15112_s5 + $0x1e30] sm:$0xff] }
 0xb03   : > { %13909 = vtanh.f32 %v13420_v47  ;;  %v13302_v55 = vcombine.high %v4950_v40, %v4958_v42  ;;  %v4973_v61 = vld [vmem:[%s15112_s5 + $0x1e70] sm:$0xff]  ;;  %v13301_v49 = vcombine.low %v4950_v40, %v4958_v42  ;;  %v4982_v52 = vld [vmem:[%s15112_s5 + $0x1eb8] sm:$0xff]  ;;  %v13317_v62 = vcombine.low %v4966_v45, %v4974_v30 }
 0xb04   : > { %13911 = vtanh.f32 %v13419_v48  ;;  %v13299_v48 = vcombine.low %v4949_v44, %v4957_v16  ;;  %v13316_v34 = vcombine.high %v4965_v58, %v4973_v61  ;;  %v4989_v51 = vld [vmem:[%s15112_s5 + $0x1ef0] sm:$0xff] }
 0xb05   : > { %13913 = vtanh.f32 %v13421_v50  ;;  %11405 = vmatpush1.bf16.msra.mxu0 %v13219_v35  ;;  %11569 = vmatpush1.bf16.msra.mxu1 %v13221_v56  ;;  %v13318_v35 = vcombine.high %v4966_v45, %v4974_v30  ;;  %v4981_v50 = vld [vmem:[%s15112_s5 + $0x1eb0] sm:$0xff]  ;;  %v4990_v56 = vld [vmem:[%s15112_s5 + $0x1ef8] sm:$0xff] }
 0xb06   : > { %11406 = vmatprep.subr.bf16.mxu0 %v13236_v60  ;;  %11570 = vmatprep.subr.bf16.mxu1 %v13238_v4  ;;  %v13315_v60 = vcombine.low %v4965_v58, %v4973_v61  ;;  %v13332_v4 = vcombine.high %v4981_v50, %v4989_v51  ;;  %v13334_v3 = vcombine.high %v4982_v52, %v4990_v56 }
 0xb09   : > { %11407 = vmatpush1.bf16.msra.mxu0 %v13235_v9  ;;  %11571 = vmatpush1.bf16.msra.mxu1 %v13237_v19  ;;  %v5006_v9 = vld [vmem:[%s15112_s5 + $0x1f78] sm:$0xff]  ;;  %v13331_v19 = vcombine.low %v4981_v50, %v4989_v51 }
 0xb0a   : > { %11408 = vmatprep.subr.bf16.mxu0 %v13252_v6  ;;  %11572 = vmatprep.subr.bf16.mxu1 %v13254_v41  ;;  %v13333_v6 = vcombine.low %v4982_v52, %v4990_v56  ;;  %v13348_v41 = vcombine.high %v4997_v20, %v5005_v5  ;;  %v13350_v7 = vcombine.high %v4998_v0, %v5006_v9 }
 0xb0c   : > { %v13908_v24 = vpop.eup %13907 }
 0xb0d   : > { %v13910_v27 = vpop.eup %13909  ;;  %11409 = vmatpush1.bf16.msra.mxu0 %v13251_v57  ;;  %11573 = vmatpush1.bf16.msra.mxu1 %v13253_v43  ;;  %v5022_v57 = vld [vmem:[%s15112_s5 + $0x1ff8] sm:$0xff]  ;;  %v13347_v43 = vcombine.low %v4997_v20, %v5005_v5 }
 0xb0e   : > { %v13912_v13 = vpop.eup %13911  ;;  %11410 = vmatprep.subr.bf16.mxu0 %v13268_v11  ;;  %11574 = vmatprep.subr.bf16.mxu1 %v13270_v37  ;;  %v13349_v11 = vcombine.low %v4998_v0, %v5006_v9  ;;  %v13364_v37 = vcombine.high %v5013_v15, %v5021_v1  ;;  %v13366_v12 = vcombine.high %v5014_v8, %v5022_v57 }
 0xb0f   : > { %v13914_v59 = vpop.eup %13913  ;;  %v11663_v39 = vcombine.low %v13908_v24, %v13912_v13  ;;  %v13365_v24 = vcombine.low %v5014_v8, %v5022_v57 }
 0xb10   : > { %v11664_v36 = vcombine.low %v13910_v27, %v13914_v59  ;;  %v5082_v27 = vrot.slane %v16484_v2, %v5049_v29 }
 0xb11   : > { %v11671_v33 = vrot.slane %v11663_v39, %v15938_v32  ;;  %11411 = vmatpush1.bf16.msra.mxu0 %v13267_v28  ;;  %11575 = vmatpush1.bf16.msra.mxu1 %v13269_v31  ;;  %v5090_v28 = vrot.slane %v16484_v2, %v5057_v23 }
 0xb12   : > { %v11678_v53 = vrot.slane %v11664_v36, %v15938_v32  ;;  %11412 = vmatprep.subr.bf16.mxu0 %v13284_v38  ;;  %11576 = vmatprep.subr.bf16.mxu1 %v13286_v14 }
 0xb14   : > { %v11679_v47 = vcombine.low %v11671_v33, %v11678_v53 }
 0xb15   : > { %11413 = vmatpush1.bf16.msra.mxu0 %v13283_v63  ;;  %11577 = vmatpush1.bf16.msra.mxu1 %v13285_v54 }
 0xb16   : > { %11414 = vmatprep.subr.bf16.mxu0 %v13300_v26  ;;  %11703 = vst [vmem:[%s15122_s12 + $0x10] sm:$0xff] %v11679_v47  ;;  %11578 = vmatprep.subr.bf16.mxu1 %v13302_v55 }
 0xb19   : > { %11415 = vmatpush1.bf16.msra.mxu0 %v13299_v48  ;;  %11579 = vmatpush1.bf16.msra.mxu1 %v13301_v49 }
 0xb1a   : > { %11416 = vmatprep.subr.bf16.mxu0 %v13316_v34  ;;  %11580 = vmatprep.subr.bf16.mxu1 %v13318_v35 }
 0xb1d   : > { %11417 = vmatpush1.bf16.msra.mxu0 %v13315_v60  ;;  %11581 = vmatpush1.bf16.msra.mxu1 %v13317_v62 }
 0xb1e   : > { %11418 = vmatprep.subr.bf16.mxu0 %v13332_v4  ;;  %11582 = vmatprep.subr.bf16.mxu1 %v13334_v3 }
 0xb21   : > { %11419 = vmatpush1.bf16.msra.mxu0 %v13331_v19  ;;  %11583 = vmatpush1.bf16.msra.mxu1 %v13333_v6 }
 0xb22   : > { %11420 = vmatprep.subr.bf16.mxu0 %v13348_v41  ;;  %11584 = vmatprep.subr.bf16.mxu1 %v13350_v7 }
 0xb25   : > { %11421 = vmatpush1.bf16.msra.mxu0 %v13347_v43  ;;  %11585 = vmatpush1.bf16.msra.mxu1 %v13349_v11 }
 0xb26   : > { %11422 = vmatprep.subr.bf16.mxu0 %v13364_v37  ;;  %11586 = vmatprep.subr.bf16.mxu1 %v13366_v12 }
 0xb29   : > { %11423 = vmatpush1.bf16.msra.mxu0 %v13363_v21  ;;  %11587 = vmatpush1.bf16.msra.mxu1 %v13365_v24 }
 0xb2c   : > { %11425 = vmatmul.mubr.bf16.vlgmr.msra.gmra.mrb[12].mxu0 %v15676_v46  ;;  %11589 = vmatmul.mubr.bf16.vlgmr.msra.gmra.mrb[12].mxu1 %v15676_v46 }
 0xbff   : > { %v11426_v13 = vpop.f32.mrb[12].mxu0  ;;  %v11590_v38 = vpop.f32.mrb[12].mxu1 }
 0xc00   : > { %v13422_v31 = vadd.f32 %v11426_v13, %v5078_v17  ;;  %v11428_v46 = vpop.f32.mrb[13].mxu0  ;;  %v13424_v59 = vadd.f32 %v11590_v38, %v5086_v25  ;;  %v11592_v14 = vpop.f32.mrb[13].mxu1 }
 0xc01   : > { %v13423_v39 = vadd.f32 %v11428_v46, %v5082_v27  ;;  %v11430_v10 = vpop.f32.mrb[14].mxu0  ;;  %v13425_v18 = vadd.f32 %v11592_v14, %v5090_v28  ;;  %v11594_v44 = vpop.f32.mrb[14].mxu1 }
 0xc02   : > { %13915 = vtanh.f32 %v13422_v31  ;;  %v11431_v16 = vpop.f32.mrb[15].mxu0  ;;  %v11595_v29 = vpop.f32.mrb[15].mxu1 }
 0xc03   : > { %13917 = vtanh.f32 %v13424_v59 }
 0xc04   : > { %13919 = vtanh.f32 %v13423_v39 }
 0xc05   : > { %13921 = vtanh.f32 %v13425_v18 }
 0xc0c   : > { %v13916_v22 = vpop.eup %13915 }
 0xc0d   : > { %v13918_v23 = vpop.eup %13917 }
 0xc0e   : > { %v13920_v2 = vpop.eup %13919 }
 0xc0f   : > { %v13922_v36 = vpop.eup %13921  ;;  %v11680_v40 = vcombine.low %v13916_v22, %v13920_v2 }
 0xc10   : > { %v11681_v42 = vcombine.low %v13918_v23, %v13922_v36 }
 0xc11   : > { %v11688_v33 = vrot.slane %v11680_v40, %v15938_v32 }
 0xc12   : > { %v11695_v63 = vrot.slane %v11681_v42, %v15938_v32 }
 0xc14   : > { %v11696_v53 = vcombine.low %v11688_v33, %v11695_v63 }
 0xc16   : > { %11704 = vst [vmem:[%s15122_s12 + $0x18] sm:$0xff] %v11696_v53 }
 0xc17   : > { %14417 = shalt.err (!%p14414_p4)
}
 0xc18   : > { %s14418_s8 = scalar_lea.hbm %s16562_s4, 512  ;;  %s14422_s1 = scalar_lea.hbm %s16720_s3, 2048 }
 0xc19   : > { %p14419_p6 = scmp.ne.s32.totalorder %s16562_s4, %s14418_s8  ;;  %p14423_p3 = scmp.lt.u32.totalorder %s16562_s4, %s16720_s3 }
 0xc1a   : > { %p14424_p1 = scmp.lt.u32.totalorder %s14422_s1, %s14418_s8  ;;  %p14426_p0 = scmp.lt.u32.totalorder %s14418_s8, %s16562_s4 }
 0xc1b   : > { %p14420_p10 = pnand %p14419_p6, %p16721_p11 }
 0xc1c   : > { %p14425_p12 = por %p14424_p1, %p14423_p3 }
 0xc1d   : > { %p14421_p13 = pneg %p14420_p10 }
 0xc1e   : > { %p14427_p2 = por %p14426_p0, %p14425_p12 }
 0xc20   : > { %p14428_p9 = pnand %p14427_p2, %p14421_p13 }
 0xc22   : > { %14431 = shalt.err (!%p14428_p9)
}
 0xc23   : > { %13586 = dma.vmem_to_hbm [thread:$0]  (%p16721_p11), %s16564_s9, 512, %s16562_s4, %s11706_s2  }
 0xc24 PF: > { %p13676_p8 = scmp.ge.s32.totalorder %s14502_s27, 2  ;;  %s11732_s12 = sand.u32 1, %s14490_s24  }
 0xc25   : > { %p16722_p5 = scmp.ne.s32.totalorder %s16682_s29, 0  ;;  %s11733_s6 = scalar_lea.sflag [#allocation5], %s11732_s12 }
 0xc27   : > { %p13642_p7 = pnand %p13676_p8, %p16722_p5 }
 0xc29   : > { %14485 = dma.done.wait (!%p13642_p7), %s11733_s6, 512  }
 0xc2a   : > { %14487 = vsyncadd (!%p13642_p7), %s11733_s6, 4294966784  ;;  %s16723_s27 = sld [smem:[#allocation42_spill]]  ;;  %s16724_s28 = sld [smem:[#allocation43_spill]] }
 0xc2b   : > { %s16725_s24 = smov %s14494_s25  ;;  %s16726_s25 = smov %s14498_s26 }
 0xc30   : > { %p38_p4 = scmp.ge.s32.totalorder %s16723_s27, 6   ;;  %s16727_s26 = smov %s16724_s28 }
 0xc32   :  { %40 = sbr.rel (!%p38_p4) target bundleno = 32 (0x20), region = 209 }
 0xc39   :  { %11738 = vsyncpa [#allocation4], 1 }
 0xc3a   :  { %11740 = vsyncpa [#allocation4 + $0x1], 1 }
 0xc3b   :  { %11741 = vsyncpa [#allocation7], 1 }
 0xc3c   :  { %11742 = vsyncpa [#allocation10], 1 }
 0xc3d   :  { %11743 = vsyncpa [#allocation13], 1 }
 0xc3e   :  { %11744 = vsyncpa [#allocation16], 1 }
 0xc3f   :  { %11745 = vsyncpa [#allocation19], 1 }
 0xc40   :  { %11746 = vsyncpa [#allocation22], 1 }
 0xc41   :  { %11747 = vsyncpa [#allocation25], 1 }
 0xc42   :  { %11748 = vsyncpa [#allocation28], 1 }
 0xc43   :  { %11750 = vsyncpa [#allocation28 + $0x1], 1 }
 0xc44   :  { %11751 = vsyncpa [#allocation5], 1 }
 0xc45   :  { %11753 = vsyncpa [#allocation5 + $0x1], 1 }

</bundles_post_ra>
